<compile_context>
chip_gen: v5e
topology: v5e:2x2
jax: 0.10.0
libtpu: 0.0.40
codegen_flags: <defaults>
</compile_context>

<pallas_src>
import jax
import jax.numpy as jnp
from jax.experimental import pallas as pl
from jax.experimental.pallas import tpu as pltpu

_BN_EPS = 1e-5
_LANE = 128


def _round_up(c, m=_LANE):
    return ((c + m - 1) // m) * m


# ----------------------------------------------------------------------------
# Fused ResidualBlock + max-pool kernel
# ----------------------------------------------------------------------------
def _make_resblock_pool_kernel(H, W, CPin, CPout, has_proj):
    Ho, Wo = H // 2, W // 2
    HW = H * W
    K1 = 3 * CPin     # conv1 contraction: 3 kw taps folded into K
    K2 = 3 * CPout    # conv2 contraction

    def kernel(*refs):
        if has_proj:
            (x_ref, w1_ref, s1_ref, b1_ref, w2_ref, s2_ref, b2_ref,
             wsc_ref, ssc_ref, bsc_ref, o_ref, acc_ref, h1p_ref) = refs
        else:
            (x_ref, w1_ref, s1_ref, b1_ref, w2_ref, s2_ref, b2_ref,
             o_ref, acc_ref, h1p_ref) = refs

        x = x_ref[0]                               # (H+2, W+2, CPin) bf16, halo'd

        # ---- conv1: 3x3/1/1.  Hoist the 3 W-shifts once, concat along channel
        #      so each kh is a single matmul with K = 3*CPin.
        cat1 = jnp.concatenate(
            [x[:, 0:W, :], x[:, 1:W + 1, :], x[:, 2:W + 2, :]], axis=-1)
        center1 = None
        for kh in range(3):
            win = cat1[kh:kh + H].reshape(HW, K1)  # outer-dim slice: free
            if kh == 1:
                center1 = win                      # reused by the shortcut path
            if kh == 0:
                acc_ref[...] = jnp.dot(win, w1_ref[kh],
                                       preferred_element_type=jnp.float32)
            else:
                acc_ref[...] += jnp.dot(win, w1_ref[kh],
                                        preferred_element_type=jnp.float32)
        h1 = jnp.clip(acc_ref[...] * s1_ref[...] + b1_ref[...], 0.0, 6.0)

        # ---- stage h1 (bf16) with a 1-px zero halo in VMEM scratch; only the
        #      border strips are zeroed, never the full tile.
        zrow = jnp.zeros((1, W + 2, CPout), jnp.bfloat16)
        zcol = jnp.zeros((H, 1, CPout), jnp.bfloat16)
        h1p_ref[0:1, :, :] = zrow
        h1p_ref[H + 1:H + 2, :, :] = zrow
        h1p_ref[1:H + 1, 0:1, :] = zcol
        h1p_ref[1:H + 1, W + 1:W + 2, :] = zcol
        h1p_ref[1:H + 1, 1:W + 1, :] = h1.astype(jnp.bfloat16).reshape(H, W, CPout)

        # ---- conv2: 3x3/1/1, same tap-folded structure.
        h1p = h1p_ref[...]
        cat2 = jnp.concatenate(
            [h1p[:, 0:W, :], h1p[:, 1:W + 1, :], h1p[:, 2:W + 2, :]], axis=-1)
        for kh in range(3):
            win = cat2[kh:kh + H].reshape(HW, K2)
            if kh == 0:
                acc_ref[...] = jnp.dot(win, w2_ref[kh],
                                       preferred_element_type=jnp.float32)
            else:
                acc_ref[...] += jnp.dot(win, w2_ref[kh],
                                        preferred_element_type=jnp.float32)
        y = jnp.clip(acc_ref[...] * s2_ref[...] + b2_ref[...], 0.0, 6.0)

        # ---- shortcut: reuse conv1's center window (lane-aligned slice, no
        #      extra W-shift copy), 1x1 conv + folded BN or identity.
        center = center1[:, CPin:2 * CPin]
        if has_proj:
            ident = jnp.dot(center, wsc_ref[...],
                            preferred_element_type=jnp.float32)
            ident = ident * ssc_ref[...] + bsc_ref[...]
        else:
            ident = center.astype(jnp.float32)
        out = y + ident                                        # (HW, CPout) f32

        # ---- fused 2x2 / stride-2 max pool (all in VMEM).
        o4 = out.reshape(Ho, 2, W, CPout)
        a = jnp.maximum(o4[:, 0], o4[:, 1])                    # pool over H
        a4 = a.reshape(Ho, Wo, 2, CPout)
        pooled = jnp.maximum(a4[:, :, 0, :], a4[:, :, 1, :])   # pool over W

        # ---- store the pooled tile WITH its 1-px halo (zero border), bf16,
        #      lane-dense, so the next block needs no wrapper-side jnp.pad.
        zrow_o = jnp.zeros((1, Wo + 2, CPout), jnp.bfloat16)
        zcol_o = jnp.zeros((Ho, 1, CPout), jnp.bfloat16)
        o_ref[0, 0:1, :, :] = zrow_o
        o_ref[0, Ho + 1:Ho + 2, :, :] = zrow_o
        o_ref[0, 1:Ho + 1, 0:1, :] = zcol_o
        o_ref[0, 1:Ho + 1, Wo + 1:Wo + 2, :] = zcol_o
        o_ref[0, 1:Ho + 1, 1:Wo + 1, :] = pooled.astype(jnp.bfloat16)

    return kernel


def residual_block_pool(x_nhwc, kp, cin, cout):
    """x_nhwc: (N, H+2, W+2, CPin) bf16 activation WITH 1-px spatial halo,
    channels zero-padded to a multiple of 128.  Returns (N, H//2+2, W//2+2,
    CPout) bf16, again halo- and channel-padded."""
    N, Hp, Wp, CPin = x_nhwc.shape
    H, W = Hp - 2, Wp - 2
    assert H % 2 == 0 and W % 2 == 0, "max_pool2d(2,2) needs even H, W"
    CPout = kp["w2"].shape[-1]
    Ho, Wo = H // 2, W // 2
    has_proj = "wsc" in kp

    in_specs = [
        pl.BlockSpec((1, Hp, Wp, CPin), lambda n: (n, 0, 0, 0)),
        pl.BlockSpec((3, 3 * CPin, CPout), lambda n: (0, 0, 0)),
        pl.BlockSpec((1, CPout), lambda n: (0, 0)),
        pl.BlockSpec((1, CPout), lambda n: (0, 0)),
        pl.BlockSpec((3, 3 * CPout, CPout), lambda n: (0, 0, 0)),
        pl.BlockSpec((1, CPout), lambda n: (0, 0)),
        pl.BlockSpec((1, CPout), lambda n: (0, 0)),
    ]
    args = [x_nhwc, kp["w1"], kp["s1"], kp["b1"], kp["w2"], kp["s2"], kp["b2"]]
    if has_proj:
        in_specs += [
            pl.BlockSpec((CPin, CPout), lambda n: (0, 0)),
            pl.BlockSpec((1, CPout), lambda n: (0, 0)),
            pl.BlockSpec((1, CPout), lambda n: (0, 0)),
        ]
        args += [kp["wsc"], kp["ssc"], kp["bsc"]]

    # CostEstimate with TRUE channel counts (padded counts overstate ~32x for
    # small-channel blocks and can skew XLA scheduling around the custom call).
    flops = int(N * H * W * (2 * 9 * cin * cout + 2 * 9 * cout * cout
                             + (2 * cin * cout if has_proj else 0)))
    bytes_accessed = int(
        N * Hp * Wp * cin * 2 + N * (Ho + 2) * (Wo + 2) * cout * 2
        + 9 * cin * cout * 2 + 9 * cout * cout * 2
        + (cin * cout * 2 if has_proj else 0) + 6 * cout * 4)

    # Rough VMEM budget: double-buffered activation blocks + weights + scratch.
    vmem_bytes = (2 * Hp * Wp * CPin * 2
                  + 2 * (Ho + 2) * (Wo + 2) * CPout * 2
                  + 2 * (3 * 3 * CPin + 3 * 3 * CPout + CPin) * CPout * 2
                  + H * W * CPout * 4
                  + Hp * Wp * CPout * 2)
    # TODO(synk): replace this hard check with H-tiling for large H*W*C.
    assert vmem_bytes < 32 * 1024 * 1024, (
        f"ResidualBlock tile needs ~{vmem_bytes >> 20} MiB VMEM; add H-tiling")

    return pl.pallas_call(
        _make_resblock_pool_kernel(H, W, CPin, CPout, has_proj),
        out_shape=jax.ShapeDtypeStruct((N, Ho + 2, Wo + 2, CPout), jnp.bfloat16),
        grid=(N,),
        in_specs=in_specs,
        out_specs=pl.BlockSpec((1, Ho + 2, Wo + 2, CPout), lambda n: (n, 0, 0, 0)),
        scratch_shapes=[pltpu.VMEM((H * W, CPout), jnp.float32),   # f32 matmul acc
                        pltpu.VMEM((Hp, Wp, CPout), jnp.bfloat16)],  # h1 + halo
        compiler_params=pltpu.CompilerParams(
            dimension_semantics=("parallel",),          # batch across TCs
            vmem_limit_bytes=40 * 1024 * 1024,
        ),
        cost_estimate=pl.CostEstimate(
            flops=flops, transcendentals=0, bytes_accessed=bytes_accessed),
    )(*args)


# ----------------------------------------------------------------------------
# Parameters: synthetic PyTorch-layout weights + folding for the kernel
# ----------------------------------------------------------------------------
def init_encoder_params(key, channels_list):
    """Deterministic synthetic weights in PyTorch layout (values pre-rounded to
    bf16-representable numbers so the kernel's bf16 weight storage is exact).
    BatchNorm params at PyTorch defaults (eval mode)."""
    def rnd(k, shape):
        w = jax.random.normal(k, shape, jnp.float32) * 0.1
        return w.astype(jnp.bfloat16).astype(jnp.float32)

    params = []
    for i in range(len(channels_list) - 1):
        cin, cout = channels_list[i], channels_list[i + 1]
        key, k0, k1, k2, k3, k4, k5 = jax.random.split(key, 7)
        layer = {
            "w1": rnd(k0, (cout, cin, 3, 3)), "b1": rnd(k1, (cout,)),
            "bn1_gamma": jnp.ones((cout,)), "bn1_beta": jnp.zeros((cout,)),
            "bn1_mean": jnp.zeros((cout,)), "bn1_var": jnp.ones((cout,)),
            "w2": rnd(k2, (cout, cout, 3, 3)), "b2": rnd(k3, (cout,)),
            "bn2_gamma": jnp.ones((cout,)), "bn2_beta": jnp.zeros((cout,)),
            "bn2_mean": jnp.zeros((cout,)), "bn2_var": jnp.ones((cout,)),
        }
        if cin != cout:  # 1x1 conv + BN shortcut
            layer.update({
                "wsc": rnd(k4, (cout, cin, 1, 1)), "bsc": rnd(k5, (cout,)),
                "bnsc_gamma": jnp.ones((cout,)), "bnsc_beta": jnp.zeros((cout,)),
                "bnsc_mean": jnp.zeros((cout,)), "bnsc_var": jnp.ones((cout,)),
            })
        params.append(layer)
    return params


def _fold_bn(conv_b, gamma, beta, mean, var):
    """Eval-mode BN folded into per-channel (scale, bias) applied after the
    bias-free convolution:  y = conv(x)*scale + bias."""
    scale = gamma / jnp.sqrt(var + _BN_EPS)
    bias = beta + (conv_b - mean) * scale
    return scale.astype(jnp.float32), bias.astype(jnp.float32)


def fold_params_for_kernel(raw_params):
    """Kernel layout: 3x3 weights as (kh, 3*CPin, CPout) bf16 with the 3 kw taps
    stacked along K (matches the kernel's kw-concat of input windows); channels
    zero-padded to multiples of 128; eval-mode BN folded into scale/bias."""
    kparams = []
    for p in raw_params:
        cout, cin = p["w1"].shape[0], p["w1"].shape[1]
        cpi, cpo = _round_up(cin), _round_up(cout)

        def pad_vec(v):
            return jnp.pad(v, (0, cpo - v.shape[0])).reshape(1, cpo).astype(jnp.float32)

        def pack_w3x3(w_oihw, ci, cpi_):
            w = jnp.transpose(w_oihw, (2, 3, 1, 0))            # (kh, kw, ci, co)
            w = jnp.pad(w, ((0, 0), (0, 0),
                            (0, cpi_ - ci), (0, cpo - w.shape[-1])))
            return w.reshape(3, 3 * cpi_, cpo).astype(jnp.bfloat16)

        s1, b1 = _fold_bn(p["b1"], p["bn1_gamma"], p["bn1_beta"],
                          p["bn1_mean"], p["bn1_var"])
        s2, b2 = _fold_bn(p["b2"], p["bn2_gamma"], p["bn2_beta"],
                          p["bn2_mean"], p["bn2_var"])
        kp = {
            "w1": pack_w3x3(p["w1"], cin, cpi), "s1": pad_vec(s1), "b1": pad_vec(b1),
            "w2": pack_w3x3(p["w2"], cout, cpo), "s2": pad_vec(s2), "b2": pad_vec(b2),
        }
        if "wsc" in p:
            w = jnp.transpose(p["wsc"][:, :, 0, 0], (1, 0))    # (cin, cout)
            w = jnp.pad(w, ((0, cpi - cin), (0, cpo - cout)))
            ssc, bsc = _fold_bn(p["bsc"], p["bnsc_gamma"], p["bnsc_beta"],
                                p["bnsc_mean"], p["bnsc_var"])
            kp["wsc"] = w.astype(jnp.bfloat16)
            kp["ssc"] = pad_vec(ssc)
            kp["bsc"] = pad_vec(bsc)
        kparams.append(kp)
    return kparams


# ----------------------------------------------------------------------------
# Forward pass (external API: NCHW f32, like the PyTorch module)
# ----------------------------------------------------------------------------
def encoder_forward(x_nchw, kernel_params, channels_list):
    x = jnp.transpose(x_nchw, (0, 2, 3, 1))                    # -> NHWC
    c0 = channels_list[0]
    # One-time input prep: 1-px spatial halo + channel pad + bf16 cast.
    x = jnp.pad(x, ((0, 0), (1, 1), (1, 1), (0, _round_up(c0) - c0))
                ).astype(jnp.bfloat16)
    feats = []
    for i, kp in enumerate(kernel_params):
        cin, cout = channels_list[i], channels_list[i + 1]
        x = residual_block_pool(x, kp, cin, cout)              # halo'd, padded, bf16
        f = x[:, 1:-1, 1:-1, :cout]                            # strip halo + pad chans
        feats.append(jnp.transpose(f, (0, 3, 1, 2)).astype(jnp.float32))
    return feats


# ----------------------------------------------------------------------------
# Pure-JAX/XLA reference mirroring the kernel's numerics (bf16 conv inputs,
# bf16 inter-block activations, f32 accumulation, eval-mode folded BN).
# ----------------------------------------------------------------------------
def _reference_forward(x_nchw, raw_params):
    dn = ("NCHW", "OIHW", "NCHW")
    rnd = lambda v: v.astype(jnp.bfloat16).astype(jnp.float32)

    def conv(inp, w, pad):
        return jax.lax.conv_general_dilated(rnd(inp), w, (1, 1), pad,
                                            dimension_numbers=dn)

    def ep(v, s, b):
        return v * s[None, :, None, None] + b[None, :, None, None]

    x, feats = x_nchw, []
    for p in raw_params:
        s1, b1 = _fold_bn(p["b1"], p["bn1_gamma"], p["bn1_beta"],
                          p["bn1_mean"], p["bn1_var"])
        s2, b2 = _fold_bn(p["b2"], p["bn2_gamma"], p["bn2_beta"],
                          p["bn2_mean"], p["bn2_var"])
        h1 = jnp.clip(ep(conv(x, p["w1"], ((1, 1), (1, 1))), s1, b1), 0.0, 6.0)
        h2 = jnp.clip(ep(conv(h1, p["w2"], ((1, 1), (1, 1))), s2, b2), 0.0, 6.0)
        if "wsc" in p:
            ssc, bsc = _fold_bn(p["bsc"], p["bnsc_gamma"], p["bnsc_beta"],
                                p["bnsc_mean"], p["bnsc_var"])
            ident = ep(conv(x, p["wsc"], ((0, 0), (0, 0))), ssc, bsc)
        else:
            ident = rnd(x)
        out = h2 + ident
        pooled = jax.lax.reduce_window(out, -jnp.inf, jax.lax.max,
                                       (1, 1, 2, 2), (1, 1, 2, 2), "VALID")
        pooled = rnd(pooled)          # kernel stores inter-block acts as bf16
        feats.append(pooled)
        x = pooled
    return feats


# ----------------------------------------------------------------------------
if __name__ == "__main__":
    channels_list = (4, 8, 16)
    kx, kw = jax.random.split(jax.random.PRNGKey(0))
    x = jax.random.normal(kx, (2, 4, 16, 16), jnp.float32)      # NCHW
    raw = init_encoder_params(kw, channels_list)
    kparams = fold_params_for_kernel(raw)

    fwd = jax.jit(encoder_forward, static_argnums=(2,))
    feats = fwd(x, kparams, channels_list)
    feats = [jax.block_until_ready(f) for f in feats]           # (2,8,8,8), (2,16,4,4)

    ref = _reference_forward(x, raw)
    for f, r in zip(feats, ref):
        assert f.shape == r.shape, (f.shape, r.shape)
        diff = jnp.abs(f - r)
        max_err = float(jnp.max(diff))
        mean_err = float(jnp.mean(diff))
        # bf16 inter-block activation storage (mirrored in the reference) can
        # put rare individual values one bf16 ulp apart (~0.03-0.06 at relu6
        # scale) due to f32 accumulation-order differences; the mean bound is
        # the tight regression guard.
        assert max_err < 8e-2, f"max abs error {max_err}"
        assert mean_err < 1e-3, f"mean abs error {mean_err}"

    print("KERNEL_OK")
</pallas_src>

<mosaic_0001>
module attributes {stable_mosaic.version = 11 : i64} {
  func.func @kernel(%arg0: i32, %arg1: memref<1x18x18x128xbf16, #tpu.memory_space<vmem>>, %arg2: memref<3x384x128xbf16, #tpu.memory_space<vmem>>, %arg3: memref<1x128xf32, #tpu.memory_space<vmem>>, %arg4: memref<1x128xf32, #tpu.memory_space<vmem>>, %arg5: memref<3x384x128xbf16, #tpu.memory_space<vmem>>, %arg6: memref<1x128xf32, #tpu.memory_space<vmem>>, %arg7: memref<1x128xf32, #tpu.memory_space<vmem>>, %arg8: memref<128x128xbf16, #tpu.memory_space<vmem>>, %arg9: memref<1x128xf32, #tpu.memory_space<vmem>>, %arg10: memref<1x128xf32, #tpu.memory_space<vmem>>, %arg11: memref<1x10x10x128xbf16, #tpu.memory_space<vmem>>, %arg12: memref<256x128xf32, #tpu.memory_space<vmem>>, %arg13: memref<18x18x128xbf16, #tpu.memory_space<vmem>>) attributes {dimension_semantics = [#tpu.dimension_semantics<parallel>], iteration_bounds = array<i64: 2>, scalar_prefetch = 0 : i64, scratch_operands = 2 : i64, tpu.core_type = #tpu.core_type<tc>, window_params = [{transform_indices = @transform_0, window_bounds = array<i64: 1, 18, 18, 128>}, {pipeline_mode = #tpu.pipeline_mode<synchronous>, transform_indices = @transform_1, window_bounds = array<i64: 3, 384, 128>}, {pipeline_mode = #tpu.pipeline_mode<synchronous>, transform_indices = @transform_2, window_bounds = array<i64: 1, 128>}, {pipeline_mode = #tpu.pipeline_mode<synchronous>, transform_indices = @transform_3, window_bounds = array<i64: 1, 128>}, {pipeline_mode = #tpu.pipeline_mode<synchronous>, transform_indices = @transform_4, window_bounds = array<i64: 3, 384, 128>}, {pipeline_mode = #tpu.pipeline_mode<synchronous>, transform_indices = @transform_5, window_bounds = array<i64: 1, 128>}, {pipeline_mode = #tpu.pipeline_mode<synchronous>, transform_indices = @transform_6, window_bounds = array<i64: 1, 128>}, {pipeline_mode = #tpu.pipeline_mode<synchronous>, transform_indices = @transform_7, window_bounds = array<i64: 128, 128>}, {pipeline_mode = #tpu.pipeline_mode<synchronous>, transform_indices = @transform_8, window_bounds = array<i64: 1, 128>}, {pipeline_mode = #tpu.pipeline_mode<synchronous>, transform_indices = @transform_9, window_bounds = array<i64: 1, 128>}, {transform_indices = @transform_10, window_bounds = array<i64: 1, 10, 10, 128>}]} {
    %c0 = arith.constant 0 : index
    %c0_0 = arith.constant 0 : index
    %c0_1 = arith.constant 0 : index
    %c0_2 = arith.constant 0 : index
    %0 = vector.load %arg1[%c0, %c0_0, %c0_1, %c0_2] : memref<1x18x18x128xbf16, #tpu.memory_space<vmem>>, vector<1x18x18x128xbf16>
    %1 = vector.shape_cast %0 : vector<1x18x18x128xbf16> to vector<18x18x128xbf16>
    %2 = vector.extract_strided_slice %1 {offsets = [0, 0, 0], sizes = [18, 16, 128], strides = [1, 1, 1]} : vector<18x18x128xbf16> to vector<18x16x128xbf16>
    %3 = vector.extract_strided_slice %1 {offsets = [0, 1, 0], sizes = [18, 16, 128], strides = [1, 1, 1]} : vector<18x18x128xbf16> to vector<18x16x128xbf16>
    %4 = vector.extract_strided_slice %1 {offsets = [0, 2, 0], sizes = [18, 16, 128], strides = [1, 1, 1]} : vector<18x18x128xbf16> to vector<18x16x128xbf16>
    %5 = tpu.concatenate %2, %3, %4 in 2 : vector<18x16x128xbf16>, vector<18x16x128xbf16>, vector<18x16x128xbf16> -> vector<18x16x384xbf16>
    %6 = vector.extract_strided_slice %5 {offsets = [0, 0, 0], sizes = [16, 16, 384], strides = [1, 1, 1]} : vector<18x16x384xbf16> to vector<16x16x384xbf16>
    %7 = vector.shape_cast %6 : vector<16x16x384xbf16> to vector<256x384xbf16>
    %c0_3 = arith.constant 0 : index
    %c0_4 = arith.constant 0 : index
    %c0_5 = arith.constant 0 : index
    %8 = vector.load %arg2[%c0_3, %c0_4, %c0_5] : memref<3x384x128xbf16, #tpu.memory_space<vmem>>, vector<1x384x128xbf16>
    %9 = vector.shape_cast %8 : vector<1x384x128xbf16> to vector<384x128xbf16>
    %cst = arith.constant dense<0.000000e+00> : vector<256x128xf32>
    %10 = tpu.matmul %7, %9, %cst {dimension_numbers = #tpu.dot_dimension_numbers<[1], [0], [0], [1], [0, 0, 1, 1], [], []>} : vector<256x384xbf16>, vector<384x128xbf16>, vector<256x128xf32> -> vector<256x128xf32>
    %c0_6 = arith.constant 0 : index
    %c0_7 = arith.constant 0 : index
    %11 = vector.load %arg12[%c0_6, %c0_7] : memref<256x128xf32, #tpu.memory_space<vmem>>, vector<256x128xf32>
    tpu.vector_store %arg12[%c0_6, %c0_7], %10 {strides = array<i32>} : memref<256x128xf32, #tpu.memory_space<vmem>>, vector<256x128xf32>,
    %12 = vector.extract_strided_slice %5 {offsets = [1, 0, 0], sizes = [16, 16, 384], strides = [1, 1, 1]} : vector<18x16x384xbf16> to vector<16x16x384xbf16>
    %13 = vector.shape_cast %12 : vector<16x16x384xbf16> to vector<256x384xbf16>
    %c0_8 = arith.constant 0 : index
    %c0_9 = arith.constant 0 : index
    %14 = vector.load %arg12[%c0_8, %c0_9] : memref<256x128xf32, #tpu.memory_space<vmem>>, vector<256x128xf32>
    %c1 = arith.constant 1 : index
    %c0_10 = arith.constant 0 : index
    %c0_11 = arith.constant 0 : index
    %15 = vector.load %arg2[%c1, %c0_10, %c0_11] : memref<3x384x128xbf16, #tpu.memory_space<vmem>>, vector<1x384x128xbf16>
    %16 = vector.shape_cast %15 : vector<1x384x128xbf16> to vector<384x128xbf16>
    %cst_12 = arith.constant dense<0.000000e+00> : vector<256x128xf32>
    %17 = tpu.matmul %13, %16, %cst_12 {dimension_numbers = #tpu.dot_dimension_numbers<[1], [0], [0], [1], [0, 0, 1, 1], [], []>} : vector<256x384xbf16>, vector<384x128xbf16>, vector<256x128xf32> -> vector<256x128xf32>
    %18 = arith.addf %14, %17 : vector<256x128xf32>
    %c0_13 = arith.constant 0 : index
    %c0_14 = arith.constant 0 : index
    %19 = vector.load %arg12[%c0_13, %c0_14] : memref<256x128xf32, #tpu.memory_space<vmem>>, vector<256x128xf32>
    tpu.vector_store %arg12[%c0_13, %c0_14], %18 {strides = array<i32>} : memref<256x128xf32, #tpu.memory_space<vmem>>, vector<256x128xf32>,
    %20 = vector.extract_strided_slice %5 {offsets = [2, 0, 0], sizes = [16, 16, 384], strides = [1, 1, 1]} : vector<18x16x384xbf16> to vector<16x16x384xbf16>
    %21 = vector.shape_cast %20 : vector<16x16x384xbf16> to vector<256x384xbf16>
    %c0_15 = arith.constant 0 : index
    %c0_16 = arith.constant 0 : index
    %22 = vector.load %arg12[%c0_15, %c0_16] : memref<256x128xf32, #tpu.memory_space<vmem>>, vector<256x128xf32>
    %c2 = arith.constant 2 : index
    %c0_17 = arith.constant 0 : index
    %c0_18 = arith.constant 0 : index
    %23 = vector.load %arg2[%c2, %c0_17, %c0_18] : memref<3x384x128xbf16, #tpu.memory_space<vmem>>, vector<1x384x128xbf16>
    %24 = vector.shape_cast %23 : vector<1x384x128xbf16> to vector<384x128xbf16>
    %cst_19 = arith.constant dense<0.000000e+00> : vector<256x128xf32>
    %25 = tpu.matmul %21, %24, %cst_19 {dimension_numbers = #tpu.dot_dimension_numbers<[1], [0], [0], [1], [0, 0, 1, 1], [], []>} : vector<256x384xbf16>, vector<384x128xbf16>, vector<256x128xf32> -> vector<256x128xf32>
    %26 = arith.addf %22, %25 : vector<256x128xf32>
    %c0_20 = arith.constant 0 : index
    %c0_21 = arith.constant 0 : index
    %27 = vector.load %arg12[%c0_20, %c0_21] : memref<256x128xf32, #tpu.memory_space<vmem>>, vector<256x128xf32>
    tpu.vector_store %arg12[%c0_20, %c0_21], %26 {strides = array<i32>} : memref<256x128xf32, #tpu.memory_space<vmem>>, vector<256x128xf32>,
    %c0_22 = arith.constant 0 : index
    %c0_23 = arith.constant 0 : index
    %28 = vector.load %arg12[%c0_22, %c0_23] : memref<256x128xf32, #tpu.memory_space<vmem>>, vector<256x128xf32>
    %c0_24 = arith.constant 0 : index
    %c0_25 = arith.constant 0 : index
    %29 = vector.load %arg3[%c0_24, %c0_25] : memref<1x128xf32, #tpu.memory_space<vmem>>, vector<1x128xf32>
    %30 = vector.broadcast %29 : vector<1x128xf32> to vector<256x128xf32>
    %31 = arith.mulf %28, %30 : vector<256x128xf32>
    %c0_26 = arith.constant 0 : index
    %c0_27 = arith.constant 0 : index
    %32 = vector.load %arg4[%c0_26, %c0_27] : memref<1x128xf32, #tpu.memory_space<vmem>>, vector<1x128xf32>
    %33 = vector.broadcast %32 : vector<1x128xf32> to vector<256x128xf32>
    %34 = arith.addf %31, %33 : vector<256x128xf32>
    %cst_28 = arith.constant 0.000000e+00 : f32
    %cst_29 = arith.constant 6.000000e+00 : f32
    %35 = vector.broadcast %cst_28 : f32 to vector<256x128xf32>
    %36 = arith.maximumf %35, %34 : vector<256x128xf32>
    %37 = vector.broadcast %cst_29 : f32 to vector<256x128xf32>
    %38 = arith.minimumf %37, %36 : vector<256x128xf32>
    %cst_30 = arith.constant 0.000000e+00 : bf16
    %39 = vector.broadcast %cst_30 : bf16 to vector<1x18x128xbf16>
    %cst_31 = arith.constant 0.000000e+00 : bf16
    %40 = vector.broadcast %cst_31 : bf16 to vector<16x1x128xbf16>
    %c0_32 = arith.constant 0 : index
    %c0_33 = arith.constant 0 : index
    %c0_34 = arith.constant 0 : index
    %41 = vector.load %arg13[%c0_32, %c0_33, %c0_34] : memref<18x18x128xbf16, #tpu.memory_space<vmem>>, vector<1x18x128xbf16>
    tpu.vector_store %arg13[%c0_32, %c0_33, %c0_34], %39 {strides = array<i32>} : memref<18x18x128xbf16, #tpu.memory_space<vmem>>, vector<1x18x128xbf16>,
    %c17 = arith.constant 17 : index
    %c0_35 = arith.constant 0 : index
    %c0_36 = arith.constant 0 : index
    %42 = vector.load %arg13[%c17, %c0_35, %c0_36] : memref<18x18x128xbf16, #tpu.memory_space<vmem>>, vector<1x18x128xbf16>
    tpu.vector_store %arg13[%c17, %c0_35, %c0_36], %39 {strides = array<i32>} : memref<18x18x128xbf16, #tpu.memory_space<vmem>>, vector<1x18x128xbf16>,
    %c1_37 = arith.constant 1 : index
    %c0_38 = arith.constant 0 : index
    %c0_39 = arith.constant 0 : index
    %43 = vector.load %arg13[%c1_37, %c0_38, %c0_39] : memref<18x18x128xbf16, #tpu.memory_space<vmem>>, vector<16x1x128xbf16>
    tpu.vector_store %arg13[%c1_37, %c0_38, %c0_39], %40 {strides = array<i32>} : memref<18x18x128xbf16, #tpu.memory_space<vmem>>, vector<16x1x128xbf16>,
    %c1_40 = arith.constant 1 : index
    %c17_41 = arith.constant 17 : index
    %c0_42 = arith.constant 0 : index
    %44 = vector.load %arg13[%c1_40, %c17_41, %c0_42] : memref<18x18x128xbf16, #tpu.memory_space<vmem>>, vector<16x1x128xbf16>
    tpu.vector_store %arg13[%c1_40, %c17_41, %c0_42], %40 {strides = array<i32>} : memref<18x18x128xbf16, #tpu.memory_space<vmem>>, vector<16x1x128xbf16>,
    %45 = arith.truncf %38 : vector<256x128xf32> to vector<256x128xbf16>
    %46 = vector.shape_cast %45 : vector<256x128xbf16> to vector<16x16x128xbf16>
    %c1_43 = arith.constant 1 : index
    %c1_44 = arith.constant 1 : index
    %c0_45 = arith.constant 0 : index
    %47 = vector.load %arg13[%c1_43, %c1_44, %c0_45] : memref<18x18x128xbf16, #tpu.memory_space<vmem>>, vector<16x16x128xbf16>
    tpu.vector_store %arg13[%c1_43, %c1_44, %c0_45], %46 {strides = array<i32>} : memref<18x18x128xbf16, #tpu.memory_space<vmem>>, vector<16x16x128xbf16>,
    %c0_46 = arith.constant 0 : index
    %c0_47 = arith.constant 0 : index
    %c0_48 = arith.constant 0 : index
    %48 = vector.load %arg13[%c0_46, %c0_47, %c0_48] : memref<18x18x128xbf16, #tpu.memory_space<vmem>>, vector<18x18x128xbf16>
    %49 = vector.extract_strided_slice %48 {offsets = [0, 0, 0], sizes = [18, 16, 128], strides = [1, 1, 1]} : vector<18x18x128xbf16> to vector<18x16x128xbf16>
    %50 = vector.extract_strided_slice %48 {offsets = [0, 1, 0], sizes = [18, 16, 128], strides = [1, 1, 1]} : vector<18x18x128xbf16> to vector<18x16x128xbf16>
    %51 = vector.extract_strided_slice %48 {offsets = [0, 2, 0], sizes = [18, 16, 128], strides = [1, 1, 1]} : vector<18x18x128xbf16> to vector<18x16x128xbf16>
    %52 = tpu.concatenate %49, %50, %51 in 2 : vector<18x16x128xbf16>, vector<18x16x128xbf16>, vector<18x16x128xbf16> -> vector<18x16x384xbf16>
    %53 = vector.extract_strided_slice %52 {offsets = [0, 0, 0], sizes = [16, 16, 384], strides = [1, 1, 1]} : vector<18x16x384xbf16> to vector<16x16x384xbf16>
    %54 = vector.shape_cast %53 : vector<16x16x384xbf16> to vector<256x384xbf16>
    %c0_49 = arith.constant 0 : index
    %c0_50 = arith.constant 0 : index
    %c0_51 = arith.constant 0 : index
    %55 = vector.load %arg5[%c0_49, %c0_50, %c0_51] : memref<3x384x128xbf16, #tpu.memory_space<vmem>>, vector<1x384x128xbf16>
    %56 = vector.shape_cast %55 : vector<1x384x128xbf16> to vector<384x128xbf16>
    %cst_52 = arith.constant dense<0.000000e+00> : vector<256x128xf32>
    %57 = tpu.matmul %54, %56, %cst_52 {dimension_numbers = #tpu.dot_dimension_numbers<[1], [0], [0], [1], [0, 0, 1, 1], [], []>} : vector<256x384xbf16>, vector<384x128xbf16>, vector<256x128xf32> -> vector<256x128xf32>
    %c0_53 = arith.constant 0 : index
    %c0_54 = arith.constant 0 : index
    %58 = vector.load %arg12[%c0_53, %c0_54] : memref<256x128xf32, #tpu.memory_space<vmem>>, vector<256x128xf32>
    tpu.vector_store %arg12[%c0_53, %c0_54], %57 {strides = array<i32>} : memref<256x128xf32, #tpu.memory_space<vmem>>, vector<256x128xf32>,
    %59 = vector.extract_strided_slice %52 {offsets = [1, 0, 0], sizes = [16, 16, 384], strides = [1, 1, 1]} : vector<18x16x384xbf16> to vector<16x16x384xbf16>
    %60 = vector.shape_cast %59 : vector<16x16x384xbf16> to vector<256x384xbf16>
    %c0_55 = arith.constant 0 : index
    %c0_56 = arith.constant 0 : index
    %61 = vector.load %arg12[%c0_55, %c0_56] : memref<256x128xf32, #tpu.memory_space<vmem>>, vector<256x128xf32>
    %c1_57 = arith.constant 1 : index
    %c0_58 = arith.constant 0 : index
    %c0_59 = arith.constant 0 : index
    %62 = vector.load %arg5[%c1_57, %c0_58, %c0_59] : memref<3x384x128xbf16, #tpu.memory_space<vmem>>, vector<1x384x128xbf16>
    %63 = vector.shape_cast %62 : vector<1x384x128xbf16> to vector<384x128xbf16>
    %cst_60 = arith.constant dense<0.000000e+00> : vector<256x128xf32>
    %64 = tpu.matmul %60, %63, %cst_60 {dimension_numbers = #tpu.dot_dimension_numbers<[1], [0], [0], [1], [0, 0, 1, 1], [], []>} : vector<256x384xbf16>, vector<384x128xbf16>, vector<256x128xf32> -> vector<256x128xf32>
    %65 = arith.addf %61, %64 : vector<256x128xf32>
    %c0_61 = arith.constant 0 : index
    %c0_62 = arith.constant 0 : index
    %66 = vector.load %arg12[%c0_61, %c0_62] : memref<256x128xf32, #tpu.memory_space<vmem>>, vector<256x128xf32>
    tpu.vector_store %arg12[%c0_61, %c0_62], %65 {strides = array<i32>} : memref<256x128xf32, #tpu.memory_space<vmem>>, vector<256x128xf32>,
    %67 = vector.extract_strided_slice %52 {offsets = [2, 0, 0], sizes = [16, 16, 384], strides = [1, 1, 1]} : vector<18x16x384xbf16> to vector<16x16x384xbf16>
    %68 = vector.shape_cast %67 : vector<16x16x384xbf16> to vector<256x384xbf16>
    %c0_63 = arith.constant 0 : index
    %c0_64 = arith.constant 0 : index
    %69 = vector.load %arg12[%c0_63, %c0_64] : memref<256x128xf32, #tpu.memory_space<vmem>>, vector<256x128xf32>
    %c2_65 = arith.constant 2 : index
    %c0_66 = arith.constant 0 : index
    %c0_67 = arith.constant 0 : index
    %70 = vector.load %arg5[%c2_65, %c0_66, %c0_67] : memref<3x384x128xbf16, #tpu.memory_space<vmem>>, vector<1x384x128xbf16>
    %71 = vector.shape_cast %70 : vector<1x384x128xbf16> to vector<384x128xbf16>
    %cst_68 = arith.constant dense<0.000000e+00> : vector<256x128xf32>
    %72 = tpu.matmul %68, %71, %cst_68 {dimension_numbers = #tpu.dot_dimension_numbers<[1], [0], [0], [1], [0, 0, 1, 1], [], []>} : vector<256x384xbf16>, vector<384x128xbf16>, vector<256x128xf32> -> vector<256x128xf32>
    %73 = arith.addf %69, %72 : vector<256x128xf32>
    %c0_69 = arith.constant 0 : index
    %c0_70 = arith.constant 0 : index
    %74 = vector.load %arg12[%c0_69, %c0_70] : memref<256x128xf32, #tpu.memory_space<vmem>>, vector<256x128xf32>
    tpu.vector_store %arg12[%c0_69, %c0_70], %73 {strides = array<i32>} : memref<256x128xf32, #tpu.memory_space<vmem>>, vector<256x128xf32>,
    %c0_71 = arith.constant 0 : index
    %c0_72 = arith.constant 0 : index
    %75 = vector.load %arg12[%c0_71, %c0_72] : memref<256x128xf32, #tpu.memory_space<vmem>>, vector<256x128xf32>
    %c0_73 = arith.constant 0 : index
    %c0_74 = arith.constant 0 : index
    %76 = vector.load %arg6[%c0_73, %c0_74] : memref<1x128xf32, #tpu.memory_space<vmem>>, vector<1x128xf32>
    %77 = vector.broadcast %76 : vector<1x128xf32> to vector<256x128xf32>
    %78 = arith.mulf %75, %77 : vector<256x128xf32>
    %c0_75 = arith.constant 0 : index
    %c0_76 = arith.constant 0 : index
    %79 = vector.load %arg7[%c0_75, %c0_76] : memref<1x128xf32, #tpu.memory_space<vmem>>, vector<1x128xf32>
    %80 = vector.broadcast %79 : vector<1x128xf32> to vector<256x128xf32>
    %81 = arith.addf %78, %80 : vector<256x128xf32>
    %cst_77 = arith.constant 0.000000e+00 : f32
    %cst_78 = arith.constant 6.000000e+00 : f32
    %82 = vector.broadcast %cst_77 : f32 to vector<256x128xf32>
    %83 = arith.maximumf %82, %81 : vector<256x128xf32>
    %84 = vector.broadcast %cst_78 : f32 to vector<256x128xf32>
    %85 = arith.minimumf %84, %83 : vector<256x128xf32>
    %86 = vector.extract_strided_slice %13 {offsets = [0, 128], sizes = [256, 128], strides = [1, 1]} : vector<256x384xbf16> to vector<256x128xbf16>
    %c0_79 = arith.constant 0 : index
    %c0_80 = arith.constant 0 : index
    %87 = vector.load %arg8[%c0_79, %c0_80] : memref<128x128xbf16, #tpu.memory_space<vmem>>, vector<128x128xbf16>
    %cst_81 = arith.constant dense<0.000000e+00> : vector<256x128xf32>
    %88 = tpu.matmul %86, %87, %cst_81 {dimension_numbers = #tpu.dot_dimension_numbers<[1], [0], [0], [1], [0, 0, 1, 1], [], []>} : vector<256x128xbf16>, vector<128x128xbf16>, vector<256x128xf32> -> vector<256x128xf32>
    %c0_82 = arith.constant 0 : index
    %c0_83 = arith.constant 0 : index
    %89 = vector.load %arg9[%c0_82, %c0_83] : memref<1x128xf32, #tpu.memory_space<vmem>>, vector<1x128xf32>
    %90 = vector.broadcast %89 : vector<1x128xf32> to vector<256x128xf32>
    %91 = arith.mulf %88, %90 : vector<256x128xf32>
    %c0_84 = arith.constant 0 : index
    %c0_85 = arith.constant 0 : index
    %92 = vector.load %arg10[%c0_84, %c0_85] : memref<1x128xf32, #tpu.memory_space<vmem>>, vector<1x128xf32>
    %93 = vector.broadcast %92 : vector<1x128xf32> to vector<256x128xf32>
    %94 = arith.addf %91, %93 : vector<256x128xf32>
    %95 = arith.addf %85, %94 : vector<256x128xf32>
    %96 = vector.shape_cast %95 : vector<256x128xf32> to vector<8x2x16x128xf32>
    %97 = vector.extract_strided_slice %96 {offsets = [0, 0, 0, 0], sizes = [8, 1, 16, 128], strides = [1, 1, 1, 1]} : vector<8x2x16x128xf32> to vector<8x1x16x128xf32>
    %98 = vector.shape_cast %97 : vector<8x1x16x128xf32> to vector<8x16x128xf32>
    %99 = vector.extract_strided_slice %96 {offsets = [0, 1, 0, 0], sizes = [8, 1, 16, 128], strides = [1, 1, 1, 1]} : vector<8x2x16x128xf32> to vector<8x1x16x128xf32>
    %100 = vector.shape_cast %99 : vector<8x1x16x128xf32> to vector<8x16x128xf32>
    %101 = arith.maximumf %98, %100 : vector<8x16x128xf32>
    %102 = vector.shape_cast %101 : vector<8x16x128xf32> to vector<8x8x2x128xf32>
    %103 = vector.extract_strided_slice %102 {offsets = [0, 0, 0, 0], sizes = [8, 8, 1, 128], strides = [1, 1, 1, 1]} : vector<8x8x2x128xf32> to vector<8x8x1x128xf32>
    %104 = vector.shape_cast %103 : vector<8x8x1x128xf32> to vector<8x8x128xf32>
    %105 = vector.extract_strided_slice %102 {offsets = [0, 0, 1, 0], sizes = [8, 8, 1, 128], strides = [1, 1, 1, 1]} : vector<8x8x2x128xf32> to vector<8x8x1x128xf32>
    %106 = vector.shape_cast %105 : vector<8x8x1x128xf32> to vector<8x8x128xf32>
    %107 = arith.maximumf %104, %106 : vector<8x8x128xf32>
    %cst_86 = arith.constant 0.000000e+00 : bf16
    %108 = vector.broadcast %cst_86 : bf16 to vector<1x10x128xbf16>
    %cst_87 = arith.constant 0.000000e+00 : bf16
    %109 = vector.broadcast %cst_87 : bf16 to vector<8x1x128xbf16>
    %c0_88 = arith.constant 0 : index
    %c0_89 = arith.constant 0 : index
    %c0_90 = arith.constant 0 : index
    %c0_91 = arith.constant 0 : index
    %110 = vector.load %arg11[%c0_88, %c0_89, %c0_90, %c0_91] : memref<1x10x10x128xbf16, #tpu.memory_space<vmem>>, vector<1x1x10x128xbf16>
    %111 = vector.shape_cast %110 : vector<1x1x10x128xbf16> to vector<1x10x128xbf16>
    %112 = vector.shape_cast %108 : vector<1x10x128xbf16> to vector<1x1x10x128xbf16>
    tpu.vector_store %arg11[%c0_88, %c0_89, %c0_90, %c0_91], %112 {strides = array<i32>} : memref<1x10x10x128xbf16, #tpu.memory_space<vmem>>, vector<1x1x10x128xbf16>,
    %c0_92 = arith.constant 0 : index
    %c9 = arith.constant 9 : index
    %c0_93 = arith.constant 0 : index
    %c0_94 = arith.constant 0 : index
    %113 = vector.load %arg11[%c0_92, %c9, %c0_93, %c0_94] : memref<1x10x10x128xbf16, #tpu.memory_space<vmem>>, vector<1x1x10x128xbf16>
    %114 = vector.shape_cast %113 : vector<1x1x10x128xbf16> to vector<1x10x128xbf16>
    %115 = vector.shape_cast %108 : vector<1x10x128xbf16> to vector<1x1x10x128xbf16>
    tpu.vector_store %arg11[%c0_92, %c9, %c0_93, %c0_94], %115 {strides = array<i32>} : memref<1x10x10x128xbf16, #tpu.memory_space<vmem>>, vector<1x1x10x128xbf16>,
    %c0_95 = arith.constant 0 : index
    %c1_96 = arith.constant 1 : index
    %c0_97 = arith.constant 0 : index
    %c0_98 = arith.constant 0 : index
    %116 = vector.load %arg11[%c0_95, %c1_96, %c0_97, %c0_98] : memref<1x10x10x128xbf16, #tpu.memory_space<vmem>>, vector<1x8x1x128xbf16>
    %117 = vector.shape_cast %116 : vector<1x8x1x128xbf16> to vector<8x1x128xbf16>
    %118 = vector.shape_cast %109 : vector<8x1x128xbf16> to vector<1x8x1x128xbf16>
    tpu.vector_store %arg11[%c0_95, %c1_96, %c0_97, %c0_98], %118 {strides = array<i32>} : memref<1x10x10x128xbf16, #tpu.memory_space<vmem>>, vector<1x8x1x128xbf16>,
    %c0_99 = arith.constant 0 : index
    %c1_100 = arith.constant 1 : index
    %c9_101 = arith.constant 9 : index
    %c0_102 = arith.constant 0 : index
    %119 = vector.load %arg11[%c0_99, %c1_100, %c9_101, %c0_102] : memref<1x10x10x128xbf16, #tpu.memory_space<vmem>>, vector<1x8x1x128xbf16>
    %120 = vector.shape_cast %119 : vector<1x8x1x128xbf16> to vector<8x1x128xbf16>
    %121 = vector.shape_cast %109 : vector<8x1x128xbf16> to vector<1x8x1x128xbf16>
    tpu.vector_store %arg11[%c0_99, %c1_100, %c9_101, %c0_102], %121 {strides = array<i32>} : memref<1x10x10x128xbf16, #tpu.memory_space<vmem>>, vector<1x8x1x128xbf16>,
    %122 = arith.truncf %107 : vector<8x8x128xf32> to vector<8x8x128xbf16>
    %c0_103 = arith.constant 0 : index
    %c1_104 = arith.constant 1 : index
    %c1_105 = arith.constant 1 : index
    %c0_106 = arith.constant 0 : index
    %123 = vector.load %arg11[%c0_103, %c1_104, %c1_105, %c0_106] : memref<1x10x10x128xbf16, #tpu.memory_space<vmem>>, vector<1x8x8x128xbf16>
    %124 = vector.shape_cast %123 : vector<1x8x8x128xbf16> to vector<8x8x128xbf16>
    %125 = vector.shape_cast %122 : vector<8x8x128xbf16> to vector<1x8x8x128xbf16>
    tpu.vector_store %arg11[%c0_103, %c1_104, %c1_105, %c0_106], %125 {strides = array<i32>} : memref<1x10x10x128xbf16, #tpu.memory_space<vmem>>, vector<1x8x8x128xbf16>,
    return
  }
  func.func @transform_0(%arg0: i32) -> (i32, i32, i32, i32) {
    %c0_i32 = arith.constant 0 : i32
    %c0_i32_0 = arith.constant 0 : i32
    %c0_i32_1 = arith.constant 0 : i32
    %c0_i32_2 = arith.constant 0 : i32
    return %arg0, %c0_i32, %c0_i32_0, %c0_i32_1 : i32, i32, i32, i32
  }
  func.func @transform_1(%arg0: i32) -> (i32, i32, i32) {
    %c0_i32 = arith.constant 0 : i32
    %c0_i32_0 = arith.constant 0 : i32
    %c0_i32_1 = arith.constant 0 : i32
    %c0_i32_2 = arith.constant 0 : i32
    return %c0_i32, %c0_i32_0, %c0_i32_1 : i32, i32, i32
  }
  func.func @transform_2(%arg0: i32) -> (i32, i32) {
    %c0_i32 = arith.constant 0 : i32
    %c0_i32_0 = arith.constant 0 : i32
    %c0_i32_1 = arith.constant 0 : i32
    return %c0_i32, %c0_i32_0 : i32, i32
  }
  func.func @transform_3(%arg0: i32) -> (i32, i32) {
    %c0_i32 = arith.constant 0 : i32
    %c0_i32_0 = arith.constant 0 : i32
    %c0_i32_1 = arith.constant 0 : i32
    return %c0_i32, %c0_i32_0 : i32, i32
  }
  func.func @transform_4(%arg0: i32) -> (i32, i32, i32) {
    %c0_i32 = arith.constant 0 : i32
    %c0_i32_0 = arith.constant 0 : i32
    %c0_i32_1 = arith.constant 0 : i32
    %c0_i32_2 = arith.constant 0 : i32
    return %c0_i32, %c0_i32_0, %c0_i32_1 : i32, i32, i32
  }
  func.func @transform_5(%arg0: i32) -> (i32, i32) {
    %c0_i32 = arith.constant 0 : i32
    %c0_i32_0 = arith.constant 0 : i32
    %c0_i32_1 = arith.constant 0 : i32
    return %c0_i32, %c0_i32_0 : i32, i32
  }
  func.func @transform_6(%arg0: i32) -> (i32, i32) {
    %c0_i32 = arith.constant 0 : i32
    %c0_i32_0 = arith.constant 0 : i32
    %c0_i32_1 = arith.constant 0 : i32
    return %c0_i32, %c0_i32_0 : i32, i32
  }
  func.func @transform_7(%arg0: i32) -> (i32, i32) {
    %c0_i32 = arith.constant 0 : i32
    %c0_i32_0 = arith.constant 0 : i32
    %c0_i32_1 = arith.constant 0 : i32
    return %c0_i32, %c0_i32_0 : i32, i32
  }
  func.func @transform_8(%arg0: i32) -> (i32, i32) {
    %c0_i32 = arith.constant 0 : i32
    %c0_i32_0 = arith.constant 0 : i32
    %c0_i32_1 = arith.constant 0 : i32
    return %c0_i32, %c0_i32_0 : i32, i32
  }
  func.func @transform_9(%arg0: i32) -> (i32, i32) {
    %c0_i32 = arith.constant 0 : i32
    %c0_i32_0 = arith.constant 0 : i32
    %c0_i32_1 = arith.constant 0 : i32
    return %c0_i32, %c0_i32_0 : i32, i32
  }
  func.func @transform_10(%arg0: i32) -> (i32, i32, i32, i32) {
    %c0_i32 = arith.constant 0 : i32
    %c0_i32_0 = arith.constant 0 : i32
    %c0_i32_1 = arith.constant 0 : i32
    %c0_i32_2 = arith.constant 0 : i32
    return %arg0, %c0_i32, %c0_i32_0, %c0_i32_1 : i32, i32, i32, i32
  }
}

module attributes {stable_mosaic.version = 11 : i64} {
  func.func @kernel(%arg0: i32, %arg1: memref<1x10x10x128xbf16, #tpu.memory_space<vmem>>, %arg2: memref<3x384x128xbf16, #tpu.memory_space<vmem>>, %arg3: memref<1x128xf32, #tpu.memory_space<vmem>>, %arg4: memref<1x128xf32, #tpu.memory_space<vmem>>, %arg5: memref<3x384x128xbf16, #tpu.memory_space<vmem>>, %arg6: memref<1x128xf32, #tpu.memory_space<vmem>>, %arg7: memref<1x128xf32, #tpu.memory_space<vmem>>, %arg8: memref<128x128xbf16, #tpu.memory_space<vmem>>, %arg9: memref<1x128xf32, #tpu.memory_space<vmem>>, %arg10: memref<1x128xf32, #tpu.memory_space<vmem>>, %arg11: memref<1x6x6x128xbf16, #tpu.memory_space<vmem>>, %arg12: memref<64x128xf32, #tpu.memory_space<vmem>>, %arg13: memref<10x10x128xbf16, #tpu.memory_space<vmem>>) attributes {dimension_semantics = [#tpu.dimension_semantics<parallel>], iteration_bounds = array<i64: 2>, scalar_prefetch = 0 : i64, scratch_operands = 2 : i64, tpu.core_type = #tpu.core_type<tc>, window_params = [{transform_indices = @transform_0, window_bounds = array<i64: 1, 10, 10, 128>}, {pipeline_mode = #tpu.pipeline_mode<synchronous>, transform_indices = @transform_1, window_bounds = array<i64: 3, 384, 128>}, {pipeline_mode = #tpu.pipeline_mode<synchronous>, transform_indices = @transform_2, window_bounds = array<i64: 1, 128>}, {pipeline_mode = #tpu.pipeline_mode<synchronous>, transform_indices = @transform_3, window_bounds = array<i64: 1, 128>}, {pipeline_mode = #tpu.pipeline_mode<synchronous>, transform_indices = @transform_4, window_bounds = array<i64: 3, 384, 128>}, {pipeline_mode = #tpu.pipeline_mode<synchronous>, transform_indices = @transform_5, window_bounds = array<i64: 1, 128>}, {pipeline_mode = #tpu.pipeline_mode<synchronous>, transform_indices = @transform_6, window_bounds = array<i64: 1, 128>}, {pipeline_mode = #tpu.pipeline_mode<synchronous>, transform_indices = @transform_7, window_bounds = array<i64: 128, 128>}, {pipeline_mode = #tpu.pipeline_mode<synchronous>, transform_indices = @transform_8, window_bounds = array<i64: 1, 128>}, {pipeline_mode = #tpu.pipeline_mode<synchronous>, transform_indices = @transform_9, window_bounds = array<i64: 1, 128>}, {transform_indices = @transform_10, window_bounds = array<i64: 1, 6, 6, 128>}]} {
    %c0 = arith.constant 0 : index
    %c0_0 = arith.constant 0 : index
    %c0_1 = arith.constant 0 : index
    %c0_2 = arith.constant 0 : index
    %0 = vector.load %arg1[%c0, %c0_0, %c0_1, %c0_2] : memref<1x10x10x128xbf16, #tpu.memory_space<vmem>>, vector<1x10x10x128xbf16>
    %1 = vector.shape_cast %0 : vector<1x10x10x128xbf16> to vector<10x10x128xbf16>
    %2 = vector.extract_strided_slice %1 {offsets = [0, 0, 0], sizes = [10, 8, 128], strides = [1, 1, 1]} : vector<10x10x128xbf16> to vector<10x8x128xbf16>
    %3 = vector.extract_strided_slice %1 {offsets = [0, 1, 0], sizes = [10, 8, 128], strides = [1, 1, 1]} : vector<10x10x128xbf16> to vector<10x8x128xbf16>
    %4 = vector.extract_strided_slice %1 {offsets = [0, 2, 0], sizes = [10, 8, 128], strides = [1, 1, 1]} : vector<10x10x128xbf16> to vector<10x8x128xbf16>
    %5 = tpu.concatenate %2, %3, %4 in 2 : vector<10x8x128xbf16>, vector<10x8x128xbf16>, vector<10x8x128xbf16> -> vector<10x8x384xbf16>
    %6 = vector.extract_strided_slice %5 {offsets = [0, 0, 0], sizes = [8, 8, 384], strides = [1, 1, 1]} : vector<10x8x384xbf16> to vector<8x8x384xbf16>
    %7 = vector.shape_cast %6 : vector<8x8x384xbf16> to vector<64x384xbf16>
    %c0_3 = arith.constant 0 : index
    %c0_4 = arith.constant 0 : index
    %c0_5 = arith.constant 0 : index
    %8 = vector.load %arg2[%c0_3, %c0_4, %c0_5] : memref<3x384x128xbf16, #tpu.memory_space<vmem>>, vector<1x384x128xbf16>
    %9 = vector.shape_cast %8 : vector<1x384x128xbf16> to vector<384x128xbf16>
    %cst = arith.constant dense<0.000000e+00> : vector<64x128xf32>
    %10 = tpu.matmul %7, %9, %cst {dimension_numbers = #tpu.dot_dimension_numbers<[1], [0], [0], [1], [0, 0, 1, 1], [], []>} : vector<64x384xbf16>, vector<384x128xbf16>, vector<64x128xf32> -> vector<64x128xf32>
    %c0_6 = arith.constant 0 : index
    %c0_7 = arith.constant 0 : index
    %11 = vector.load %arg12[%c0_6, %c0_7] : memref<64x128xf32, #tpu.memory_space<vmem>>, vector<64x128xf32>
    tpu.vector_store %arg12[%c0_6, %c0_7], %10 {strides = array<i32>} : memref<64x128xf32, #tpu.memory_space<vmem>>, vector<64x128xf32>,
    %12 = vector.extract_strided_slice %5 {offsets = [1, 0, 0], sizes = [8, 8, 384], strides = [1, 1, 1]} : vector<10x8x384xbf16> to vector<8x8x384xbf16>
    %13 = vector.shape_cast %12 : vector<8x8x384xbf16> to vector<64x384xbf16>
    %c0_8 = arith.constant 0 : index
    %c0_9 = arith.constant 0 : index
    %14 = vector.load %arg12[%c0_8, %c0_9] : memref<64x128xf32, #tpu.memory_space<vmem>>, vector<64x128xf32>
    %c1 = arith.constant 1 : index
    %c0_10 = arith.constant 0 : index
    %c0_11 = arith.constant 0 : index
    %15 = vector.load %arg2[%c1, %c0_10, %c0_11] : memref<3x384x128xbf16, #tpu.memory_space<vmem>>, vector<1x384x128xbf16>
    %16 = vector.shape_cast %15 : vector<1x384x128xbf16> to vector<384x128xbf16>
    %cst_12 = arith.constant dense<0.000000e+00> : vector<64x128xf32>
    %17 = tpu.matmul %13, %16, %cst_12 {dimension_numbers = #tpu.dot_dimension_numbers<[1], [0], [0], [1], [0, 0, 1, 1], [], []>} : vector<64x384xbf16>, vector<384x128xbf16>, vector<64x128xf32> -> vector<64x128xf32>
    %18 = arith.addf %14, %17 : vector<64x128xf32>
    %c0_13 = arith.constant 0 : index
    %c0_14 = arith.constant 0 : index
    %19 = vector.load %arg12[%c0_13, %c0_14] : memref<64x128xf32, #tpu.memory_space<vmem>>, vector<64x128xf32>
    tpu.vector_store %arg12[%c0_13, %c0_14], %18 {strides = array<i32>} : memref<64x128xf32, #tpu.memory_space<vmem>>, vector<64x128xf32>,
    %20 = vector.extract_strided_slice %5 {offsets = [2, 0, 0], sizes = [8, 8, 384], strides = [1, 1, 1]} : vector<10x8x384xbf16> to vector<8x8x384xbf16>
    %21 = vector.shape_cast %20 : vector<8x8x384xbf16> to vector<64x384xbf16>
    %c0_15 = arith.constant 0 : index
    %c0_16 = arith.constant 0 : index
    %22 = vector.load %arg12[%c0_15, %c0_16] : memref<64x128xf32, #tpu.memory_space<vmem>>, vector<64x128xf32>
    %c2 = arith.constant 2 : index
    %c0_17 = arith.constant 0 : index
    %c0_18 = arith.constant 0 : index
    %23 = vector.load %arg2[%c2, %c0_17, %c0_18] : memref<3x384x128xbf16, #tpu.memory_space<vmem>>, vector<1x384x128xbf16>
    %24 = vector.shape_cast %23 : vector<1x384x128xbf16> to vector<384x128xbf16>
    %cst_19 = arith.constant dense<0.000000e+00> : vector<64x128xf32>
    %25 = tpu.matmul %21, %24, %cst_19 {dimension_numbers = #tpu.dot_dimension_numbers<[1], [0], [0], [1], [0, 0, 1, 1], [], []>} : vector<64x384xbf16>, vector<384x128xbf16>, vector<64x128xf32> -> vector<64x128xf32>
    %26 = arith.addf %22, %25 : vector<64x128xf32>
    %c0_20 = arith.constant 0 : index
    %c0_21 = arith.constant 0 : index
    %27 = vector.load %arg12[%c0_20, %c0_21] : memref<64x128xf32, #tpu.memory_space<vmem>>, vector<64x128xf32>
    tpu.vector_store %arg12[%c0_20, %c0_21], %26 {strides = array<i32>} : memref<64x128xf32, #tpu.memory_space<vmem>>, vector<64x128xf32>,
    %c0_22 = arith.constant 0 : index
    %c0_23 = arith.constant 0 : index
    %28 = vector.load %arg12[%c0_22, %c0_23] : memref<64x128xf32, #tpu.memory_space<vmem>>, vector<64x128xf32>
    %c0_24 = arith.constant 0 : index
    %c0_25 = arith.constant 0 : index
    %29 = vector.load %arg3[%c0_24, %c0_25] : memref<1x128xf32, #tpu.memory_space<vmem>>, vector<1x128xf32>
    %30 = vector.broadcast %29 : vector<1x128xf32> to vector<64x128xf32>
    %31 = arith.mulf %28, %30 : vector<64x128xf32>
    %c0_26 = arith.constant 0 : index
    %c0_27 = arith.constant 0 : index
    %32 = vector.load %arg4[%c0_26, %c0_27] : memref<1x128xf32, #tpu.memory_space<vmem>>, vector<1x128xf32>
    %33 = vector.broadcast %32 : vector<1x128xf32> to vector<64x128xf32>
    %34 = arith.addf %31, %33 : vector<64x128xf32>
    %cst_28 = arith.constant 0.000000e+00 : f32
    %cst_29 = arith.constant 6.000000e+00 : f32
    %35 = vector.broadcast %cst_28 : f32 to vector<64x128xf32>
    %36 = arith.maximumf %35, %34 : vector<64x128xf32>
    %37 = vector.broadcast %cst_29 : f32 to vector<64x128xf32>
    %38 = arith.minimumf %37, %36 : vector<64x128xf32>
    %cst_30 = arith.constant 0.000000e+00 : bf16
    %39 = vector.broadcast %cst_30 : bf16 to vector<1x10x128xbf16>
    %cst_31 = arith.constant 0.000000e+00 : bf16
    %40 = vector.broadcast %cst_31 : bf16 to vector<8x1x128xbf16>
    %c0_32 = arith.constant 0 : index
    %c0_33 = arith.constant 0 : index
    %c0_34 = arith.constant 0 : index
    %41 = vector.load %arg13[%c0_32, %c0_33, %c0_34] : memref<10x10x128xbf16, #tpu.memory_space<vmem>>, vector<1x10x128xbf16>
    tpu.vector_store %arg13[%c0_32, %c0_33, %c0_34], %39 {strides = array<i32>} : memref<10x10x128xbf16, #tpu.memory_space<vmem>>, vector<1x10x128xbf16>,
    %c9 = arith.constant 9 : index
    %c0_35 = arith.constant 0 : index
    %c0_36 = arith.constant 0 : index
    %42 = vector.load %arg13[%c9, %c0_35, %c0_36] : memref<10x10x128xbf16, #tpu.memory_space<vmem>>, vector<1x10x128xbf16>
    tpu.vector_store %arg13[%c9, %c0_35, %c0_36], %39 {strides = array<i32>} : memref<10x10x128xbf16, #tpu.memory_space<vmem>>, vector<1x10x128xbf16>,
    %c1_37 = arith.constant 1 : index
    %c0_38 = arith.constant 0 : index
    %c0_39 = arith.constant 0 : index
    %43 = vector.load %arg13[%c1_37, %c0_38, %c0_39] : memref<10x10x128xbf16, #tpu.memory_space<vmem>>, vector<8x1x128xbf16>
    tpu.vector_store %arg13[%c1_37, %c0_38, %c0_39], %40 {strides = array<i32>} : memref<10x10x128xbf16, #tpu.memory_space<vmem>>, vector<8x1x128xbf16>,
    %c1_40 = arith.constant 1 : index
    %c9_41 = arith.constant 9 : index
    %c0_42 = arith.constant 0 : index
    %44 = vector.load %arg13[%c1_40, %c9_41, %c0_42] : memref<10x10x128xbf16, #tpu.memory_space<vmem>>, vector<8x1x128xbf16>
    tpu.vector_store %arg13[%c1_40, %c9_41, %c0_42], %40 {strides = array<i32>} : memref<10x10x128xbf16, #tpu.memory_space<vmem>>, vector<8x1x128xbf16>,
    %45 = arith.truncf %38 : vector<64x128xf32> to vector<64x128xbf16>
    %46 = vector.shape_cast %45 : vector<64x128xbf16> to vector<8x8x128xbf16>
    %c1_43 = arith.constant 1 : index
    %c1_44 = arith.constant 1 : index
    %c0_45 = arith.constant 0 : index
    %47 = vector.load %arg13[%c1_43, %c1_44, %c0_45] : memref<10x10x128xbf16, #tpu.memory_space<vmem>>, vector<8x8x128xbf16>
    tpu.vector_store %arg13[%c1_43, %c1_44, %c0_45], %46 {strides = array<i32>} : memref<10x10x128xbf16, #tpu.memory_space<vmem>>, vector<8x8x128xbf16>,
    %c0_46 = arith.constant 0 : index
    %c0_47 = arith.constant 0 : index
    %c0_48 = arith.constant 0 : index
    %48 = vector.load %arg13[%c0_46, %c0_47, %c0_48] : memref<10x10x128xbf16, #tpu.memory_space<vmem>>, vector<10x10x128xbf16>
    %49 = vector.extract_strided_slice %48 {offsets = [0, 0, 0], sizes = [10, 8, 128], strides = [1, 1, 1]} : vector<10x10x128xbf16> to vector<10x8x128xbf16>
    %50 = vector.extract_strided_slice %48 {offsets = [0, 1, 0], sizes = [10, 8, 128], strides = [1, 1, 1]} : vector<10x10x128xbf16> to vector<10x8x128xbf16>
    %51 = vector.extract_strided_slice %48 {offsets = [0, 2, 0], sizes = [10, 8, 128], strides = [1, 1, 1]} : vector<10x10x128xbf16> to vector<10x8x128xbf16>
    %52 = tpu.concatenate %49, %50, %51 in 2 : vector<10x8x128xbf16>, vector<10x8x128xbf16>, vector<10x8x128xbf16> -> vector<10x8x384xbf16>
    %53 = vector.extract_strided_slice %52 {offsets = [0, 0, 0], sizes = [8, 8, 384], strides = [1, 1, 1]} : vector<10x8x384xbf16> to vector<8x8x384xbf16>
    %54 = vector.shape_cast %53 : vector<8x8x384xbf16> to vector<64x384xbf16>
    %c0_49 = arith.constant 0 : index
    %c0_50 = arith.constant 0 : index
    %c0_51 = arith.constant 0 : index
    %55 = vector.load %arg5[%c0_49, %c0_50, %c0_51] : memref<3x384x128xbf16, #tpu.memory_space<vmem>>, vector<1x384x128xbf16>
    %56 = vector.shape_cast %55 : vector<1x384x128xbf16> to vector<384x128xbf16>
    %cst_52 = arith.constant dense<0.000000e+00> : vector<64x128xf32>
    %57 = tpu.matmul %54, %56, %cst_52 {dimension_numbers = #tpu.dot_dimension_numbers<[1], [0], [0], [1], [0, 0, 1, 1], [], []>} : vector<64x384xbf16>, vector<384x128xbf16>, vector<64x128xf32> -> vector<64x128xf32>
    %c0_53 = arith.constant 0 : index
    %c0_54 = arith.constant 0 : index
    %58 = vector.load %arg12[%c0_53, %c0_54] : memref<64x128xf32, #tpu.memory_space<vmem>>, vector<64x128xf32>
    tpu.vector_store %arg12[%c0_53, %c0_54], %57 {strides = array<i32>} : memref<64x128xf32, #tpu.memory_space<vmem>>, vector<64x128xf32>,
    %59 = vector.extract_strided_slice %52 {offsets = [1, 0, 0], sizes = [8, 8, 384], strides = [1, 1, 1]} : vector<10x8x384xbf16> to vector<8x8x384xbf16>
    %60 = vector.shape_cast %59 : vector<8x8x384xbf16> to vector<64x384xbf16>
    %c0_55 = arith.constant 0 : index
    %c0_56 = arith.constant 0 : index
    %61 = vector.load %arg12[%c0_55, %c0_56] : memref<64x128xf32, #tpu.memory_space<vmem>>, vector<64x128xf32>
    %c1_57 = arith.constant 1 : index
    %c0_58 = arith.constant 0 : index
    %c0_59 = arith.constant 0 : index
    %62 = vector.load %arg5[%c1_57, %c0_58, %c0_59] : memref<3x384x128xbf16, #tpu.memory_space<vmem>>, vector<1x384x128xbf16>
    %63 = vector.shape_cast %62 : vector<1x384x128xbf16> to vector<384x128xbf16>
    %cst_60 = arith.constant dense<0.000000e+00> : vector<64x128xf32>
    %64 = tpu.matmul %60, %63, %cst_60 {dimension_numbers = #tpu.dot_dimension_numbers<[1], [0], [0], [1], [0, 0, 1, 1], [], []>} : vector<64x384xbf16>, vector<384x128xbf16>, vector<64x128xf32> -> vector<64x128xf32>
    %65 = arith.addf %61, %64 : vector<64x128xf32>
    %c0_61 = arith.constant 0 : index
    %c0_62 = arith.constant 0 : index
    %66 = vector.load %arg12[%c0_61, %c0_62] : memref<64x128xf32, #tpu.memory_space<vmem>>, vector<64x128xf32>
    tpu.vector_store %arg12[%c0_61, %c0_62], %65 {strides = array<i32>} : memref<64x128xf32, #tpu.memory_space<vmem>>, vector<64x128xf32>,
    %67 = vector.extract_strided_slice %52 {offsets = [2, 0, 0], sizes = [8, 8, 384], strides = [1, 1, 1]} : vector<10x8x384xbf16> to vector<8x8x384xbf16>
    %68 = vector.shape_cast %67 : vector<8x8x384xbf16> to vector<64x384xbf16>
    %c0_63 = arith.constant 0 : index
    %c0_64 = arith.constant 0 : index
    %69 = vector.load %arg12[%c0_63, %c0_64] : memref<64x128xf32, #tpu.memory_space<vmem>>, vector<64x128xf32>
    %c2_65 = arith.constant 2 : index
    %c0_66 = arith.constant 0 : index
    %c0_67 = arith.constant 0 : index
    %70 = vector.load %arg5[%c2_65, %c0_66, %c0_67] : memref<3x384x128xbf16, #tpu.memory_space<vmem>>, vector<1x384x128xbf16>
    %71 = vector.shape_cast %70 : vector<1x384x128xbf16> to vector<384x128xbf16>
    %cst_68 = arith.constant dense<0.000000e+00> : vector<64x128xf32>
    %72 = tpu.matmul %68, %71, %cst_68 {dimension_numbers = #tpu.dot_dimension_numbers<[1], [0], [0], [1], [0, 0, 1, 1], [], []>} : vector<64x384xbf16>, vector<384x128xbf16>, vector<64x128xf32> -> vector<64x128xf32>
    %73 = arith.addf %69, %72 : vector<64x128xf32>
    %c0_69 = arith.constant 0 : index
    %c0_70 = arith.constant 0 : index
    %74 = vector.load %arg12[%c0_69, %c0_70] : memref<64x128xf32, #tpu.memory_space<vmem>>, vector<64x128xf32>
    tpu.vector_store %arg12[%c0_69, %c0_70], %73 {strides = array<i32>} : memref<64x128xf32, #tpu.memory_space<vmem>>, vector<64x128xf32>,
    %c0_71 = arith.constant 0 : index
    %c0_72 = arith.constant 0 : index
    %75 = vector.load %arg12[%c0_71, %c0_72] : memref<64x128xf32, #tpu.memory_space<vmem>>, vector<64x128xf32>
    %c0_73 = arith.constant 0 : index
    %c0_74 = arith.constant 0 : index
    %76 = vector.load %arg6[%c0_73, %c0_74] : memref<1x128xf32, #tpu.memory_space<vmem>>, vector<1x128xf32>
    %77 = vector.broadcast %76 : vector<1x128xf32> to vector<64x128xf32>
    %78 = arith.mulf %75, %77 : vector<64x128xf32>
    %c0_75 = arith.constant 0 : index
    %c0_76 = arith.constant 0 : index
    %79 = vector.load %arg7[%c0_75, %c0_76] : memref<1x128xf32, #tpu.memory_space<vmem>>, vector<1x128xf32>
    %80 = vector.broadcast %79 : vector<1x128xf32> to vector<64x128xf32>
    %81 = arith.addf %78, %80 : vector<64x128xf32>
    %cst_77 = arith.constant 0.000000e+00 : f32
    %cst_78 = arith.constant 6.000000e+00 : f32
    %82 = vector.broadcast %cst_77 : f32 to vector<64x128xf32>
    %83 = arith.maximumf %82, %81 : vector<64x128xf32>
    %84 = vector.broadcast %cst_78 : f32 to vector<64x128xf32>
    %85 = arith.minimumf %84, %83 : vector<64x128xf32>
    %86 = vector.extract_strided_slice %13 {offsets = [0, 128], sizes = [64, 128], strides = [1, 1]} : vector<64x384xbf16> to vector<64x128xbf16>
    %c0_79 = arith.constant 0 : index
    %c0_80 = arith.constant 0 : index
    %87 = vector.load %arg8[%c0_79, %c0_80] : memref<128x128xbf16, #tpu.memory_space<vmem>>, vector<128x128xbf16>
    %cst_81 = arith.constant dense<0.000000e+00> : vector<64x128xf32>
    %88 = tpu.matmul %86, %87, %cst_81 {dimension_numbers = #tpu.dot_dimension_numbers<[1], [0], [0], [1], [0, 0, 1, 1], [], []>} : vector<64x128xbf16>, vector<128x128xbf16>, vector<64x128xf32> -> vector<64x128xf32>
    %c0_82 = arith.constant 0 : index
    %c0_83 = arith.constant 0 : index
    %89 = vector.load %arg9[%c0_82, %c0_83] : memref<1x128xf32, #tpu.memory_space<vmem>>, vector<1x128xf32>
    %90 = vector.broadcast %89 : vector<1x128xf32> to vector<64x128xf32>
    %91 = arith.mulf %88, %90 : vector<64x128xf32>
    %c0_84 = arith.constant 0 : index
    %c0_85 = arith.constant 0 : index
    %92 = vector.load %arg10[%c0_84, %c0_85] : memref<1x128xf32, #tpu.memory_space<vmem>>, vector<1x128xf32>
    %93 = vector.broadcast %92 : vector<1x128xf32> to vector<64x128xf32>
    %94 = arith.addf %91, %93 : vector<64x128xf32>
    %95 = arith.addf %85, %94 : vector<64x128xf32>
    %96 = vector.shape_cast %95 : vector<64x128xf32> to vector<4x2x8x128xf32>
    %97 = vector.extract_strided_slice %96 {offsets = [0, 0, 0, 0], sizes = [4, 1, 8, 128], strides = [1, 1, 1, 1]} : vector<4x2x8x128xf32> to vector<4x1x8x128xf32>
    %98 = vector.shape_cast %97 : vector<4x1x8x128xf32> to vector<4x8x128xf32>
    %99 = vector.extract_strided_slice %96 {offsets = [0, 1, 0, 0], sizes = [4, 1, 8, 128], strides = [1, 1, 1, 1]} : vector<4x2x8x128xf32> to vector<4x1x8x128xf32>
    %100 = vector.shape_cast %99 : vector<4x1x8x128xf32> to vector<4x8x128xf32>
    %101 = arith.maximumf %98, %100 : vector<4x8x128xf32>
    %102 = vector.shape_cast %101 : vector<4x8x128xf32> to vector<4x4x2x128xf32>
    %103 = vector.extract_strided_slice %102 {offsets = [0, 0, 0, 0], sizes = [4, 4, 1, 128], strides = [1, 1, 1, 1]} : vector<4x4x2x128xf32> to vector<4x4x1x128xf32>
    %104 = vector.shape_cast %103 : vector<4x4x1x128xf32> to vector<4x4x128xf32>
    %105 = vector.extract_strided_slice %102 {offsets = [0, 0, 1, 0], sizes = [4, 4, 1, 128], strides = [1, 1, 1, 1]} : vector<4x4x2x128xf32> to vector<4x4x1x128xf32>
    %106 = vector.shape_cast %105 : vector<4x4x1x128xf32> to vector<4x4x128xf32>
    %107 = arith.maximumf %104, %106 : vector<4x4x128xf32>
    %cst_86 = arith.constant 0.000000e+00 : bf16
    %108 = vector.broadcast %cst_86 : bf16 to vector<1x6x128xbf16>
    %cst_87 = arith.constant 0.000000e+00 : bf16
    %109 = vector.broadcast %cst_87 : bf16 to vector<4x1x128xbf16>
    %c0_88 = arith.constant 0 : index
    %c0_89 = arith.constant 0 : index
    %c0_90 = arith.constant 0 : index
    %c0_91 = arith.constant 0 : index
    %110 = vector.load %arg11[%c0_88, %c0_89, %c0_90, %c0_91] : memref<1x6x6x128xbf16, #tpu.memory_space<vmem>>, vector<1x1x6x128xbf16>
    %111 = vector.shape_cast %110 : vector<1x1x6x128xbf16> to vector<1x6x128xbf16>
    %112 = vector.shape_cast %108 : vector<1x6x128xbf16> to vector<1x1x6x128xbf16>
    tpu.vector_store %arg11[%c0_88, %c0_89, %c0_90, %c0_91], %112 {strides = array<i32>} : memref<1x6x6x128xbf16, #tpu.memory_space<vmem>>, vector<1x1x6x128xbf16>,
    %c0_92 = arith.constant 0 : index
    %c5 = arith.constant 5 : index
    %c0_93 = arith.constant 0 : index
    %c0_94 = arith.constant 0 : index
    %113 = vector.load %arg11[%c0_92, %c5, %c0_93, %c0_94] : memref<1x6x6x128xbf16, #tpu.memory_space<vmem>>, vector<1x1x6x128xbf16>
    %114 = vector.shape_cast %113 : vector<1x1x6x128xbf16> to vector<1x6x128xbf16>
    %115 = vector.shape_cast %108 : vector<1x6x128xbf16> to vector<1x1x6x128xbf16>
    tpu.vector_store %arg11[%c0_92, %c5, %c0_93, %c0_94], %115 {strides = array<i32>} : memref<1x6x6x128xbf16, #tpu.memory_space<vmem>>, vector<1x1x6x128xbf16>,
    %c0_95 = arith.constant 0 : index
    %c1_96 = arith.constant 1 : index
    %c0_97 = arith.constant 0 : index
    %c0_98 = arith.constant 0 : index
    %116 = vector.load %arg11[%c0_95, %c1_96, %c0_97, %c0_98] : memref<1x6x6x128xbf16, #tpu.memory_space<vmem>>, vector<1x4x1x128xbf16>
    %117 = vector.shape_cast %116 : vector<1x4x1x128xbf16> to vector<4x1x128xbf16>
    %118 = vector.shape_cast %109 : vector<4x1x128xbf16> to vector<1x4x1x128xbf16>
    tpu.vector_store %arg11[%c0_95, %c1_96, %c0_97, %c0_98], %118 {strides = array<i32>} : memref<1x6x6x128xbf16, #tpu.memory_space<vmem>>, vector<1x4x1x128xbf16>,
    %c0_99 = arith.constant 0 : index
    %c1_100 = arith.constant 1 : index
    %c5_101 = arith.constant 5 : index
    %c0_102 = arith.constant 0 : index
    %119 = vector.load %arg11[%c0_99, %c1_100, %c5_101, %c0_102] : memref<1x6x6x128xbf16, #tpu.memory_space<vmem>>, vector<1x4x1x128xbf16>
    %120 = vector.shape_cast %119 : vector<1x4x1x128xbf16> to vector<4x1x128xbf16>
    %121 = vector.shape_cast %109 : vector<4x1x128xbf16> to vector<1x4x1x128xbf16>
    tpu.vector_store %arg11[%c0_99, %c1_100, %c5_101, %c0_102], %121 {strides = array<i32>} : memref<1x6x6x128xbf16, #tpu.memory_space<vmem>>, vector<1x4x1x128xbf16>,
    %122 = arith.truncf %107 : vector<4x4x128xf32> to vector<4x4x128xbf16>
    %c0_103 = arith.constant 0 : index
    %c1_104 = arith.constant 1 : index
    %c1_105 = arith.constant 1 : index
    %c0_106 = arith.constant 0 : index
    %123 = vector.load %arg11[%c0_103, %c1_104, %c1_105, %c0_106] : memref<1x6x6x128xbf16, #tpu.memory_space<vmem>>, vector<1x4x4x128xbf16>
    %124 = vector.shape_cast %123 : vector<1x4x4x128xbf16> to vector<4x4x128xbf16>
    %125 = vector.shape_cast %122 : vector<4x4x128xbf16> to vector<1x4x4x128xbf16>
    tpu.vector_store %arg11[%c0_103, %c1_104, %c1_105, %c0_106], %125 {strides = array<i32>} : memref<1x6x6x128xbf16, #tpu.memory_space<vmem>>, vector<1x4x4x128xbf16>,
    return
  }
  func.func @transform_0(%arg0: i32) -> (i32, i32, i32, i32) {
    %c0_i32 = arith.constant 0 : i32
    %c0_i32_0 = arith.constant 0 : i32
    %c0_i32_1 = arith.constant 0 : i32
    %c0_i32_2 = arith.constant 0 : i32
    return %arg0, %c0_i32, %c0_i32_0, %c0_i32_1 : i32, i32, i32, i32
  }
  func.func @transform_1(%arg0: i32) -> (i32, i32, i32) {
    %c0_i32 = arith.constant 0 : i32
    %c0_i32_0 = arith.constant 0 : i32
    %c0_i32_1 = arith.constant 0 : i32
    %c0_i32_2 = arith.constant 0 : i32
    return %c0_i32, %c0_i32_0, %c0_i32_1 : i32, i32, i32
  }
  func.func @transform_2(%arg0: i32) -> (i32, i32) {
    %c0_i32 = arith.constant 0 : i32
    %c0_i32_0 = arith.constant 0 : i32
    %c0_i32_1 = arith.constant 0 : i32
    return %c0_i32, %c0_i32_0 : i32, i32
  }
  func.func @transform_3(%arg0: i32) -> (i32, i32) {
    %c0_i32 = arith.constant 0 : i32
    %c0_i32_0 = arith.constant 0 : i32
    %c0_i32_1 = arith.constant 0 : i32
    return %c0_i32, %c0_i32_0 : i32, i32
  }
  func.func @transform_4(%arg0: i32) -> (i32, i32, i32) {
    %c0_i32 = arith.constant 0 : i32
    %c0_i32_0 = arith.constant 0 : i32
    %c0_i32_1 = arith.constant 0 : i32
    %c0_i32_2 = arith.constant 0 : i32
    return %c0_i32, %c0_i32_0, %c0_i32_1 : i32, i32, i32
  }
  func.func @transform_5(%arg0: i32) -> (i32, i32) {
    %c0_i32 = arith.constant 0 : i32
    %c0_i32_0 = arith.constant 0 : i32
    %c0_i32_1 = arith.constant 0 : i32
    return %c0_i32, %c0_i32_0 : i32, i32
  }
  func.func @transform_6(%arg0: i32) -> (i32, i32) {
    %c0_i32 = arith.constant 0 : i32
    %c0_i32_0 = arith.constant 0 : i32
    %c0_i32_1 = arith.constant 0 : i32
    return %c0_i32, %c0_i32_0 : i32, i32
  }
  func.func @transform_7(%arg0: i32) -> (i32, i32) {
    %c0_i32 = arith.constant 0 : i32
    %c0_i32_0 = arith.constant 0 : i32
    %c0_i32_1 = arith.constant 0 : i32
    return %c0_i32, %c0_i32_0 : i32, i32
  }
  func.func @transform_8(%arg0: i32) -> (i32, i32) {
    %c0_i32 = arith.constant 0 : i32
    %c0_i32_0 = arith.constant 0 : i32
    %c0_i32_1 = arith.constant 0 : i32
    return %c0_i32, %c0_i32_0 : i32, i32
  }
  func.func @transform_9(%arg0: i32) -> (i32, i32) {
    %c0_i32 = arith.constant 0 : i32
    %c0_i32_0 = arith.constant 0 : i32
    %c0_i32_1 = arith.constant 0 : i32
    return %c0_i32, %c0_i32_0 : i32, i32
  }
  func.func @transform_10(%arg0: i32) -> (i32, i32, i32, i32) {
    %c0_i32 = arith.constant 0 : i32
    %c0_i32_0 = arith.constant 0 : i32
    %c0_i32_1 = arith.constant 0 : i32
    %c0_i32_2 = arith.constant 0 : i32
    return %arg0, %c0_i32, %c0_i32_0, %c0_i32_1 : i32, i32, i32, i32
  }
}

</mosaic_0001>

<bundles_post_ra>
// kernel: encoder_forward.3
= control target key start
LH: loop header
LB: loop body
LE: loop exit
PB: predicated region body
PF: predicated region fallthrough
CT: control target
= control target key end

     0   :  { %15 = vsyncpa [#allocation5], 0  ;;  %s5396_s0 = inlined_call_operand.vmem [shape: bf16[2,10,10,128], index: 0, kind: input, shape index: {}]   ;;  %s5397_s1 = inlined_call_operand.hbm [shape: bf16[3,384,128], index: 1, kind: input, shape index: {}]   ;;  %s5398_s2 = inlined_call_operand.vmem [shape: f32[1,128], index: 2, kind: input, shape index: {}]   ;;  %s5399_s3 = inlined_call_operand.hbm [shape: f32[1,128], index: 3, kind: input, shape index: {}]   ;;  %s5400_s4 = inlined_call_operand.hbm [shape: bf16[3,384,128], index: 4, kind: input, shape index: {}]   ;;  %s5401_s5 = inlined_call_operand.vmem [shape: f32[1,128], index: 5, kind: input, shape index: {}]   ;;  %s5402_s6 = inlined_call_operand.hbm [shape: f32[1,128], index: 6, kind: input, shape index: {}]   ;;  %s5403_s7 = inlined_call_operand.vmem [shape: bf16[128,128], index: 7, kind: input, shape index: {}]   ;;  %s5404_s8 = inlined_call_operand.vmem [shape: f32[1,128], index: 8, kind: input, shape index: {}]   ;;  %s5405_s9 = inlined_call_operand.hbm [shape: f32[1,128], index: 9, kind: input, shape index: {}]   ;;  %s5406_s10 = inlined_call_operand.vmem [shape: bf16[2,6,6,128], index: 10, kind: output, shape index: {}]  }
   0x1   :  { %16 = vsyncpa [#allocation7], 0 }
   0x2   :  { %17 = vsyncpa [#allocation10], 0  ;;  %s4575_s13 = smov 0  }
   0x3 LB: > { %s298_s16 = sshll.u32 %s5399_s3, 4  ;;  %s4584_s17 = sadd.s32 4294967295, %s4510_s13   ;;  %s4510_s13 = sphi %s4575_s13, %s23_s13   ;;  %s299_s16 = int_to_ptr.hbm [resolvable:$true] %s298_s16 }
   0x4   : > { %p3430_p0 = scmp.ge.s32.totalorder %s4510_s13, 1  ;;  %p269_p1 = scmp.lt.s32.totalorder %s4510_s13, 3 }
   0x5   : > { %p4310_p2 = scmp.eq.s32.totalorder %s4584_s17, 0  ;;  %s4512_s19 = smov [#allocation6]  }
   0x6   : > { %p4589_p3 = pnand %p3430_p0, %p269_p1  ;;  %s300_s20 = sshll.u32 %s4512_s19, 4  ;;  %s301_s20 = int_to_ptr.vmem [resolvable:$true] %s300_s20 }
   0x7   : > { %s327_s23 = sshll.u32 %s5402_s6, 4  ;;  %s280_s26 = sshll.u32 %s5397_s1, 4  ;;  %s328_s23 = int_to_ptr.hbm [resolvable:$true] %s327_s23  ;;  %s281_s26 = int_to_ptr.hbm [resolvable:$true] %s280_s26 }
   0x8   : > { %p4294_p4 = pneg %p4589_p3  ;;  %s4513_s28 = smov [#allocation9]  }
   0x9   : > { %s329_s29 = sshll.u32 %s4513_s28, 4  ;;  %s4514_s30 = smov [#allocation4]   ;;  %s330_s29 = int_to_ptr.vmem [resolvable:$true] %s329_s29 }
   0xa   : > { %p4603_p5 = pnand %p4310_p2, %p4294_p4  ;;  %s282_s11 = sshll.u32 %s4514_s30, 4  ;;  %s283_s11 = int_to_ptr.vmem [resolvable:$true] %s282_s11 }
   0xb   : > { %s4515_s12 = smov 64   ;;  %s4516_s14 = smov 4  }
   0xc   : > { %4300 = dma.hbm_to_vmem [thread:$0]  (!%p4603_p5), %s299_s16, 16, %s301_s20, [#allocation7]  }
   0xd   : > { %4306 = dma.hbm_to_vmem [thread:$0]  (!%p4603_p5), %s328_s23, 16, %s330_s29, [#allocation10]  }
   0xe   : > { %4297 = dma.hbm_to_vmem [thread:$0]  (!%p4603_p5), %s281_s26, 9216, %s283_s11, [#allocation5], %s4515_s12, %s4515_s12, %s4516_s14  }
   0xf   : > { %s309_s21 = sshll.u32 %s5400_s4, 4  ;;  %s4517_s22 = smov [#allocation8]   ;;  %s310_s21 = int_to_ptr.hbm [resolvable:$true] %s309_s21 }
  0x10   : > { %s311_s24 = sshll.u32 %s4517_s22, 4  ;;  %s345_s20 = sshll.u32 %s5405_s9, 4  ;;  %s312_s24 = int_to_ptr.vmem [resolvable:$true] %s311_s24  ;;  %s346_s20 = int_to_ptr.hbm [resolvable:$true] %s345_s20 }
  0x11   : > { %4303 = dma.hbm_to_vmem [thread:$0]  (!%p4603_p5), %s310_s21, 9216, %s312_s24, [#allocation7], %s4515_s12, %s4515_s12, %s4516_s14  }
  0x12   : > { %s4518_s23 = smov [#allocation11]   ;;  %368 = sbr.rel (%p4589_p3) target bundleno = 664 (0x298), region = 60 }
  0x13   : > { %s347_s28 = sshll.u32 %s4518_s23, 4  ;;  %s348_s28 = int_to_ptr.vmem [resolvable:$true] %s347_s28 }
  0x14   : > { %4309 = dma.hbm_to_vmem [thread:$0]  (!%p4603_p5), %s346_s20, 16, %s348_s28, [#allocation10]  }
  0x17   : > { %4497 = dma.done.wait (%p4310_p2), [#allocation5], 9216  }
  0x18   : > { %4499 = vsyncadd (%p4310_p2), [#allocation5], 4294958080 }
  0x19   : > { %4501 = dma.done.wait (%p4310_p2), [#allocation7], 9232  }
  0x1a   : > { %4503 = vsyncadd (%p4310_p2), [#allocation7], 4294958064 }
  0x1b   : > { %4505 = dma.done.wait (%p4310_p2), [#allocation10], 32  }
  0x1c   : > { %4507 = vsyncadd (%p4310_p2), [#allocation10], 4294967264  ;;  %p427_p6 = scmp.lt.s32.totalorder %s4584_s17, 1  ;;  %v4103_v0 = vld [vmem:[#allocation4 + $0x38] sm:$0xff]  ;;  %v4102_v3 = vld [vmem:[#allocation4 + $0x30] sm:$0xff]  ;;  %vm1611_vm0 = vcmask 1040384  }
  0x1d   : > { %v4111_v1 = vld [vmem:[#allocation4 + $0x78] sm:$0xff]  ;;  %820 = vmatpush.bf16.msra.mxu0 %v4103_v0  ;;  %4248 = vmatpush.bf16.msra.mxu3 %v4103_v0  ;;  %v4110_v4 = vld [vmem:[#allocation4 + $0x70] sm:$0xff]  ;;  %v4101_v6 = vld [vmem:[#allocation4 + $0x28] sm:$0xff]  ;;  %vm1612_vm1 = vsmask.f32 256  ;;  %vm1752_vm5 = vcmask 1043456  }
  0x1e   : > { %s5420_s17 = smov (!%p427_p6, %s4584_s17), 1  ;;  %v4119_v2 = vld [vmem:[#allocation4 + $0xb8] sm:$0xff]  ;;  %849 = vmatpush.bf16.msra.mxu1 %v4111_v1  ;;  %v4118_v5 = vld [vmem:[#allocation4 + $0xb0] sm:$0xff]  ;;  %v4109_v7 = vld [vmem:[#allocation4 + $0x68] sm:$0xff]  ;;  %vm1638_vm3 = vsmask.f32 7938 }
  0x1f   : > { %s4272_s18 = smul.u32 80, %s5420_s17  ;;  %878 = vmatpush.bf16.msra.mxu2 %v4119_v2  ;;  %v4117_v8 = vld [vmem:[#allocation4 + $0xa8] sm:$0xff]  ;;  %v4100_v16 = vld [vmem:[#allocation4 + $0x20] sm:$0xff]  ;;  %v4099_v22 = vld [vmem:[#allocation4 + $0x18] sm:$0xff]  ;;  %vm3206_vm7 = vcmask 1042434   ;;  %vm3274_vm10 = vcmask 1043459  }
  0x20   : > { %v4108_v18 = vld [vmem:[#allocation4 + $0x60] sm:$0xff]  ;;  %v4107_v25 = vld [vmem:[#allocation4 + $0x58] sm:$0xff]  ;;  %v4098_v27 = vld [vmem:[#allocation4 + $0x10] sm:$0xff]  ;;  %s4273_s30 = smul.u32 24, %s5420_s17  ;;  %vm3207_vm8 = vsmask.f32 7946 }
  0x21   : > { %s4645_s29 = scalar_lea.vmem %s5396_s0, %s4272_s18  ;;  %821 = vmatpush.bf16.msra.mxu0 %v4102_v3  ;;  %4249 = vmatpush.bf16.msra.mxu3 %v4102_v3  ;;  %v4116_v19 = vld [vmem:[#allocation4 + $0xa0] sm:$0xff]  ;;  %v4115_v26 = vld [vmem:[#allocation4 + $0x98] sm:$0xff]  ;;  %v4106_v29 = vld [vmem:[#allocation4 + $0x50] sm:$0xff]  ;;  %vm3277_vm11 = vcmask 1044484   ;;  %vm3308_vm12 = vcmask 1042432  }
  0x22   : > { %850 = vmatpush.bf16.msra.mxu1 %v4110_v4  ;;  %v4648_v9 = vld [vmem:[%s4645_s29] sm:$0xf]  ;;  %v439_v10 = vld [vmem:[%s4645_s29 + $0x4] sm:$0x1]  ;;  %v440_v11 = vld [vmem:[%s4645_s29 + $0x8] sm:$0xf]  ;;  %s4911_s12 = scalar_lea.vmem %s5406_s10, %s4273_s30 }
  0x23   : > { %879 = vmatpush.bf16.msra.mxu2 %v4118_v5  ;;  %v478_v12 = vunpack.c.l.b16 %v4648_v9  ;;  %v479_v13 = vunpack.c.l.b16 %v439_v10  ;;  %v4653_v14 = vunpack.c.l.b16 %v440_v11  ;;  %v441_v15 = vld [vmem:[%s4645_s29 + $0xc] sm:$0x1]  ;;  %v442_v28 = vld [vmem:[%s4645_s29 + $0x10] sm:$0xf]  ;;  %v4114_v30 = vld [vmem:[#allocation4 + $0x90] sm:$0xff] }
  0x24   : > { %v481_v17 = vunpack.c.l.b16 %v441_v15  ;;  %v444_v33 = vld [vmem:[%s4645_s29 + $0x18] sm:$0xf]  ;;  %v443_v36 = vld [vmem:[%s4645_s29 + $0x14] sm:$0x1]  ;;  %v445_v37 = vld [vmem:[%s4645_s29 + $0x1c] sm:$0x1]  ;;  %v4663_v40 = vunpack.c.l.b16 %v442_v28 }
  0x25   : > { %822 = vmatpush.bf16.msra.mxu0 %v4101_v6  ;;  %4250 = vmatpush.bf16.msra.mxu3 %v4101_v6  ;;  %v498_v20 = vpack.c.b16 %v479_v13, %v478_v12  ;;  %v4665_v41 = vunpack.c.l.b16 %v444_v33  ;;  %v4097_v42 = vld [vmem:[#allocation4 + $0x8] sm:$0xff]  ;;  %v446_v43 = vld [vmem:[%s4645_s29 + $0x20] sm:$0xf]  ;;  %v448_v44 = vld [vmem:[%s4645_s29 + $0x28] sm:$0xf]  ;;  %v483_v47 = vunpack.c.l.b16 %v443_v36  ;;  %v485_v48 = vunpack.c.l.b16 %v445_v37 }
  0x26   : > { %851 = vmatpush.bf16.msra.mxu1 %v4109_v7  ;;  %v499_v21 = vpack.c.b16 %v481_v17, %v4653_v14  ;;  %v4105_v49 = vld [vmem:[#allocation4 + $0x48] sm:$0xff]  ;;  %v4671_v51 = vunpack.c.l.b16 %v446_v43  ;;  %v4673_v52 = vunpack.c.l.b16 %v448_v44  ;;  %v4096_v55 = vld [vmem:[#allocation4] sm:$0xff]  ;;  %v4127_v62 = vld [vmem:[#allocation4 + $0xf8] sm:$0xff]  ;;  %v652_v0 = vpack.c.b16 %v4653_v14, %v478_v12 }
  0x27   : > { %880 = vmatpush.bf16.msra.mxu2 %v4117_v8  ;;  %v511_v23 = vshll.u32 %v498_v20, 16  ;;  %v509_v31 = vshrl.u32 %v498_v20, 16  ;;  %v578_v38 = vrot.slane %v498_v20, 1  ;;  %v4113_v50 = vld [vmem:[#allocation4 + $0x88] sm:$0xff]  ;;  %v4679_v58 = vpack.c.b16 %v483_v47, %v4663_v40  ;;  %v4104_v60 = vld [vmem:[#allocation4 + $0x40] sm:$0xff]  ;;  %v4135_v63 = vld [vmem:[#allocation4 + $0x138] sm:$0xff] }
  0x28   : > { %v518_v24 = vshll.u32 %v499_v21, 16  ;;  %v516_v32 = vshrl.u32 %v499_v21, 16  ;;  %v579_v39 = vrot.slane %v499_v21, 1  ;;  %v4682_v59 = vpack.c.b16 %v485_v48, %v4665_v41  ;;  %v4112_v61 = vld [vmem:[#allocation4 + $0x80] sm:$0xff]  ;;  %v4126_v6 = vld [vmem:[#allocation4 + $0xf0] sm:$0xff]  ;;  %v4143_v10 = vld [vmem:[#allocation4 + $0x178] sm:$0xff] }
  0x29   : > { %823 = vmatpush.bf16.msra.mxu0 %v4100_v16  ;;  %4251 = vmatpush.bf16.msra.mxu3 %v4100_v16  ;;  %v513_v34 = vrot.slane %v511_v23, 1  ;;  %v589_v53 = vunpack.c.l.b16 %v578_v38  ;;  %v4689_v1 = vpack.c.b16 %v4673_v52, %v4671_v51  ;;  %v525_v4 = vshll.u32 %v4679_v58, 16  ;;  %v4134_v7 = vld [vmem:[#allocation4 + $0x130] sm:$0xff]  ;;  %v449_v9 = vld [vmem:[%s4645_s29 + $0x2c] sm:$0x1]  ;;  %vm4882_vm2 = vmand %vm1611_vm0, %vm1612_vm1 }
  0x2a   : > { %852 = vmatpush.bf16.msra.mxu1 %v4108_v18  ;;  %v520_v35 = vrot.slane %v518_v24, 1  ;;  %v4675_v54 = vunpack.c.l.b16 %v579_v39  ;;  %v532_v5 = vshll.u32 %v4682_v59, 16  ;;  %v447_v8 = vld [vmem:[%s4645_s29 + $0x24] sm:$0x1]  ;;  %v523_v11 = vshrl.u32 %v4679_v58, 16  ;;  %v4151_v16 = vld [vmem:[#allocation4 + $0x1b8] sm:$0xff]  ;;  %vm4889_vm4 = vmand %vm1611_vm0, %vm1638_vm3 }
  0x2b   : > { %881 = vmatpush.bf16.msra.mxu2 %v4116_v19  ;;  %v514_v45 = vor.u32 %v513_v34, %v509_v31  ;;  %v527_v12 = vrot.slane %v525_v4, 1  ;;  %v530_v13 = vshrl.u32 %v4682_v59, 16  ;;  %v4142_v17 = vld [vmem:[#allocation4 + $0x170] sm:$0xff]  ;;  %v4125_v18 = vld [vmem:[#allocation4 + $0xe8] sm:$0xff]  ;;  %v487_v20 = vunpack.c.l.b16 %v447_v8  ;;  %v450_v23 = vld [vmem:[%s4645_s29 + $0x30] sm:$0xf] }
  0x2c   : > { %v4669_v46 = vor.u32 %v520_v35, %v516_v32  ;;  %v654_v3 = vpack.c.b16 %v4675_v54, %v589_v53  ;;  %v534_v15 = vrot.slane %v532_v5, 1  ;;  %v4133_v19 = vld [vmem:[#allocation4 + $0x128] sm:$0xff]  ;;  %v489_v21 = vunpack.c.l.b16 %v449_v9  ;;  %v4132_v31 = vld [vmem:[#allocation4 + $0x120] sm:$0xff]  ;;  %v4123_v43 = vld [vmem:[#allocation4 + $0xd8] sm:$0xff] }
  0x2d   : > { %824 = vmatpush.bf16.msra.mxu0 %v4099_v22  ;;  %4252 = vmatpush.bf16.msra.mxu3 %v4099_v22  ;;  %v588_v56 = vunpack.c.l.b16 %v514_v45  ;;  %v4150_v22 = vld [vmem:[#allocation4 + $0x1b0] sm:$0xff]  ;;  %v452_v24 = vld [vmem:[%s4645_s29 + $0x38] sm:$0xf]  ;;  %v581_v28 = vrot.slane %v4682_v59, 1  ;;  %v4709_v32 = vunpack.c.l.b16 %v450_v23  ;;  %v502_v34 = vpack.c.b16 %v487_v20, %v4671_v51  ;;  %v4131_v44 = vld [vmem:[#allocation4 + $0x118] sm:$0xff] }
  0x2e   : > { %853 = vmatpush.bf16.msra.mxu1 %v4107_v25  ;;  %v590_v57 = vunpack.c.l.b16 %v4669_v46  ;;  %v4703_v25 = vor.u32 %v527_v12, %v523_v11  ;;  %v4711_v33 = vunpack.c.l.b16 %v452_v24  ;;  %v503_v35 = vpack.c.b16 %v489_v21, %v4673_v52  ;;  %v4121_v4 = vld [vmem:[#allocation4 + $0xc8] sm:$0xff]  ;;  %v4148_v8 = vld [vmem:[#allocation4 + $0x1a0] sm:$0xff]  ;;  %v4167_v20 = vld [vmem:[#allocation4 + $0x238] sm:$0xff] }
  0x2f   : > { %882 = vmatpush.bf16.msra.mxu2 %v4115_v26  ;;  %v4705_v26 = vor.u32 %v534_v15, %v530_v13  ;;  %v4719_v39 = vunpack.c.l.b16 %v581_v28  ;;  %v4723_v45 = vpack.c.b16 %v4665_v41, %v4663_v40  ;;  %v539_v48 = vshll.u32 %v502_v34, 16  ;;  %v4129_v5 = vld [vmem:[#allocation4 + $0x108] sm:$0xff]  ;;  %v4120_v15 = vld [vmem:[#allocation4 + $0xc0] sm:$0xff]  ;;  %vm4957_vm6 = vmand %vm1752_vm5, %vm1638_vm3 }
  0x30   : > { %v653_v2 = vpack.c.b16 %v590_v57, %v588_v56  ;;  %v592_v36 = vunpack.c.l.b16 %v4703_v25  ;;  %v4727_v47 = vpack.c.b16 %v4711_v33, %v4709_v32  ;;  %v546_v53 = vshll.u32 %v503_v35, 16  ;;  %v4130_v56 = vld [vmem:[#allocation4 + $0x110] sm:$0xff]  ;;  %v4137_v13 = vld [vmem:[#allocation4 + $0x148] sm:$0xff]  ;;  %vm5256_vm9 = vmand %vm3206_vm7, %vm3207_vm8 }
  0x31   : > { %825 = vmatpush.bf16.msra.mxu0 %v4098_v27  ;;  %4253 = vmatpush.bf16.msra.mxu3 %v4098_v27  ;;  %v580_v27 = vrot.slane %v4679_v58, 1  ;;  %v594_v37 = vunpack.c.l.b16 %v4705_v26  ;;  %v537_v58 = vshrl.u32 %v502_v34, 16  ;;  %v541_v59 = vrot.slane %v539_v48, 1  ;;  %v4146_v48 = vld [vmem:[#allocation4 + $0x190] sm:$0xff] }
  0x32   : > { %854 = vmatpush.bf16.msra.mxu1 %v4106_v29  ;;  %v4141_v29 = vld [vmem:[#allocation4 + $0x168] sm:$0xff]  ;;  %v974_v28 = vpack.c.b16 %v4663_v40, %v4653_v14  ;;  %v4166_v14 = vld [vmem:[#allocation4 + $0x230] sm:$0xff]  ;;  %vm3309_vm13 = vsmask.f32 2306 }
  0x33   : > { %883 = vmatpush.bf16.msra.mxu2 %v4114_v30  ;;  %v4124_v30 = vld [vmem:[#allocation4 + $0xe0] sm:$0xff]  ;;  %v4717_v38 = vunpack.c.l.b16 %v580_v27  ;;  %v4162_v26 = vld [vmem:[#allocation4 + $0x210] sm:$0xff]  ;;  %vm5355_vm14 = vmand %vm3308_vm12, %vm3309_vm13 }
  0x34   : > { %v4136_v27 = vld [vmem:[#allocation4 + $0x140] sm:$0xff] }
  0x35   : > { %826 = vmatpush.bf16.msra.mxu0 %v4097_v42  ;;  %4254 = vmatpush.bf16.msra.mxu3 %v4097_v42  ;;  %v4140_v42 = vld [vmem:[#allocation4 + $0x160] sm:$0xff] }
  0x36   : > { %855 = vmatpush.bf16.msra.mxu1 %v4105_v49  ;;  %v4733_v49 = vpack.c.b16 %v594_v37, %v592_v36 }
  0x37   : > { %884 = vmatpush.bf16.msra.mxu2 %v4113_v50  ;;  %v4737_v50 = vpack.c.b16 %v4719_v39, %v4717_v38 }
  0x39   : > { %827 = vmatpush.bf16.msra.mxu0 %v4096_v55  ;;  %4255 = vmatpush.bf16.msra.mxu3 %v4096_v55  ;;  %v4122_v55 = vld [vmem:[#allocation4 + $0xd0] sm:$0xff] }
  0x3a   : > { %856 = vmatpush.bf16.msra.mxu1 %v4104_v60  ;;  %v4139_v60 = vld [vmem:[#allocation4 + $0x158] sm:$0xff] }
  0x3b   : > { %885 = vmatpush.bf16.msra.mxu2 %v4112_v61  ;;  %v544_v61 = vshrl.u32 %v503_v35, 16 }
  0x3c   : > { %828 = vmatmul.bf16.vlgmr.msra.gmra.mxu0 %v652_v0  ;;  %838 = vmatmul.bf16.vlgmr.msra.gmra.mxu3 %v4689_v1  ;;  %v451_v0 = vld [vmem:[%s4645_s29 + $0x34] sm:$0x1] }
  0x3d   : > { %1142 = vmatpush.bf16.msrb.mxu3 %v4127_v62  ;;  %1171 = vmatpush.bf16.msrb.mxu0 %v4135_v63  ;;  %v548_v62 = vrot.slane %v546_v53, 1  ;;  %v4149_v63 = vld [vmem:[#allocation4 + $0x1a8] sm:$0xff]  ;;  %v491_v11 = vunpack.c.l.b16 %v451_v0 }
  0x3e   : > { %857 = vmatmul.bf16.vlgmr.msra.gmra.mxu1 %v653_v2  ;;  %886 = vmatmul.bf16.vlgmr.msra.gmra.mxu2 %v654_v3  ;;  %v453_v2 = vld [vmem:[%s4645_s29 + $0x3c] sm:$0x1]  ;;  %v4138_v3 = vld [vmem:[#allocation4 + $0x150] sm:$0xff] }
  0x3f   : > { %1200 = vmatpush.bf16.msrb.mxu1 %v4143_v10  ;;  %1454 = vmatpush.bf16.msrb.mxu2 %v4151_v16  ;;  %v4747_v9 = vor.u32 %v548_v62, %v544_v61  ;;  %v583_v10 = vrot.slane %v503_v35, 1  ;;  %v493_v12 = vunpack.c.l.b16 %v453_v2  ;;  %v4128_v16 = vld [vmem:[#allocation4 + $0x100] sm:$0xff]  ;;  %v504_v23 = vpack.c.b16 %v491_v11, %v4709_v32  ;;  %v4155_v2 = vld [vmem:[#allocation4 + $0x1d8] sm:$0xff] }
  0x40   : > { %v4144_v11 = vld [vmem:[#allocation4 + $0x180] sm:$0xff] }
  0x41   : > { %1143 = vmatpush.bf16.msrb.mxu3 %v4126_v6  ;;  %1172 = vmatpush.bf16.msrb.mxu0 %v4134_v7  ;;  %v4745_v6 = vor.u32 %v541_v59, %v537_v58  ;;  %v582_v7 = vrot.slane %v502_v34, 1  ;;  %v598_v21 = vunpack.c.l.b16 %v4747_v9  ;;  %v505_v24 = vpack.c.b16 %v493_v12, %v4711_v33  ;;  %v4156_v59 = vld [vmem:[#allocation4 + $0x1e0] sm:$0xff]  ;;  %v4161_v12 = vld [vmem:[#allocation4 + $0x208] sm:$0xff] }
  0x42   : > { %v553_v34 = vshll.u32 %v504_v23, 16  ;;  %v551_v40 = vshrl.u32 %v504_v23, 16 }
  0x43   : > { %1201 = vmatpush.bf16.msrb.mxu1 %v4142_v17  ;;  %1455 = vmatpush.bf16.msrb.mxu2 %v4150_v22  ;;  %v596_v17 = vunpack.c.l.b16 %v4745_v6  ;;  %v4753_v22 = vunpack.c.l.b16 %v583_v10  ;;  %v560_v35 = vshll.u32 %v505_v24, 16  ;;  %v585_v58 = vrot.slane %v505_v24, 1  ;;  %v4145_v10 = vld [vmem:[#allocation4 + $0x188] sm:$0xff] }
  0x44   : > { %v555_v46 = vrot.slane %v553_v34, 1 }
  0x45   : > { %1144 = vmatpush.bf16.msrb.mxu3 %v4125_v18  ;;  %1173 = vmatpush.bf16.msrb.mxu0 %v4133_v19  ;;  %v4750_v18 = vunpack.c.l.b16 %v582_v7  ;;  %v4159_v19 = vld [vmem:[#allocation4 + $0x1f8] sm:$0xff]  ;;  %v562_v25 = vrot.slane %v560_v35, 1  ;;  %v4776_v0 = vunpack.c.l.b16 %v585_v58 }
  0x46   : > { %v556_v53 = vor.u32 %v555_v46, %v551_v40 }
  0x47   : > { %1202 = vmatpush.bf16.msrb.mxu1 %v4141_v29  ;;  %1456 = vmatpush.bf16.msrb.mxu2 %v4149_v63  ;;  %v4763_v29 = vpack.c.b16 %v592_v36, %v590_v57  ;;  %v558_v57 = vshrl.u32 %v505_v24, 16  ;;  %v4147_v36 = vld [vmem:[#allocation4 + $0x198] sm:$0xff]  ;;  %v979_v9 = vpack.c.b16 %v4750_v18, %v4719_v39 }
  0x48   : > { %v600_v61 = vunpack.c.l.b16 %v556_v53 }
  0x49   : > { %1145 = vmatpush.bf16.msrb.mxu3 %v4124_v30  ;;  %1174 = vmatpush.bf16.msrb.mxu0 %v4132_v31  ;;  %v4767_v30 = vpack.c.b16 %v598_v21, %v596_v17  ;;  %v4771_v31 = vpack.c.b16 %v4753_v22, %v4750_v18 }
  0x4b   : > { %1203 = vmatpush.bf16.msrb.mxu1 %v4140_v42  ;;  %1457 = vmatpush.bf16.msrb.mxu2 %v4148_v8  ;;  %v4158_v42 = vld [vmem:[#allocation4 + $0x1f0] sm:$0xff] }
  0x4c   : > { %833 = vmatmul.bf16.gmra.mxu0 %v4723_v45  ;;  %843 = vmatmul.bf16.gmra.mxu3 %v4727_v47  ;;  %v4154_v8 = vld [vmem:[#allocation4 + $0x1d0] sm:$0xff] }
  0x4d   : > { %1146 = vmatpush.bf16.msrb.mxu3 %v4123_v43  ;;  %1175 = vmatpush.bf16.msrb.mxu0 %v4131_v44  ;;  %v4157_v43 = vld [vmem:[#allocation4 + $0x1e8] sm:$0xff] }
  0x4e   : > { %862 = vmatmul.bf16.gmra.mxu1 %v4733_v49  ;;  %891 = vmatmul.bf16.gmra.mxu2 %v4737_v50  ;;  %v4165_v44 = vld [vmem:[#allocation4 + $0x228] sm:$0xff] }
  0x4f   : > { %1204 = vmatpush.bf16.msrb.mxu1 %v4139_v60  ;;  %1458 = vmatpush.bf16.msrb.mxu2 %v4147_v36  ;;  %v4164_v60 = vld [vmem:[#allocation4 + $0x220] sm:$0xff] }
  0x51   : > { %1147 = vmatpush.bf16.msrb.mxu3 %v4122_v55  ;;  %1176 = vmatpush.bf16.msrb.mxu0 %v4130_v56  ;;  %v563_v55 = vor.u32 %v562_v25, %v558_v57  ;;  %v584_v56 = vrot.slane %v504_v23, 1  ;;  %v4798_v23 = vpack.c.b16 %v600_v61, %v598_v21 }
  0x53   : > { %1205 = vmatpush.bf16.msrb.mxu1 %v4138_v3  ;;  %1459 = vmatpush.bf16.msrb.mxu2 %v4146_v48  ;;  %v602_v62 = vunpack.c.l.b16 %v563_v55  ;;  %v601_v63 = vunpack.c.l.b16 %v584_v56  ;;  %v4163_v3 = vld [vmem:[#allocation4 + $0x218] sm:$0xff] }
  0x55   : > { %1148 = vmatpush.bf16.msrb.mxu3 %v4121_v4  ;;  %1177 = vmatpush.bf16.msrb.mxu0 %v4129_v5  ;;  %v977_v4 = vpack.c.b16 %v4671_v51, %v4665_v41  ;;  %v4782_v5 = vpack.c.b16 %v596_v17, %v594_v37  ;;  %v4784_v6 = vpack.c.b16 %v602_v62, %v600_v61  ;;  %v454_v41 = vld [vmem:[%s4645_s29 + $0x40] sm:$0xf]  ;;  %v455_v51 = vld [vmem:[%s4645_s29 + $0x44] sm:$0x1]  ;;  %v4153_v37 = vld [vmem:[#allocation4 + $0x1c8] sm:$0xff] }
  0x56   : > { %v4787_v7 = vpack.c.b16 %v4776_v0, %v601_v63  ;;  %v4160_v17 = vld [vmem:[#allocation4 + $0x200] sm:$0xff] }
  0x57   : > { %1206 = vmatpush.bf16.msrb.mxu1 %v4137_v13  ;;  %1460 = vmatpush.bf16.msrb.mxu2 %v4145_v10  ;;  %v494_v13 = vunpack.c.l.b16 %v454_v41 }
  0x59   : > { %1149 = vmatpush.bf16.msrb.mxu3 %v4120_v15  ;;  %1178 = vmatpush.bf16.msrb.mxu0 %v4128_v16  ;;  %v495_v15 = vunpack.c.l.b16 %v455_v51  ;;  %v4152_v16 = vld [vmem:[#allocation4 + $0x1c0] sm:$0xff] }
  0x5b   : > { %1207 = vmatpush.bf16.msrb.mxu1 %v4136_v27  ;;  %1461 = vmatpush.bf16.msrb.mxu2 %v4144_v11  ;;  %v976_v27 = vpack.c.b16 %v4717_v38, %v4675_v54  ;;  %v982_v54 = vpack.c.b16 %v601_v63, %v4753_v22  ;;  %v456_v38 = vld [vmem:[%s4645_s29 + $0x48] sm:$0xf] }
  0x5c   : > { %1150 = vmatmul.bf16.vlgmr.msrb.gmra.mxu3 %v974_v28  ;;  %1179 = vmatmul.bf16.vlgmr.msrb.gmra.mxu0 %v4763_v29  ;;  %v496_v39 = vunpack.c.l.b16 %v456_v38  ;;  %v4173_v38 = vld [vmem:[#allocation8 + $0x28] sm:$0xff] }
  0x5d   : > { %1483 = vmatpush.bf16.msra.mxu3 %v4159_v19  ;;  %1512 = vmatpush.bf16.msra.mxu0 %v4167_v20  ;;  %v506_v19 = vpack.c.b16 %v495_v15, %v494_v13  ;;  %v980_v20 = vpack.c.b16 %v4709_v32, %v4673_v52  ;;  %v983_v52 = vpack.c.b16 %v494_v13, %v4711_v33 }
  0x5e   : > { %867 = vmatmul.bf16.gmra.mxu1 %v4767_v30  ;;  %896 = vmatmul.bf16.gmra.mxu2 %v4771_v31  ;;  %v1304_v21 = vpack.c.b16 %v496_v39, %v494_v13 }
  0x5f   : > { %v567_v24 = vshll.u32 %v506_v19, 16  ;;  %v565_v28 = vshrl.u32 %v506_v19, 16  ;;  %v586_v33 = vrot.slane %v506_v19, 1 }
  0x61   : > { %1484 = vmatpush.bf16.msra.mxu3 %v4158_v42  ;;  %1513 = vmatpush.bf16.msra.mxu0 %v4166_v14  ;;  %v569_v34 = vrot.slane %v567_v24, 1  ;;  %v4183_v24 = vld [vmem:[#allocation8 + $0x78] sm:$0xff] }
  0x62   : > { %2213 = vmatpush.bf16.msra.mxu2 %v4183_v24 }
  0x63   : > { %v570_v35 = vor.u32 %v569_v34, %v565_v28 }
  0x65   : > { %1485 = vmatpush.bf16.msra.mxu3 %v4157_v43  ;;  %1514 = vmatpush.bf16.msra.mxu0 %v4165_v44  ;;  %v915_v42 = vunpack.c.l.b16 %v570_v35 }
  0x67   : > { %v4805_v32 = vpack.c.b16 %v915_v42, %v602_v62 }
  0x69   : > { %1486 = vmatpush.bf16.msra.mxu3 %v4156_v59  ;;  %1515 = vmatpush.bf16.msra.mxu0 %v4164_v60 }
  0x6c   : > { %1155 = vmatmul.bf16.gmra.mxu3 %v977_v4  ;;  %1184 = vmatmul.bf16.gmra.mxu0 %v4782_v5 }
  0x6d   : > { %1487 = vmatpush.bf16.msra.mxu3 %v4155_v2  ;;  %1516 = vmatpush.bf16.msra.mxu0 %v4163_v3 }
  0x6e   : > { %872 = vmatmul.bf16.gmra.mxu1 %v4784_v6  ;;  %901 = vmatmul.bf16.gmra.mxu2 %v4787_v7 }
  0x71   : > { %1488 = vmatpush.bf16.msra.mxu3 %v4154_v8  ;;  %1517 = vmatpush.bf16.msra.mxu0 %v4162_v26 }
  0x75   : > { %1489 = vmatpush.bf16.msra.mxu3 %v4153_v37  ;;  %1518 = vmatpush.bf16.msra.mxu0 %v4161_v12 }
  0x79   : > { %1490 = vmatpush.bf16.msra.mxu3 %v4152_v16  ;;  %1519 = vmatpush.bf16.msra.mxu0 %v4160_v17 }
  0x7c   : > { %1160 = vmatmul.bf16.gmra.mxu3 %v980_v20  ;;  %1189 = vmatmul.bf16.gmra.mxu0 %v4798_v23  ;;  %v4175_v20 = vld [vmem:[#allocation8 + $0x38] sm:$0xff] }
  0x7d   : > { %2184 = vmatpush.bf16.msra.mxu1 %v4175_v20  ;;  %v4188_v20 = vld [vmem:[#allocation8 + $0xa0] sm:$0xff] }
  0x7e   : > { %1208 = vmatmul.bf16.vlgmr.msrb.gmra.mxu1 %v976_v27  ;;  %1462 = vmatmul.bf16.vlgmr.msrb.gmra.mxu2 %v4723_v45  ;;  %v916_v45 = vunpack.c.l.b16 %v586_v33 }
  0x80   : > { %v985_v18 = vpack.c.b16 %v916_v45, %v4776_v0 }
  0x8c   : > { %1165 = vmatmul.bf16.gmra.mxu3 %v983_v52  ;;  %1194 = vmatmul.bf16.gmra.mxu0 %v4805_v32  ;;  %v4174_v52 = vld [vmem:[#allocation8 + $0x30] sm:$0xff] }
  0x8d   : > { %2185 = vmatpush.bf16.msra.mxu1 %v4174_v52  ;;  %v4180_v52 = vld [vmem:[#allocation8 + $0x60] sm:$0xff] }
  0x8e   : > { %1213 = vmatmul.bf16.gmra.mxu1 %v979_v9  ;;  %1467 = vmatmul.bf16.gmra.mxu2 %v4689_v1  ;;  %v457_v1 = vld [vmem:[%s4645_s29 + $0x4c] sm:$0x1]  ;;  %v4182_v9 = vld [vmem:[#allocation8 + $0x70] sm:$0xff] }
  0x8f   : > { %2214 = vmatpush.bf16.msra.mxu2 %v4182_v9 }
  0x91   : > { %2186 = vmatpush.bf16.msra.mxu1 %v4173_v38  ;;  %v4187_v38 = vld [vmem:[#allocation8 + $0x98] sm:$0xff] }
  0x9c   : > { %1491 = vmatmul.bf16.vlgmr.msra.gmra.mxu3 %v4733_v49  ;;  %1520 = vmatmul.bf16.vlgmr.msra.gmra.mxu0 %v4737_v50  ;;  %v497_v49 = vunpack.c.l.b16 %v457_v1 }
  0x9e   : > { %1218 = vmatmul.bf16.gmra.mxu1 %v982_v54  ;;  %1472 = vmatmul.bf16.gmra.mxu2 %v4727_v47  ;;  %v507_v22 = vpack.c.b16 %v497_v49, %v496_v39 }
  0xa0   : > { %v574_v50 = vshll.u32 %v507_v22, 16  ;;  %v572_v47 = vshrl.u32 %v507_v22, 16  ;;  %v587_v43 = vrot.slane %v507_v22, 1 }
  0xa2   : > { %v576_v46 = vrot.slane %v574_v50, 1  ;;  %v1246_v55 = vunpack.c.l.b16 %v587_v43  ;;  %v4191_v50 = vld [vmem:[#allocation8 + $0xb8] sm:$0xff] }
  0xa3   : > { %2242 = vmatpush.bf16.msrb.mxu3 %v4191_v50 }
  0xa4   : > { %v1306_v60 = vpack.c.b16 %v1246_v55, %v916_v45  ;;  %v4181_v45 = vld [vmem:[#allocation8 + $0x68] sm:$0xff]  ;;  %v4172_v55 = vld [vmem:[#allocation8 + $0x20] sm:$0xff] }
  0xa5   : > { %2215 = vmatpush.bf16.msra.mxu2 %v4181_v45  ;;  %2187 = vmatpush.bf16.msra.mxu1 %v4172_v55  ;;  %v4519_v45 = vmov 0  }
  0xa6   : > { %1605 = vst [vmem:[#allocation3] sm:$0xf] %v4519_v45 }
  0xa7   : > { %1606 = vst [vmem:[#allocation3 + $0x4] sm:$0x1] %v4519_v45 }
  0xa8   : > { %3190 = vst [vmem:[%s4911_s12] sm:$0x7] %v4519_v45 }
  0xa9   : > { %2216 = vmatpush.bf16.msra.mxu2 %v4180_v52  ;;  %4069 = vst [vmem:[%s4911_s12 + $0x14] sm:$0x7] %v4519_v45  ;;  %v4193_v52 = vld [vmem:[#allocation8 + $0xc8] sm:$0xff] }
  0xaa   : > { %1608 = vst [vmem:[#allocation3 + $0x48] sm:$0xf] %v4519_v45 }
  0xab   : > { %1609 = vst [vmem:[#allocation3 + $0x4c] sm:$0x1] %v4519_v45 }
  0xac   : > { %1496 = vmatmul.bf16.gmra.mxu3 %v4767_v30  ;;  %1525 = vmatmul.bf16.gmra.mxu0 %v4771_v31  ;;  %v577_v30 = vor.u32 %v576_v46, %v572_v47  ;;  %v1614_v47 = vld [vmem:[#allocation3 + $0x8] sm:$0x1] }
  0xae   : > { %1223 = vmatmul.bf16.gmra.mxu1 %v985_v18  ;;  %1477 = vmatmul.bf16.gmra.mxu2 %v1304_v21  ;;  %v1245_v53 = vunpack.c.l.b16 %v577_v30  ;;  %v4205_v30 = vld [vmem:[#allocation8 + $0x128] sm:$0xff] }
  0xb0   : > { %v1305_v59 = vpack.c.b16 %v1245_v53, %v915_v42 }
  0xb9   : > { %v829_v14 = vpop.f32.mrf.mxu0 }
  0xbb   : > { %v858_v40 = vpop.f32.mrf.mxu1 }
  0xbc   : > { %1501 = vmatmul.bf16.gmra.mxu3 %v4784_v6  ;;  %1530 = vmatmul.bf16.gmra.mxu0 %v4787_v7  ;;  %v859_v57 = vadd.f32 %v858_v40, %v829_v14  ;;  %v4199_v40 = vld [vmem:[#allocation8 + $0xf8] sm:$0xff] }
  0xbd   : > { %2506 = vmatpush.bf16.msrb.mxu0 %v4199_v40  ;;  %v4169_v40 = vld [vmem:[#allocation8 + $0x8] sm:$0xff] }
  0xbf   : > { %v839_v25 = vpop.f32.mrf.mxu3 }
  0xc1   : > { %v887_v36 = vpop.f32.mrf.mxu2  ;;  %v4824_v44 = vpop.f32.mrf.mxu0 }
  0xc2   : > { %v4822_v31 = vadd.f32 %v887_v36, %v859_v57  ;;  %v1640_v57 = vld [vmem:[#allocation3 + $0xc] sm:$0x1]  ;;  %v1615_v36 = vsel %vm4882_vm2, 0, %v1614_v47 }
  0xc3   : > { %v4826_v48 = vpop.f32.mrf.mxu1  ;;  %1616 = vst [vmem:[#allocation3 + $0x8] sm:$0x1] %v1615_v36  ;;  %v1641_v53 = vsel %vm4889_vm4, 0, %v1640_v57  ;;  %v4195_v47 = vld [vmem:[#allocation8 + $0xd8] sm:$0xff]  ;;  %v1620_v36 = vld [vmem:[#allocation3 + $0x18] sm:$0x1] }
  0xc4   : > { %1642 = vst [vmem:[#allocation3 + $0xc] sm:$0x1] %v1641_v53  ;;  %v1646_v53 = vld [vmem:[#allocation3 + $0x1c] sm:$0x1] }
  0xc7   : > { %v4828_v56 = vpop.f32.mrf.mxu3 }
  0xc9   : > { %v4830_v58 = vpop.f32.mrf.mxu2  ;;  %v834_v61 = vpop.f32.mrf.mxu0 }
  0xcb   : > { %v863_v62 = vpop.f32.mrf.mxu1 }
  0xcc   : > { %1506 = vmatmul.bf16.gmra.mxu3 %v1305_v59  ;;  %1535 = vmatmul.bf16.gmra.mxu0 %v1306_v60  ;;  %v864_v63 = vadd.f32 %v863_v62, %v834_v61  ;;  %v4198_v59 = vld [vmem:[#allocation8 + $0xf0] sm:$0xff]  ;;  %v4189_v62 = vld [vmem:[#allocation8 + $0xa8] sm:$0xff] }
  0xcd   : > { %2507 = vmatpush.bf16.msrb.mxu0 %v4198_v59 }
  0xcf   : > { %v844_v0 = vpop.f32.mrf.mxu3 }
  0xd1   : > { %v892_v2 = vpop.f32.mrf.mxu2  ;;  %v4834_v4 = vpop.f32.mrf.mxu0 }
  0xd2   : > { %v4832_v3 = vadd.f32 %v892_v2, %v864_v63  ;;  %v4171_v63 = vld [vmem:[#allocation8 + $0x18] sm:$0xff] }
  0xd3   : > { %v4836_v6 = vpop.f32.mrf.mxu1  ;;  %2188 = vmatpush.bf16.msra.mxu1 %v4171_v63  ;;  %v1647_v63 = vsel %vm4889_vm4, 0, %v1646_v53 }
  0xd4   : > { %1648 = vst [vmem:[#allocation3 + $0x1c] sm:$0x1] %v1647_v63 }
  0xd7   : > { %v4838_v7 = vpop.f32.mrf.mxu3 }
  0xd9   : > { %v4840_v8 = vpop.f32.mrf.mxu2  ;;  %v4842_v10 = vpop.f32.mrf.mxu0 }
  0xdb   : > { %v868_v41 = vpop.f32.mrf.mxu1 }
  0xdc   : > { %v869_v51 = vadd.f32 %v868_v41, %v839_v25  ;;  %v4190_v25 = vld [vmem:[#allocation8 + $0xb0] sm:$0xff]  ;;  %v1617_v41 = vld [vmem:[#allocation3 + $0x10] sm:$0x1] }
  0xdd   : > { %2243 = vmatpush.bf16.msrb.mxu3 %v4190_v25  ;;  %v4179_v25 = vld [vmem:[#allocation8 + $0x58] sm:$0xff] }
  0xde   : > { %2217 = vmatpush.bf16.msra.mxu2 %v4179_v25  ;;  %v4177_v25 = vld [vmem:[#allocation8 + $0x48] sm:$0xff] }
  0xdf   : > { %v4844_v26 = vpop.f32.mrf.mxu3 }
  0xe0   : > { %v1181_v57 = vadd.f32 %v4842_v10, %v4844_v26  ;;  %v4168_v10 = vld [vmem:[#allocation8] sm:$0xff]  ;;  %v4194_v26 = vld [vmem:[#allocation8 + $0xd0] sm:$0xff] }
  0xe1   : > { %v897_v37 = vpop.f32.mrf.mxu2  ;;  %v4848_v12 = vpop.f32.mrf.mxu0  ;;  %2244 = vmatpush.bf16.msrb.mxu3 %v4189_v62  ;;  %v1621_v62 = vsel %vm4882_vm2, 0, %v1620_v36 }
  0xe2   : > { %v4846_v11 = vadd.f32 %v897_v37, %v869_v51  ;;  %v1643_v51 = vld [vmem:[#allocation3 + $0x14] sm:$0x1]  ;;  %v1618_v37 = vsel %vm4882_vm2, 0, %v1617_v41  ;;  %1622 = vst [vmem:[#allocation3 + $0x18] sm:$0x1] %v1621_v62 }
  0xe3   : > { %v4850_v13 = vpop.f32.mrf.mxu1  ;;  %1619 = vst [vmem:[#allocation3 + $0x10] sm:$0x1] %v1618_v37 }
  0xe5   : > { %2245 = vmatpush.bf16.msrb.mxu3 %v4188_v20 }
  0xe7   : > { %v4852_v15 = vpop.f32.mrf.mxu3 }
  0xe9   : > { %v4854_v16 = vpop.f32.mrf.mxu2  ;;  %v4856_v17 = vpop.f32.mrf.mxu0  ;;  %2246 = vmatpush.bf16.msrb.mxu3 %v4187_v38 }
  0xeb   : > { %v873_v19 = vpop.f32.mrf.mxu1 }
  0xec   : > { %v874_v27 = vadd.f32 %v873_v19, %v844_v0  ;;  %v4197_v0 = vld [vmem:[#allocation8 + $0xe8] sm:$0xff]  ;;  %v1644_v19 = vsel %vm4889_vm4, 0, %v1643_v51 }
  0xed   : > { %2508 = vmatpush.bf16.msrb.mxu0 %v4197_v0  ;;  %1645 = vst [vmem:[#allocation3 + $0x14] sm:$0x1] %v1644_v19  ;;  %v4186_v0 = vld [vmem:[#allocation8 + $0x90] sm:$0xff] }
  0xee   : > { %2247 = vmatpush.bf16.msrb.mxu3 %v4186_v0  ;;  %v4178_v19 = vld [vmem:[#allocation8 + $0x50] sm:$0xff] }
  0xef   : > { %v4858_v28 = vpop.f32.mrf.mxu3  ;;  %2218 = vmatpush.bf16.msra.mxu2 %v4178_v19 }
  0xf0   : > { %v1186_v19 = vadd.f32 %v4856_v17, %v4858_v28 }
  0xf1   : > { %v902_v34 = vpop.f32.mrf.mxu2  ;;  %v4862_v42 = vpop.f32.mrf.mxu0 }
  0xf2   : > { %v4860_v35 = vadd.f32 %v902_v34, %v874_v27  ;;  %v4170_v27 = vld [vmem:[#allocation8 + $0x10] sm:$0xff]  ;;  %v4196_v34 = vld [vmem:[#allocation8 + $0xe0] sm:$0xff] }
  0xf3   : > { %v4870_v18 = vpop.f32.mrf.mxu1  ;;  %2189 = vmatpush.bf16.msra.mxu1 %v4170_v27  ;;  %2509 = vmatpush.bf16.msrb.mxu0 %v4196_v34  ;;  %v4926_v34 = vld [vmem:[%s5398_s2] ss:$0 sm:$0xff] }
  0xf4   : > { %2219 = vmatpush.bf16.msra.mxu2 %v4177_v25 }
  0xf7   : > { %v4864_v54 = vpop.f32.mrf.mxu3  ;;  %2190 = vmatpush.bf16.msra.mxu1 %v4169_v40  ;;  %2510 = vmatpush.bf16.msrb.mxu0 %v4195_v47  ;;  %v4930_v40 = vld [vmem:[#allocation6] ss:$0 sm:$0xff]  ;;  %v861_v47 = vadd.f32 %v4826_v48, %v4824_v44  ;;  %v4192_v44 = vld [vmem:[#allocation8 + $0xc0] sm:$0xff] }
  0xf9   : > { %v4866_v33 = vpop.f32.mrf.mxu0  ;;  %v4876_v49 = vpop.f32.mrf.mxu2  ;;  %v890_v48 = vadd.f32 %v4830_v58, %v861_v47  ;;  %v1626_v58 = vld [vmem:[#allocation3 + $0x28] sm:$0x1] }
  0xfb   : > { %v4880_v14 = vpop.f32.mrf.mxu1  ;;  %2191 = vmatpush.bf16.msra.mxu1 %v4168_v10  ;;  %2511 = vmatpush.bf16.msrb.mxu0 %v4194_v26 }
  0xfc   : > { %v1210_v55 = vadd.f32 %v4880_v14, %v1181_v57  ;;  %v4185_v14 = vld [vmem:[#allocation8 + $0x88] sm:$0xff]  ;;  %v1649_v57 = vld [vmem:[#allocation3 + $0x24] sm:$0x1] }
  0xfd   : > { %2248 = vmatpush.bf16.msrb.mxu3 %v4185_v14 }
  0xfe   : > { %v1229_v20 = vadd.f32 %v1210_v55, %v4822_v31 }
  0xff   : > { %v4868_v39 = vpop.f32.mrf.mxu3  ;;  %2512 = vmatpush.bf16.msrb.mxu0 %v4193_v52  ;;  %v1652_v52 = vld [vmem:[#allocation3 + $0x2c] sm:$0x1] }
 0x100   : > { %v1653_v47 = vsel %vm4889_vm4, 0, %v1652_v52 }
 0x101   : > { %v4872_v21 = vpop.f32.mrf.mxu0  ;;  %v1463_v61 = vpop.f32.mrf.mxu2  ;;  %1654 = vst [vmem:[#allocation3 + $0x2c] sm:$0x1] %v1653_v47 }
 0x103   : > { %v4899_v2 = vpop.f32.mrf.mxu1  ;;  %2513 = vmatpush.bf16.msrb.mxu0 %v4192_v44 }
 0x107   : > { %v4874_v1 = vpop.f32.mrf.mxu3 }
 0x109   : > { %v4878_v22 = vpop.f32.mrf.mxu0  ;;  %v1465_v50 = vpop.f32.mrf.mxu2 }
 0x10b   : > { %v1214_v59 = vpop.f32.mrf.mxu1 }
 0x10f   : > { %v4893_v43 = vpop.f32.mrf.mxu3 }
 0x111   : > { %v4897_v60 = vpop.f32.mrf.mxu0  ;;  %v1468_v31 = vpop.f32.mrf.mxu2 }
 0x113   : > { %v1216_v62 = vpop.f32.mrf.mxu1 }
 0x117   : > { %v4906_v24 = vpop.f32.mrf.mxu3 }
 0x119   : > { %v1521_v9 = vpop.f32.mrf.mxu0 }
 0x11f   : > { %v1492_v41 = vpop.f32.mrf.mxu3 }
 0x120   : > { %v1493_v51 = vadd.f32 %v1492_v41, %v1463_v61  ;;  %v1183_v61 = vadd.f32 %v4848_v12, %v4852_v15  ;;  %v1650_v12 = vsel %vm4889_vm4, 0, %v1649_v57  ;;  %v4184_v15 = vld [vmem:[#allocation8 + $0x80] sm:$0xff]  ;;  %v1470_v57 = vpop.f32.mrf.mxu2 }
 0x121   : > { %v1523_v37 = vpop.f32.mrf.mxu0  ;;  %1651 = vst [vmem:[#allocation3 + $0x24] sm:$0x1] %v1650_v12  ;;  %2249 = vmatpush.bf16.msrb.mxu3 %v4184_v15  ;;  %v4176_v41 = vld [vmem:[#allocation8 + $0x40] sm:$0xff]  ;;  %v1219_v15 = vpop.f32.mrf.mxu1 }
 0x122   : > { %v1522_v27 = vadd.f32 %v1521_v9, %v1493_v51  ;;  %v1623_v9 = vld [vmem:[#allocation3 + $0x20] sm:$0x1]  ;;  %v1212_v36 = vadd.f32 %v4899_v2, %v1183_v61  ;;  %2220 = vmatpush.bf16.msra.mxu2 %v4176_v41 }
 0x123   : > { %v1624_v53 = vsel %vm4882_vm2, 0, %v1623_v9  ;;  %v4949_v9 = vld [vmem:[#allocation3] sm:$0xf] }
 0x124   : > { %v1541_v38 = vadd.f32 %v1522_v27, %v1229_v20  ;;  %1625 = vst [vmem:[#allocation3 + $0x20] sm:$0x1] %v1624_v53  ;;  %v1230_v10 = vadd.f32 %v1212_v36, %v890_v48  ;;  %v1215_v27 = vadd.f32 %v1214_v59, %v1186_v19  ;;  %v1842_v53 = vunpack.c.l.b16 %v4949_v9 }
 0x126   : > { %v1569_v45 = vmul.f32 %v4926_v34, %v1541_v38  ;;  %v1627_v38 = vsel %vm4882_vm2, 0, %v1626_v58  ;;  %v1231_v36 = vadd.f32 %v1215_v27, %v4832_v3 }
 0x127   : > { %v1494_v55 = vpop.f32.mrf.mxu3  ;;  %1628 = vst [vmem:[#allocation3 + $0x28] sm:$0x1] %v1627_v38 }
 0x128   : > { %v1581_v63 = vadd.f32 %v4930_v40, %v1569_v45  ;;  %v1495_v0 = vadd.f32 %v1494_v55, %v1465_v50 }
 0x129   : > { %v1526_v2 = vpop.f32.mrf.mxu0 }
 0x12a   : > { %v1589_v26 = vmax.f32 %v1581_v63, 0.0  ;;  %v1524_v51 = vadd.f32 %v1523_v37, %v1495_v0  ;;  %v1803_v37 = vld [vmem:[#allocation3 + $0x4] sm:$0x1]  ;;  %v1188_v0 = vadd.f32 %v4862_v42, %v4864_v54  ;;  %v1629_v42 = vld [vmem:[#allocation3 + $0x30] sm:$0x1] }
 0x12b   : > { %v1843_v12 = vunpack.c.l.b16 %v1803_v37  ;;  %v1655_v54 = vld [vmem:[#allocation3 + $0x34] sm:$0x1] }
 0x12c   : > { %v1597_v14 = vmin.f32 %v1589_v26, 6.0  ;;  %v1542_v20 = vadd.f32 %v1524_v51, %v1230_v10  ;;  %v1757_v10 = vld [vmem:[#allocation3 + $0xc] sm:$0x1] }
 0x12e   : > { %v1664_v61 = vpack.c.bf16 %v1597_v14, %v1597_v14  ;;  %v1570_v50 = vmul.f32 %v4926_v34, %v1542_v20  ;;  %v866_v14 = vadd.f32 %v4836_v6, %v4834_v4  ;;  %v1217_v20 = vadd.f32 %v1216_v62, %v1188_v0 }
 0x12f   : > { %v1497_v17 = vpop.f32.mrf.mxu3  ;;  %v1630_v6 = vsel %vm4882_vm2, 0, %v1629_v42  ;;  %v1656_v62 = vsel %vm4889_vm4, 0, %v1655_v54  ;;  %v1658_v42 = vld [vmem:[#allocation3 + $0x3c] sm:$0x1] }
 0x130   : > { %v1673_v28 = vshrl.u32 %v1664_v61, 16  ;;  %v1582_v59 = vadd.f32 %v4930_v40, %v1570_v50  ;;  %v1498_v25 = vadd.f32 %v1497_v17, %v1468_v31  ;;  %v1676_v44 = vshll.u32 %v1664_v61, 16  ;;  %v1754_v31 = vld [vmem:[#allocation3 + $0x8] sm:$0xf]  ;;  %1631 = vst [vmem:[#allocation3 + $0x30] sm:$0x1] %v1630_v6 }
 0x131   : > { %v1528_v45 = vpop.f32.mrf.mxu0  ;;  %v895_v50 = vadd.f32 %v4840_v8, %v866_v14  ;;  %1657 = vst [vmem:[#allocation3 + $0x34] sm:$0x1] %v1656_v62 }
 0x132   : > { %v1675_v55 = vrot.slane %v1673_v28, 7  ;;  %v1590_v48 = vmax.f32 %v1582_v59, 0.0  ;;  %v1527_v63 = vadd.f32 %v1526_v2, %v1498_v25  ;;  %v4965_v2 = vpack.c.b16 %v1843_v12, %v1842_v53  ;;  %v1473_v28 = vpop.f32.mrf.mxu2 }
 0x133   : > { %v1232_v17 = vadd.f32 %v1217_v20, %v895_v50  ;;  %v1632_v20 = vld [vmem:[#allocation3 + $0x38] sm:$0x1] }
 0x134   : > { %v1678_v3 = vor.u32 %v1676_v44, %v1675_v55  ;;  %v1679_v26 = vrot.slane %v1675_v55, 4  ;;  %v1598_v51 = vmin.f32 %v1590_v48, 6.0  ;;  %v1543_v19 = vadd.f32 %v1527_v63, %v1231_v36  ;;  %v1763_v63 = vld [vmem:[#allocation3 + $0x14] sm:$0x1] }
 0x135   : > { %v1875_v59 = vshll.u32 %v4965_v2, 16  ;;  %v871_v55 = vadd.f32 %v4850_v13, %v4828_v56  ;;  %v1191_v44 = vadd.f32 %v4866_v33, %v4868_v39  ;;  %v1193_v48 = vadd.f32 %v4872_v21, %v4874_v1 }
 0x136   : > { %v1755_v27 = vsel %vm4957_vm6, %v1678_v3, %v1754_v31  ;;  %v1758_v58 = vsel %vm4882_vm2, %v1679_v26, %v1757_v10  ;;  %v1665_v52 = vpack.c.bf16 %v1598_v51, %v1598_v51  ;;  %v1571_v61 = vmul.f32 %v4926_v34, %v1543_v19  ;;  %v1221_v31 = vpop.f32.mrf.mxu1 }
 0x137   : > { %1756 = vst [vmem:[#allocation3 + $0x8] sm:$0xf] %v1755_v27  ;;  %v1499_v4 = vpop.f32.mrf.mxu3  ;;  %v1220_v19 = vadd.f32 %v1219_v15, %v1191_v44  ;;  %v1873_v14 = vshrl.u32 %v4965_v2, 16  ;;  %v1877_v56 = vrot.slane %v1875_v59, 1  ;;  %v1222_v54 = vadd.f32 %v1221_v31, %v1193_v48  ;;  %v4215_v59 = vld [vmem:[#allocation8 + $0x178] sm:$0xff] }
 0x138   : > { %1759 = vst [vmem:[#allocation3 + $0xc] sm:$0x1] %v1758_v58  ;;  %v1681_v38 = vshrl.u32 %v1665_v52, 16  ;;  %v1583_v47 = vadd.f32 %v4930_v40, %v1571_v61  ;;  %v1500_v37 = vadd.f32 %v1499_v4, %v1470_v57  ;;  %v1684_v8 = vshll.u32 %v1665_v52, 16  ;;  %v1760_v57 = vld [vmem:[#allocation3 + $0x10] sm:$0xf]  ;;  %2564 = vmatpush.bf16.msrb.mxu2 %v4215_v59 }
 0x139   : > { %v1531_v0 = vpop.f32.mrf.mxu0  ;;  %v1659_v52 = vsel %vm4889_vm4, 0, %v1658_v42  ;;  %v900_v61 = vadd.f32 %v4854_v16, %v871_v55  ;;  %v1233_v62 = vadd.f32 %v1220_v19, %v4846_v11  ;;  %v1766_v11 = vld [vmem:[#allocation3 + $0x18] sm:$0xf]  ;;  %v1769_v55 = vld [vmem:[#allocation3 + $0x1c] sm:$0x1] }
 0x13a   : > { %v1683_v25 = vrot.slane %v1681_v38, 7  ;;  %v1591_v36 = vmax.f32 %v1583_v47, 0.0  ;;  %v1529_v12 = vadd.f32 %v1528_v45, %v1500_v37  ;;  %v1942_v45 = vrot.slane %v4965_v2, 1  ;;  %v4207_v37 = vld [vmem:[#allocation8 + $0x138] sm:$0xff]  ;;  %1660 = vst [vmem:[#allocation3 + $0x3c] sm:$0x1] %v1659_v52  ;;  %v1475_v9 = vpop.f32.mrf.mxu2 }
 0x13b   : > { %v1633_v2 = vsel %vm4882_vm2, 0, %v1632_v20  ;;  %2535 = vmatpush.bf16.msrb.mxu1 %v4207_v37 }
 0x13c   : > { %v1686_v10 = vor.u32 %v1684_v8, %v1683_v25  ;;  %v1687_v3 = vrot.slane %v1683_v25, 4  ;;  %v1599_v26 = vmin.f32 %v1591_v36, 6.0  ;;  %v1544_v51 = vadd.f32 %v1529_v12, %v1232_v17  ;;  %1634 = vst [vmem:[#allocation3 + $0x38] sm:$0x1] %v1633_v2 }
 0x13d   : > { %v5004_v17 = vor.u32 %v1877_v56, %v1873_v14  ;;  %v1234_v12 = vadd.f32 %v1222_v54, %v900_v61  ;;  %v1953_v44 = vunpack.c.l.b16 %v1942_v45 }
 0x13e   : > { %v1761_v13 = vsel %vm4957_vm6, %v1686_v10, %v1760_v57  ;;  %v1764_v33 = vsel %vm4882_vm2, %v1687_v3, %v1763_v63  ;;  %v1666_v39 = vpack.c.bf16 %v1599_v26, %v1599_v26  ;;  %v1572_v21 = vmul.f32 %v4926_v34, %v1544_v51  ;;  %v1804_v1 = vld [vmem:[#allocation3 + $0x8] sm:$0xf] }
 0x13f   : > { %1762 = vst [vmem:[#allocation3 + $0x10] sm:$0xf] %v1761_v13  ;;  %v1502_v15 = vpop.f32.mrf.mxu3  ;;  %v4992_v27 = vunpack.c.l.b16 %v1804_v1  ;;  %v1805_v58 = vld [vmem:[#allocation3 + $0xc] sm:$0x1]  ;;  %v1635_v13 = vld [vmem:[#allocation3 + $0x40] sm:$0x1] }
 0x140   : > { %1765 = vst [vmem:[#allocation3 + $0x14] sm:$0x1] %v1764_v33  ;;  %v1689_v50 = vshrl.u32 %v1666_v39, 16  ;;  %v1584_v4 = vadd.f32 %v4930_v40, %v1572_v21  ;;  %v1503_v6 = vadd.f32 %v1502_v15, %v1473_v28  ;;  %v1845_v47 = vunpack.c.l.b16 %v1805_v58  ;;  %v1661_v33 = vld [vmem:[#allocation3 + $0x44] sm:$0x1] }
 0x141   : > { %v2016_v38 = vpack.c.b16 %v4992_v27, %v1842_v53  ;;  %v1692_v8 = vshll.u32 %v1666_v39, 16  ;;  %v1196_v28 = vadd.f32 %v4878_v22, %v4893_v43  ;;  %v1533_v10 = vpop.f32.mrf.mxu0  ;;  %v1952_v22 = vunpack.c.l.b16 %v5004_v17  ;;  %v1224_v43 = vpop.f32.mrf.mxu1 }
 0x142   : > { %v1691_v25 = vrot.slane %v1689_v50, 7  ;;  %v1592_v16 = vmax.f32 %v1584_v4, 0.0  ;;  %v1532_v36 = vadd.f32 %v1531_v0, %v1503_v6  ;;  %v1863_v53 = vpack.c.b16 %v1845_v47, %v4992_v27  ;;  %v4206_v6 = vld [vmem:[#allocation8 + $0x130] sm:$0xff] }
 0x143   : > { %2192 = vmatmul.bf16.vlgmr.msra.gmra.mxu1 %v2016_v38  ;;  %v1636_v42 = vsel %vm4882_vm2, 0, %v1635_v13  ;;  %v1662_v59 = vsel %vm4889_vm4, 0, %v1661_v33 }
 0x144   : > { %v1694_v48 = vor.u32 %v1692_v8, %v1691_v25  ;;  %v1695_v57 = vrot.slane %v1691_v25, 4  ;;  %v1600_v63 = vmin.f32 %v1592_v16, 6.0  ;;  %v1545_v31 = vadd.f32 %v1532_v36, %v1233_v62  ;;  %v4214_v62 = vld [vmem:[#allocation8 + $0x170] sm:$0xff]  ;;  %1637 = vst [vmem:[#allocation3 + $0x40] sm:$0x1] %v1636_v42  ;;  %v4223_v25 = vld [vmem:[#allocation8 + $0x1b8] sm:$0xff]  ;;  %2536 = vmatpush.bf16.msrb.mxu1 %v4206_v6 }
 0x145   : > { %v1943_v0 = vrot.slane %v1863_v53, 1  ;;  %v1880_v3 = vshrl.u32 %v1863_v53, 16  ;;  %v1882_v26 = vshll.u32 %v1863_v53, 16  ;;  %v1225_v8 = vadd.f32 %v1224_v43, %v1196_v28  ;;  %v1772_v16 = vld [vmem:[#allocation3 + $0x20] sm:$0xf]  ;;  %2565 = vmatpush.bf16.msrb.mxu2 %v4214_v62  ;;  %2818 = vmatpush.bf16.msra.mxu3 %v4223_v25 }
 0x146   : > { %v1767_v51 = vsel %vm4957_vm6, %v1694_v48, %v1766_v11  ;;  %v1770_v19 = vsel %vm4882_vm2, %v1695_v57, %v1769_v55  ;;  %v1667_v45 = vpack.c.bf16 %v1600_v63, %v1600_v63  ;;  %v1573_v14 = vmul.f32 %v4926_v34, %v1545_v31  ;;  %v1806_v56 = vld [vmem:[#allocation3 + $0x10] sm:$0xf]  ;;  %v1775_v36 = vld [vmem:[#allocation3 + $0x24] sm:$0x1]  ;;  %1663 = vst [vmem:[#allocation3 + $0x44] sm:$0x1] %v1662_v59  ;;  %v1478_v57 = vpop.f32.mrf.mxu2 }
 0x147   : > { %1768 = vst [vmem:[#allocation3 + $0x18] sm:$0xf] %v1767_v51  ;;  %v1504_v39 = vpop.f32.mrf.mxu3  ;;  %v5015_v21 = vunpack.c.l.b16 %v1943_v0  ;;  %v5017_v1 = vunpack.c.l.b16 %v1806_v56  ;;  %v1884_v20 = vrot.slane %v1882_v26, 1  ;;  %v1807_v54 = vld [vmem:[#allocation3 + $0x14] sm:$0x1]  ;;  %v4231_v48 = vld [vmem:[#allocation8 + $0x1f8] sm:$0xff]  ;;  %v876_v43 = vadd.f32 %v4870_v18, %v4838_v7 }
 0x148   : > { %1771 = vst [vmem:[#allocation3 + $0x1c] sm:$0x1] %v1770_v19  ;;  %v1697_v15 = vshrl.u32 %v1667_v45, 16  ;;  %v1700_v58 = vshll.u32 %v1667_v45, 16  ;;  %v1585_v2 = vadd.f32 %v4930_v40, %v1573_v14  ;;  %v1505_v52 = vadd.f32 %v1504_v39, %v1475_v9  ;;  %2847 = vmatpush.bf16.msra.mxu0 %v4231_v48  ;;  %v4222_v26 = vld [vmem:[#allocation8 + $0x1b0] sm:$0xff]  ;;  %2537 = vmatpush.bf16.msrb.mxu1 %v4205_v30 }
 0x149   : > { %v2018_v61 = vpack.c.b16 %v5015_v21, %v1953_v44  ;;  %v2338_v50 = vpack.c.b16 %v5017_v1, %v4992_v27  ;;  %v5025_v4 = vor.u32 %v1884_v20, %v1880_v3  ;;  %v1847_v38 = vunpack.c.l.b16 %v1807_v54  ;;  %v1536_v51 = vpop.f32.mrf.mxu0  ;;  %v1226_v13 = vpop.f32.mrf.mxu1  ;;  %v1778_v7 = vld [vmem:[#allocation3 + $0x28] sm:$0xf]  ;;  %v4213_v54 = vld [vmem:[#allocation8 + $0x168] sm:$0xff]  ;;  %2819 = vmatpush.bf16.msra.mxu3 %v4222_v26 }
 0x14a   : > { %v1699_v47 = vrot.slane %v1697_v15, 7  ;;  %v1593_v37 = vmax.f32 %v1585_v2, 0.0  ;;  %v1534_v17 = vadd.f32 %v1533_v10, %v1505_v52  ;;  %v1235_v56 = vadd.f32 %v1225_v8, %v4860_v35  ;;  %v4204_v15 = vld [vmem:[#allocation8 + $0x120] sm:$0xff]  ;;  %v1781_v2 = vld [vmem:[#allocation3 + $0x2c] sm:$0x1]  ;;  %2566 = vmatpush.bf16.msrb.mxu2 %v4213_v54 }
 0x14b   : > { %2250 = vmatmul.bf16.vlgmr.msrb.gmra.mxu3 %v2018_v61  ;;  %2514 = vmatmul.bf16.vlgmr.msrb.gmra.mxu0 %v2338_v50  ;;  %v1954_v27 = vunpack.c.l.b16 %v5025_v4  ;;  %v5031_v11 = vpack.c.b16 %v1847_v38, %v5017_v1  ;;  %v905_v50 = vadd.f32 %v4876_v49, %v876_v43  ;;  %v4212_v38 = vld [vmem:[#allocation8 + $0x160] sm:$0xff]  ;;  %v4235_v4 = vld [vmem:[#allocation8 + $0x218] sm:$0xff] }
 0x14c   : > { %v1702_v55 = vor.u32 %v1700_v58, %v1699_v47  ;;  %v1703_v9 = vrot.slane %v1699_v47, 4  ;;  %v1601_v53 = vmin.f32 %v1593_v37, 6.0  ;;  %v1546_v44 = vadd.f32 %v1534_v17, %v1234_v12  ;;  %v4230_v47 = vld [vmem:[#allocation8 + $0x1f0] sm:$0xff]  ;;  %v4221_v37 = vld [vmem:[#allocation8 + $0x1a8] sm:$0xff]  ;;  %2538 = vmatpush.bf16.msrb.mxu1 %v4204_v15 }
 0x14d   : > { %v2017_v28 = vpack.c.b16 %v1954_v27, %v1952_v22  ;;  %v1889_v63 = vshll.u32 %v5031_v11, 16  ;;  %v1198_v22 = vadd.f32 %v4897_v60, %v4906_v24  ;;  %v1944_v24 = vrot.slane %v5031_v11, 1  ;;  %2848 = vmatpush.bf16.msra.mxu0 %v4230_v47  ;;  %2820 = vmatpush.bf16.msra.mxu3 %v4221_v37  ;;  %v4201_v47 = vld [vmem:[#allocation8 + $0x108] sm:$0xff] }
 0x14e   : > { %v1773_v31 = vsel %vm4957_vm6, %v1702_v55, %v1772_v16  ;;  %v1776_v10 = vsel %vm4882_vm2, %v1703_v9, %v1775_v36  ;;  %v1668_v0 = vpack.c.bf16 %v1601_v53, %v1601_v53  ;;  %v1574_v12 = vmul.f32 %v4926_v34, %v1546_v44  ;;  %v1808_v3 = vld [vmem:[#allocation3 + $0x18] sm:$0xf]  ;;  %v4203_v16 = vld [vmem:[#allocation8 + $0x118] sm:$0xff]  ;;  %2567 = vmatpush.bf16.msrb.mxu2 %v4212_v38  ;;  %v4210_v38 = vld [vmem:[#allocation8 + $0x150] sm:$0xff] }
 0x14f   : > { %1774 = vst [vmem:[#allocation3 + $0x20] sm:$0xf] %v1773_v31  ;;  %2221 = vmatmul.bf16.vlgmr.msra.gmra.mxu2 %v2017_v28  ;;  %v1507_v19 = vpop.f32.mrf.mxu3  ;;  %v5045_v45 = vunpack.c.l.b16 %v1808_v3  ;;  %v1809_v14 = vld [vmem:[#allocation3 + $0x1c] sm:$0x1]  ;;  %v1891_v42 = vrot.slane %v1889_v63, 1  ;;  %v1227_v6 = vadd.f32 %v1226_v13, %v1198_v22  ;;  %v1887_v62 = vshrl.u32 %v5031_v11, 16  ;;  %v1480_v63 = vpop.f32.mrf.mxu2 }
 0x150   : > { %1777 = vst [vmem:[#allocation3 + $0x24] sm:$0x1] %v1776_v10  ;;  %v1705_v33 = vshrl.u32 %v1668_v0, 16  ;;  %v1586_v39 = vadd.f32 %v4930_v40, %v1574_v12  ;;  %v1508_v20 = vadd.f32 %v1507_v19, %v1478_v57  ;;  %v1849_v60 = vunpack.c.l.b16 %v1809_v14  ;;  %v4229_v53 = vld [vmem:[#allocation8 + $0x1e8] sm:$0xff]  ;;  %v4220_v11 = vld [vmem:[#allocation8 + $0x1a0] sm:$0xff]  ;;  %2539 = vmatpush.bf16.msrb.mxu1 %v4203_v16  ;;  %v4211_v14 = vld [vmem:[#allocation8 + $0x158] sm:$0xff] }
 0x151   : > { %v5051_v18 = vpack.c.b16 %v5045_v45, %v5017_v1  ;;  %v1708_v58 = vshll.u32 %v1668_v0, 16  ;;  %v5058_v55 = vunpack.c.l.b16 %v1944_v24  ;;  %v5060_v49 = vor.u32 %v1891_v42, %v1887_v62  ;;  %v1538_v13 = vpop.f32.mrf.mxu0  ;;  %2849 = vmatpush.bf16.msra.mxu0 %v4229_v53  ;;  %2821 = vmatpush.bf16.msra.mxu3 %v4220_v11 }
 0x152   : > { %v1707_v35 = vrot.slane %v1705_v33, 7  ;;  %v1594_v52 = vmax.f32 %v1586_v39, 0.0  ;;  %v1537_v61 = vadd.f32 %v1536_v51, %v1508_v20  ;;  %v1865_v1 = vpack.c.b16 %v1849_v60, %v5045_v45  ;;  %v4228_v60 = vld [vmem:[#allocation8 + $0x1e0] sm:$0xff]  ;;  %2568 = vmatpush.bf16.msrb.mxu2 %v4211_v14 }
 0x153   : > { %2197 = vmatmul.bf16.gmra.mxu1 %v5051_v18  ;;  %v1236_v43 = vadd.f32 %v1227_v6, %v905_v50 }
 0x154   : > { %v1710_v17 = vor.u32 %v1708_v58, %v1707_v35  ;;  %v1711_v59 = vrot.slane %v1707_v35, 4  ;;  %v1602_v25 = vmin.f32 %v1594_v52, 6.0  ;;  %v1547_v8 = vadd.f32 %v1537_v61, %v1235_v56  ;;  %v4202_v56 = vld [vmem:[#allocation8 + $0x110] sm:$0xff]  ;;  %v4219_v35 = vld [vmem:[#allocation8 + $0x198] sm:$0xff] }
 0x155   : > { %v1945_v36 = vrot.slane %v1865_v1, 1  ;;  %v1896_v9 = vshll.u32 %v1865_v1, 16  ;;  %v1894_v3 = vshrl.u32 %v1865_v1, 16  ;;  %v1784_v58 = vld [vmem:[#allocation3 + $0x30] sm:$0xf]  ;;  %2540 = vmatpush.bf16.msrb.mxu1 %v4202_v56  ;;  %2850 = vmatpush.bf16.msra.mxu0 %v4228_v60 }
 0x156   : > { %v1779_v44 = vsel %vm4957_vm6, %v1710_v17, %v1778_v7  ;;  %v1782_v30 = vsel %vm4882_vm2, %v1711_v59, %v1781_v2  ;;  %v1669_v48 = vpack.c.bf16 %v1602_v25, %v1602_v25  ;;  %v1575_v57 = vmul.f32 %v4926_v34, %v1547_v8  ;;  %v1810_v28 = vld [vmem:[#allocation3 + $0x20] sm:$0xf]  ;;  %v1787_v2 = vld [vmem:[#allocation3 + $0x34] sm:$0x1]  ;;  %2822 = vmatpush.bf16.msra.mxu3 %v4219_v35  ;;  %v4227_v17 = vld [vmem:[#allocation8 + $0x1d8] sm:$0xff] }
 0x157   : > { %1780 = vst [vmem:[#allocation3 + $0x28] sm:$0xf] %v1779_v44  ;;  %v1509_v31 = vpop.f32.mrf.mxu3  ;;  %v5067_v10 = vunpack.c.l.b16 %v1945_v36  ;;  %v1811_v0 = vld [vmem:[#allocation3 + $0x24] sm:$0x1]  ;;  %v5069_v12 = vunpack.c.l.b16 %v1810_v28  ;;  %v1898_v26 = vrot.slane %v1896_v9, 1  ;;  %2569 = vmatpush.bf16.msrb.mxu2 %v4210_v38  ;;  %v4209_v28 = vld [vmem:[#allocation8 + $0x148] sm:$0xff] }
 0x158   : > { %1783 = vst [vmem:[#allocation3 + $0x2c] sm:$0x1] %v1782_v30  ;;  %v1713_v22 = vshrl.u32 %v1669_v48, 16  ;;  %v1587_v51 = vadd.f32 %v4930_v40, %v1575_v57  ;;  %v1510_v19 = vadd.f32 %v1509_v31, %v1480_v63  ;;  %v1851_v39 = vunpack.c.l.b16 %v1811_v0  ;;  %v4218_v9 = vld [vmem:[#allocation8 + $0x190] sm:$0xff]  ;;  %v4200_v63 = vld [vmem:[#allocation8 + $0x100] sm:$0xff] }
 0x159   : > { %v5074_v33 = vpack.c.b16 %v5067_v10, %v5058_v55  ;;  %v2341_v20 = vpack.c.b16 %v5069_v12, %v5045_v45  ;;  %v5078_v7 = vor.u32 %v1898_v26, %v1894_v3  ;;  %v1716_v42 = vshll.u32 %v1669_v48, 16  ;;  %2541 = vmatpush.bf16.msrb.mxu1 %v4201_v47  ;;  %2851 = vmatpush.bf16.msra.mxu0 %v4227_v17  ;;  %v4226_v0 = vld [vmem:[#allocation8 + $0x1d0] sm:$0xff]  ;;  %v4217_v3 = vld [vmem:[#allocation8 + $0x188] sm:$0xff] }
 0x15a   : > { %v1715_v24 = vrot.slane %v1713_v22, 7  ;;  %v1595_v54 = vmax.f32 %v1587_v51, 0.0  ;;  %v1539_v15 = vadd.f32 %v1538_v13, %v1510_v19  ;;  %v5082_v52 = vpack.c.b16 %v1851_v39, %v5069_v12  ;;  %2823 = vmatpush.bf16.msra.mxu3 %v4218_v9  ;;  %v1790_v51 = vld [vmem:[#allocation3 + $0x38] sm:$0xf]  ;;  %v1793_v19 = vld [vmem:[#allocation3 + $0x3c] sm:$0x1] }
 0x15b   : > { %2255 = vmatmul.bf16.gmra.mxu3 %v5074_v33  ;;  %2519 = vmatmul.bf16.gmra.mxu0 %v2341_v20  ;;  %v1956_v45 = vunpack.c.l.b16 %v5060_v49  ;;  %v1958_v61 = vunpack.c.l.b16 %v5078_v7  ;;  %v4208_v20 = vld [vmem:[#allocation8 + $0x140] sm:$0xff]  ;;  %v4233_v7 = vld [vmem:[#allocation8 + $0x208] sm:$0xff] }
 0x15c   : > { %v1718_v50 = vor.u32 %v1716_v42, %v1715_v24  ;;  %v1719_v6 = vrot.slane %v1715_v24, 4  ;;  %v1603_v1 = vmin.f32 %v1595_v54, 6.0  ;;  %v1548_v62 = vadd.f32 %v1539_v15, %v1236_v43  ;;  %2570 = vmatpush.bf16.msrb.mxu2 %v4209_v28  ;;  %v4225_v54 = vld [vmem:[#allocation8 + $0x1c8] sm:$0xff]  ;;  %v4216_v15 = vld [vmem:[#allocation8 + $0x180] sm:$0xff] }
 0x15d   : > { %v5090_v37 = vpack.c.b16 %v1958_v61, %v1956_v45  ;;  %v1903_v44 = vshll.u32 %v5082_v52, 16  ;;  %v1946_v31 = vrot.slane %v5082_v52, 1  ;;  %2542 = vmatpush.bf16.msrb.mxu1 %v4200_v63  ;;  %v1901_v24 = vshrl.u32 %v5082_v52, 16  ;;  %2852 = vmatpush.bf16.msra.mxu0 %v4226_v0  ;;  %v4239_v63 = vld [vmem:[#allocation8 + $0x238] sm:$0xff]  ;;  %v4243_v49 = vld [vmem:[%s5403_s7 + $0x18] sm:$0xff] }
 0x15e   : > { %v1785_v59 = vsel %vm4957_vm6, %v1718_v50, %v1784_v58  ;;  %v1788_v25 = vsel %vm4882_vm2, %v1719_v6, %v1787_v2  ;;  %v1670_v8 = vpack.c.bf16 %v1603_v1, %v1603_v1  ;;  %v1576_v16 = vmul.f32 %v4926_v34, %v1548_v62  ;;  %v1812_v36 = vld [vmem:[#allocation3 + $0x28] sm:$0xf]  ;;  %2824 = vmatpush.bf16.msra.mxu3 %v4217_v3 }
 0x15f   : > { %1786 = vst [vmem:[#allocation3 + $0x30] sm:$0xf] %v1785_v59  ;;  %2226 = vmatmul.bf16.gmra.mxu2 %v5090_v37  ;;  %v1813_v53 = vld [vmem:[#allocation3 + $0x2c] sm:$0x1]  ;;  %v5098_v11 = vunpack.c.l.b16 %v1812_v36  ;;  %v1905_v14 = vrot.slane %v1903_v44, 1  ;;  %v5109_v60 = vunpack.c.l.b16 %v1946_v31  ;;  %v4224_v36 = vld [vmem:[#allocation8 + $0x1c0] sm:$0xff] }
 0x160   : > { %1789 = vst [vmem:[#allocation3 + $0x34] sm:$0x1] %v1788_v25  ;;  %v1721_v30 = vshrl.u32 %v1670_v8, 16  ;;  %v1588_v48 = vadd.f32 %v4930_v40, %v1576_v16  ;;  %v1853_v57 = vunpack.c.l.b16 %v1813_v53  ;;  %v1724_v43 = vshll.u32 %v1670_v8, 16  ;;  %2571 = vmatpush.bf16.msrb.mxu2 %v4208_v20  ;;  %v4246_v20 = vld [vmem:[%s5403_s7 + $0x30] sm:$0xff] }
 0x161   : > { %v5104_v34 = vpack.c.b16 %v5098_v11, %v5069_v12  ;;  %v5118_v62 = vor.u32 %v1905_v14, %v1901_v24  ;;  %2853 = vmatpush.bf16.msra.mxu0 %v4225_v54  ;;  %4256 = vmatpush.bf16.msra.mxu1 %v4239_v63 }
 0x162   : > { %v1723_v26 = vrot.slane %v1721_v30, 7  ;;  %v1596_v22 = vmax.f32 %v1588_v48, 0.0  ;;  %v1867_v40 = vpack.c.b16 %v1853_v57, %v5098_v11  ;;  %2825 = vmatpush.bf16.msra.mxu3 %v4216_v15  ;;  %v1796_v30 = vld [vmem:[#allocation3 + $0x40] sm:$0xf]  ;;  %v1799_v48 = vld [vmem:[#allocation3 + $0x44] sm:$0x1] }
 0x163   : > { %2202 = vmatmul.bf16.gmra.mxu1 %v5104_v34  ;;  %v1960_v57 = vunpack.c.l.b16 %v5118_v62 }
 0x164   : > { %v1726_v56 = vor.u32 %v1724_v43, %v1723_v26  ;;  %v1727_v13 = vrot.slane %v1723_v26, 4  ;;  %v1604_v12 = vmin.f32 %v1596_v22, 6.0  ;;  %v1947_v39 = vrot.slane %v1867_v40, 1 }
 0x165   : > { %v1910_v42 = vshll.u32 %v1867_v40, 16  ;;  %v1908_v52 = vshrl.u32 %v1867_v40, 16  ;;  %2854 = vmatpush.bf16.msra.mxu0 %v4224_v36  ;;  %v4237_v36 = vld [vmem:[#allocation8 + $0x228] sm:$0xff] }
 0x166   : > { %v1791_v35 = vsel %vm4957_vm6, %v1726_v56, %v1790_v51  ;;  %v1794_v58 = vsel %vm4882_vm2, %v1727_v13, %v1793_v19  ;;  %v1671_v2 = vpack.c.bf16 %v1604_v12, %v1604_v12  ;;  %v5116_v50 = vunpack.c.l.b16 %v1947_v39  ;;  %v1814_v6 = vld [vmem:[#allocation3 + $0x30] sm:$0xf]  ;;  %v4247_v19 = vld [vmem:[%s5403_s7 + $0x38] sm:$0xff]  ;;  %v4238_v39 = vld [vmem:[#allocation8 + $0x230] sm:$0xff] }
 0x167   : > { %1792 = vst [vmem:[#allocation3 + $0x38] sm:$0xf] %v1791_v35  ;;  %v1854_v1 = vunpack.c.l.b16 %v1814_v6  ;;  %v1912_v38 = vrot.slane %v1910_v42, 1  ;;  %v1815_v47 = vld [vmem:[#allocation3 + $0x34] sm:$0x1]  ;;  %3033 = vmatpush.bf16.msra.mxu2 %v4247_v19  ;;  %4264 = vmatpush.bf16.msrb.mxu3 %v4247_v19 }
 0x168   : > { %1795 = vst [vmem:[#allocation3 + $0x3c] sm:$0x1] %v1794_v58  ;;  %v1729_v17 = vshrl.u32 %v1671_v2, 16  ;;  %v5122_v59 = vpack.c.b16 %v5116_v50, %v5109_v60  ;;  %v1855_v25 = vunpack.c.l.b16 %v1815_v47  ;;  %v1732_v53 = vshll.u32 %v1671_v2, 16  ;;  %4257 = vmatpush.bf16.msra.mxu1 %v4238_v39 }
 0x169   : > { %v2344_v8 = vpack.c.b16 %v1854_v1, %v5098_v11  ;;  %v5125_v16 = vor.u32 %v1912_v38, %v1908_v52  ;;  %2876 = vmatpush.bf16.msrb.mxu0 %v4239_v63  ;;  %v1821_v63 = vld [vmem:[#allocation3 + $0x4c] sm:$0x1] }
 0x16a   : > { %v1731_v9 = vrot.slane %v1729_v17, 7  ;;  %v1868_v44 = vpack.c.b16 %v1855_v25, %v1854_v1 }
 0x16b   : > { %2260 = vmatmul.bf16.gmra.mxu3 %v5122_v59  ;;  %2524 = vmatmul.bf16.gmra.mxu0 %v2344_v8  ;;  %v1962_v28 = vunpack.c.l.b16 %v5125_v16 }
 0x16c   : > { %v1734_v31 = vor.u32 %v1732_v53, %v1731_v9  ;;  %v1735_v11 = vrot.slane %v1731_v9, 4  ;;  %v1917_v22 = vshll.u32 %v1868_v44, 16  ;;  %v1948_v41 = vrot.slane %v1868_v44, 1  ;;  %3034 = vmatpush.bf16.msra.mxu2 %v4246_v20  ;;  %4265 = vmatpush.bf16.msrb.mxu3 %v4246_v20  ;;  %v4245_v53 = vld [vmem:[%s5403_s7 + $0x28] sm:$0xff] }
 0x16d   : > { %v5134_v0 = vpack.c.b16 %v1962_v28, %v1960_v57  ;;  %v1915_v42 = vshrl.u32 %v1868_v44, 16  ;;  %2877 = vmatpush.bf16.msrb.mxu0 %v4238_v39  ;;  %4258 = vmatpush.bf16.msra.mxu1 %v4237_v36  ;;  %v2339_v44 = vpack.c.b16 %v1956_v45, %v1954_v27  ;;  %v2340_v27 = vpack.c.b16 %v5058_v55, %v5015_v21  ;;  %v4242_v21 = vld [vmem:[%s5403_s7 + $0x10] sm:$0xff] }
 0x16e   : > { %v1797_v3 = vsel %vm4957_vm6, %v1734_v31, %v1796_v30  ;;  %v1800_v26 = vsel %vm4882_vm2, %v1735_v11, %v1799_v48  ;;  %v1816_v43 = vld [vmem:[#allocation3 + $0x38] sm:$0xf]  ;;  %v1919_v12 = vrot.slane %v1917_v22, 1  ;;  %v5150_v15 = vunpack.c.l.b16 %v1948_v41  ;;  %v4244_v48 = vld [vmem:[%s5403_s7 + $0x20] sm:$0xff]  ;;  %v4241_v31 = vld [vmem:[%s5403_s7 + $0x8] sm:$0xff] }
 0x16f   : > { %1798 = vst [vmem:[#allocation3 + $0x40] sm:$0xf] %v1797_v3  ;;  %2231 = vmatmul.bf16.gmra.mxu2 %v5134_v0  ;;  %v1817_v40 = vld [vmem:[#allocation3 + $0x3c] sm:$0x1]  ;;  %v1856_v51 = vunpack.c.l.b16 %v1816_v43  ;;  %v4236_v30 = vld [vmem:[#allocation8 + $0x220] sm:$0xff]  ;;  %v2342_v45 = vpack.c.b16 %v1960_v57, %v1958_v61  ;;  %v2343_v61 = vpack.c.b16 %v5109_v60, %v5067_v10  ;;  %v4240_v10 = vld [vmem:[%s5403_s7] sm:$0xff] }
 0x170   : > { %1801 = vst [vmem:[#allocation3 + $0x44] sm:$0x1] %v1800_v26  ;;  %v1857_v14 = vunpack.c.l.b16 %v1817_v40  ;;  %v1920_v2 = vor.u32 %v1919_v12, %v1915_v42  ;;  %3035 = vmatpush.bf16.msra.mxu2 %v4245_v53  ;;  %4266 = vmatpush.bf16.msrb.mxu3 %v4245_v53  ;;  %v1820_v57 = vld [vmem:[#allocation3 + $0x48] sm:$0xf]  ;;  %v4232_v11 = vld [vmem:[#allocation8 + $0x200] sm:$0xff]  ;;  %v1861_v26 = vunpack.c.l.b16 %v1821_v63 }
 0x171   : > { %v5144_v56 = vpack.c.b16 %v1856_v51, %v1854_v1  ;;  %2878 = vmatpush.bf16.msrb.mxu0 %v4237_v36  ;;  %4259 = vmatpush.bf16.msra.mxu1 %v4236_v30  ;;  %v1860_v3 = vunpack.c.l.b16 %v1820_v57 }
 0x172   : > { %v1869_v13 = vpack.c.b16 %v1857_v14, %v1856_v51  ;;  %v1964_v25 = vunpack.c.l.b16 %v1920_v2 }
 0x173   : > { %2207 = vmatmul.bf16.gmra.mxu1 %v5144_v56  ;;  %v1871_v43 = vpack.c.b16 %v1861_v26, %v1860_v3 }
 0x174   : > { %v1949_v24 = vrot.slane %v1869_v13, 1  ;;  %v1924_v54 = vshll.u32 %v1869_v13, 16  ;;  %v1922_v6 = vshrl.u32 %v1869_v13, 16  ;;  %3036 = vmatpush.bf16.msra.mxu2 %v4244_v48  ;;  %4267 = vmatpush.bf16.msrb.mxu3 %v4244_v48 }
 0x175   : > { %2879 = vmatpush.bf16.msrb.mxu0 %v4236_v30  ;;  %4260 = vmatpush.bf16.msra.mxu1 %v4235_v4  ;;  %v1938_v16 = vshll.u32 %v1871_v43, 16  ;;  %v1936_v19 = vshrl.u32 %v1871_v43, 16 }
 0x176   : > { %v5152_v35 = vunpack.c.l.b16 %v1949_v24  ;;  %v1818_v58 = vld [vmem:[#allocation3 + $0x40] sm:$0xf]  ;;  %v1926_v1 = vrot.slane %v1924_v54, 1 }
 0x177   : > { %v5154_v52 = vunpack.c.l.b16 %v1818_v58  ;;  %v1819_v55 = vld [vmem:[#allocation3 + $0x44] sm:$0x1]  ;;  %v1940_v14 = vrot.slane %v1938_v16, 1 }
 0x178   : > { %v5158_v38 = vpack.c.b16 %v5152_v35, %v5150_v15  ;;  %v5160_v47 = vor.u32 %v1926_v1, %v1922_v6  ;;  %3037 = vmatpush.bf16.msra.mxu2 %v4243_v49  ;;  %4268 = vmatpush.bf16.msrb.mxu3 %v4243_v49 }
 0x179   : > { %v2347_v17 = vpack.c.b16 %v5154_v52, %v1856_v51  ;;  %2880 = vmatpush.bf16.msrb.mxu0 %v4235_v4  ;;  %v1941_v13 = vor.u32 %v1940_v14, %v1936_v19  ;;  %v2668_v20 = vpack.c.b16 %v1860_v3, %v5154_v52 }
 0x17a   : > { %v1966_v8 = vunpack.c.l.b16 %v5160_v47 }
 0x17b   : > { %2265 = vmatmul.bf16.gmra.mxu3 %v5158_v38  ;;  %2529 = vmatmul.bf16.gmra.mxu0 %v2347_v17  ;;  %v2609_v12 = vunpack.c.l.b16 %v1941_v13 }
 0x17c   : > { %v5167_v9 = vpack.c.b16 %v1966_v8, %v1964_v25  ;;  %3038 = vmatpush.bf16.msra.mxu2 %v4242_v21  ;;  %4269 = vmatpush.bf16.msrb.mxu3 %v4242_v21 }
 0x17f   : > { %2236 = vmatmul.bf16.gmra.mxu2 %v5167_v9 }
 0x180   : > { %3039 = vmatpush.bf16.msra.mxu2 %v4241_v31  ;;  %4270 = vmatpush.bf16.msrb.mxu3 %v4241_v31 }
 0x183   : > { %2543 = vmatmul.bf16.vlgmr.msrb.gmra.mxu1 %v2339_v44 }
 0x184   : > { %3040 = vmatpush.bf16.msra.mxu2 %v4240_v10  ;;  %4271 = vmatpush.bf16.msrb.mxu3 %v4240_v10 }
 0x18b   : > { %2826 = vmatmul.bf16.vlgmr.msra.gmra.mxu3 %v5051_v18  ;;  %2855 = vmatmul.bf16.vlgmr.msra.gmra.mxu0 %v5090_v37  ;;  %v4234_v18 = vld [vmem:[#allocation8 + $0x210] sm:$0xff]  ;;  %v1859_v37 = vunpack.c.l.b16 %v1819_v55 }
 0x18c   : > { %4261 = vmatpush.bf16.msra.mxu1 %v4234_v18  ;;  %2881 = vmatpush.bf16.msrb.mxu0 %v4234_v18 }
 0x18d   : > { %v1870_v62 = vpack.c.b16 %v1859_v37, %v5154_v52 }
 0x18f   : > { %2572 = vmatmul.bf16.vlgmr.msrb.gmra.mxu2 %v2340_v27  ;;  %v1929_v22 = vshrl.u32 %v1870_v62, 16  ;;  %v1950_v39 = vrot.slane %v1870_v62, 1 }
 0x190   : > { %4262 = vmatpush.bf16.msra.mxu1 %v4233_v7  ;;  %2882 = vmatpush.bf16.msrb.mxu0 %v4233_v7 }
 0x193   : > { %2548 = vmatmul.bf16.gmra.mxu1 %v2342_v45 }
 0x194   : > { %4263 = vmatpush.bf16.msra.mxu1 %v4232_v11  ;;  %2883 = vmatpush.bf16.msrb.mxu0 %v4232_v11 }
 0x19b   : > { %2831 = vmatmul.bf16.gmra.mxu3 %v5104_v34  ;;  %2860 = vmatmul.bf16.gmra.mxu0 %v5134_v0  ;;  %v2345_v34 = vpack.c.b16 %v1964_v25, %v1962_v28  ;;  %v1931_v0 = vshll.u32 %v1870_v62, 16  ;;  %v2346_v28 = vpack.c.b16 %v5150_v15, %v5116_v50 }
 0x19d   : > { %v1933_v60 = vrot.slane %v1931_v0, 1 }
 0x19f   : > { %2577 = vmatmul.bf16.gmra.mxu2 %v2343_v61  ;;  %v1934_v40 = vor.u32 %v1933_v60, %v1929_v22 }
 0x1a1   : > { %v2279_v51 = vunpack.c.l.b16 %v1934_v40 }
 0x1a3   : > { %2553 = vmatmul.bf16.gmra.mxu1 %v2345_v34  ;;  %v2348_v41 = vpack.c.b16 %v2279_v51, %v1966_v8  ;;  %v2669_v24 = vpack.c.b16 %v2609_v12, %v2279_v51 }
 0x1ab   : > { %2836 = vmatmul.bf16.gmra.mxu3 %v5144_v56  ;;  %2865 = vmatmul.bf16.gmra.mxu0 %v5167_v9  ;;  %v2280_v56 = vunpack.c.l.b16 %v1950_v39 }
 0x1ad   : > { %v2349_v42 = vpack.c.b16 %v2280_v56, %v5152_v35 }
 0x1af   : > { %2582 = vmatmul.bf16.gmra.mxu2 %v2346_v28 }
 0x1b3   : > { %2558 = vmatmul.bf16.gmra.mxu1 %v2348_v41 }
 0x1bb   : > { %2841 = vmatmul.bf16.gmra.mxu3 %v2668_v20  ;;  %2870 = vmatmul.bf16.gmra.mxu0 %v2669_v24 }
 0x1bf   : > { %2587 = vmatmul.bf16.gmra.mxu2 %v2349_v42 }
 0x1c0   : > { %v2193_v50 = vpop.f32.mrf.mxu1 }
 0x1c3   : > { %2889 = vmatmul.bf16.vlgmr.msra.gmra.mxu1 %v5122_v59  ;;  %v1951_v59 = vrot.slane %v1871_v43, 1 }
 0x1c8   : > { %v2195_v54 = vpop.f32.mrf.mxu1  ;;  %v2515_v15 = vpop.f32.mrf.mxu0 }
 0x1cb   : > { %2884 = vmatmul.bf16.vlgmr.msrb.gmra.mxu0 %v5074_v33  ;;  %3056 = vmatmul.bf16.vlgmr.msrb.gmra.mxu3 %v4805_v32  ;;  %v2610_v33 = vunpack.c.l.b16 %v1951_v59 }
 0x1cd   : > { %v2670_v44 = vpack.c.b16 %v2610_v33, %v2280_v56 }
 0x1ce   : > { %v2251_v58 = vpop.f32.mrf.mxu3 }
 0x1cf   : > { %3041 = vmatmul.bf16.vlgmr.msra.gmra.mxu2 %v4763_v29 }
 0x1d0   : > { %v2198_v2 = vpop.f32.mrf.mxu1  ;;  %v2517_v6 = vpop.f32.mrf.mxu0 }
 0x1d2   : > { %v2222_v1 = vpop.f32.mrf.mxu2 }
 0x1d3   : > { %v2223_v52 = vadd.f32 %v2222_v1, %v2193_v50  ;;  %2894 = vmatmul.bf16.gmra.mxu1 %v5158_v38 }
 0x1d5   : > { %v2252_v35 = vadd.f32 %v2251_v58, %v2223_v52 }
 0x1d6   : > { %v2253_v47 = vpop.f32.mrf.mxu3 }
 0x1d8   : > { %v2200_v17 = vpop.f32.mrf.mxu1  ;;  %v2520_v25 = vpop.f32.mrf.mxu0 }
 0x1da   : > { %v2224_v8 = vpop.f32.mrf.mxu2 }
 0x1db   : > { %v2225_v36 = vadd.f32 %v2224_v8, %v2195_v54 }
 0x1dd   : > { %v2254_v9 = vadd.f32 %v2253_v47, %v2225_v36 }
 0x1de   : > { %v2256_v53 = vpop.f32.mrf.mxu3 }
 0x1df   : > { %3046 = vmatmul.bf16.gmra.mxu2 %v4782_v5 }
 0x1e0   : > { %v2203_v32 = vpop.f32.mrf.mxu1  ;;  %v2522_v29 = vpop.f32.mrf.mxu0 }
 0x1e2   : > { %v2227_v30 = vpop.f32.mrf.mxu2 }
 0x1e3   : > { %v2228_v48 = vadd.f32 %v2227_v30, %v2198_v2  ;;  %2899 = vmatmul.bf16.gmra.mxu1 %v2670_v44 }
 0x1e5   : > { %v2257_v4 = vadd.f32 %v2256_v53, %v2228_v48 }
 0x1e6   : > { %v2258_v38 = vpop.f32.mrf.mxu3 }
 0x1e8   : > { %v2205_v27 = vpop.f32.mrf.mxu1  ;;  %v2525_v49 = vpop.f32.mrf.mxu0 }
 0x1ea   : > { %v2229_v45 = vpop.f32.mrf.mxu2 }
 0x1eb   : > { %v2230_v18 = vadd.f32 %v2229_v45, %v2200_v17 }
 0x1ed   : > { %v2259_v21 = vadd.f32 %v2258_v38, %v2230_v18 }
 0x1ee   : > { %v2261_v55 = vpop.f32.mrf.mxu3 }
 0x1ef   : > { %3051 = vmatmul.bf16.gmra.mxu2 %v4798_v23 }
 0x1f0   : > { %v2208_v37 = vpop.f32.mrf.mxu1  ;;  %v2527_v7 = vpop.f32.mrf.mxu0 }
 0x1f2   : > { %v2232_v61 = vpop.f32.mrf.mxu2 }
 0x1f3   : > { %v2233_v5 = vadd.f32 %v2232_v61, %v2203_v32 }
 0x1f5   : > { %v2262_v62 = vadd.f32 %v2261_v55, %v2233_v5 }
 0x1f6   : > { %v2263_v57 = vpop.f32.mrf.mxu3 }
 0x1f8   : > { %v2210_v63 = vpop.f32.mrf.mxu1  ;;  %v2530_v31 = vpop.f32.mrf.mxu0 }
 0x1fa   : > { %v2234_v11 = vpop.f32.mrf.mxu2 }
 0x1fb   : > { %v2235_v34 = vadd.f32 %v2234_v11, %v2205_v27 }
 0x1fd   : > { %v2264_v0 = vadd.f32 %v2263_v57, %v2235_v34 }
 0x1fe   : > { %v2266_v3 = vpop.f32.mrf.mxu3 }
 0x200   : > { %v5222_v26 = vpop.f32.mrf.mxu0  ;;  %v2544_v10 = vpop.f32.mrf.mxu1 }
 0x201   : > { %v2545_v60 = vadd.f32 %v2544_v10, %v2515_v15 }
 0x202   : > { %v2237_v43 = vpop.f32.mrf.mxu2 }
 0x203   : > { %v2238_v22 = vadd.f32 %v2237_v43, %v2208_v37 }
 0x205   : > { %v2267_v40 = vadd.f32 %v2266_v3, %v2238_v22 }
 0x206   : > { %v2268_v28 = vpop.f32.mrf.mxu3 }
 0x208   : > { %v2546_v23 = vpop.f32.mrf.mxu1  ;;  %v2856_v16 = vpop.f32.mrf.mxu0 }
 0x209   : > { %v2547_v51 = vadd.f32 %v2546_v23, %v2517_v6 }
 0x20a   : > { %v2239_v19 = vpop.f32.mrf.mxu2 }
 0x20b   : > { %v2240_v14 = vadd.f32 %v2239_v19, %v2210_v63 }
 0x20d   : > { %v5224_v41 = vadd.f32 %v2268_v28, %v2240_v14  ;;  %v4080_v28 = vld [vmem:[%s4911_s12 + $0x8] sm:$0x4] }
 0x20e   : > { %v2827_v24 = vpop.f32.mrf.mxu3  ;;  %v3213_v14 = vsel %vm5256_vm9, 0, %v4080_v28 }
 0x20f   : > { %4081 = vst [vmem:[%s4911_s12 + $0x8] sm:$0x4] %v3213_v14 }
 0x210   : > { %v2549_v13 = vpop.f32.mrf.mxu1  ;;  %v5226_v12 = vpop.f32.mrf.mxu0 }
 0x211   : > { %v2550_v39 = vadd.f32 %v2549_v13, %v2520_v25  ;;  %v4082_v13 = vld [vmem:[%s4911_s12 + $0xc] sm:$0x4] }
 0x212   : > { %v2573_v20 = vpop.f32.mrf.mxu2 }
 0x213   : > { %v2574_v56 = vadd.f32 %v2573_v20, %v2545_v60  ;;  %v2857_v60 = vadd.f32 %v2856_v16, %v2827_v24  ;;  %v3216_v20 = vsel %vm5256_vm9, 0, %v4082_v13  ;;  %v4084_v24 = vld [vmem:[%s4911_s12 + $0x10] sm:$0x4] }
 0x214   : > { %4083 = vst [vmem:[%s4911_s12 + $0xc] sm:$0x4] %v3216_v20 }
 0x215   : > { %v5228_v42 = vadd.f32 %v2574_v56, %v2252_v35 }
 0x216   : > { %v5230_v1 = vpop.f32.mrf.mxu3 }
 0x218   : > { %v2551_v50 = vpop.f32.mrf.mxu1  ;;  %v2861_v54 = vpop.f32.mrf.mxu0 }
 0x219   : > { %v2552_v15 = vadd.f32 %v2551_v50, %v2522_v29 }
 0x21a   : > { %v2575_v58 = vpop.f32.mrf.mxu2 }
 0x21b   : > { %v2576_v2 = vadd.f32 %v2575_v58, %v2547_v51 }
 0x21d   : > { %v5232_v6 = vadd.f32 %v2576_v2, %v2254_v9  ;;  %v2859_v2 = vadd.f32 %v5226_v12, %v5230_v1  ;;  %v5299_v12 = vld [vmem:[%s5404_s8] ss:$0 sm:$0xff] }
 0x21e   : > { %v2832_v36 = vpop.f32.mrf.mxu3 }
 0x21f   : > { %v2862_v61 = vadd.f32 %v2861_v54, %v2832_v36  ;;  %v5280_v54 = vld [vmem:[%s5401_s5] ss:$0 sm:$0xff] }
 0x220   : > { %v2554_v52 = vpop.f32.mrf.mxu1  ;;  %v5234_v47 = vpop.f32.mrf.mxu0 }
 0x221   : > { %v2555_v17 = vadd.f32 %v2554_v52, %v2525_v49 }
 0x222   : > { %v2578_v59 = vpop.f32.mrf.mxu2 }
 0x223   : > { %v2579_v25 = vadd.f32 %v2578_v59, %v2550_v39 }
 0x225   : > { %v2595_v8 = vadd.f32 %v2579_v25, %v2257_v4 }
 0x226   : > { %v5240_v9 = vpop.f32.mrf.mxu3 }
 0x228   : > { %v2556_v33 = vpop.f32.mrf.mxu1  ;;  %v2866_v35 = vpop.f32.mrf.mxu0 }
 0x229   : > { %v2557_v53 = vadd.f32 %v2556_v33, %v2527_v7 }
 0x22a   : > { %v2580_v32 = vpop.f32.mrf.mxu2 }
 0x22b   : > { %v2581_v44 = vadd.f32 %v2580_v32, %v2552_v15 }
 0x22d   : > { %v5236_v29 = vadd.f32 %v2581_v44, %v2259_v21 }
 0x22e   : > { %v2837_v55 = vpop.f32.mrf.mxu3 }
 0x230   : > { %v2559_v30 = vpop.f32.mrf.mxu1  ;;  %v5238_v48 = vpop.f32.mrf.mxu0 }
 0x231   : > { %v2560_v57 = vadd.f32 %v2559_v30, %v2530_v31 }
 0x232   : > { %v2583_v38 = vpop.f32.mrf.mxu2 }
 0x233   : > { %v2584_v27 = vadd.f32 %v2583_v38, %v2555_v17  ;;  %v5290_v17 = vld [vmem:[#allocation9] ss:$0 sm:$0xff] }
 0x235   : > { %v2597_v45 = vadd.f32 %v2584_v27, %v2262_v62  ;;  %v5305_v27 = vld [vmem:[#allocation11] ss:$0 sm:$0xff] }
 0x236   : > { %v2839_v3 = vpop.f32.mrf.mxu3 }
 0x237   : > { %v2869_v44 = vadd.f32 %v5238_v48, %v2839_v3 }
 0x238   : > { %v2561_v49 = vpop.f32.mrf.mxu1  ;;  %v5242_v18 = vpop.f32.mrf.mxu0 }
 0x239   : > { %v2562_v16 = vadd.f32 %v2561_v49, %v5222_v26  ;;  %v3219_v26 = vsel %vm5256_vm9, 0, %v4084_v24  ;;  %v4072_v49 = vld [vmem:[%s4911_s12 + $0x8] sm:$0x1] }
 0x23a   : > { %v2585_v4 = vpop.f32.mrf.mxu2  ;;  %4085 = vst [vmem:[%s4911_s12 + $0x10] sm:$0x4] %v3219_v26 }
 0x23b   : > { %v2586_v37 = vadd.f32 %v2585_v4, %v2557_v53 }
 0x23d   : > { %v5244_v7 = vadd.f32 %v2586_v37, %v2264_v0  ;;  %v4070_v0 = vld [vmem:[%s4911_s12 + $0x4] sm:$0x1]  ;;  %v3198_v37 = vsel %vm4882_vm2, 0, %v4072_v49 }
 0x23e   : > { %v3195_v31 = vsel %vm4882_vm2, 0, %v4070_v0  ;;  %v2842_v52 = vpop.f32.mrf.mxu3  ;;  %4073 = vst [vmem:[%s4911_s12 + $0x8] sm:$0x1] %v3198_v37 }
 0x23f   : > { %4071 = vst [vmem:[%s4911_s12 + $0x4] sm:$0x1] %v3195_v31  ;;  %v2872_v0 = vadd.f32 %v5242_v18, %v2842_v52 }
 0x240   : > { %v5246_v21 = vpop.f32.mrf.mxu0  ;;  %v2890_v5 = vpop.f32.mrf.mxu1 }
 0x241   : > { %v2891_v63 = vadd.f32 %v2890_v5, %v2862_v61 }
 0x242   : > { %v2588_v11 = vpop.f32.mrf.mxu2 }
 0x243   : > { %v2589_v34 = vadd.f32 %v2588_v11, %v2560_v57  ;;  %v5248_v62 = vadd.f32 %v2891_v63, %v2595_v8 }
 0x245   : > { %v5250_v10 = vadd.f32 %v2589_v34, %v2267_v40  ;;  %v4078_v40 = vld [vmem:[%s4911_s12 + $0x4] sm:$0x4] }
 0x246   : > { %v3210_v19 = vsel %vm5256_vm9, 0, %v4078_v40  ;;  %v2844_v61 = vpop.f32.mrf.mxu3 }
 0x247   : > { %4079 = vst [vmem:[%s4911_s12 + $0x4] sm:$0x4] %v3210_v19  ;;  %v2874_v26 = vadd.f32 %v5246_v21, %v2844_v61 }
 0x248   : > { %v2885_v43 = vpop.f32.mrf.mxu0  ;;  %v2892_v22 = vpop.f32.mrf.mxu1 }
 0x249   : > { %v2886_v51 = vadd.f32 %v2885_v43, %v2857_v60 }
 0x24a   : > { %v2590_v39 = vpop.f32.mrf.mxu2 }
 0x24b   : > { %v2591_v56 = vadd.f32 %v2590_v39, %v2562_v16  ;;  %v2905_v50 = vadd.f32 %v2886_v51, %v5228_v42  ;;  %v2867_v42 = vadd.f32 %v2866_v35, %v2837_v55  ;;  %v4076_v39 = vld [vmem:[%s4911_s12 + $0x10] sm:$0x1] }
 0x24d   : > { %v5284_v15 = vadd.f32 %v2591_v56, %v5224_v41  ;;  %v2933_v58 = vmul.f32 %v5280_v54, %v2905_v50 }
 0x24e   : > { %v3057_v51 = vpop.f32.mrf.mxu3 }
 0x24f   : > { %v2945_v33 = vadd.f32 %v5290_v17, %v2933_v58 }
 0x250   : > { %v2887_v59 = vpop.f32.mrf.mxu0  ;;  %v2895_v25 = vpop.f32.mrf.mxu1 }
 0x251   : > { %v2888_v8 = vadd.f32 %v2887_v59, %v2859_v2  ;;  %v2896_v36 = vadd.f32 %v2895_v25, %v2867_v42  ;;  %v2953_v35 = vmax.f32 %v2945_v33, 0.0  ;;  %v3204_v42 = vsel %vm4882_vm2, 0, %v4076_v39 }
 0x252   : > { %v3042_v53 = vpop.f32.mrf.mxu2  ;;  %4077 = vst [vmem:[%s4911_s12 + $0x10] sm:$0x1] %v3204_v42 }
 0x253   : > { %v2906_v41 = vadd.f32 %v2888_v8, %v5232_v6  ;;  %v5294_v32 = vadd.f32 %v2896_v36, %v2597_v45  ;;  %v3066_v38 = vmul.f32 %v5299_v12, %v3042_v53  ;;  %v2864_v6 = vadd.f32 %v5234_v47, %v5240_v9 }
 0x254   : > { %v2961_v57 = vmin.f32 %v2953_v35, 6.0  ;;  %v2935_v9 = vmul.f32 %v5280_v54, %v5248_v62  ;;  %v3072_v53 = vmul.f32 %v5299_v12, %v3057_v51  ;;  %v4086_v51 = vld [vmem:[%s4911_s12 + $0x4] sm:$0x7] }
 0x255   : > { %v2934_v1 = vmul.f32 %v5280_v54, %v2906_v41  ;;  %v2893_v5 = vadd.f32 %v2892_v22, %v2864_v6  ;;  %v3078_v63 = vadd.f32 %v5305_v27, %v3066_v38 }
 0x256   : > { %v2947_v31 = vadd.f32 %v5290_v17, %v2935_v9 }
 0x257   : > { %v2946_v30 = vadd.f32 %v5290_v17, %v2934_v1  ;;  %v2908_v60 = vadd.f32 %v2893_v5, %v5236_v29  ;;  %v3086_v43 = vadd.f32 %v3078_v63, %v2961_v57  ;;  %v3059_v5 = vpop.f32.mrf.mxu3  ;;  %v2937_v57 = vmul.f32 %v5280_v54, %v5294_v32 }
 0x258   : > { %v2897_v45 = vpop.f32.mrf.mxu1  ;;  %v2955_v18 = vmax.f32 %v2947_v31, 0.0  ;;  %v3073_v31 = vmul.f32 %v5299_v12, %v3059_v5 }
 0x259   : > { %v2898_v4 = vadd.f32 %v2897_v45, %v2869_v44  ;;  %v2954_v55 = vmax.f32 %v2946_v30, 0.0  ;;  %v2936_v28 = vmul.f32 %v5280_v54, %v2908_v60 }
 0x25a   : > { %v3044_v48 = vpop.f32.mrf.mxu2  ;;  %v3085_v39 = vadd.f32 %v5305_v27, %v3073_v31 }
 0x25b   : > { %v5315_v11 = vadd.f32 %v2898_v4, %v5244_v7  ;;  %v2962_v34 = vmin.f32 %v2954_v55, 6.0  ;;  %v3067_v47 = vmul.f32 %v5299_v12, %v3044_v48  ;;  %v2948_v58 = vadd.f32 %v5290_v17, %v2936_v28 }
 0x25c   : > { %v2949_v28 = vadd.f32 %v5290_v17, %v2937_v57 }
 0x25d   : > { %v3079_v3 = vadd.f32 %v5305_v27, %v3067_v47  ;;  %v2956_v30 = vmax.f32 %v2948_v58, 0.0  ;;  %v4074_v47 = vld [vmem:[%s4911_s12 + $0xc] sm:$0x1] }
 0x25f   : > { %v3087_v22 = vadd.f32 %v3079_v3, %v2962_v34  ;;  %v2964_v3 = vmin.f32 %v2956_v30, 6.0 }
 0x260   : > { %v2900_v23 = vpop.f32.mrf.mxu1 }
 0x261   : > { %v3094_v7 = vmax.f32 %v3086_v43, %v3087_v22  ;;  %v2901_v40 = vadd.f32 %v2900_v23, %v2872_v0 }
 0x262   : > { %v3047_v16 = vpop.f32.mrf.mxu2 }
 0x263   : > { %v3102_v19 = vrot.slane %v3094_v7, 2  ;;  %v3103_v62 = vrot.slane %v3094_v7, 4  ;;  %v3104_v14 = vrot.slane %v3094_v7, 6  ;;  %v4053_v13 = vrot.slane %v3094_v7, 9 }
 0x264   : > { %v2911_v29 = vadd.f32 %v2901_v40, %v5250_v10  ;;  %v2963_v10 = vmin.f32 %v2955_v18, 6.0  ;;  %v3068_v36 = vmul.f32 %v5299_v12, %v3047_v16  ;;  %v3084_v18 = vadd.f32 %v5305_v27, %v3072_v53 }
 0x265   : > { %v4054_v20 = vrot.slane %v3102_v19, 9  ;;  %v4055_v24 = vrot.slane %v3103_v62, 9  ;;  %v4056_v56 = vrot.slane %v3104_v14, 9  ;;  %v3174_v50 = vmax.f32 %v3094_v7, %v4053_v13 }
 0x266   : > { %v2939_v2 = vmul.f32 %v5280_v54, %v2911_v29  ;;  %v3080_v55 = vadd.f32 %v5305_v27, %v3068_v36 }
 0x267   : > { %v3175_v52 = vmax.f32 %v3102_v19, %v4054_v20  ;;  %v3176_v59 = vmax.f32 %v3103_v62, %v4055_v24  ;;  %v3177_v25 = vmax.f32 %v3104_v14, %v4056_v56  ;;  %v3221_v8 = vpack.c.bf16 %v3174_v50, %v3174_v50 }
 0x268   : > { %v2902_v33 = vpop.f32.mrf.mxu1  ;;  %v2951_v4 = vadd.f32 %v5290_v17, %v2939_v2  ;;  %v3088_v23 = vadd.f32 %v3080_v55, %v2963_v10  ;;  %v2957_v2 = vmax.f32 %v2949_v28, 0.0 }
 0x269   : > { %v3222_v21 = vpack.c.bf16 %v3175_v52, %v3175_v52  ;;  %v3223_v41 = vpack.c.bf16 %v3176_v59, %v3176_v59  ;;  %v3224_v1 = vpack.c.bf16 %v3177_v25, %v3177_v25  ;;  %v3253_v35 = vunpack.c.l.b16 %v3221_v8 }
 0x26a   : > { %v2903_v44 = vadd.f32 %v2902_v33, %v2874_v26  ;;  %v3049_v38 = vpop.f32.mrf.mxu2  ;;  %v2959_v22 = vmax.f32 %v2951_v4, 0.0  ;;  %v2938_v26 = vmul.f32 %v5280_v54, %v5315_v11 }
 0x26b   : > { %v3254_v6 = vunpack.c.l.b16 %v3222_v21  ;;  %v3255_v45 = vunpack.c.l.b16 %v3223_v41  ;;  %v3256_v49 = vunpack.c.l.b16 %v3224_v1  ;;  %v3069_v61 = vmul.f32 %v5299_v12, %v3049_v38 }
 0x26c   : > { %v2912_v37 = vadd.f32 %v2903_v44, %v5284_v15  ;;  %v3269_v48 = vrot.slane %v3253_v35, 7  ;;  %v3201_v15 = vsel %vm4882_vm2, 0, %v4074_v47  ;;  %v2967_v29 = vmin.f32 %v2959_v22, 6.0 }
 0x26d   : > { %v3270_v63 = vrot.slane %v3254_v6, 6  ;;  %v3273_v34 = vrot.slane %v3255_v45, 5  ;;  %v3081_v60 = vadd.f32 %v5305_v27, %v3069_v61  ;;  %v3276_v43 = vrot.slane %v3256_v49, 4  ;;  %4075 = vst [vmem:[%s4911_s12 + $0xc] sm:$0x1] %v3201_v15 }
 0x26e   : > { %v2940_v9 = vmul.f32 %v5280_v54, %v2912_v37  ;;  %v3092_v10 = vadd.f32 %v3084_v18, %v2967_v29  ;;  %v2950_v41 = vadd.f32 %v5290_v17, %v2938_v26  ;;  %v2965_v35 = vmin.f32 %v2957_v2, 6.0 }
 0x26f   : > { %v3272_v0 = vsel %vm3206_vm7, %v3270_v63, %v3269_v48  ;;  %v3089_v40 = vadd.f32 %v3081_v60, %v2964_v3 }
 0x270   : > { %v3275_v32 = vsel %vm3274_vm10, %v3273_v34, %v3272_v0  ;;  %v2952_v7 = vadd.f32 %v5290_v17, %v2940_v9  ;;  %v2958_v34 = vmax.f32 %v2950_v41, 0.0 }
 0x271   : > { %v3278_v16 = vsel %vm3277_vm11, %v3276_v43, %v3275_v32  ;;  %v3095_v62 = vmax.f32 %v3088_v23, %v3089_v40 }
 0x272   : > { %v3300_v19 = vpack.c.b16 %v3278_v16, %v3278_v16  ;;  %v3052_v14 = vpop.f32.mrf.mxu2  ;;  %v2960_v13 = vmax.f32 %v2952_v7, 0.0 }
 0x273   : > { %v3105_v24 = vrot.slane %v3095_v62, 2  ;;  %v3106_v56 = vrot.slane %v3095_v62, 4  ;;  %v3107_v50 = vrot.slane %v3095_v62, 6  ;;  %v4057_v58 = vrot.slane %v3095_v62, 9 }
 0x274   : > { %v3312_v20 = vsel %vm5355_vm14, %v3300_v19, %v4086_v51  ;;  %v2968_v42 = vmin.f32 %v2960_v13, 6.0  ;;  %v3070_v38 = vmul.f32 %v5299_v12, %v3052_v14  ;;  %v2966_v13 = vmin.f32 %v2958_v34, 6.0 }
 0x275   : > { %4087 = vst [vmem:[%s4911_s12 + $0x4] sm:$0x7] %v3312_v20  ;;  %v4058_v52 = vrot.slane %v3105_v24, 9  ;;  %v4059_v59 = vrot.slane %v3106_v56, 9  ;;  %v4060_v25 = vrot.slane %v3107_v50, 9  ;;  %v3178_v8 = vmax.f32 %v3095_v62, %v4057_v58 }
 0x276   : > { %v3093_v36 = vadd.f32 %v3085_v39, %v2968_v42  ;;  %v3082_v23 = vadd.f32 %v5305_v27, %v3070_v38  ;;  %v4088_v62 = vld [vmem:[%s4911_s12 + $0x8] sm:$0x7] }
 0x277   : > { %v3179_v33 = vmax.f32 %v3105_v24, %v4058_v52  ;;  %v3180_v53 = vmax.f32 %v3106_v56, %v4059_v59  ;;  %v3181_v21 = vmax.f32 %v3107_v50, %v4060_v25  ;;  %v3225_v1 = vpack.c.bf16 %v3178_v8, %v3178_v8 }
 0x278   : > { %v3097_v44 = vmax.f32 %v3092_v10, %v3093_v36  ;;  %v3090_v24 = vadd.f32 %v3082_v23, %v2965_v35 }
 0x279   : > { %v3226_v30 = vpack.c.bf16 %v3179_v33, %v3179_v33  ;;  %v3227_v54 = vpack.c.bf16 %v3180_v53, %v3180_v53  ;;  %v3228_v11 = vpack.c.bf16 %v3181_v21, %v3181_v21  ;;  %v3257_v6 = vunpack.c.l.b16 %v3225_v1  ;;  %v4092_v33 = vld [vmem:[%s4911_s12 + $0x10] sm:$0x7] }
 0x27a   : > { %v3111_v45 = vrot.slane %v3097_v44, 2  ;;  %v3112_v49 = vrot.slane %v3097_v44, 4  ;;  %v3113_v4 = vrot.slane %v3097_v44, 6  ;;  %v4065_v5 = vrot.slane %v3097_v44, 9  ;;  %v3054_v57 = vpop.f32.mrf.mxu2 }
 0x27b   : > { %v3258_v55 = vunpack.c.l.b16 %v3226_v30  ;;  %v3259_v37 = vunpack.c.l.b16 %v3227_v54  ;;  %v3260_v61 = vunpack.c.l.b16 %v3228_v11  ;;  %v3279_v47 = vrot.slane %v3257_v6, 7 }
 0x27c   : > { %v4066_v48 = vrot.slane %v3111_v45, 9  ;;  %v4067_v63 = vrot.slane %v3112_v49, 9  ;;  %v4068_v17 = vrot.slane %v3113_v4, 9  ;;  %v3186_v60 = vmax.f32 %v3097_v44, %v4065_v5 }
 0x27d   : > { %v3280_v9 = vrot.slane %v3258_v55, 6  ;;  %v3282_v3 = vrot.slane %v3259_v37, 5  ;;  %v3071_v22 = vmul.f32 %v5299_v12, %v3054_v57  ;;  %v3284_v32 = vrot.slane %v3260_v61, 4 }
 0x27e   : > { %v3187_v15 = vmax.f32 %v3111_v45, %v4066_v48  ;;  %v3188_v0 = vmax.f32 %v3112_v49, %v4067_v63  ;;  %v3189_v43 = vmax.f32 %v3113_v4, %v4068_v17  ;;  %v3233_v7 = vpack.c.bf16 %v3186_v60, %v3186_v60 }
 0x27f   : > { %v3281_v31 = vsel %vm3206_vm7, %v3280_v9, %v3279_v47  ;;  %v3083_v29 = vadd.f32 %v5305_v27, %v3071_v22 }
 0x280   : > { %v3283_v40 = vsel %vm3274_vm10, %v3282_v3, %v3281_v31  ;;  %v3234_v28 = vpack.c.bf16 %v3187_v15, %v3187_v15  ;;  %v3235_v16 = vpack.c.bf16 %v3188_v0, %v3188_v0  ;;  %v3236_v51 = vpack.c.bf16 %v3189_v43, %v3189_v43  ;;  %v4090_v3 = vld [vmem:[%s4911_s12 + $0xc] sm:$0x7] }
 0x281   : > { %v3285_v19 = vsel %vm3277_vm11, %v3284_v32, %v3283_v40  ;;  %v3265_v14 = vunpack.c.l.b16 %v3233_v7  ;;  %v3091_v56 = vadd.f32 %v3083_v29, %v2966_v13 }
 0x282   : > { %v3301_v12 = vpack.c.b16 %v3285_v19, %v3285_v19  ;;  %v3266_v18 = vunpack.c.l.b16 %v3234_v28  ;;  %v3267_v39 = vunpack.c.l.b16 %v3235_v16  ;;  %v3268_v20 = vunpack.c.l.b16 %v3236_v51 }
 0x283   : > { %v3293_v26 = vrot.slane %v3265_v14, 7  ;;  %v3096_v42 = vmax.f32 %v3090_v24, %v3091_v56 }
 0x284   : > { %v3315_v50 = vsel %vm5355_vm14, %v3301_v12, %v4088_v62  ;;  %v3294_v58 = vrot.slane %v3266_v18, 6  ;;  %v3296_v2 = vrot.slane %v3267_v39, 5  ;;  %v3298_v59 = vrot.slane %v3268_v20, 4 }
 0x285   : > { %4089 = vst [vmem:[%s4911_s12 + $0x8] sm:$0x7] %v3315_v50  ;;  %v3108_v25 = vrot.slane %v3096_v42, 2  ;;  %v3109_v8 = vrot.slane %v3096_v42, 4  ;;  %v3110_v10 = vrot.slane %v3096_v42, 6  ;;  %v4061_v53 = vrot.slane %v3096_v42, 9 }
 0x286   : > { %v3295_v52 = vsel %vm3206_vm7, %v3294_v58, %v3293_v26 }
 0x287   : > { %v3297_v27 = vsel %vm3274_vm10, %v3296_v2, %v3295_v52  ;;  %v4062_v41 = vrot.slane %v3108_v25, 9  ;;  %v4063_v1 = vrot.slane %v3109_v8, 9  ;;  %v4064_v35 = vrot.slane %v3110_v10, 9 }
 0x288   : > { %v3299_v36 = vsel %vm3277_vm11, %v3298_v59, %v3297_v27  ;;  %v3182_v44 = vmax.f32 %v3096_v42, %v4061_v53 }
 0x289   : > { %v3303_v21 = vpack.c.b16 %v3299_v36, %v3299_v36  ;;  %v3183_v54 = vmax.f32 %v3108_v25, %v4062_v41  ;;  %v3184_v11 = vmax.f32 %v3109_v8, %v4063_v1  ;;  %v3185_v38 = vmax.f32 %v3110_v10, %v4064_v35 }
 0x28a   : > { %v3229_v6 = vpack.c.bf16 %v3182_v44, %v3182_v44 }
 0x28b   : > { %v3321_v30 = vsel %vm5355_vm14, %v3303_v21, %v4092_v33  ;;  %v3230_v45 = vpack.c.bf16 %v3183_v54, %v3183_v54  ;;  %v3231_v49 = vpack.c.bf16 %v3184_v11, %v3184_v11  ;;  %v3232_v4 = vpack.c.bf16 %v3185_v38, %v3185_v38 }
 0x28c   : > { %4093 = vst [vmem:[%s4911_s12 + $0x10] sm:$0x7] %v3321_v30  ;;  %v3261_v55 = vunpack.c.l.b16 %v3229_v6 }
 0x28d   : > { %v3262_v37 = vunpack.c.l.b16 %v3230_v45  ;;  %v3263_v61 = vunpack.c.l.b16 %v3231_v49  ;;  %v3264_v5 = vunpack.c.l.b16 %v3232_v4 }
 0x28e   : > { %v3286_v57 = vrot.slane %v3261_v55, 7 }
 0x28f   : > { %v3287_v48 = vrot.slane %v3262_v37, 6  ;;  %v3289_v63 = vrot.slane %v3263_v61, 5  ;;  %v3291_v34 = vrot.slane %v3264_v5, 4 }
 0x291   : > { %v3288_v17 = vsel %vm3206_vm7, %v3287_v48, %v3286_v57 }
 0x292   : > { %v3290_v47 = vsel %vm3274_vm10, %v3289_v63, %v3288_v17 }
 0x293   : > { %v3292_v9 = vsel %vm3277_vm11, %v3291_v34, %v3290_v47 }
 0x294   : > { %v3302_v60 = vpack.c.b16 %v3292_v9, %v3292_v9 }
 0x296   : > { %v3318_v15 = vsel %vm5355_vm14, %v3302_v60, %v4090_v3 }
 0x297   : > { %4091 = vst [vmem:[%s4911_s12 + $0xc] sm:$0x7] %v3318_v15 }
 0x298 PF: > { %s23_s13 = sadd.s32 1, %s4510_s13  }
 0x299   : > { %p20_p7 = scmp.ge.s32.totalorder %s23_s13, 4  }
 0x29b   :  { %22 = sbr.rel (!%p20_p7) target bundleno = 3 (0x3), region = 119 }
 0x2a0   :  { %3344 = vsyncpa [#allocation5], 1 }
 0x2a1   :  { %3346 = vsyncpa [#allocation5 + $0x1], 1 }
 0x2a2   :  { %3347 = vsyncpa [#allocation7], 1 }
 0x2a3   :  { %3348 = vsyncpa [#allocation10], 1 }

// kernel: encoder_forward.2
= control target key start
LH: loop header
LB: loop body
LE: loop exit
PB: predicated region body
PF: predicated region fallthrough
CT: control target
= control target key end

     0   :  { %15 = vsyncpa [#allocation5], 0  ;;  %s8140_s13 = smov 0   ;;  %s11014_s0 = inlined_call_operand.vmem [shape: bf16[2,18,18,128], index: 0, kind: input, shape index: {}]   ;;  %s11015_s1 = inlined_call_operand.vmem [shape: bf16[3,384,128], index: 1, kind: input, shape index: {}]   ;;  %s11016_s2 = inlined_call_operand.vmem [shape: f32[1,128], index: 2, kind: input, shape index: {}]   ;;  %s11017_s3 = inlined_call_operand.vmem [shape: f32[1,128], index: 3, kind: input, shape index: {}]   ;;  %s11018_s4 = inlined_call_operand.vmem [shape: bf16[3,384,128], index: 4, kind: input, shape index: {}]   ;;  %s11019_s5 = inlined_call_operand.vmem [shape: f32[1,128], index: 5, kind: input, shape index: {}]   ;;  %s11020_s6 = inlined_call_operand.vmem [shape: f32[1,128], index: 6, kind: input, shape index: {}]   ;;  %s11021_s7 = inlined_call_operand.hbm [shape: bf16[128,128], index: 7, kind: input, shape index: {}]   ;;  %s11022_s8 = inlined_call_operand.vmem [shape: f32[1,128], index: 8, kind: input, shape index: {}]   ;;  %s11023_s9 = inlined_call_operand.vmem [shape: f32[1,128], index: 9, kind: input, shape index: {}]   ;;  %s11024_s10 = inlined_call_operand.vmem [shape: bf16[2,10,10,128], index: 10, kind: output, shape index: {}]  }
   0x1 LB: > { %s296_s16 = sshll.u32 %s11021_s7, 4  ;;  %s6687_s17 = sadd.s32 4294967295, %s8079_s13   ;;  %s8079_s13 = sphi %s8140_s13, %s21_s13   ;;  %s297_s16 = int_to_ptr.hbm [resolvable:$true] %s296_s16 }
   0x2   : > { %p6689_p0 = scmp.ge.s32.totalorder %s8079_s13, 1  ;;  %p267_p1 = scmp.lt.s32.totalorder %s8079_s13, 3 }
   0x3   : > { %p7994_p2 = scmp.eq.s32.totalorder %s6687_s17, 0  ;;  %s8081_s18 = smov [#allocation4]  }
   0x4   : > { %p268_p3 = pnand %p6689_p0, %p267_p1  ;;  %s298_s19 = sshll.u32 %s8081_s18, 4  ;;  %s299_s19 = int_to_ptr.vmem [resolvable:$true] %s298_s19 }
   0x5   : > { %s8082_s20 = smov 64   ;;  %s8083_s21 = smov 4  }
   0x6   : > { %p7990_p4 = pneg %p268_p3  ;;  %328 = sbr.rel (%p268_p3) target bundleno = 1577 (0x629), region = 60 }
   0x8   : > { %p7991_p5 = pnand %p7994_p2, %p7990_p4 }
   0xa   : > { %7993 = dma.hbm_to_vmem [thread:$0]  (!%p7991_p5), %s297_s16, 1024, %s299_s19, [#allocation5], %s8082_s20, %s8082_s20, %s8083_s21  }
   0xb   : > { %8074 = dma.done.wait (%p7994_p2), [#allocation5], 1024  }
   0xc   : > { %8076 = vsyncadd (%p7994_p2), [#allocation5], 4294966272  ;;  %p367_p6 = scmp.lt.s32.totalorder %s6687_s17, 1  ;;  %v7797_v0 = vld [vmem:[%s11015_s1 + $0x38] sm:$0xff]  ;;  %v7796_v3 = vld [vmem:[%s11015_s1 + $0x30] sm:$0xff]  ;;  %vm829_vm1 = vcmask 1046528  }
   0xd   : > { %v8157_v1 = vld [vmem:[%s11015_s1 + $0x78] sm:$0xff]  ;;  %1094 = vmatpush.bf16.msra.mxu0 %v7797_v0  ;;  %7960 = vmatpush.bf16.msra.mxu3 %v7797_v0  ;;  %v8174_v4 = vld [vmem:[%s11015_s1 + $0x70] sm:$0xff]  ;;  %v7795_v6 = vld [vmem:[%s11015_s1 + $0x28] sm:$0xff]  ;;  %vm594_vm0 = vsmask.f32 7424  ;;  %vm2681_vm2 = vcmask 1040384  }
   0xe   : > { %v8162_v2 = vld [vmem:[%s11015_s1 + $0xb8] sm:$0xff]  ;;  %s11357_s17 = smov (!%p367_p6, %s6687_s17), 1  ;;  %1183 = vmatpush.bf16.msra.mxu1 %v8157_v1  ;;  %v8179_v5 = vld [vmem:[%s11015_s1 + $0xb0] sm:$0xff]  ;;  %v8190_v7 = vld [vmem:[%s11015_s1 + $0x68] sm:$0xff]  ;;  %vm2682_vm3 = vsmask.f32 256 }
   0xf   : > { %1272 = vmatpush.bf16.msra.mxu2 %v8162_v2  ;;  %s7984_s15 = smul.u32 216, %s11357_s17  ;;  %v8195_v8 = vld [vmem:[%s11015_s1 + $0xa8] sm:$0xff]  ;;  %v7794_v9 = vld [vmem:[%s11015_s1 + $0x20] sm:$0xff]  ;;  %v7793_v13 = vld [vmem:[%s11015_s1 + $0x18] sm:$0xff]  ;;  %vm2732_vm5 = vsmask.f32 7938 }
  0x10   : > { %v8208_v10 = vld [vmem:[%s11015_s1 + $0x60] sm:$0xff]  ;;  %v8226_v14 = vld [vmem:[%s11015_s1 + $0x58] sm:$0xff]  ;;  %v7792_v18 = vld [vmem:[%s11015_s1 + $0x10] sm:$0xff]  ;;  %s7985_s29 = smul.u32 80, %s11357_s17  ;;  %vm3136_vm7 = vcmask 1043456   ;;  %vm6432_vm11 = vcmask 1042434  }
  0x11   : > { %1095 = vmatpush.bf16.msra.mxu0 %v7796_v3  ;;  %7961 = vmatpush.bf16.msra.mxu3 %v7796_v3  ;;  %s8200_s25 = scalar_lea.vmem %s11014_s0, %s7984_s15  ;;  %v8215_v11 = vld [vmem:[%s11015_s1 + $0xa0] sm:$0xff]  ;;  %v8231_v15 = vld [vmem:[%s11015_s1 + $0x98] sm:$0xff]  ;;  %v8242_v19 = vld [vmem:[%s11015_s1 + $0x50] sm:$0xff]  ;;  %vm2814_vm9 = vsmask.f32 4368  ;;  %vm6435_vm12 = vcmask 1043459  }
  0x12   : > { %1184 = vmatpush.bf16.msra.mxu1 %v8174_v4  ;;  %v380_v12 = vld [vmem:[%s8200_s25 + $0x8] sm:$0x1]  ;;  %v7772_v16 = vld [vmem:[%s8200_s25] sm:$0xff]  ;;  %v8247_v20 = vld [vmem:[%s11015_s1 + $0x90] sm:$0xff]  ;;  %s9114_s12 = scalar_lea.vmem %s11024_s10, %s7985_s29  ;;  %vm6438_vm13 = vcmask 1044484   ;;  %vm6441_vm14 = vcmask 1045509  }
  0x13   : > { %1273 = vmatpush.bf16.msra.mxu2 %v8179_v5  ;;  %v558_v17 = vunpack.c.l.b16 %v380_v12  ;;  %v598_v22 = vshll.u32 %v7772_v16, 16  ;;  %v7791_v23 = vld [vmem:[%s11015_s1 + $0x8] sm:$0xff]  ;;  %v596_v26 = vshrl.u32 %v7772_v16, 16  ;;  %v7790_v29 = vld [vmem:[%s11015_s1] sm:$0xff]  ;;  %v830_v34 = vrot.slane %v7772_v16, 1  ;;  %v7829_v36 = vld [vmem:[%s11015_s1 + $0x138] sm:$0xff] }
  0x14   : > { %v8257_v24 = vld [vmem:[%s11015_s1 + $0x48] sm:$0xff]  ;;  %v8272_v30 = vld [vmem:[%s11015_s1 + $0x40] sm:$0xff]  ;;  %v383_v37 = vld [vmem:[%s8200_s25 + $0x14] sm:$0x1]  ;;  %vm6444_vm15 = vcmask 1046534  }
  0x15   : > { %1096 = vmatpush.bf16.msra.mxu0 %v7795_v6  ;;  %7962 = vmatpush.bf16.msra.mxu3 %v7795_v6  ;;  %v576_v21 = vpack.c.b16 %v558_v17, %v558_v17  ;;  %v8262_v25 = vld [vmem:[%s11015_s1 + $0x88] sm:$0xff]  ;;  %v600_v27 = vrot.slane %v598_v22, 1  ;;  %v8277_v31 = vld [vmem:[%s11015_s1 + $0x80] sm:$0xff]  ;;  %v8284_v38 = vld [vmem:[%s8200_s25 + $0x90] sm:$0xff]  ;;  %v559_v42 = vunpack.c.l.b16 %v383_v37 }
  0x16   : > { %1185 = vmatpush.bf16.msra.mxu1 %v8190_v7  ;;  %v8291_v41 = vld [vmem:[%s8200_s25 + $0xc] sm:$0xff]  ;;  %v386_v53 = vld [vmem:[%s8200_s25 + $0x20] sm:$0x1]  ;;  %v8315_v57 = vld [vmem:[%s8200_s25 + $0x18] sm:$0xff] }
  0x17   : > { %1274 = vmatpush.bf16.msra.mxu2 %v8195_v8  ;;  %v603_v28 = vshll.u32 %v576_v21, 16  ;;  %v601_v32 = vor.u32 %v600_v27, %v596_v26  ;;  %v831_v35 = vrot.slane %v576_v21, 1  ;;  %v7828_v43 = vld [vmem:[%s11015_s1 + $0x130] sm:$0xff]  ;;  %v577_v44 = vpack.c.b16 %v559_v42, %v559_v42  ;;  %v8306_v54 = vld [vmem:[%s8200_s25 + $0x9c] sm:$0xff]  ;;  %v7827_v59 = vld [vmem:[%s11015_s1 + $0x128] sm:$0xff] }
  0x18   : > { %v610_v45 = vshll.u32 %v8291_v41, 16  ;;  %v608_v46 = vshrl.u32 %v8291_v41, 16  ;;  %v833_v51 = vrot.slane %v8291_v41, 1  ;;  %v560_v58 = vunpack.c.l.b16 %v386_v53  ;;  %v416_v26 = vld [vmem:[%s8200_s25 + $0x98] sm:$0x1]  ;;  %vm9143_vm4 = vmand %vm2681_vm2, %vm2682_vm3 }
  0x19   : > { %1097 = vmatpush.bf16.msra.mxu0 %v7794_v9  ;;  %7963 = vmatpush.bf16.msra.mxu3 %v7794_v9  ;;  %v605_v33 = vrot.slane %v603_v28, 1  ;;  %v832_v40 = vsel %vm829_vm1, %v830_v34, %v831_v35  ;;  %v615_v48 = vshll.u32 %v577_v44, 16  ;;  %v834_v52 = vrot.slane %v577_v44, 1  ;;  %v8333_v9 = vld [vmem:[%s8200_s25 + $0xa8] sm:$0xff]  ;;  %v392_v27 = vld [vmem:[%s8200_s25 + $0x38] sm:$0x1]  ;;  %vm9154_vm6 = vmand %vm2681_vm2, %vm2732_vm5 }
  0x1a   : > { %1186 = vmatpush.bf16.msra.mxu1 %v8208_v10  ;;  %v612_v47 = vrot.slane %v610_v45, 1  ;;  %v578_v60 = vpack.c.b16 %v560_v58, %v560_v58  ;;  %v622_v61 = vshll.u32 %v8315_v57, 16  ;;  %v620_v62 = vshrl.u32 %v8315_v57, 16  ;;  %v8358_v28 = vld [vmem:[%s8200_s25 + $0xb4] sm:$0xff]  ;;  %v7826_v34 = vld [vmem:[%s11015_s1 + $0x120] sm:$0xff]  ;;  %vm9213_vm8 = vmand %vm3136_vm7, %vm2732_vm5 }
  0x1b   : > { %1275 = vmatpush.bf16.msra.mxu2 %v8215_v11  ;;  %v606_v39 = vsel %vm594_vm0, %v601_v32, %v605_v33  ;;  %v617_v50 = vrot.slane %v615_v48, 1  ;;  %v8312_v56 = vsel %vm829_vm1, %v833_v51, %v834_v52  ;;  %v8367_v32 = vld [vmem:[%s8200_s25 + $0x30] sm:$0xff]  ;;  %v742_v33 = vshll.u32 %v8284_v38, 16  ;;  %v8400_v58 = vld [vmem:[%s8200_s25 + $0x3c] sm:$0xff]  ;;  %vm9231_vm10 = vmor %vm2682_vm3, %vm2814_vm9 }
  0x1c   : > { %v613_v49 = vor.u32 %v612_v47, %v608_v46  ;;  %v624_v63 = vrot.slane %v622_v61, 1  ;;  %v627_v0 = vshll.u32 %v578_v60, 16  ;;  %v837_v6 = vrot.slane %v578_v60, 1  ;;  %v7825_v61 = vld [vmem:[%s11015_s1 + $0x118] sm:$0xff] }
  0x1d   : > { %1098 = vmatpush.bf16.msra.mxu0 %v7793_v13  ;;  %7964 = vmatpush.bf16.msra.mxu3 %v7793_v13  ;;  %v8343_v13 = vld [vmem:[%s8200_s25 + $0x24] sm:$0xff]  ;;  %v744_v37 = vrot.slane %v742_v33, 1  ;;  %v754_v60 = vshll.u32 %v8306_v54, 16  ;;  %vm6447_vm2 = vcmask 1047559  }
  0x1e   : > { %1187 = vmatpush.bf16.msra.mxu1 %v8226_v14  ;;  %v8309_v55 = vsel %vm594_vm0, %v613_v49, %v617_v50  ;;  %v629_v3 = vrot.slane %v627_v0, 1  ;;  %v632_v17 = vshrl.u32 %v8343_v13, 16  ;;  %v419_v49 = vld [vmem:[%s8200_s25 + $0xa4] sm:$0x1]  ;;  %v752_v0 = vshrl.u32 %v8306_v54, 16 }
  0x1f   : > { %1276 = vmatpush.bf16.msra.mxu2 %v8231_v15  ;;  %11102 = vst [vmem:[#allocation7_spill] sm:$0xff] %v8309_v55  ;;  %v395_v50 = vld [vmem:[%s8200_s25 + $0x44] sm:$0x1]  ;;  %v571_v52 = vunpack.c.l.b16 %v419_v49  ;;  %v425_v49 = vld [vmem:[%s8200_s25 + $0xbc] sm:$0x1] }
  0x21   : > { %1099 = vmatpush.bf16.msra.mxu0 %v7792_v18  ;;  %7965 = vmatpush.bf16.msra.mxu3 %v7792_v18 }
  0x22   : > { %1188 = vmatpush.bf16.msra.mxu1 %v8242_v19 }
  0x23   : > { %1277 = vmatpush.bf16.msra.mxu2 %v8247_v20 }
  0x25   : > { %1100 = vmatpush.bf16.msra.mxu0 %v7791_v23  ;;  %7966 = vmatpush.bf16.msra.mxu3 %v7791_v23  ;;  %v839_v23 = vrot.slane %v8343_v13, 1 }
  0x26   : > { %1189 = vmatpush.bf16.msra.mxu1 %v8257_v24 }
  0x27   : > { %1278 = vmatpush.bf16.msra.mxu2 %v8262_v25 }
  0x29   : > { %1101 = vmatpush.bf16.msra.mxu0 %v7790_v29  ;;  %7967 = vmatpush.bf16.msra.mxu3 %v7790_v29  ;;  %v570_v29 = vunpack.c.l.b16 %v416_v26 }
  0x2a   : > { %1190 = vmatpush.bf16.msra.mxu1 %v8272_v30 }
  0x2b   : > { %1279 = vmatpush.bf16.msra.mxu2 %v8277_v31 }
  0x2c   : > { %1102 = vmatmul.bf16.vlgmr.msra.gmra.mxu0 %v7772_v16  ;;  %1162 = vmatmul.bf16.vlgmr.msra.gmra.mxu3 %v8284_v38  ;;  %v634_v16 = vshll.u32 %v8343_v13, 16 }
  0x2d   : > { %7968 = vmatpush.bf16.msrb.mxu3 %v8157_v1  ;;  %1707 = vmatpush.bf16.msrb.mxu0 %v7829_v36  ;;  %v625_v1 = vor.u32 %v624_v63, %v620_v62  ;;  %v646_v36 = vshll.u32 %v8367_v32, 16  ;;  %v658_v63 = vshll.u32 %v8400_v58, 16 }
  0x2e   : > { %1191 = vmatmul.bf16.vlgmr.msra.gmra.mxu1 %v606_v39  ;;  %1280 = vmatmul.bf16.vlgmr.msra.gmra.mxu2 %v832_v40  ;;  %v636_v18 = vrot.slane %v634_v16, 1  ;;  %v644_v40 = vshrl.u32 %v8367_v32, 16 }
  0x2f   : > { %v648_v42 = vrot.slane %v646_v36, 1 }
  0x30   : > { %v637_v21 = vor.u32 %v636_v18, %v632_v17  ;;  %v845_v18 = vrot.slane %v8400_v58, 1 }
  0x31   : > { %7969 = vmatpush.bf16.msrb.mxu3 %v8174_v4  ;;  %1708 = vmatpush.bf16.msrb.mxu0 %v7828_v43  ;;  %v836_v4 = vrot.slane %v8315_v57, 1  ;;  %v649_v46 = vor.u32 %v648_v42, %v644_v40 }
  0x33   : > { %v8340_v12 = vsel %vm829_vm1, %v836_v4, %v837_v6  ;;  %v656_v4 = vshrl.u32 %v8400_v58, 16  ;;  %v660_v6 = vrot.slane %v658_v63, 1 }
  0x34   : > { %11104 = vst [vmem:[#allocation9_spill] sm:$0xff] %v8340_v12 }
  0x35   : > { %7970 = vmatpush.bf16.msrb.mxu3 %v8190_v7  ;;  %1709 = vmatpush.bf16.msrb.mxu0 %v7827_v59  ;;  %v389_v7 = vld [vmem:[%s8200_s25 + $0x2c] sm:$0x1]  ;;  %v563_v59 = vunpack.c.l.b16 %v395_v50  ;;  %v661_v16 = vor.u32 %v660_v6, %v656_v4  ;;  %v401_v50 = vld [vmem:[%s8200_s25 + $0x5c] sm:$0x1]  ;;  %v7824_v4 = vld [vmem:[%s11015_s1 + $0x110] sm:$0xff] }
  0x36   : > { %v565_v63 = vunpack.c.l.b16 %v401_v50  ;;  %v7823_v50 = vld [vmem:[%s11015_s1 + $0x108] sm:$0xff] }
  0x37   : > { %v581_v62 = vpack.c.b16 %v563_v59, %v563_v59  ;;  %v573_v59 = vunpack.c.l.b16 %v425_v49  ;;  %v7818_v49 = vld [vmem:[%s11015_s1 + $0xe0] sm:$0xff] }
  0x38   : > { %v583_v6 = vpack.c.b16 %v565_v63, %v565_v63 }
  0x39   : > { %7971 = vmatpush.bf16.msrb.mxu3 %v8208_v10  ;;  %v8337_v10 = vsel %vm594_vm0, %v625_v1, %v629_v3  ;;  %1710 = vmatpush.bf16.msrb.mxu0 %v7826_v34  ;;  %v756_v1 = vrot.slane %v754_v60, 1  ;;  %v766_v34 = vshll.u32 %v8333_v9, 16 }
  0x3a   : > { %11103 = vst [vmem:[#allocation8_spill] sm:$0xff] %v8337_v10 }
  0x3c   : > { %1107 = vmatmul.bf16.gmra.mxu0 %v8291_v41  ;;  %1167 = vmatmul.bf16.gmra.mxu3 %v8306_v54 }
  0x3d   : > { %7972 = vmatpush.bf16.msrb.mxu3 %v8226_v14  ;;  %v561_v14 = vunpack.c.l.b16 %v389_v7  ;;  %1711 = vmatpush.bf16.msrb.mxu0 %v7825_v61  ;;  %v663_v7 = vshll.u32 %v581_v62, 16 }
  0x3e   : > { %1196 = vmatmul.bf16.gmra.mxu1 %v8309_v55  ;;  %1285 = vmatmul.bf16.gmra.mxu2 %v8312_v56 }
  0x3f   : > { %v665_v17 = vrot.slane %v663_v7, 1 }
  0x41   : > { %7973 = vmatpush.bf16.msrb.mxu3 %v8242_v19  ;;  %v8423_v26 = vsel %vm594_vm0, %v661_v16, %v665_v17  ;;  %1712 = vmatpush.bf16.msrb.mxu0 %v7824_v4 }
  0x42   : > { %11111 = vst [vmem:[#allocation16_spill] sm:$0xff] %v8423_v26 }
  0x45   : > { %7974 = vmatpush.bf16.msrb.mxu3 %v8257_v24  ;;  %1713 = vmatpush.bf16.msrb.mxu0 %v7823_v50 }
  0x49   : > { %7975 = vmatpush.bf16.msrb.mxu3 %v8272_v30 }
  0x4c   : > { %1112 = vmatmul.bf16.gmra.mxu0 %v8315_v57  ;;  %1172 = vmatmul.bf16.gmra.mxu3 %v8333_v9 }
  0x4d   : > { %7976 = vmatpush.bf16.msra.mxu3 %v8162_v2  ;;  %v579_v2 = vpack.c.b16 %v561_v14, %v561_v14  ;;  %v757_v14 = vor.u32 %v756_v1, %v752_v0  ;;  %v8461_v0 = vpack.c.b16 %v573_v59, %v573_v59  ;;  %v778_v1 = vshll.u32 %v8358_v28, 16 }
  0x4e   : > { %1201 = vmatmul.bf16.gmra.mxu1 %v8337_v10  ;;  %1290 = vmatmul.bf16.gmra.mxu2 %v8340_v12  ;;  %v866_v59 = vrot.slane %v8284_v38, 1 }
  0x4f   : > { %v639_v19 = vshll.u32 %v579_v2, 16  ;;  %v840_v24 = vrot.slane %v579_v2, 1  ;;  %v783_v16 = vshll.u32 %v8461_v0, 16 }
  0x51   : > { %7977 = vmatpush.bf16.msra.mxu3 %v8179_v5  ;;  %v641_v22 = vrot.slane %v639_v19, 1  ;;  %v8364_v30 = vsel %vm829_vm1, %v839_v23, %v840_v24  ;;  %v846_v19 = vrot.slane %v581_v62, 1  ;;  %v8455_v62 = vld [vmem:[%s8200_s25 + $0x54] sm:$0xff] }
  0x52   : > { %11106 = vst [vmem:[#allocation11_spill] sm:$0xff] %v8364_v30  ;;  %v682_v7 = vshll.u32 %v8455_v62, 16  ;;  %v680_v17 = vshrl.u32 %v8455_v62, 16 }
  0x53   : > { %v8361_v5 = vsel %vm594_vm0, %v637_v21, %v641_v22  ;;  %v422_v21 = vld [vmem:[%s8200_s25 + $0xb0] sm:$0x1] }
  0x54   : > { %11105 = vst [vmem:[#allocation10_spill] sm:$0xff] %v8361_v5  ;;  %v398_v22 = vld [vmem:[%s8200_s25 + $0x50] sm:$0x1]  ;;  %v572_v24 = vunpack.c.l.b16 %v422_v21 }
  0x55   : > { %7978 = vmatpush.bf16.msra.mxu3 %v8195_v8  ;;  %v562_v8 = vunpack.c.l.b16 %v392_v27  ;;  %v8426_v27 = vsel %vm829_vm1, %v845_v18, %v846_v19  ;;  %v684_v18 = vrot.slane %v682_v7, 1  ;;  %v687_v19 = vshll.u32 %v583_v6, 16  ;;  %v7820_v21 = vld [vmem:[%s11015_s1 + $0xf0] sm:$0xff] }
  0x56   : > { %11112 = vst [vmem:[#allocation17_spill] sm:$0xff] %v8426_v27  ;;  %v8435_v33 = vpack.c.b16 %v572_v24, %v572_v24  ;;  %v785_v24 = vrot.slane %v783_v16, 1  ;;  %v407_v7 = vld [vmem:[%s8200_s25 + $0x74] sm:$0x1] }
  0x57   : > { %v580_v35 = vpack.c.b16 %v562_v8, %v562_v8  ;;  %v564_v8 = vunpack.c.l.b16 %v398_v22 }
  0x59   : > { %7979 = vmatpush.bf16.msra.mxu3 %v8215_v11  ;;  %v8374_v11 = vpack.c.b16 %v570_v29, %v570_v29  ;;  %v651_v43 = vshll.u32 %v580_v35, 16  ;;  %v843_v48 = vrot.slane %v580_v35, 1  ;;  %v8429_v29 = vld [vmem:[%s8200_s25 + $0x48] sm:$0xff]  ;;  %v582_v35 = vpack.c.b16 %v564_v8, %v564_v8 }
  0x5a   : > { %v670_v36 = vshll.u32 %v8429_v29, 16  ;;  %v668_v40 = vshrl.u32 %v8429_v29, 16  ;;  %v685_v8 = vor.u32 %v684_v18, %v680_v17  ;;  %v567_v18 = vunpack.c.l.b16 %v407_v7 }
  0x5b   : > { %v747_v39 = vshll.u32 %v8374_v11, 16  ;;  %v653_v47 = vrot.slane %v651_v43, 1  ;;  %v675_v43 = vshll.u32 %v582_v35, 16  ;;  %v867_v63 = vrot.slane %v8374_v11, 1  ;;  %v8520_v11 = vld [vmem:[%s8200_s25 + $0x6c] sm:$0xff] }
  0x5c   : > { %1117 = vmatmul.bf16.gmra.mxu0 %v8343_v13  ;;  %1177 = vmatmul.bf16.gmra.mxu3 %v8358_v28  ;;  %v672_v42 = vrot.slane %v670_v36, 1  ;;  %v852_v36 = vrot.slane %v583_v6, 1 }
  0x5d   : > { %7980 = vmatpush.bf16.msra.mxu3 %v8231_v15  ;;  %v740_v15 = vshrl.u32 %v8284_v38, 16  ;;  %v749_v45 = vrot.slane %v747_v39, 1  ;;  %v8394_v53 = vsel %vm594_vm0, %v649_v46, %v653_v47  ;;  %v771_v39 = vshll.u32 %v8435_v33, 16 }
  0x5e   : > { %1206 = vmatmul.bf16.gmra.mxu1 %v8361_v5  ;;  %1295 = vmatmul.bf16.gmra.mxu2 %v8364_v30  ;;  %11108 = vst [vmem:[#allocation13_spill] sm:$0xff] %v8394_v53  ;;  %v673_v46 = vor.u32 %v672_v42, %v668_v40  ;;  %v677_v47 = vrot.slane %v675_v43, 1  ;;  %v8489_v42 = vld [vmem:[%s8200_s25 + $0x60] sm:$0xff] }
  0x5f   : > { %v745_v44 = vor.u32 %v744_v37, %v740_v15  ;;  %v764_v15 = vshrl.u32 %v8333_v9, 16  ;;  %v768_v37 = vrot.slane %v766_v34, 1  ;;  %v689_v34 = vrot.slane %v687_v19, 1 }
  0x60   : > { %v8449_v60 = vsel %vm594_vm0, %v673_v46, %v677_v47  ;;  %v694_v46 = vshll.u32 %v8489_v42, 16  ;;  %v692_v47 = vshrl.u32 %v8489_v42, 16  ;;  %v854_v4 = vrot.slane %v8489_v42, 1 }
  0x61   : > { %7981 = vmatpush.bf16.msra.mxu3 %v8247_v20  ;;  %v842_v20 = vrot.slane %v8367_v32, 1  ;;  %v8391_v51 = vsel %vm594_vm0, %v745_v44, %v749_v45  ;;  %v769_v44 = vor.u32 %v768_v37, %v764_v15  ;;  %v773_v45 = vrot.slane %v771_v39, 1  ;;  %11114 = vst [vmem:[#allocation19_spill] sm:$0xff] %v8449_v60  ;;  %v404_v15 = vld [vmem:[%s8200_s25 + $0x68] sm:$0x1] }
  0x62   : > { %11107 = vst [vmem:[#allocation12_spill] sm:$0xff] %v8391_v51  ;;  %v8483_v39 = vsel %vm594_vm0, %v685_v8, %v689_v34  ;;  %v566_v43 = vunpack.c.l.b16 %v404_v15  ;;  %v706_v8 = vshll.u32 %v8520_v11, 16 }
  0x63   : > { %11117 = vst [vmem:[#allocation22_spill] sm:$0xff] %v8483_v39 }
  0x65   : > { %7982 = vmatpush.bf16.msra.mxu3 %v8262_v25  ;;  %v8397_v25 = vsel %vm829_vm1, %v842_v20, %v843_v48  ;;  %v848_v20 = vrot.slane %v8429_v29, 1  ;;  %v849_v48 = vrot.slane %v582_v35, 1  ;;  %v851_v35 = vrot.slane %v8455_v62, 1 }
  0x66   : > { %11109 = vst [vmem:[#allocation14_spill] sm:$0xff] %v8397_v25 }
  0x67   : > { %v8452_v61 = vsel %vm829_vm1, %v848_v20, %v849_v48  ;;  %v8486_v40 = vsel %vm829_vm1, %v851_v35, %v852_v36  ;;  %v696_v20 = vrot.slane %v694_v46, 1  ;;  %v708_v46 = vrot.slane %v706_v8, 1  ;;  %v7835_v8 = vld [vmem:[%s11015_s1 + $0x168] sm:$0xff] }
  0x68   : > { %11115 = vst [vmem:[#allocation20_spill] sm:$0xff] %v8452_v61 }
  0x69   : > { %7983 = vmatpush.bf16.msra.mxu3 %v8277_v31  ;;  %v8406_v31 = vpack.c.b16 %v571_v52, %v571_v52  ;;  %v8446_v52 = vsel %vm594_vm0, %v769_v44, %v773_v45  ;;  %v7819_v44 = vld [vmem:[%s11015_s1 + $0xe8] sm:$0xff]  ;;  %v584_v45 = vpack.c.b16 %v566_v43, %v566_v43  ;;  %v7845_v43 = vld [vmem:[%s11015_s1 + $0x1b8] sm:$0xff] }
  0x6a   : > { %11113 = vst [vmem:[#allocation18_spill] sm:$0xff] %v8446_v52  ;;  %2174 = vmatpush.bf16.msrb.mxu2 %v7845_v43 }
  0x6b   : > { %v759_v3 = vshll.u32 %v8406_v31, 16  ;;  %v699_v48 = vshll.u32 %v584_v45, 16  ;;  %v855_v6 = vrot.slane %v584_v45, 1  ;;  %v704_v45 = vshrl.u32 %v8520_v11, 16 }
  0x6c   : > { %1122 = vmatmul.bf16.gmra.mxu0 %v8367_v32  ;;  %1251 = vmatmul.bf16.vlgmr.msrb.gmra.mxu3 %v8391_v51  ;;  %v870_v50 = vrot.slane %v8406_v31, 1 }
  0x6d   : > { %v761_v2 = vrot.slane %v759_v3, 1  ;;  %v7821_v3 = vld [vmem:[%s11015_s1 + $0xf8] sm:$0xff]  ;;  %v8517_v38 = vsel %vm829_vm1, %v854_v4, %v855_v6  ;;  %v410_v6 = vld [vmem:[%s8200_s25 + $0x80] sm:$0x1] }
  0x6e   : > { %1211 = vmatmul.bf16.gmra.mxu1 %v8394_v53  ;;  %1300 = vmatmul.bf16.gmra.mxu2 %v8397_v25 }
  0x6f   : > { %v8420_v23 = vsel %vm594_vm0, %v757_v14, %v761_v2  ;;  %1618 = vmatpush.bf16.msrb.mxu3 %v7821_v3  ;;  %v776_v14 = vshrl.u32 %v8358_v28, 16  ;;  %v780_v2 = vrot.slane %v778_v1, 1  ;;  %v697_v1 = vor.u32 %v696_v20, %v692_v47 }
  0x70   : > { %11110 = vst [vmem:[#allocation15_spill] sm:$0xff] %v8420_v23  ;;  %v701_v3 = vrot.slane %v699_v48, 1  ;;  %v7816_v48 = vld [vmem:[%s11015_s1 + $0xd0] sm:$0xff] }
  0x71   : > { %v781_v22 = vor.u32 %v780_v2, %v776_v14  ;;  %v8511_v2 = vsel %vm829_vm1, %v866_v59, %v867_v63  ;;  %v709_v59 = vor.u32 %v708_v46, %v704_v45 }
  0x72   : > { %11118 = vst [vmem:[#allocation23_spill] sm:$0xff] %v8511_v2  ;;  %v8514_v17 = vsel %vm594_vm0, %v697_v1, %v701_v3  ;;  %v857_v1 = vrot.slane %v8520_v11, 1 }
  0x73   : > { %1619 = vmatpush.bf16.msrb.mxu3 %v7820_v21  ;;  %v8480_v37 = vsel %vm594_vm0, %v781_v22, %v785_v24  ;;  %11119 = vst [vmem:[#allocation24_spill] sm:$0xff] %v8514_v17  ;;  %v7817_v21 = vld [vmem:[%s11015_s1 + $0xd8] sm:$0xff]  ;;  %v585_v24 = vpack.c.b16 %v567_v18, %v567_v18 }
  0x74   : > { %11116 = vst [vmem:[#allocation21_spill] sm:$0xff] %v8480_v37  ;;  %v7837_v22 = vld [vmem:[%s11015_s1 + $0x178] sm:$0xff] }
  0x75   : > { %1796 = vmatpush.bf16.msrb.mxu1 %v7837_v22  ;;  %v711_v47 = vshll.u32 %v585_v24, 16  ;;  %v858_v3 = vrot.slane %v585_v24, 1  ;;  %v568_v22 = vunpack.c.l.b16 %v410_v6  ;;  %v7814_v6 = vld [vmem:[%s11015_s1 + $0xc0] sm:$0xff] }
  0x77   : > { %1620 = vmatpush.bf16.msrb.mxu3 %v7819_v44  ;;  %v713_v63 = vrot.slane %v711_v47, 1  ;;  %v586_v43 = vpack.c.b16 %v568_v22, %v568_v22  ;;  %v7834_v47 = vld [vmem:[%s11015_s1 + $0x160] sm:$0xff] }
  0x79   : > { %v8561_v18 = vsel %vm594_vm0, %v709_v59, %v713_v63 }
  0x7a   : > { %11121 = vst [vmem:[#allocation26_spill] sm:$0xff] %v8561_v18 }
  0x7b   : > { %1621 = vmatpush.bf16.msrb.mxu3 %v7818_v49  ;;  %v869_v49 = vrot.slane %v8306_v54, 1 }
  0x7c   : > { %1127 = vmatmul.bf16.gmra.mxu0 %v8400_v58  ;;  %1256 = vmatmul.bf16.gmra.mxu3 %v8420_v23 }
  0x7d   : > { %v8558_v54 = vsel %vm829_vm1, %v869_v49, %v870_v50 }
  0x7e   : > { %1216 = vmatmul.bf16.gmra.mxu1 %v8423_v26  ;;  %1305 = vmatmul.bf16.gmra.mxu2 %v8426_v27  ;;  %11120 = vst [vmem:[#allocation25_spill] sm:$0xff] %v8558_v54 }
  0x7f   : > { %1622 = vmatpush.bf16.msrb.mxu3 %v7817_v21  ;;  %v8567_v21 = vld [vmem:[%s8200_s25 + $0x78] sm:$0xff] }
  0x80   : > { %v716_v59 = vshrl.u32 %v8567_v21, 16 }
  0x83   : > { %1623 = vmatpush.bf16.msrb.mxu3 %v7816_v48 }
  0x8c   : > { %1132 = vmatmul.bf16.gmra.mxu0 %v8429_v29  ;;  %1261 = vmatmul.bf16.gmra.mxu3 %v8446_v52 }
  0x8e   : > { %1221 = vmatmul.bf16.gmra.mxu1 %v8449_v60  ;;  %1310 = vmatmul.bf16.gmra.mxu2 %v8452_v61 }
  0x9c   : > { %1137 = vmatmul.bf16.gmra.mxu0 %v8455_v62  ;;  %1266 = vmatmul.bf16.gmra.mxu3 %v8480_v37 }
  0x9e   : > { %1226 = vmatmul.bf16.gmra.mxu1 %v8483_v39  ;;  %1315 = vmatmul.bf16.gmra.mxu2 %v8486_v40 }
  0xa9   : > { %v1103_v14 = vpop.f32.mrf.mxu0 }
  0xab   : > { %v1192_v16 = vpop.f32.mrf.mxu1 }
  0xac   : > { %v1193_v19 = vadd.f32 %v1192_v16, %v1103_v14  ;;  %1142 = vmatmul.bf16.gmra.mxu0 %v8489_v42  ;;  %1340 = vmatmul.bf16.vlgmr.msra.gmra.mxu3 %v8511_v2  ;;  %v7836_v14 = vld [vmem:[%s11015_s1 + $0x170] sm:$0xff] }
  0xad   : > { %1797 = vmatpush.bf16.msrb.mxu1 %v7836_v14  ;;  %v7833_v14 = vld [vmem:[%s11015_s1 + $0x158] sm:$0xff] }
  0xae   : > { %1231 = vmatmul.bf16.gmra.mxu1 %v8514_v17  ;;  %1320 = vmatmul.bf16.gmra.mxu2 %v8517_v38 }
  0xaf   : > { %v8533_v34 = vpop.f32.mrf.mxu3 }
  0xb1   : > { %v1281_v35 = vpop.f32.mrf.mxu2  ;;  %v1105_v15 = vpop.f32.mrf.mxu0  ;;  %1798 = vmatpush.bf16.msrb.mxu1 %v7835_v8  ;;  %v860_v8 = vrot.slane %v8567_v21, 1 }
  0xb2   : > { %v8535_v36 = vadd.f32 %v1281_v35, %v1193_v19  ;;  %v8564_v19 = vsel %vm829_vm1, %v857_v1, %v858_v3  ;;  %v7815_v35 = vld [vmem:[%s11015_s1 + $0xc8] sm:$0xff]  ;;  %v723_v1 = vshll.u32 %v586_v43, 16 }
  0xb3   : > { %v1194_v44 = vpop.f32.mrf.mxu1  ;;  %11122 = vst [vmem:[#allocation27_spill] sm:$0xff] %v8564_v19  ;;  %1624 = vmatpush.bf16.msrb.mxu3 %v7815_v35  ;;  %v861_v35 = vrot.slane %v586_v43, 1 }
  0xb4   : > { %v8541_v20 = vadd.f32 %v1194_v44, %v1105_v15  ;;  %v7822_v15 = vld [vmem:[%s11015_s1 + $0x100] sm:$0xff]  ;;  %v718_v44 = vshll.u32 %v8567_v21, 16 }
  0xb5   : > { %1714 = vmatpush.bf16.msrb.mxu0 %v7822_v15  ;;  %1799 = vmatpush.bf16.msrb.mxu1 %v7834_v47  ;;  %v7832_v47 = vld [vmem:[%s11015_s1 + $0x150] sm:$0xff] }
  0xb6   : > { %v720_v63 = vrot.slane %v718_v44, 1  ;;  %v413_v44 = vld [vmem:[%s8200_s25 + $0x8c] sm:$0x1] }
  0xb7   : > { %v8549_v4 = vpop.f32.mrf.mxu3  ;;  %1625 = vmatpush.bf16.msrb.mxu3 %v7814_v6 }
  0xb8   : > { %v721_v22 = vor.u32 %v720_v63, %v716_v59  ;;  %v8620_v59 = vsel %vm829_vm1, %v860_v8, %v861_v35  ;;  %v8623_v63 = vld [vmem:[%s8200_s25 + $0x84] sm:$0xff] }
  0xb9   : > { %v8552_v7 = vpop.f32.mrf.mxu2  ;;  %v1108_v16 = vpop.f32.mrf.mxu0  ;;  %1800 = vmatpush.bf16.msrb.mxu1 %v7833_v14  ;;  %v7853_v14 = vld [vmem:[%s11015_s1 + $0x1f8] sm:$0xff]  ;;  %v7830_v35 = vld [vmem:[%s11015_s1 + $0x140] sm:$0xff]  ;;  %v863_v52 = vrot.slane %v8623_v63, 1 }
  0xbb   : > { %v1197_v31 = vpop.f32.mrf.mxu1  ;;  %2263 = vmatpush.bf16.msra.mxu3 %v7853_v14  ;;  %v7861_v14 = vld [vmem:[%s11015_s1 + $0x238] sm:$0xff] }
  0xbc   : > { %v1198_v24 = vadd.f32 %v1197_v31, %v1108_v16  ;;  %1147 = vmatmul.bf16.gmra.mxu0 %v8520_v11  ;;  %1345 = vmatmul.bf16.gmra.mxu3 %v8558_v54  ;;  %v872_v16 = vrot.slane %v8333_v9, 1  ;;  %v873_v31 = vrot.slane %v8435_v33, 1 }
  0xbd   : > { %1801 = vmatpush.bf16.msrb.mxu1 %v7832_v47  ;;  %2352 = vmatpush.bf16.msra.mxu0 %v7861_v14 }
  0xbe   : > { %1236 = vmatmul.bf16.gmra.mxu1 %v8561_v18  ;;  %1325 = vmatmul.bf16.gmra.mxu2 %v8564_v19  ;;  %v8611_v33 = vsel %vm829_vm1, %v872_v16, %v873_v31  ;;  %v7831_v16 = vld [vmem:[%s11015_s1 + $0x148] sm:$0xff] }
  0xbf   : > { %v8583_v45 = vpop.f32.mrf.mxu3  ;;  %11123 = vst [vmem:[#allocation28_spill] sm:$0xff] %v8611_v33 }
  0xc1   : > { %v1286_v46 = vpop.f32.mrf.mxu2  ;;  %v1110_v49 = vpop.f32.mrf.mxu0  ;;  %1802 = vmatpush.bf16.msrb.mxu1 %v7831_v16  ;;  %v875_v16 = vrot.slane %v8358_v28, 1 }
  0xc2   : > { %v8588_v48 = vadd.f32 %v1286_v46, %v1198_v24  ;;  %v725_v24 = vrot.slane %v723_v1, 1  ;;  %v569_v1 = vunpack.c.l.b16 %v413_v44 }
  0xc3   : > { %v1199_v50 = vpop.f32.mrf.mxu1 }
  0xc4   : > { %v8591_v3 = vadd.f32 %v1199_v50, %v1110_v49  ;;  %v7844_v49 = vld [vmem:[%s11015_s1 + $0x1b0] sm:$0xff]  ;;  %v8617_v43 = vsel %vm594_vm0, %v721_v22, %v725_v24  ;;  %v587_v31 = vpack.c.b16 %v569_v1, %v569_v1  ;;  %v730_v22 = vshll.u32 %v8623_v63, 16 }
  0xc5   : > { %11124 = vst [vmem:[#allocation29_spill] sm:$0xff] %v8617_v43  ;;  %2175 = vmatpush.bf16.msrb.mxu2 %v7844_v49  ;;  %v728_v49 = vshrl.u32 %v8623_v63, 16  ;;  %1803 = vmatpush.bf16.msrb.mxu1 %v7830_v35 }
  0xc6   : > { %v735_v37 = vshll.u32 %v587_v31, 16  ;;  %v864_v54 = vrot.slane %v587_v31, 1 }
  0xc7   : > { %v8602_v15 = vpop.f32.mrf.mxu3 }
  0xc8   : > { %v8663_v28 = vsel %vm829_vm1, %v863_v52, %v864_v54  ;;  %v7843_v52 = vld [vmem:[%s11015_s1 + $0x1a8] sm:$0xff] }
  0xc9   : > { %v8605_v46 = vpop.f32.mrf.mxu2  ;;  %v1113_v9 = vpop.f32.mrf.mxu0  ;;  %2176 = vmatpush.bf16.msrb.mxu2 %v7843_v52 }
  0xcb   : > { %v1202_v50 = vpop.f32.mrf.mxu1 }
  0xcc   : > { %v1203_v6 = vadd.f32 %v1202_v50, %v1113_v9  ;;  %1152 = vmatmul.bf16.gmra.mxu0 %v8567_v21  ;;  %1350 = vmatmul.bf16.gmra.mxu3 %v8611_v33  ;;  %v732_v50 = vrot.slane %v730_v22, 1  ;;  %v876_v33 = vrot.slane %v8461_v0, 1 }
  0xce   : > { %1241 = vmatmul.bf16.gmra.mxu1 %v8617_v43  ;;  %1330 = vmatmul.bf16.gmra.mxu2 %v8620_v59 }
  0xcf   : > { %v8636_v24 = vpop.f32.mrf.mxu3 }
  0xd1   : > { %v1291_v8 = vpop.f32.mrf.mxu2  ;;  %v1115_v47 = vpop.f32.mrf.mxu0 }
  0xd2   : > { %v8641_v44 = vadd.f32 %v1291_v8, %v1203_v6  ;;  %v733_v6 = vor.u32 %v732_v50, %v728_v49  ;;  %v737_v8 = vrot.slane %v735_v37, 1 }
  0xd3   : > { %v1204_v9 = vpop.f32.mrf.mxu1 }
  0xd4   : > { %v8644_v1 = vadd.f32 %v1204_v9, %v1115_v47  ;;  %v8657_v47 = vsel %vm829_vm1, %v875_v16, %v876_v33  ;;  %v8660_v2 = vsel %vm594_vm0, %v733_v6, %v737_v8 }
  0xd5   : > { %11125 = vst [vmem:[#allocation30_spill] sm:$0xff] %v8657_v47 }
  0xd6   : > { %11126 = vst [vmem:[#allocation31_spill] sm:$0xff] %v8660_v2 }
  0xd7   : > { %v8652_v23 = vpop.f32.mrf.mxu3 }
  0xd9   : > { %v8654_v22 = vpop.f32.mrf.mxu2  ;;  %v1118_v35 = vpop.f32.mrf.mxu0 }
  0xdb   : > { %v1207_v9 = vpop.f32.mrf.mxu1 }
  0xdc   : > { %v1208_v0 = vadd.f32 %v1207_v9, %v1118_v35  ;;  %1157 = vmatmul.bf16.gmra.mxu0 %v8623_v63  ;;  %1355 = vmatmul.bf16.gmra.mxu3 %v8657_v47  ;;  %v7852_v9 = vld [vmem:[%s11015_s1 + $0x1f0] sm:$0xff] }
  0xdd   : > { %2264 = vmatpush.bf16.msra.mxu3 %v7852_v9 }
  0xde   : > { %1246 = vmatmul.bf16.gmra.mxu1 %v8660_v2  ;;  %1335 = vmatmul.bf16.gmra.mxu2 %v8663_v28 }
  0xdf   : > { %v8669_v37 = vpop.f32.mrf.mxu3 }
  0xe1   : > { %v1296_v33 = vpop.f32.mrf.mxu2  ;;  %v1120_v49 = vpop.f32.mrf.mxu0 }
  0xe2   : > { %v8671_v31 = vadd.f32 %v1296_v33, %v1208_v0 }
  0xe3   : > { %v1209_v54 = vpop.f32.mrf.mxu1 }
  0xe4   : > { %v8676_v50 = vadd.f32 %v1209_v54, %v1120_v49 }
  0xe7   : > { %v8678_v14 = vpop.f32.mrf.mxu3 }
  0xe9   : > { %v8680_v16 = vpop.f32.mrf.mxu2  ;;  %v1123_v6 = vpop.f32.mrf.mxu0 }
  0xeb   : > { %v1212_v8 = vpop.f32.mrf.mxu1 }
  0xec   : > { %v1213_v35 = vadd.f32 %v1212_v8, %v1123_v6  ;;  %1626 = vmatmul.bf16.vlgmr.msrb.gmra.mxu3 %v8291_v41  ;;  %1715 = vmatmul.bf16.vlgmr.msrb.gmra.mxu0 %v8309_v55  ;;  %v7860_v41 = vld [vmem:[%s11015_s1 + $0x230] sm:$0xff] }
  0xed   : > { %2353 = vmatpush.bf16.msra.mxu0 %v7860_v41 }
  0xee   : > { %1804 = vmatmul.bf16.vlgmr.msrb.gmra.mxu1 %v8312_v56 }
  0xef   : > { %v1252_v0 = vpop.f32.mrf.mxu3 }
  0xf0   : > { %v8689_v33 = vadd.f32 %v1252_v0, %v8533_v34 }
  0xf1   : > { %v1301_v49 = vpop.f32.mrf.mxu2  ;;  %v1125_v54 = vpop.f32.mrf.mxu0 }
  0xf2   : > { %v8691_v52 = vadd.f32 %v1301_v49, %v1213_v35  ;;  %v7842_v35 = vld [vmem:[%s11015_s1 + $0x1a0] sm:$0xff] }
  0xf3   : > { %v1214_v6 = vpop.f32.mrf.mxu1  ;;  %2177 = vmatpush.bf16.msrb.mxu2 %v7842_v35 }
  0xf4   : > { %v8693_v8 = vadd.f32 %v1214_v6, %v1125_v54 }
  0xf6   : > { %11127 = vst [vmem:[#allocation32_spill] sm:$0xff] %v8693_v8 }
  0xf7   : > { %v1254_v55 = vpop.f32.mrf.mxu3 }
  0xf8   : > { %v8699_v56 = vadd.f32 %v1254_v55, %v8549_v4 }
  0xf9   : > { %v8701_v9 = vpop.f32.mrf.mxu2  ;;  %v1128_v34 = vpop.f32.mrf.mxu0 }
  0xfa   : > { %11128 = vst [vmem:[#allocation33_spill] sm:$0xff] %v8701_v9 }
  0xfb   : > { %v1217_v0 = vpop.f32.mrf.mxu1 }
  0xfc   : > { %v1218_v49 = vadd.f32 %v1217_v0, %v1128_v34  ;;  %1631 = vmatmul.bf16.gmra.mxu3 %v8315_v57  ;;  %1720 = vmatmul.bf16.gmra.mxu0 %v8337_v10 }
  0xfe   : > { %1809 = vmatmul.bf16.gmra.mxu1 %v8340_v12 }
  0xff   : > { %v1257_v54 = vpop.f32.mrf.mxu3 }
 0x100   : > { %v8710_v55 = vadd.f32 %v1257_v54, %v8583_v45  ;;  %v7851_v45 = vld [vmem:[%s11015_s1 + $0x1e8] sm:$0xff] }
 0x101   : > { %v1306_v4 = vpop.f32.mrf.mxu2  ;;  %v1130_v41 = vpop.f32.mrf.mxu0  ;;  %2265 = vmatpush.bf16.msra.mxu3 %v7851_v45 }
 0x102   : > { %v8712_v6 = vadd.f32 %v1306_v4, %v1218_v49 }
 0x103   : > { %v1219_v47 = vpop.f32.mrf.mxu1 }
 0x104   : > { %v8714_v9 = vadd.f32 %v1219_v47, %v1130_v41 }
 0x107   : > { %v1259_v8 = vpop.f32.mrf.mxu3 }
 0x108   : > { %v8717_v34 = vadd.f32 %v1259_v8, %v8602_v15 }
 0x109   : > { %v8719_v35 = vpop.f32.mrf.mxu2  ;;  %v1133_v0 = vpop.f32.mrf.mxu0 }
 0x10b   : > { %v1222_v10 = vpop.f32.mrf.mxu1 }
 0x10c   : > { %v1223_v12 = vadd.f32 %v1222_v10, %v1133_v0  ;;  %1636 = vmatmul.bf16.gmra.mxu3 %v8343_v13  ;;  %1725 = vmatmul.bf16.gmra.mxu0 %v8361_v5  ;;  %v7841_v10 = vld [vmem:[%s11015_s1 + $0x198] sm:$0xff]  ;;  %v7859_v0 = vld [vmem:[%s11015_s1 + $0x228] sm:$0xff] }
 0x10d   : > { %2178 = vmatpush.bf16.msrb.mxu2 %v7841_v10  ;;  %2354 = vmatpush.bf16.msra.mxu0 %v7859_v0 }
 0x10e   : > { %1814 = vmatmul.bf16.gmra.mxu1 %v8364_v30 }
 0x10f   : > { %v1262_v47 = vpop.f32.mrf.mxu3 }
 0x110   : > { %v8728_v15 = vadd.f32 %v1262_v47, %v8636_v24 }
 0x111   : > { %v1311_v8 = vpop.f32.mrf.mxu2  ;;  %v1135_v54 = vpop.f32.mrf.mxu0 }
 0x112   : > { %v8730_v49 = vadd.f32 %v1311_v8, %v1223_v12 }
 0x113   : > { %v1224_v4 = vpop.f32.mrf.mxu1 }
 0x114   : > { %v8735_v41 = vadd.f32 %v1224_v4, %v1135_v54 }
 0x117   : > { %v1264_v45 = vpop.f32.mrf.mxu3 }
 0x118   : > { %v8741_v24 = vadd.f32 %v1264_v45, %v8652_v23 }
 0x119   : > { %v8743_v12 = vpop.f32.mrf.mxu2  ;;  %v1138_v47 = vpop.f32.mrf.mxu0 }
 0x11a   : > { %11129 = vst [vmem:[#allocation34_spill] sm:$0xff] %v8743_v12 }
 0x11b   : > { %v1227_v8 = vpop.f32.mrf.mxu1 }
 0x11c   : > { %v1228_v30 = vadd.f32 %v1227_v8, %v1138_v47  ;;  %1641 = vmatmul.bf16.gmra.mxu3 %v8367_v32  ;;  %1730 = vmatmul.bf16.gmra.mxu0 %v8394_v53 }
 0x11e   : > { %1819 = vmatmul.bf16.gmra.mxu1 %v8397_v25  ;;  %v7840_v25 = vld [vmem:[%s11015_s1 + $0x190] sm:$0xff] }
 0x11f   : > { %v1267_v54 = vpop.f32.mrf.mxu3  ;;  %2179 = vmatpush.bf16.msrb.mxu2 %v7840_v25 }
 0x120   : > { %v8749_v10 = vadd.f32 %v1267_v54, %v8669_v37 }
 0x121   : > { %v1316_v4 = vpop.f32.mrf.mxu2  ;;  %v1140_v23 = vpop.f32.mrf.mxu0 }
 0x122   : > { %v8751_v0 = vadd.f32 %v1316_v4, %v1228_v30  ;;  %v7850_v30 = vld [vmem:[%s11015_s1 + $0x1e0] sm:$0xff] }
 0x123   : > { %v1229_v45 = vpop.f32.mrf.mxu1  ;;  %2266 = vmatpush.bf16.msra.mxu3 %v7850_v30 }
 0x124   : > { %v8753_v5 = vadd.f32 %v1229_v45, %v1140_v23 }
 0x127   : > { %v1269_v12 = vpop.f32.mrf.mxu3 }
 0x128   : > { %v8756_v47 = vadd.f32 %v1269_v12, %v8678_v14 }
 0x129   : > { %v8758_v8 = vpop.f32.mrf.mxu2  ;;  %v1143_v53 = vpop.f32.mrf.mxu0 }
 0x12a   : > { %11130 = vst [vmem:[#allocation35_spill] sm:$0xff] %v8758_v8 }
 0x12b   : > { %v1232_v37 = vpop.f32.mrf.mxu1 }
 0x12c   : > { %v1233_v54 = vadd.f32 %v1232_v37, %v1143_v53  ;;  %1646 = vmatmul.bf16.gmra.mxu3 %v8400_v58  ;;  %1735 = vmatmul.bf16.gmra.mxu0 %v8423_v26  ;;  %v7858_v37 = vld [vmem:[%s11015_s1 + $0x220] sm:$0xff] }
 0x12d   : > { %2355 = vmatpush.bf16.msra.mxu0 %v7858_v37 }
 0x12e   : > { %1824 = vmatmul.bf16.gmra.mxu1 %v8426_v27 }
 0x12f   : > { %v1341_v14 = vpop.f32.mrf.mxu3 }
 0x130   : > { %v8770_v4 = vadd.f32 %v1341_v14, %v8689_v33 }
 0x131   : > { %v1321_v12 = vpop.f32.mrf.mxu2  ;;  %v1145_v53 = vpop.f32.mrf.mxu0 }
 0x132   : > { %11131 = vst [vmem:[#allocation36_spill] sm:$0xff] %v8770_v4  ;;  %v8772_v23 = vadd.f32 %v1321_v12, %v1233_v54 }
 0x133   : > { %v1234_v25 = vpop.f32.mrf.mxu1 }
 0x134   : > { %v8774_v45 = vadd.f32 %v1234_v25, %v1145_v53 }
 0x137   : > { %v1343_v26 = vpop.f32.mrf.mxu3 }
 0x138   : > { %v8782_v30 = vadd.f32 %v1343_v26, %v8699_v56  ;;  %v7839_v26 = vld [vmem:[%s11015_s1 + $0x188] sm:$0xff] }
 0x139   : > { %v8779_v8 = vpop.f32.mrf.mxu2  ;;  %v1148_v27 = vpop.f32.mrf.mxu0  ;;  %2180 = vmatpush.bf16.msrb.mxu2 %v7839_v26 }
 0x13a   : > { %11132 = vst [vmem:[#allocation37_spill] sm:$0xff] %v8782_v30 }
 0x13b   : > { %v1237_v33 = vpop.f32.mrf.mxu1 }
 0x13c   : > { %v1238_v14 = vadd.f32 %v1237_v33, %v1148_v27  ;;  %1651 = vmatmul.bf16.gmra.mxu3 %v8429_v29  ;;  %1740 = vmatmul.bf16.gmra.mxu0 %v8449_v60 }
 0x13e   : > { %1829 = vmatmul.bf16.gmra.mxu1 %v8452_v61 }
 0x13f   : > { %v1346_v54 = vpop.f32.mrf.mxu3 }
 0x140   : > { %v8788_v53 = vadd.f32 %v1346_v54, %v8710_v55 }
 0x141   : > { %v1326_v12 = vpop.f32.mrf.mxu2  ;;  %v1150_v37 = vpop.f32.mrf.mxu0 }
 0x142   : > { %11133 = vst [vmem:[#allocation38_spill] sm:$0xff] %v8788_v53  ;;  %v8790_v25 = vadd.f32 %v1326_v12, %v1238_v14  ;;  %v7849_v14 = vld [vmem:[%s11015_s1 + $0x1d8] sm:$0xff] }
 0x143   : > { %v1239_v56 = vpop.f32.mrf.mxu1  ;;  %2267 = vmatpush.bf16.msra.mxu3 %v7849_v14 }
 0x144   : > { %v8795_v27 = vadd.f32 %v1239_v56, %v1150_v37 }
 0x147   : > { %v1348_v33 = vpop.f32.mrf.mxu3 }
 0x148   : > { %v8800_v4 = vadd.f32 %v1348_v33, %v8717_v34 }
 0x149   : > { %v8797_v30 = vpop.f32.mrf.mxu2  ;;  %v1153_v61 = vpop.f32.mrf.mxu0 }
 0x14a   : > { %11134 = vst [vmem:[#allocation39_spill] sm:$0xff] %v8800_v4 }
 0x14b   : > { %v1242_v55 = vpop.f32.mrf.mxu1 }
 0x14c   : > { %v1243_v54 = vadd.f32 %v1242_v55, %v1153_v61  ;;  %1656 = vmatmul.bf16.gmra.mxu3 %v8455_v62  ;;  %1745 = vmatmul.bf16.gmra.mxu0 %v8483_v39  ;;  %v7857_v55 = vld [vmem:[%s11015_s1 + $0x218] sm:$0xff] }
 0x14d   : > { %2356 = vmatpush.bf16.msra.mxu0 %v7857_v55 }
 0x14e   : > { %1834 = vmatmul.bf16.gmra.mxu1 %v8486_v40 }
 0x14f   : > { %v1351_v12 = vpop.f32.mrf.mxu3 }
 0x150   : > { %v8809_v26 = vadd.f32 %v1351_v12, %v8728_v15  ;;  %v7838_v15 = vld [vmem:[%s11015_s1 + $0x180] sm:$0xff] }
 0x151   : > { %v1331_v37 = vpop.f32.mrf.mxu2  ;;  %v1155_v56 = vpop.f32.mrf.mxu0  ;;  %2181 = vmatpush.bf16.msrb.mxu2 %v7838_v15 }
 0x152   : > { %11135 = vst [vmem:[#allocation40_spill] sm:$0xff] %v8809_v26  ;;  %v8811_v34 = vadd.f32 %v1331_v37, %v1243_v54 }
 0x153   : > { %v1244_v61 = vpop.f32.mrf.mxu1 }
 0x154   : > { %v8813_v33 = vadd.f32 %v1244_v61, %v1155_v56  ;;  %2182 = vmatmul.bf16.vlgmr.msrb.gmra.mxu2 %v8315_v57  ;;  %v7848_v57 = vld [vmem:[%s11015_s1 + $0x1d0] sm:$0xff] }
 0x155   : > { %2268 = vmatpush.bf16.msra.mxu3 %v7848_v57 }
 0x157   : > { %v1353_v4 = vpop.f32.mrf.mxu3 }
 0x158   : > { %v8821_v14 = vadd.f32 %v1353_v4, %v8741_v24 }
 0x159   : > { %v8818_v53 = vpop.f32.mrf.mxu2  ;;  %v1158_v54 = vpop.f32.mrf.mxu0 }
 0x15a   : > { %11136 = vst [vmem:[#allocation41_spill] sm:$0xff] %v8821_v14 }
 0x15b   : > { %v1247_v12 = vpop.f32.mrf.mxu1 }
 0x15c   : > { %v1248_v37 = vadd.f32 %v1247_v12, %v1158_v54  ;;  %1661 = vmatmul.bf16.gmra.mxu3 %v8489_v42  ;;  %1750 = vmatmul.bf16.gmra.mxu0 %v8514_v17 }
 0x15e   : > { %1839 = vmatmul.bf16.gmra.mxu1 %v8517_v38 }
 0x15f   : > { %v1356_v56 = vpop.f32.mrf.mxu3 }
 0x160   : > { %v8831_v24 = vadd.f32 %v1356_v56, %v8749_v10  ;;  %v7887_v10 = vld [vmem:[%s11018_s4 + $0x38] sm:$0xff] }
 0x161   : > { %v1336_v61 = vpop.f32.mrf.mxu2  ;;  %v1160_v55 = vpop.f32.mrf.mxu0  ;;  %3964 = vmatpush.bf16.msra.mxu1 %v7887_v10 }
 0x162   : > { %11137 = vst [vmem:[#allocation42_spill] sm:$0xff] %v8831_v24  ;;  %v8833_v4 = vadd.f32 %v1336_v61, %v1248_v37  ;;  %v7895_v37 = vld [vmem:[%s11018_s4 + $0x78] sm:$0xff] }
 0x163   : > { %v1249_v14 = vpop.f32.mrf.mxu1  ;;  %4053 = vmatpush.bf16.msra.mxu2 %v7895_v37 }
 0x164   : > { %v8835_v26 = vadd.f32 %v1249_v14, %v1160_v55  ;;  %2187 = vmatmul.bf16.gmra.mxu2 %v8343_v13 }
 0x167   : > { %v1358_v15 = vpop.f32.mrf.mxu3 }
 0x168   : > { %v8838_v54 = vadd.f32 %v1358_v15, %v8756_v47 }
 0x169   : > { %v1716_v12 = vpop.f32.mrf.mxu0 }
 0x16a   : > { %11138 = vst [vmem:[#allocation43_spill] sm:$0xff] %v8838_v54  ;;  %v7856_v54 = vld [vmem:[%s11015_s1 + $0x210] sm:$0xff] }
 0x16b   : > { %v1805_v17 = vpop.f32.mrf.mxu1  ;;  %2357 = vmatpush.bf16.msra.mxu0 %v7856_v54 }
 0x16c   : > { %1666 = vmatmul.bf16.gmra.mxu3 %v8520_v11  ;;  %1755 = vmatmul.bf16.gmra.mxu0 %v8561_v18 }
 0x16e   : > { %1844 = vmatmul.bf16.gmra.mxu1 %v8564_v19 }
 0x16f   : > { %v1627_v47 = vpop.f32.mrf.mxu3 }
 0x170   : > { %v1717_v14 = vadd.f32 %v1716_v12, %v1627_v47  ;;  %v1284_v12 = vadd.f32 %v8552_v7, %v8541_v20 }
 0x171   : > { %v1718_v56 = vpop.f32.mrf.mxu0 }
 0x172   : > { %v1806_v61 = vadd.f32 %v1805_v17, %v1717_v14 }
 0x173   : > { %v1807_v55 = vpop.f32.mrf.mxu1 }
 0x174   : > { %v8854_v15 = vadd.f32 %v1806_v61, %v8535_v36  ;;  %2192 = vmatmul.bf16.gmra.mxu2 %v8367_v32  ;;  %v7847_v32 = vld [vmem:[%s11015_s1 + $0x1c8] sm:$0xff] }
 0x175   : > { %2269 = vmatpush.bf16.msra.mxu3 %v7847_v32 }
 0x177   : > { %v1629_v13 = vpop.f32.mrf.mxu3 }
 0x178   : > { %v1719_v57 = vadd.f32 %v1718_v56, %v1629_v13 }
 0x179   : > { %v1721_v10 = vpop.f32.mrf.mxu0 }
 0x17a   : > { %v1808_v47 = vadd.f32 %v1807_v55, %v1719_v57  ;;  %v1289_v55 = vadd.f32 %v8605_v46, %v8591_v3 }
 0x17b   : > { %v1810_v24 = vpop.f32.mrf.mxu1 }
 0x17c   : > { %v8861_v19 = vadd.f32 %v1808_v47, %v1284_v12  ;;  %1671 = vmatmul.bf16.gmra.mxu3 %v8567_v21  ;;  %1760 = vmatmul.bf16.gmra.mxu0 %v8617_v43 }
 0x17e   : > { %1849 = vmatmul.bf16.gmra.mxu1 %v8620_v59 }
 0x17f   : > { %v1632_v17 = vpop.f32.mrf.mxu3 }
 0x180   : > { %v1722_v36 = vadd.f32 %v1721_v10, %v1632_v17 }
 0x181   : > { %v1723_v54 = vpop.f32.mrf.mxu0 }
 0x182   : > { %v1811_v14 = vadd.f32 %v1810_v24, %v1722_v36  ;;  %v7894_v24 = vld [vmem:[%s11018_s4 + $0x70] sm:$0xff] }
 0x183   : > { %v1812_v37 = vpop.f32.mrf.mxu1  ;;  %4054 = vmatpush.bf16.msra.mxu2 %v7894_v24 }
 0x184   : > { %v8868_v56 = vadd.f32 %v1811_v14, %v8588_v48  ;;  %v7886_v48 = vld [vmem:[%s11018_s4 + $0x30] sm:$0xff]  ;;  %2197 = vmatmul.bf16.gmra.mxu2 %v8400_v58  ;;  %v7855_v58 = vld [vmem:[%s11015_s1 + $0x208] sm:$0xff] }
 0x185   : > { %3965 = vmatpush.bf16.msra.mxu1 %v7886_v48  ;;  %2358 = vmatpush.bf16.msra.mxu0 %v7855_v58 }
 0x187   : > { %v1634_v20 = vpop.f32.mrf.mxu3 }
 0x188   : > { %v1724_v7 = vadd.f32 %v1723_v54, %v1634_v20  ;;  %v1294_v20 = vadd.f32 %v8654_v22, %v8644_v1 }
 0x189   : > { %v1726_v61 = vpop.f32.mrf.mxu0 }
 0x18a   : > { %v1813_v13 = vadd.f32 %v1812_v37, %v1724_v7 }
 0x18b   : > { %v1815_v57 = vpop.f32.mrf.mxu1 }
 0x18c   : > { %v8872_v12 = vadd.f32 %v1813_v13, %v1289_v55  ;;  %1676 = vmatmul.bf16.gmra.mxu3 %v8623_v63  ;;  %1765 = vmatmul.bf16.gmra.mxu0 %v8660_v2  ;;  %v8898_v13 = vld [vmem:[%s8200_s25 + $0x90] sm:$0xff] }
 0x18e   : > { %1854 = vmatmul.bf16.gmra.mxu1 %v8663_v28 }
 0x18f   : > { %v1637_v3 = vpop.f32.mrf.mxu3 }
 0x190   : > { %v1727_v46 = vadd.f32 %v1726_v61, %v1637_v3 }
 0x191   : > { %v1728_v10 = vpop.f32.mrf.mxu0 }
 0x192   : > { %v1816_v47 = vadd.f32 %v1815_v57, %v1727_v46 }
 0x193   : > { %v1817_v17 = vpop.f32.mrf.mxu1 }
 0x194   : > { %v8888_v36 = vadd.f32 %v1816_v47, %v8641_v44  ;;  %v11139_v44 = vld [vmem:[#allocation23_spill] sm:$0xff]  ;;  %2202 = vmatmul.bf16.gmra.mxu2 %v8429_v29  ;;  %v1299_v47 = vadd.f32 %v8680_v16, %v8676_v50 }
 0x195   : > { %v11140_v29 = vld [vmem:[#allocation15_spill] sm:$0xff] }
 0x197   : > { %v1639_v54 = vpop.f32.mrf.mxu3 }
 0x198   : > { %v1729_v14 = vadd.f32 %v1728_v10, %v1639_v54 }
 0x199   : > { %v1731_v37 = vpop.f32.mrf.mxu0 }
 0x19a   : > { %v1818_v7 = vadd.f32 %v1817_v17, %v1729_v14  ;;  %v8912_v14 = vld [vmem:[%s8200_s25 + $0x9c] sm:$0xff] }
 0x19b   : > { %v1820_v61 = vpop.f32.mrf.mxu1 }
 0x19c   : > { %v8895_v55 = vadd.f32 %v1818_v7, %v1294_v20  ;;  %1681 = vmatmul.bf16.gmra.mxu3 %v8898_v13  ;;  %1770 = vmatmul.bf16.gmra.mxu0 %v8391_v51  ;;  %v11141_v20 = vld [vmem:[#allocation25_spill] sm:$0xff] }
 0x19d   : > { %v7893_v7 = vld [vmem:[%s11018_s4 + $0x68] sm:$0xff] }
 0x19e   : > { %1859 = vmatmul.bf16.gmra.mxu1 %v11139_v44  ;;  %4055 = vmatpush.bf16.msra.mxu2 %v7893_v7 }
 0x19f   : > { %v1642_v57 = vpop.f32.mrf.mxu3 }
 0x1a0   : > { %v1732_v32 = vadd.f32 %v1731_v37, %v1642_v57  ;;  %v7885_v37 = vld [vmem:[%s11018_s4 + $0x28] sm:$0xff] }
 0x1a1   : > { %v1733_v48 = vpop.f32.mrf.mxu0  ;;  %3966 = vmatpush.bf16.msra.mxu1 %v7885_v37  ;;  %v8938_v37 = vld [vmem:[%s8200_s25 + $0xa8] sm:$0xff] }
 0x1a2   : > { %v1821_v3 = vadd.f32 %v1820_v61, %v1732_v32 }
 0x1a3   : > { %v1822_v1 = vpop.f32.mrf.mxu1 }
 0x1a4   : > { %v8905_v22 = vadd.f32 %v1821_v3, %v8671_v31  ;;  %v7846_v31 = vld [vmem:[%s11015_s1 + $0x1c0] sm:$0xff]  ;;  %2207 = vmatmul.bf16.gmra.mxu2 %v8455_v62 }
 0x1a5   : > { %2270 = vmatpush.bf16.msra.mxu3 %v7846_v31  ;;  %v7854_v62 = vld [vmem:[%s11015_s1 + $0x200] sm:$0xff] }
 0x1a6   : > { %2359 = vmatpush.bf16.msra.mxu0 %v7854_v62 }
 0x1a7   : > { %v1644_v46 = vpop.f32.mrf.mxu3 }
 0x1a8   : > { %v1734_v24 = vadd.f32 %v1733_v48, %v1644_v46 }
 0x1a9   : > { %v1736_v10 = vpop.f32.mrf.mxu0 }
 0x1aa   : > { %v1823_v17 = vadd.f32 %v1822_v1, %v1734_v24  ;;  %v11143_v24 = vld [vmem:[#allocation32_spill] sm:$0xff] }
 0x1ab   : > { %v1825_v58 = vpop.f32.mrf.mxu1 }
 0x1ac   : > { %v8909_v54 = vadd.f32 %v1823_v17, %v1299_v47  ;;  %1686 = vmatmul.bf16.gmra.mxu3 %v8912_v14  ;;  %1775 = vmatmul.bf16.gmra.mxu0 %v11140_v29 }
 0x1ae   : > { %1864 = vmatmul.bf16.gmra.mxu1 %v11141_v20 }
 0x1af   : > { %v1647_v50 = vpop.f32.mrf.mxu3 }
 0x1b0   : > { %v1737_v16 = vadd.f32 %v1736_v10, %v1647_v50  ;;  %v11144_v10 = vld [vmem:[#allocation33_spill] sm:$0xff]  ;;  %v11147_v50 = vld [vmem:[#allocation28_spill] sm:$0xff] }
 0x1b1   : > { %v1738_v61 = vpop.f32.mrf.mxu0  ;;  %v1304_v47 = vadd.f32 %v11144_v10, %v11143_v24 }
 0x1b2   : > { %v1826_v57 = vadd.f32 %v1825_v58, %v1737_v16 }
 0x1b3   : > { %v1827_v32 = vpop.f32.mrf.mxu1 }
 0x1b4   : > { %v8928_v48 = vadd.f32 %v1826_v57, %v8691_v52  ;;  %v11146_v52 = vld [vmem:[#allocation18_spill] sm:$0xff]  ;;  %2212 = vmatmul.bf16.gmra.mxu2 %v8489_v42 }
 0x1b6   : > { %11142 = vst [vmem:[#allocation23_spill] sm:$0xff] %v8928_v48 }
 0x1b7   : > { %v1649_v3 = vpop.f32.mrf.mxu3 }
 0x1b8   : > { %v1739_v1 = vadd.f32 %v1738_v61, %v1649_v3  ;;  %v428_v3 = vld [vmem:[%s8200_s25 + $0xc8] sm:$0x1] }
 0x1b9   : > { %v1741_v46 = vpop.f32.mrf.mxu0 }
 0x1ba   : > { %v1828_v17 = vadd.f32 %v1827_v32, %v1739_v1 }
 0x1bb   : > { %v1830_v31 = vpop.f32.mrf.mxu1 }
 0x1bc   : > { %v8935_v58 = vadd.f32 %v1828_v17, %v1304_v47  ;;  %1691 = vmatmul.bf16.gmra.mxu3 %v8938_v37  ;;  %1780 = vmatmul.bf16.gmra.mxu0 %v11146_v52  ;;  %v8949_v47 = vld [vmem:[%s8200_s25 + $0xc0] sm:$0xff]  ;;  %v574_v17 = vunpack.c.l.b16 %v428_v3 }
 0x1be   : > { %11145 = vst [vmem:[#allocation25_spill] sm:$0xff] %v8935_v58  ;;  %1869 = vmatmul.bf16.gmra.mxu1 %v11147_v50  ;;  %v1309_v58 = vadd.f32 %v8719_v35, %v8714_v9 }
 0x1bf   : > { %v1652_v16 = vpop.f32.mrf.mxu3 }
 0x1c0   : > { %v1742_v7 = vadd.f32 %v1741_v46, %v1652_v16  ;;  %v8956_v46 = vld [vmem:[%s8200_s25 + $0xb4] sm:$0xff] }
 0x1c1   : > { %v1743_v61 = vpop.f32.mrf.mxu0  ;;  %v11151_v16 = vld [vmem:[#allocation30_spill] sm:$0xff] }
 0x1c2   : > { %v1831_v57 = vadd.f32 %v1830_v31, %v1742_v7  ;;  %v7884_v31 = vld [vmem:[%s11018_s4 + $0x20] sm:$0xff]  ;;  %v592_v7 = vpack.c.b16 %v574_v17, %v574_v17 }
 0x1c3   : > { %v1832_v32 = vpop.f32.mrf.mxu1  ;;  %3967 = vmatpush.bf16.msra.mxu1 %v7884_v31  ;;  %v878_v31 = vrot.slane %v8949_v47, 1 }
 0x1c4   : > { %v8945_v62 = vadd.f32 %v1831_v57, %v8712_v6  ;;  %v11150_v6 = vld [vmem:[#allocation21_spill] sm:$0xff]  ;;  %2217 = vmatmul.bf16.gmra.mxu2 %v8520_v11 }
 0x1c6   : > { %11148 = vst [vmem:[#allocation32_spill] sm:$0xff] %v8945_v62 }
 0x1c7   : > { %v1654_v1 = vpop.f32.mrf.mxu3 }
 0x1c8   : > { %v1744_v24 = vadd.f32 %v1743_v61, %v1654_v1  ;;  %v790_v61 = vshll.u32 %v8949_v47, 16  ;;  %v795_v1 = vshll.u32 %v592_v7, 16 }
 0x1c9   : > { %v1746_v10 = vpop.f32.mrf.mxu0 }
 0x1ca   : > { %v1833_v42 = vadd.f32 %v1832_v32, %v1744_v24  ;;  %v788_v32 = vshrl.u32 %v8949_v47, 16  ;;  %v792_v3 = vrot.slane %v790_v61, 1  ;;  %v797_v11 = vrot.slane %v795_v1, 1  ;;  %v11153_v61 = vld [vmem:[#allocation34_spill] sm:$0xff] }
 0x1cb   : > { %v1835_v48 = vpop.f32.mrf.mxu1  ;;  %v1314_v52 = vadd.f32 %v11153_v61, %v8735_v41 }
 0x1cc   : > { %v8953_v50 = vadd.f32 %v1833_v42, %v1309_v58  ;;  %1696 = vmatmul.bf16.gmra.mxu3 %v8956_v46  ;;  %1785 = vmatmul.bf16.gmra.mxu0 %v11150_v6  ;;  %v7892_v58 = vld [vmem:[%s11018_s4 + $0x60] sm:$0xff] }
 0x1cd   : > { %4056 = vmatpush.bf16.msra.mxu2 %v7892_v58 }
 0x1ce   : > { %11149 = vst [vmem:[#allocation33_spill] sm:$0xff] %v8953_v50  ;;  %1874 = vmatmul.bf16.gmra.mxu1 %v11151_v16  ;;  %v793_v50 = vor.u32 %v792_v3, %v788_v32 }
 0x1cf   : > { %v1657_v9 = vpop.f32.mrf.mxu3 }
 0x1d0   : > { %v1747_v35 = vadd.f32 %v1746_v10, %v1657_v9  ;;  %v879_v10 = vrot.slane %v592_v7, 1  ;;  %v8975_v6 = vsel %vm594_vm0, %v793_v50, %v797_v11  ;;  %v11154_v11 = vld [vmem:[#allocation35_spill] sm:$0xff] }
 0x1d1   : > { %v1748_v57 = vpop.f32.mrf.mxu0  ;;  %11152 = vst [vmem:[#allocation44_spill] sm:$0xff] %v8975_v6 }
 0x1d2   : > { %v1836_v24 = vadd.f32 %v1835_v48, %v1747_v35  ;;  %v8980_v58 = vsel %vm829_vm1, %v878_v31, %v879_v10  ;;  %v1319_v31 = vadd.f32 %v11154_v11, %v8753_v5  ;;  %v7891_v5 = vld [vmem:[%s11018_s4 + $0x58] sm:$0xff] }
 0x1d3   : > { %v1837_v42 = vpop.f32.mrf.mxu1  ;;  %4057 = vmatpush.bf16.msra.mxu2 %v7891_v5 }
 0x1d4   : > { %v8971_v17 = vadd.f32 %v1836_v24, %v8730_v49  ;;  %v8982_v49 = vpop.f32.mrf.mxu2  ;;  %2222 = vmatmul.bf16.gmra.mxu2 %v8567_v21  ;;  %v11155_v21 = vld [vmem:[#allocation8_spill] sm:$0xff] }
 0x1d7   : > { %v1659_v9 = vpop.f32.mrf.mxu3 }
 0x1d8   : > { %v1749_v62 = vadd.f32 %v1748_v57, %v1659_v9 }
 0x1d9   : > { %v1751_v16 = vpop.f32.mrf.mxu0 }
 0x1da   : > { %v1838_v48 = vadd.f32 %v1837_v42, %v1749_v62 }
 0x1db   : > { %v1840_v35 = vpop.f32.mrf.mxu1 }
 0x1dc   : > { %v8984_v32 = vadd.f32 %v1838_v48, %v1314_v52  ;;  %1701 = vmatmul.bf16.gmra.mxu3 %v8949_v47  ;;  %1790 = vmatmul.bf16.gmra.mxu0 %v8975_v6  ;;  %v8993_v1 = vpop.f32.mrf.mxu2 }
 0x1de   : > { %1879 = vmatmul.bf16.gmra.mxu1 %v8980_v58 }
 0x1df   : > { %v1662_v50 = vpop.f32.mrf.mxu3 }
 0x1e0   : > { %v1752_v7 = vadd.f32 %v1751_v16, %v1662_v50  ;;  %v11156_v16 = vld [vmem:[#allocation9_spill] sm:$0xff] }
 0x1e1   : > { %v1753_v41 = vpop.f32.mrf.mxu0 }
 0x1e2   : > { %v1841_v62 = vadd.f32 %v1840_v35, %v1752_v7 }
 0x1e3   : > { %v1842_v57 = vpop.f32.mrf.mxu1 }
 0x1e4   : > { %v8991_v3 = vadd.f32 %v1841_v62, %v8751_v0  ;;  %v9001_v48 = vpop.f32.mrf.mxu2  ;;  %v7883_v0 = vld [vmem:[%s11018_s4 + $0x18] sm:$0xff]  ;;  %2227 = vmatmul.bf16.gmra.mxu2 %v8623_v63  ;;  %v1324_v63 = vadd.f32 %v8779_v8, %v8774_v45 }
 0x1e5   : > { %3968 = vmatpush.bf16.msra.mxu1 %v7883_v0  ;;  %v11157_v0 = vld [vmem:[#allocation10_spill] sm:$0xff] }
 0x1e7   : > { %v1664_v52 = vpop.f32.mrf.mxu3 }
 0x1e8   : > { %v1754_v24 = vadd.f32 %v1753_v41, %v1664_v52 }
 0x1e9   : > { %v1756_v42 = vpop.f32.mrf.mxu0 }
 0x1ea   : > { %v1843_v10 = vadd.f32 %v1842_v57, %v1754_v24 }
 0x1eb   : > { %v1845_v9 = vpop.f32.mrf.mxu1 }
 0x1ec   : > { %v8997_v61 = vadd.f32 %v1843_v10, %v1319_v31  ;;  %2271 = vmatmul.bf16.vlgmr.msra.gmra.mxu3 %v11155_v21  ;;  %2360 = vmatmul.bf16.vlgmr.msra.gmra.mxu0 %v11156_v16  ;;  %v9013_v52 = vpop.f32.mrf.mxu2 }
 0x1ef   : > { %v1667_v35 = vpop.f32.mrf.mxu3 }
 0x1f0   : > { %v1757_v50 = vadd.f32 %v1756_v42, %v1667_v35 }
 0x1f1   : > { %v1758_v7 = vpop.f32.mrf.mxu0 }
 0x1f2   : > { %v1846_v41 = vadd.f32 %v1845_v9, %v1757_v50  ;;  %v11158_v9 = vld [vmem:[#allocation11_spill] sm:$0xff] }
 0x1f3   : > { %v1847_v62 = vpop.f32.mrf.mxu1 }
 0x1f4   : > { %v9011_v57 = vadd.f32 %v1846_v41, %v8772_v23  ;;  %v9021_v35 = vpop.f32.mrf.mxu2  ;;  %2232 = vmatmul.bf16.gmra.mxu2 %v8898_v13  ;;  %v11160_v13 = vld [vmem:[#allocation13_spill] sm:$0xff] }
 0x1f7   : > { %v1669_v24 = vpop.f32.mrf.mxu3 }
 0x1f8   : > { %v1759_v11 = vadd.f32 %v1758_v7, %v1669_v24 }
 0x1f9   : > { %v1761_v31 = vpop.f32.mrf.mxu0 }
 0x1fa   : > { %v1848_v42 = vadd.f32 %v1847_v62, %v1759_v11 }
 0x1fb   : > { %v1850_v10 = vpop.f32.mrf.mxu1 }
 0x1fc   : > { %v9017_v16 = vadd.f32 %v1848_v42, %v1324_v63  ;;  %2276 = vmatmul.bf16.gmra.mxu3 %v11157_v0  ;;  %2365 = vmatmul.bf16.gmra.mxu0 %v11158_v9  ;;  %v9027_v8 = vpop.f32.mrf.mxu2  ;;  %v1329_v63 = vadd.f32 %v8797_v30, %v8795_v27  ;;  %v7890_v30 = vld [vmem:[%s11018_s4 + $0x50] sm:$0xff] }
 0x1fd   : > { %4058 = vmatpush.bf16.msra.mxu2 %v7890_v30 }
 0x1ff   : > { %v1672_v23 = vpop.f32.mrf.mxu3 }
 0x200   : > { %v1762_v50 = vadd.f32 %v1761_v31, %v1672_v23  ;;  %v11161_v31 = vld [vmem:[#allocation14_spill] sm:$0xff] }
 0x201   : > { %v1763_v5 = vpop.f32.mrf.mxu0 }
 0x202   : > { %v1851_v7 = vadd.f32 %v1850_v10, %v1762_v50 }
 0x203   : > { %v1852_v41 = vpop.f32.mrf.mxu1 }
 0x204   : > { %v9025_v24 = vadd.f32 %v1851_v7, %v8790_v25  ;;  %v9035_v10 = vpop.f32.mrf.mxu2  ;;  %v7882_v25 = vld [vmem:[%s11018_s4 + $0x10] sm:$0xff]  ;;  %2237 = vmatmul.bf16.gmra.mxu2 %v8912_v14  ;;  %v1334_v14 = vadd.f32 %v8818_v53, %v8813_v33 }
 0x205   : > { %3969 = vmatpush.bf16.msra.mxu1 %v7882_v25 }
 0x207   : > { %v1674_v45 = vpop.f32.mrf.mxu3 }
 0x208   : > { %v1764_v62 = vadd.f32 %v1763_v5, %v1674_v45 }
 0x209   : > { %v1766_v11 = vpop.f32.mrf.mxu0 }
 0x20a   : > { %v1853_v42 = vadd.f32 %v1852_v41, %v1764_v62 }
 0x20b   : > { %v1855_v9 = vpop.f32.mrf.mxu1 }
 0x20c   : > { %v9031_v0 = vadd.f32 %v1853_v42, %v1329_v63  ;;  %2281 = vmatmul.bf16.gmra.mxu3 %v11160_v13  ;;  %2370 = vmatmul.bf16.gmra.mxu0 %v11161_v31  ;;  %v9047_v45 = vpop.f32.mrf.mxu2 }
 0x20e   : > { %11159 = vst [vmem:[#allocation34_spill] sm:$0xff] %v9031_v0 }
 0x20f   : > { %v1677_v23 = vpop.f32.mrf.mxu3 }
 0x210   : > { %v1767_v50 = vadd.f32 %v1766_v11, %v1677_v23  ;;  %v11164_v23 = vld [vmem:[#allocation16_spill] sm:$0xff] }
 0x211   : > { %v1768_v27 = vpop.f32.mrf.mxu0 }
 0x212   : > { %v1856_v5 = vadd.f32 %v1855_v9, %v1767_v50  ;;  %v11165_v9 = vld [vmem:[#allocation17_spill] sm:$0xff] }
 0x213   : > { %v1857_v7 = vpop.f32.mrf.mxu1 }
 0x214   : > { %v9045_v41 = vadd.f32 %v1856_v5, %v8811_v34  ;;  %v9055_v50 = vpop.f32.mrf.mxu2  ;;  %2242 = vmatmul.bf16.gmra.mxu2 %v8938_v37  ;;  %v11168_v37 = vld [vmem:[#allocation20_spill] sm:$0xff] }
 0x216   : > { %11162 = vst [vmem:[#allocation35_spill] sm:$0xff] %v9045_v41 }
 0x217   : > { %v1679_v62 = vpop.f32.mrf.mxu3 }
 0x218   : > { %v1769_v63 = vadd.f32 %v1768_v27, %v1679_v62 }
 0x219   : > { %v1771_v42 = vpop.f32.mrf.mxu0 }
 0x21a   : > { %v1858_v11 = vadd.f32 %v1857_v7, %v1769_v63 }
 0x21b   : > { %v1860_v31 = vpop.f32.mrf.mxu1 }
 0x21c   : > { %v9051_v25 = vadd.f32 %v1858_v11, %v1334_v14  ;;  %2286 = vmatmul.bf16.gmra.mxu3 %v11164_v23  ;;  %2375 = vmatmul.bf16.gmra.mxu0 %v11165_v9  ;;  %v9061_v53 = vpop.f32.mrf.mxu2  ;;  %v1339_v14 = vadd.f32 %v8982_v49, %v8835_v26  ;;  %v7889_v26 = vld [vmem:[%s11018_s4 + $0x48] sm:$0xff] }
 0x21d   : > { %4059 = vmatpush.bf16.msra.mxu2 %v7889_v26 }
 0x21e   : > { %11163 = vst [vmem:[#allocation9_spill] sm:$0xff] %v9051_v25 }
 0x21f   : > { %v1682_v34 = vpop.f32.mrf.mxu3 }
 0x220   : > { %v1772_v30 = vadd.f32 %v1771_v42, %v1682_v34 }
 0x221   : > { %v1773_v5 = vpop.f32.mrf.mxu0 }
 0x222   : > { %v1861_v27 = vadd.f32 %v1860_v31, %v1772_v30 }
 0x223   : > { %v1862_v62 = vpop.f32.mrf.mxu1 }
 0x224   : > { %v9059_v13 = vadd.f32 %v1861_v27, %v8833_v4  ;;  %v9069_v42 = vpop.f32.mrf.mxu2  ;;  %v7881_v4 = vld [vmem:[%s11018_s4 + $0x8] sm:$0xff]  ;;  %2247 = vmatmul.bf16.gmra.mxu2 %v8956_v46  ;;  %v11169_v27 = vld [vmem:[#allocation36_spill] sm:$0xff] }
 0x225   : > { %3970 = vmatpush.bf16.msra.mxu1 %v7881_v4  ;;  %v11171_v4 = vld [vmem:[#allocation37_spill] sm:$0xff] }
 0x226   : > { %11166 = vst [vmem:[#allocation11_spill] sm:$0xff] %v9059_v13 }
 0x227   : > { %v1684_v33 = vpop.f32.mrf.mxu3 }
 0x228   : > { %v1774_v7 = vadd.f32 %v1773_v5, %v1684_v33 }
 0x229   : > { %v1776_v63 = vpop.f32.mrf.mxu0 }
 0x22a   : > { %v1863_v11 = vadd.f32 %v1862_v62, %v1774_v7 }
 0x22b   : > { %v1865_v9 = vpop.f32.mrf.mxu1 }
 0x22c   : > { %v9065_v23 = vadd.f32 %v1863_v11, %v1339_v14  ;;  %2291 = vmatmul.bf16.gmra.mxu3 %v8449_v60  ;;  %2380 = vmatmul.bf16.gmra.mxu0 %v11168_v37  ;;  %v9081_v33 = vpop.f32.mrf.mxu2  ;;  %v11175_v60 = vld [vmem:[#allocation39_spill] sm:$0xff] }
 0x22e   : > { %11167 = vst [vmem:[#allocation14_spill] sm:$0xff] %v9065_v23 }
 0x22f   : > { %v1687_v31 = vpop.f32.mrf.mxu3 }
 0x230   : > { %v1777_v34 = vadd.f32 %v1776_v63, %v1687_v31 }
 0x231   : > { %v1778_v49 = vpop.f32.mrf.mxu0 }
 0x232   : > { %v1866_v30 = vadd.f32 %v1865_v9, %v1777_v34 }
 0x233   : > { %v1867_v5 = vpop.f32.mrf.mxu1 }
 0x234   : > { %v9079_v62 = vadd.f32 %v1866_v30, %v11169_v27  ;;  %v9088_v9 = vpop.f32.mrf.mxu2  ;;  %2252 = vmatmul.bf16.gmra.mxu2 %v8949_v47  ;;  %v11173_v27 = vld [vmem:[#allocation38_spill] sm:$0xff]  ;;  %v11177_v47 = vld [vmem:[#allocation24_spill] sm:$0xff] }
 0x236   : > { %11170 = vst [vmem:[#allocation17_spill] sm:$0xff] %v9079_v62 }
 0x237   : > { %v1689_v7 = vpop.f32.mrf.mxu3 }
 0x238   : > { %v1779_v14 = vadd.f32 %v1778_v49, %v1689_v7 }
 0x239   : > { %v1781_v11 = vpop.f32.mrf.mxu0 }
 0x23a   : > { %v1868_v46 = vadd.f32 %v1867_v5, %v1779_v14 }
 0x23b   : > { %v1870_v37 = vpop.f32.mrf.mxu1 }
 0x23c   : > { %v9084_v63 = vadd.f32 %v1868_v46, %v11171_v4  ;;  %2296 = vmatmul.bf16.gmra.mxu3 %v8483_v39  ;;  %2385 = vmatmul.bf16.gmra.mxu0 %v8486_v40  ;;  %v9094_v7 = vpop.f32.mrf.mxu2 }
 0x23e   : > { %11172 = vst [vmem:[#allocation20_spill] sm:$0xff] %v9084_v63 }
 0x23f   : > { %v1692_v31 = vpop.f32.mrf.mxu3 }
 0x240   : > { %v1782_v34 = vadd.f32 %v1781_v11, %v1692_v31 }
 0x241   : > { %v1783_v26 = vpop.f32.mrf.mxu0 }
 0x242   : > { %v1871_v30 = vadd.f32 %v1870_v37, %v1782_v34  ;;  %v7880_v37 = vld [vmem:[%s11018_s4] sm:$0xff]  ;;  %v9108_v34 = vld [vmem:[%s8200_s25 + $0xcc] sm:$0xff] }
 0x243   : > { %v1872_v49 = vpop.f32.mrf.mxu1  ;;  %3971 = vmatpush.bf16.msra.mxu1 %v7880_v37 }
 0x244   : > { %v9092_v5 = vadd.f32 %v1871_v30, %v11173_v27  ;;  %v9101_v11 = vpop.f32.mrf.mxu2  ;;  %v8084_v30 = vmov 0   ;;  %2257 = vmatmul.bf16.gmra.mxu2 %v9108_v34  ;;  %v11178_v27 = vld [vmem:[#allocation40_spill] sm:$0xff] }
 0x245   : > { %2673 = vst [vmem:[#allocation3] sm:$0xf] %v8084_v30 }
 0x246   : > { %11174 = vst [vmem:[#allocation36_spill] sm:$0xff] %v9092_v5 }
 0x247   : > { %v1694_v14 = vpop.f32.mrf.mxu3  ;;  %2674 = vst [vmem:[#allocation3 + $0x4] sm:$0xf] %v8084_v30 }
 0x248   : > { %v1784_v46 = vadd.f32 %v1783_v26, %v1694_v14  ;;  %2675 = vst [vmem:[#allocation3 + $0x8] sm:$0x1] %v8084_v30 }
 0x249   : > { %v1786_v4 = vpop.f32.mrf.mxu0  ;;  %6184 = vst [vmem:[%s9114_s12] sm:$0xf] %v8084_v30 }
 0x24a   : > { %v1873_v40 = vadd.f32 %v1872_v49, %v1784_v46  ;;  %6185 = vst [vmem:[%s9114_s12 + $0x4] sm:$0x1] %v8084_v30 }
 0x24b   : > { %v1875_v39 = vpop.f32.mrf.mxu1  ;;  %7704 = vst [vmem:[%s9114_s12 + $0x48] sm:$0xf] %v8084_v30 }
 0x24c   : > { %v9097_v21 = vadd.f32 %v1873_v40, %v11175_v60  ;;  %2301 = vmatmul.bf16.gmra.mxu3 %v11177_v47  ;;  %2390 = vmatmul.bf16.gmra.mxu0 %v8517_v38  ;;  %v9120_v46 = vpop.f32.mrf.mxu2  ;;  %7705 = vst [vmem:[%s9114_s12 + $0x4c] sm:$0x1] %v8084_v30 }
 0x24d   : > { %2677 = vst [vmem:[#allocation3 + $0xcc] sm:$0xf] %v8084_v30 }
 0x24e   : > { %11176 = vst [vmem:[#allocation37_spill] sm:$0xff] %v9097_v21  ;;  %v9125_v37 = vld [vmem:[#allocation3] sm:$0xff] }
 0x24f   : > { %v1697_v31 = vpop.f32.mrf.mxu3  ;;  %2678 = vst [vmem:[#allocation3 + $0xd0] sm:$0xf] %v8084_v30  ;;  %v3252_v47 = vld [vmem:[#allocation3 + $0x8] sm:$0x1]  ;;  %v3469_v21 = vshll.u32 %v9125_v37, 16  ;;  %3972 = vmatmul.bf16.vlgmr.msra.gmra.mxu1 %v9125_v37 }
 0x250   : > { %v1787_v26 = vadd.f32 %v1786_v4, %v1697_v31  ;;  %2679 = vst [vmem:[#allocation3 + $0xd4] sm:$0x1] %v8084_v30  ;;  %v7888_v30 = vld [vmem:[%s11018_s4 + $0x40] sm:$0xff] }
 0x251   : > { %v1788_v60 = vpop.f32.mrf.mxu0  ;;  %4060 = vmatpush.bf16.msra.mxu2 %v7888_v30 }
 0x252   : > { %v1876_v38 = vadd.f32 %v1875_v39, %v1787_v26  ;;  %v3430_v26 = vunpack.c.l.b16 %v3252_v47 }
 0x253   : > { %v1877_v49 = vpop.f32.mrf.mxu1 }
 0x254   : > { %v9118_v14 = vadd.f32 %v1876_v38, %v11178_v27  ;;  %v11180_v38 = vld [vmem:[#allocation41_spill] sm:$0xff]  ;;  %v9139_v47 = vpack.c.b16 %v3430_v26, %v3430_v26 }
 0x256   : > { %11179 = vst [vmem:[#allocation38_spill] sm:$0xff] %v9118_v14  ;;  %v11182_v14 = vld [vmem:[#allocation27_spill] sm:$0xff] }
 0x257   : > { %v1699_v4 = vpop.f32.mrf.mxu3 }
 0x258   : > { %v1789_v40 = vadd.f32 %v1788_v60, %v1699_v4  ;;  %v2684_v60 = vld [vmem:[#allocation3 + $0xc] sm:$0x1] }
 0x259   : > { %v1791_v31 = vpop.f32.mrf.mxu0 }
 0x25a   : > { %v1878_v39 = vadd.f32 %v1877_v49, %v1789_v40  ;;  %v9137_v49 = vpop.f32.mrf.mxu2  ;;  %v11183_v40 = vmov 0 }
 0x25b   : > { %v1880_v4 = vpop.f32.mrf.mxu1  ;;  %v11184_v40 = vsel %vm9143_vm4, 4294967295, %v11183_v40 }
 0x25c   : > { %v9130_v27 = vadd.f32 %v1878_v39, %v11180_v38  ;;  %2306 = vmatmul.bf16.gmra.mxu3 %v8561_v18  ;;  %2395 = vmatmul.bf16.gmra.mxu0 %v11182_v14  ;;  %11185 = vst [vmem:[#allocation40_spill] sm:$0xff] %v11184_v40  ;;  %v3467_v14 = vshrl.u32 %v9125_v37, 16  ;;  %v3471_v39 = vrot.slane %v3469_v21, 1  ;;  %v2685_v38 = vsel %vm9143_vm4, 0, %v2684_v60  ;;  %v11189_v60 = vld [vmem:[#allocation42_spill] sm:$0xff] }
 0x25d   : > { %v3474_v18 = vshll.u32 %v9139_v47, 16  ;;  %2686 = vst [vmem:[#allocation3 + $0xc] sm:$0x1] %v2685_v38  ;;  %v11186_v21 = vmov 0 }
 0x25e   : > { %11181 = vst [vmem:[#allocation39_spill] sm:$0xff] %v9130_v27  ;;  %v3472_v26 = vor.u32 %v3471_v39, %v3467_v14  ;;  %v11187_v21 = vsel %vm9154_vm6, 4294967295, %v11186_v21  ;;  %v2734_v14 = vld [vmem:[#allocation3 + $0x14] sm:$0x1]  ;;  %v11191_v39 = vld [vmem:[#allocation43_spill] sm:$0xff] }
 0x25f   : > { %v1702_v27 = vpop.f32.mrf.mxu3  ;;  %v3476_v63 = vrot.slane %v3474_v18, 1  ;;  %11188 = vst [vmem:[#allocation41_spill] sm:$0xff] %v11187_v21  ;;  %v2735_v18 = vsel %vm9154_vm6, 0, %v2734_v14 }
 0x260   : > { %v1792_v5 = vadd.f32 %v1791_v31, %v1702_v27  ;;  %2736 = vst [vmem:[#allocation3 + $0x14] sm:$0x1] %v2735_v18 }
 0x261   : > { %v1793_v62 = vpop.f32.mrf.mxu0  ;;  %v3477_v13 = vsel %vm594_vm0, %v3472_v26, %v3476_v63 }
 0x262   : > { %v1881_v23 = vadd.f32 %v1880_v4, %v1792_v5  ;;  %4061 = vmatmul.bf16.vlgmr.msra.gmra.mxu2 %v3477_v13  ;;  %v9161_v25 = vpop.f32.mrf.mxu2 }
 0x263   : > { %v1882_v5 = vpop.f32.mrf.mxu1 }
 0x264   : > { %v9159_v30 = vadd.f32 %v1881_v23, %v11189_v60  ;;  %v2687_v23 = vld [vmem:[#allocation3 + $0x18] sm:$0x1] }
 0x265   : > { %v2688_v26 = vsel %vm9143_vm4, 0, %v2687_v23  ;;  %v7903_v23 = vld [vmem:[%s11018_s4 + $0xb8] sm:$0xff] }
 0x266   : > { %11190 = vst [vmem:[#allocation27_spill] sm:$0xff] %v9159_v30  ;;  %4142 = vmatpush.bf16.msrb.mxu3 %v7903_v23 }
 0x267   : > { %v1704_v31 = vpop.f32.mrf.mxu3  ;;  %2689 = vst [vmem:[#allocation3 + $0x18] sm:$0x1] %v2688_v26 }
 0x268   : > { %v1794_v63 = vadd.f32 %v1793_v62, %v1704_v31  ;;  %v9178_v31 = vld [vmem:[%s11016_s2] ss:$0 sm:$0xff] }
 0x269   : > { %v2361_v27 = vpop.f32.mrf.mxu0 }
 0x26a   : > { %v1883_v4 = vadd.f32 %v1882_v5, %v1794_v63  ;;  %v9170_v13 = vpop.f32.mrf.mxu2 }
 0x26c   : > { %v9166_v38 = vadd.f32 %v1883_v4, %v11191_v39  ;;  %2311 = vmatmul.bf16.gmra.mxu3 %v8617_v43  ;;  %2400 = vmatmul.bf16.gmra.mxu0 %v8620_v59  ;;  %v9184_v59 = vld [vmem:[%s11017_s3] ss:$0 sm:$0xff] }
 0x26d   : > { %v2737_v4 = vld [vmem:[#allocation3 + $0x20] sm:$0x1] }
 0x26e   : > { %11192 = vst [vmem:[#allocation42_spill] sm:$0xff] %v9166_v38  ;;  %v2690_v38 = vld [vmem:[#allocation3 + $0x24] sm:$0x1] }
 0x26f   : > { %v2272_v60 = vpop.f32.mrf.mxu3 }
 0x270   : > { %v2273_v14 = vadd.f32 %v2272_v60, %v8993_v1  ;;  %v2738_v1 = vsel %vm9154_vm6, 0, %v2737_v4 }
 0x271   : > { %v2363_v62 = vpop.f32.mrf.mxu0  ;;  %2739 = vst [vmem:[#allocation3 + $0x20] sm:$0x1] %v2738_v1 }
 0x272   : > { %v2362_v18 = vadd.f32 %v2361_v27, %v2273_v14  ;;  %v9186_v63 = vpop.f32.mrf.mxu2 }
 0x274   : > { %v2441_v5 = vadd.f32 %v2362_v18, %v8854_v15 }
 0x276   : > { %v2541_v39 = vmul.f32 %v9178_v31, %v2441_v5 }
 0x277   : > { %v2274_v27 = vpop.f32.mrf.mxu3 }
 0x278   : > { %v2577_v15 = vadd.f32 %v9184_v59, %v2541_v39  ;;  %v2275_v26 = vadd.f32 %v2274_v27, %v9001_v48  ;;  %v2691_v48 = vsel %vm9143_vm4, 0, %v2690_v38 }
 0x279   : > { %v2366_v60 = vpop.f32.mrf.mxu0  ;;  %2692 = vst [vmem:[#allocation3 + $0x24] sm:$0x1] %v2691_v48 }
 0x27a   : > { %v2609_v14 = vmax.f32 %v2577_v15, 0.0  ;;  %v2364_v18 = vadd.f32 %v2363_v62, %v2275_v26  ;;  %v9199_v4 = vpop.f32.mrf.mxu2 }
 0x27c   : > { %v2641_v43 = vmin.f32 %v2609_v14, 6.0  ;;  %v2442_v5 = vadd.f32 %v2364_v18, %v8861_v19  ;;  %2316 = vmatmul.bf16.gmra.mxu3 %v8660_v2  ;;  %2405 = vmatmul.bf16.gmra.mxu0 %v8663_v28  ;;  %v7911_v28 = vld [vmem:[%s11018_s4 + $0xf8] sm:$0xff]  ;;  %v11193_v18 = vmov 0 }
 0x27d   : > { %4488 = vmatpush.bf16.msrb.mxu0 %v7911_v28  ;;  %v11194_v18 = vsel %vm9213_vm8, 4294967295, %v11193_v18  ;;  %v7927_v28 = vld [vmem:[%s11018_s4 + $0x178] sm:$0xff] }
 0x27e   : > { %v2782_v30 = vpack.c.bf16 %v2641_v43, %v2641_v43  ;;  %v2542_v1 = vmul.f32 %v9178_v31, %v2442_v5  ;;  %v7919_v43 = vld [vmem:[%s11018_s4 + $0x138] sm:$0xff]  ;;  %11195 = vst [vmem:[#allocation43_spill] sm:$0xff] %v11194_v18  ;;  %4666 = vmatpush.bf16.msrb.mxu2 %v7927_v28 }
 0x27f   : > { %v2277_v39 = vpop.f32.mrf.mxu3  ;;  %4577 = vmatpush.bf16.msrb.mxu1 %v7919_v43 }
 0x280   : > { %v2817_v27 = vshrl.u32 %v2782_v30, 16  ;;  %v2578_v62 = vadd.f32 %v9184_v59, %v2542_v1  ;;  %v2278_v19 = vadd.f32 %v2277_v39, %v9013_v52  ;;  %v2820_v26 = vshll.u32 %v2782_v30, 16  ;;  %v3138_v52 = vld [vmem:[#allocation3 + $0xc] sm:$0xf] }
 0x281   : > { %v2368_v23 = vpop.f32.mrf.mxu0  ;;  %v2740_v39 = vld [vmem:[#allocation3 + $0x2c] sm:$0x1] }
 0x282   : > { %v2819_v15 = vrot.slane %v2817_v27, 7  ;;  %v2610_v38 = vmax.f32 %v2578_v62, 0.0  ;;  %v2367_v14 = vadd.f32 %v2366_v60, %v2278_v19  ;;  %v9218_v2 = vpop.f32.mrf.mxu2  ;;  %v2741_v62 = vsel %vm9154_vm6, 0, %v2740_v39 }
 0x283   : > { %11196 = vst [vmem:[#allocation45_spill] sm:$0xff] %v9218_v2 }
 0x284   : > { %v2822_v5 = vor.u32 %v2820_v26, %v2819_v15  ;;  %v2642_v1 = vmin.f32 %v2610_v38, 6.0  ;;  %v2443_v48 = vadd.f32 %v2367_v14, %v8868_v56  ;;  %2742 = vst [vmem:[#allocation3 + $0x2c] sm:$0x1] %v2741_v62 }
 0x286   : > { %v3139_v30 = vsel %vm9213_vm8, %v2822_v5, %v3138_v52  ;;  %v2783_v27 = vpack.c.bf16 %v2642_v1, %v2642_v1  ;;  %v2543_v60 = vmul.f32 %v9178_v31, %v2443_v48  ;;  %v2823_v48 = vrot.slane %v2819_v15, 4 }
 0x287   : > { %3140 = vst [vmem:[#allocation3 + $0xc] sm:$0xf] %v3139_v30  ;;  %v2279_v19 = vpop.f32.mrf.mxu3  ;;  %v3142_v30 = vld [vmem:[#allocation3 + $0x14] sm:$0x1] }
 0x288   : > { %v2825_v56 = vshrl.u32 %v2783_v27, 16  ;;  %v2579_v43 = vadd.f32 %v9184_v59, %v2543_v60  ;;  %v2280_v26 = vadd.f32 %v2279_v19, %v9021_v35  ;;  %v2828_v52 = vshll.u32 %v2783_v27, 16  ;;  %v2693_v35 = vld [vmem:[#allocation3 + $0x30] sm:$0x1] }
 0x289   : > { %v2371_v38 = vpop.f32.mrf.mxu0 }
 0x28a   : > { %v2827_v14 = vrot.slane %v2825_v56, 7  ;;  %v2611_v5 = vmax.f32 %v2579_v43, 0.0  ;;  %v2369_v1 = vadd.f32 %v2368_v23, %v2280_v26  ;;  %v9238_v27 = vpop.f32.mrf.mxu2 }
 0x28c   : > { %v2830_v41 = vor.u32 %v2828_v52, %v2827_v14  ;;  %v2832_v2 = vrot.slane %v2827_v14, 4  ;;  %v2643_v0 = vmin.f32 %v2611_v5, 6.0  ;;  %v2444_v60 = vadd.f32 %v2369_v1, %v8872_v12  ;;  %2321 = vmatmul.bf16.gmra.mxu3 %v8391_v51  ;;  %2410 = vmatmul.bf16.gmra.mxu0 %v11139_v44 }
 0x28d   : > { %v2694_v12 = vsel %vm9143_vm4, 0, %v2693_v35 }
 0x28e   : > { %v2831_v23 = vsel %vm9231_vm10, %v2823_v48, %v2830_v41  ;;  %v3143_v15 = vsel %vm9143_vm4, %v2832_v2, %v3142_v30  ;;  %v2784_v62 = vpack.c.bf16 %v2643_v0, %v2643_v0  ;;  %v2544_v19 = vmul.f32 %v9178_v31, %v2444_v60  ;;  %2695 = vst [vmem:[#allocation3 + $0x30] sm:$0x1] %v2694_v12  ;;  %v3145_v0 = vld [vmem:[#allocation3 + $0x18] sm:$0xf] }
 0x28f   : > { %3141 = vst [vmem:[#allocation3 + $0x10] sm:$0xf] %v2831_v23  ;;  %v2282_v28 = vpop.f32.mrf.mxu3 }
 0x290   : > { %3144 = vst [vmem:[#allocation3 + $0x14] sm:$0x1] %v3143_v15  ;;  %v2834_v56 = vshrl.u32 %v2784_v62, 16  ;;  %v2580_v44 = vadd.f32 %v9184_v59, %v2544_v19  ;;  %v2283_v43 = vadd.f32 %v2282_v28, %v9027_v8  ;;  %v2837_v14 = vshll.u32 %v2784_v62, 16  ;;  %v2743_v15 = vld [vmem:[#allocation3 + $0x38] sm:$0x1] }
 0x291   : > { %v2373_v26 = vpop.f32.mrf.mxu0 }
 0x292   : > { %v2836_v41 = vrot.slane %v2834_v56, 7  ;;  %v2612_v52 = vmax.f32 %v2580_v44, 0.0  ;;  %v2372_v2 = vadd.f32 %v2371_v38, %v2283_v43  ;;  %v9250_v30 = vpop.f32.mrf.mxu2  ;;  %v7902_v38 = vld [vmem:[%s11018_s4 + $0xb0] sm:$0xff] }
 0x293   : > { %4143 = vmatpush.bf16.msrb.mxu3 %v7902_v38 }
 0x294   : > { %v2839_v5 = vor.u32 %v2837_v14, %v2836_v41  ;;  %v2644_v1 = vmin.f32 %v2612_v52, 6.0  ;;  %v2445_v48 = vadd.f32 %v2372_v2, %v8888_v36  ;;  %v2744_v36 = vsel %vm9154_vm6, 0, %v2743_v15 }
 0x295   : > { %2745 = vst [vmem:[#allocation3 + $0x38] sm:$0x1] %v2744_v36 }
 0x296   : > { %v3146_v60 = vsel %vm9213_vm8, %v2839_v5, %v3145_v0  ;;  %v2785_v35 = vpack.c.bf16 %v2644_v1, %v2644_v1  ;;  %v2545_v23 = vmul.f32 %v9178_v31, %v2445_v48  ;;  %v9255_v8 = vld [vmem:[#allocation3 + $0xc] sm:$0xff]  ;;  %v2840_v1 = vrot.slane %v2836_v41, 4  ;;  %v3149_v48 = vld [vmem:[#allocation3 + $0x20] sm:$0x1] }
 0x297   : > { %3147 = vst [vmem:[#allocation3 + $0x18] sm:$0xf] %v3146_v60  ;;  %v2284_v62 = vpop.f32.mrf.mxu3  ;;  %v3255_v19 = vld [vmem:[#allocation3 + $0x14] sm:$0x1]  ;;  %3977 = vmatmul.bf16.gmra.mxu1 %v9255_v8  ;;  %v3481_v14 = vshll.u32 %v9255_v8, 16 }
 0x298   : > { %v2842_v28 = vshrl.u32 %v2785_v35, 16  ;;  %v2581_v12 = vadd.f32 %v9184_v59, %v2545_v23  ;;  %v2285_v56 = vadd.f32 %v2284_v62, %v9035_v10  ;;  %v3431_v43 = vunpack.c.l.b16 %v3255_v19 }
 0x299   : > { %v2376_v44 = vpop.f32.mrf.mxu0  ;;  %v2845_v2 = vshll.u32 %v2785_v35, 16  ;;  %v3479_v23 = vshrl.u32 %v9255_v8, 16  ;;  %v3483_v15 = vrot.slane %v3481_v14, 1 }
 0x29a   : > { %v2844_v52 = vrot.slane %v2842_v28, 7  ;;  %v2613_v0 = vmax.f32 %v2581_v12, 0.0  ;;  %v2374_v5 = vadd.f32 %v2373_v26, %v2285_v56  ;;  %v9266_v60 = vpack.c.b16 %v3431_v43, %v3431_v43  ;;  %v9273_v26 = vpop.f32.mrf.mxu2  ;;  %v2696_v56 = vld [vmem:[#allocation3 + $0x3c] sm:$0x1] }
 0x29b   : > { %v3484_v19 = vor.u32 %v3483_v15, %v3479_v23 }
 0x29c   : > { %v2847_v10 = vor.u32 %v2845_v2, %v2844_v52  ;;  %v2849_v62 = vrot.slane %v2844_v52, 4  ;;  %v2645_v51 = vmin.f32 %v2613_v0, 6.0  ;;  %v2446_v36 = vadd.f32 %v2374_v5, %v8895_v55  ;;  %2326 = vmatmul.bf16.gmra.mxu3 %v11140_v29  ;;  %2415 = vmatmul.bf16.gmra.mxu0 %v11141_v20  ;;  %v7910_v0 = vld [vmem:[%s11018_s4 + $0xf0] sm:$0xff]  ;;  %v11201_v29 = vld [vmem:[#allocation28_spill] sm:$0xff] }
 0x29d   : > { %v3486_v35 = vshll.u32 %v9266_v60, 16  ;;  %v2697_v20 = vsel %vm9143_vm4, 0, %v2696_v56  ;;  %4489 = vmatpush.bf16.msrb.mxu0 %v7910_v0 }
 0x29e   : > { %v2848_v41 = vsel %vm9231_vm10, %v2840_v1, %v2847_v10  ;;  %v3150_v38 = vsel %vm9143_vm4, %v2849_v62, %v3149_v48  ;;  %v2786_v28 = vpack.c.bf16 %v2645_v51, %v2645_v51  ;;  %v2546_v12 = vmul.f32 %v9178_v31, %v2446_v36  ;;  %v7918_v51 = vld [vmem:[%s11018_s4 + $0x130] sm:$0xff]  ;;  %2698 = vst [vmem:[#allocation3 + $0x3c] sm:$0x1] %v2697_v20 }
 0x29f   : > { %3148 = vst [vmem:[#allocation3 + $0x1c] sm:$0xf] %v2848_v41  ;;  %v2287_v55 = vpop.f32.mrf.mxu3  ;;  %v3488_v43 = vrot.slane %v3486_v35, 1  ;;  %4578 = vmatpush.bf16.msrb.mxu1 %v7918_v51 }
 0x2a0   : > { %3151 = vst [vmem:[#allocation3 + $0x20] sm:$0x1] %v3150_v38  ;;  %v2851_v14 = vshrl.u32 %v2786_v28, 16  ;;  %v2582_v52 = vadd.f32 %v9184_v59, %v2546_v12  ;;  %v2288_v2 = vadd.f32 %v2287_v55, %v9047_v45  ;;  %v2854_v23 = vshll.u32 %v2786_v28, 16  ;;  %v3152_v45 = vld [vmem:[#allocation3 + $0x24] sm:$0xf] }
 0x2a1   : > { %v9291_v5 = vsel %vm594_vm0, %v3484_v19, %v3488_v43  ;;  %v2378_v1 = vpop.f32.mrf.mxu0  ;;  %v7926_v43 = vld [vmem:[%s11018_s4 + $0x170] sm:$0xff] }
 0x2a2   : > { %11199 = vst [vmem:[#allocation46_spill] sm:$0xff] %v9291_v5  ;;  %v2853_v48 = vrot.slane %v2851_v14, 7  ;;  %v2614_v15 = vmax.f32 %v2582_v52, 0.0  ;;  %v2377_v10 = vadd.f32 %v2376_v44, %v2288_v2  ;;  %4066 = vmatmul.bf16.gmra.mxu2 %v9291_v5  ;;  %v9295_v41 = vpop.f32.mrf.mxu2  ;;  %v2746_v44 = vld [vmem:[#allocation3 + $0x44] sm:$0x1] }
 0x2a3   : > { %4667 = vmatpush.bf16.msrb.mxu2 %v7926_v43 }
 0x2a4   : > { %v2856_v62 = vor.u32 %v2854_v23, %v2853_v48  ;;  %v2646_v36 = vmin.f32 %v2614_v15, 6.0  ;;  %v2447_v35 = vadd.f32 %v2377_v10, %v8905_v22  ;;  %v2747_v22 = vsel %vm9154_vm6, 0, %v2746_v44 }
 0x2a5   : > { %2748 = vst [vmem:[#allocation3 + $0x44] sm:$0x1] %v2747_v22 }
 0x2a6   : > { %v3153_v19 = vsel %vm9213_vm8, %v2856_v62, %v3152_v45  ;;  %v2787_v38 = vpack.c.bf16 %v2646_v36, %v2646_v36  ;;  %v2547_v12 = vmul.f32 %v9178_v31, %v2447_v35  ;;  %v9300_v28 = vld [vmem:[#allocation3 + $0x18] sm:$0xff]  ;;  %v2857_v62 = vrot.slane %v2853_v48, 4  ;;  %v3156_v36 = vld [vmem:[#allocation3 + $0x2c] sm:$0x1] }
 0x2a7   : > { %3154 = vst [vmem:[#allocation3 + $0x24] sm:$0xf] %v3153_v19  ;;  %v2289_v56 = vpop.f32.mrf.mxu3  ;;  %v3258_v55 = vld [vmem:[#allocation3 + $0x20] sm:$0x1]  ;;  %3982 = vmatmul.bf16.gmra.mxu1 %v9300_v28  ;;  %v3493_v51 = vshll.u32 %v9300_v28, 16  ;;  %v3491_v19 = vshrl.u32 %v9300_v28, 16 }
 0x2a8   : > { %v2859_v20 = vshrl.u32 %v2787_v38, 16  ;;  %v2583_v14 = vadd.f32 %v9184_v59, %v2547_v12  ;;  %v2290_v52 = vadd.f32 %v2289_v56, %v9055_v50  ;;  %v3432_v0 = vunpack.c.l.b16 %v3258_v55  ;;  %v11200_v55 = vld [vmem:[#allocation18_spill] sm:$0xff] }
 0x2a9   : > { %v2381_v2 = vpop.f32.mrf.mxu0  ;;  %v2862_v15 = vshll.u32 %v2787_v38, 16  ;;  %v3495_v12 = vrot.slane %v3493_v51, 1 }
 0x2aa   : > { %v2861_v23 = vrot.slane %v2859_v20, 7  ;;  %v2615_v10 = vmax.f32 %v2583_v14, 0.0  ;;  %v2379_v45 = vadd.f32 %v2378_v1, %v2290_v52  ;;  %v9311_v35 = vpack.c.b16 %v3432_v0, %v3432_v0  ;;  %v9318_v1 = vpop.f32.mrf.mxu2  ;;  %v2699_v0 = vld [vmem:[#allocation3 + $0x48] sm:$0x1] }
 0x2ab   : > { %v3496_v43 = vor.u32 %v3495_v12, %v3491_v19 }
 0x2ac   : > { %v2864_v50 = vor.u32 %v2862_v15, %v2861_v23  ;;  %v2866_v44 = vrot.slane %v2861_v23, 4  ;;  %v2647_v56 = vmin.f32 %v2615_v10, 6.0  ;;  %v2448_v22 = vadd.f32 %v2379_v45, %v8909_v54  ;;  %2331 = vmatmul.bf16.gmra.mxu3 %v11200_v55  ;;  %2420 = vmatmul.bf16.gmra.mxu0 %v11201_v29 }
 0x2ad   : > { %v3498_v38 = vshll.u32 %v9311_v35, 16  ;;  %v2700_v29 = vsel %vm9143_vm4, 0, %v2699_v0 }
 0x2ae   : > { %v2865_v48 = vsel %vm9231_vm10, %v2857_v62, %v2864_v50  ;;  %v3157_v20 = vsel %vm9143_vm4, %v2866_v44, %v3156_v36  ;;  %v2788_v14 = vpack.c.bf16 %v2647_v56, %v2647_v56  ;;  %v2548_v52 = vmul.f32 %v9178_v31, %v2448_v22  ;;  %2701 = vst [vmem:[#allocation3 + $0x48] sm:$0x1] %v2700_v29  ;;  %v3159_v44 = vld [vmem:[#allocation3 + $0x30] sm:$0xf] }
 0x2af   : > { %3155 = vst [vmem:[#allocation3 + $0x28] sm:$0xf] %v2865_v48  ;;  %v2292_v54 = vpop.f32.mrf.mxu3  ;;  %v3500_v51 = vrot.slane %v3498_v38, 1  ;;  %v11203_v38 = vld [vmem:[#allocation23_spill] sm:$0xff] }
 0x2b0   : > { %3158 = vst [vmem:[#allocation3 + $0x2c] sm:$0x1] %v3157_v20  ;;  %v2868_v23 = vshrl.u32 %v2788_v14, 16  ;;  %v2584_v15 = vadd.f32 %v9184_v59, %v2548_v52  ;;  %v2293_v10 = vadd.f32 %v2292_v54, %v9061_v53  ;;  %v2871_v19 = vshll.u32 %v2788_v14, 16  ;;  %v7901_v53 = vld [vmem:[%s11018_s4 + $0xa8] sm:$0xff] }
 0x2b1   : > { %v9330_v45 = vsel %vm594_vm0, %v3496_v43, %v3500_v51  ;;  %v2383_v62 = vpop.f32.mrf.mxu0  ;;  %v7909_v43 = vld [vmem:[%s11018_s4 + $0xe8] sm:$0xff]  ;;  %v2749_v54 = vld [vmem:[#allocation3 + $0x50] sm:$0x1]  ;;  %4144 = vmatpush.bf16.msrb.mxu3 %v7901_v53 }
 0x2b2   : > { %11202 = vst [vmem:[#allocation28_spill] sm:$0xff] %v9330_v45  ;;  %v2870_v36 = vrot.slane %v2868_v23, 7  ;;  %v2616_v12 = vmax.f32 %v2584_v15, 0.0  ;;  %v2382_v50 = vadd.f32 %v2381_v2, %v2293_v10  ;;  %4071 = vmatmul.bf16.gmra.mxu2 %v9330_v45  ;;  %v9340_v20 = vpop.f32.mrf.mxu2  ;;  %v2750_v23 = vsel %vm9154_vm6, 0, %v2749_v54  ;;  %4490 = vmatpush.bf16.msrb.mxu0 %v7909_v43  ;;  %v11205_v45 = vld [vmem:[#allocation25_spill] sm:$0xff] }
 0x2b3   : > { %11204 = vst [vmem:[#allocation23_spill] sm:$0xff] %v9340_v20  ;;  %v11206_v20 = vld [vmem:[#allocation21_spill] sm:$0xff] }
 0x2b4   : > { %v2873_v56 = vor.u32 %v2871_v19, %v2870_v36  ;;  %v2648_v22 = vmin.f32 %v2616_v12, 6.0  ;;  %v2449_v48 = vadd.f32 %v2382_v50, %v11203_v38  ;;  %2751 = vst [vmem:[#allocation3 + $0x50] sm:$0x1] %v2750_v23 }
 0x2b6   : > { %v3160_v2 = vsel %vm9213_vm8, %v2873_v56, %v3159_v44  ;;  %v2789_v14 = vpack.c.bf16 %v2648_v22, %v2648_v22  ;;  %v2549_v52 = vmul.f32 %v9178_v31, %v2449_v48  ;;  %v9345_v0 = vld [vmem:[#allocation3 + $0x24] sm:$0xff] }
 0x2b7   : > { %3161 = vst [vmem:[#allocation3 + $0x30] sm:$0xf] %v3160_v2  ;;  %v2294_v51 = vpop.f32.mrf.mxu3  ;;  %v3261_v29 = vld [vmem:[#allocation3 + $0x2c] sm:$0x1]  ;;  %3987 = vmatmul.bf16.gmra.mxu1 %v9345_v0  ;;  %v3505_v44 = vshll.u32 %v9345_v0, 16  ;;  %v7900_v56 = vld [vmem:[%s11018_s4 + $0xa0] sm:$0xff] }
 0x2b8   : > { %v2876_v15 = vshrl.u32 %v2789_v14, 16  ;;  %v2585_v10 = vadd.f32 %v9184_v59, %v2549_v52  ;;  %v2295_v19 = vadd.f32 %v2294_v51, %v9069_v42  ;;  %v3433_v50 = vunpack.c.l.b16 %v3261_v29  ;;  %v7908_v22 = vld [vmem:[%s11018_s4 + $0xe0] sm:$0xff]  ;;  %v3163_v2 = vld [vmem:[#allocation3 + $0x38] sm:$0x1]  ;;  %4145 = vmatpush.bf16.msrb.mxu3 %v7900_v56 }
 0x2b9   : > { %v2386_v12 = vpop.f32.mrf.mxu0  ;;  %v2879_v48 = vshll.u32 %v2789_v14, 16  ;;  %v2874_v42 = vrot.slane %v2870_v36, 4  ;;  %v3503_v54 = vshrl.u32 %v9345_v0, 16  ;;  %v3507_v51 = vrot.slane %v3505_v44, 1  ;;  %4491 = vmatpush.bf16.msrb.mxu0 %v7908_v22  ;;  %v2702_v22 = vld [vmem:[#allocation3 + $0x54] sm:$0x1] }
 0x2ba   : > { %v2878_v38 = vrot.slane %v2876_v15, 7  ;;  %v2617_v53 = vmax.f32 %v2585_v10, 0.0  ;;  %v2384_v43 = vadd.f32 %v2383_v62, %v2295_v19  ;;  %v9359_v52 = vpack.c.b16 %v3433_v50, %v3433_v50  ;;  %v11207_v15 = vld [vmem:[#allocation30_spill] sm:$0xff]  ;;  %v9366_v36 = vpop.f32.mrf.mxu2  ;;  %v7899_v10 = vld [vmem:[%s11018_s4 + $0x98] sm:$0xff] }
 0x2bb   : > { %v3508_v14 = vor.u32 %v3507_v51, %v3503_v54  ;;  %11208 = vst [vmem:[#allocation25_spill] sm:$0xff] %v9366_v36  ;;  %v7907_v19 = vld [vmem:[%s11018_s4 + $0xd8] sm:$0xff]  ;;  %v7898_v51 = vld [vmem:[%s11018_s4 + $0x90] sm:$0xff] }
 0x2bc   : > { %v2881_v29 = vor.u32 %v2879_v48, %v2878_v38  ;;  %v2883_v23 = vrot.slane %v2878_v38, 4  ;;  %v2649_v55 = vmin.f32 %v2617_v53, 6.0  ;;  %v2450_v5 = vadd.f32 %v2384_v43, %v11205_v45  ;;  %2336 = vmatmul.bf16.gmra.mxu3 %v11206_v20  ;;  %2425 = vmatmul.bf16.gmra.mxu0 %v11207_v15 }
 0x2bd   : > { %v3510_v62 = vshll.u32 %v9359_v52, 16  ;;  %v2703_v53 = vsel %vm9143_vm4, 0, %v2702_v22  ;;  %4146 = vmatpush.bf16.msrb.mxu3 %v7899_v10  ;;  %4492 = vmatpush.bf16.msrb.mxu0 %v7907_v19 }
 0x2be   : > { %v2882_v45 = vsel %vm9231_vm10, %v2874_v42, %v2881_v29  ;;  %v3164_v50 = vsel %vm9143_vm4, %v2883_v23, %v3163_v2  ;;  %v2790_v44 = vpack.c.bf16 %v2649_v55, %v2649_v55  ;;  %v2550_v56 = vmul.f32 %v9178_v31, %v2450_v5  ;;  %v7917_v55 = vld [vmem:[%s11018_s4 + $0x128] sm:$0xff]  ;;  %2704 = vst [vmem:[#allocation3 + $0x54] sm:$0x1] %v2703_v53  ;;  %v7906_v29 = vld [vmem:[%s11018_s4 + $0xd0] sm:$0xff]  ;;  %v2752_v53 = vld [vmem:[#allocation3 + $0x5c] sm:$0x1] }
 0x2bf   : > { %3162 = vst [vmem:[#allocation3 + $0x34] sm:$0xf] %v2882_v45  ;;  %v2297_v38 = vpop.f32.mrf.mxu3  ;;  %v3512_v48 = vrot.slane %v3510_v62, 1  ;;  %4579 = vmatpush.bf16.msrb.mxu1 %v7917_v55  ;;  %v11210_v45 = vld [vmem:[#allocation32_spill] sm:$0xff] }
 0x2c0   : > { %3165 = vst [vmem:[#allocation3 + $0x38] sm:$0x1] %v3164_v50  ;;  %v2885_v43 = vshrl.u32 %v2790_v44, 16  ;;  %v2586_v54 = vadd.f32 %v9184_v59, %v2550_v56  ;;  %v2298_v42 = vadd.f32 %v2297_v38, %v9081_v33  ;;  %v2888_v33 = vshll.u32 %v2790_v44, 16  ;;  %v7897_v56 = vld [vmem:[%s11018_s4 + $0x88] sm:$0xff] }
 0x2c1   : > { %v9387_v5 = vsel %vm594_vm0, %v3508_v14, %v3512_v48  ;;  %v2388_v2 = vpop.f32.mrf.mxu0  ;;  %v3166_v14 = vld [vmem:[#allocation3 + $0x3c] sm:$0xf]  ;;  %4147 = vmatpush.bf16.msrb.mxu3 %v7898_v51  ;;  %4493 = vmatpush.bf16.msrb.mxu0 %v7906_v29  ;;  %v7925_v51 = vld [vmem:[%s11018_s4 + $0x168] sm:$0xff]  ;;  %v2753_v29 = vsel %vm9154_vm6, 0, %v2752_v53 }
 0x2c2   : > { %11209 = vst [vmem:[#allocation30_spill] sm:$0xff] %v9387_v5  ;;  %v9395_v23 = vrot.slane %v2885_v43, 7  ;;  %v2618_v15 = vmax.f32 %v2586_v54, 0.0  ;;  %v2387_v62 = vadd.f32 %v2386_v12, %v2298_v42  ;;  %4076 = vmatmul.bf16.gmra.mxu2 %v9387_v5  ;;  %v7905_v12 = vld [vmem:[%s11018_s4 + $0xc8] sm:$0xff]  ;;  %v431_v43 = vld [vmem:[%s8200_s25 + $0xd4] sm:$0x1]  ;;  %v9412_v54 = vpop.f32.mrf.mxu2 }
 0x2c3   : > { %11211 = vst [vmem:[#allocation32_spill] sm:$0xff] %v9412_v54  ;;  %4668 = vmatpush.bf16.msrb.mxu2 %v7925_v51  ;;  %v11212_v54 = vld [vmem:[#allocation33_spill] sm:$0xff] }
 0x2c4   : > { %v2890_v10 = vor.u32 %v2888_v33, %v9395_v23  ;;  %v2650_v19 = vmin.f32 %v2618_v15, 6.0  ;;  %v2451_v50 = vadd.f32 %v2387_v62, %v11210_v45  ;;  %2754 = vst [vmem:[#allocation3 + $0x5c] sm:$0x1] %v2753_v29  ;;  %v575_v45 = vunpack.c.l.b16 %v431_v43 }
 0x2c5   : > { %4148 = vmatpush.bf16.msrb.mxu3 %v7897_v56  ;;  %4494 = vmatpush.bf16.msrb.mxu0 %v7905_v12  ;;  %v7904_v56 = vld [vmem:[%s11018_s4 + $0xc0] sm:$0xff]  ;;  %v2891_v53 = vrot.slane %v9395_v23, 4 }
 0x2c6   : > { %v3167_v44 = vsel %vm9213_vm8, %v2890_v10, %v3166_v14  ;;  %v2791_v22 = vpack.c.bf16 %v2650_v19, %v2650_v19  ;;  %v2551_v38 = vmul.f32 %v9178_v31, %v2451_v50  ;;  %v9409_v48 = vld [vmem:[#allocation3 + $0x30] sm:$0xff]  ;;  %v7896_v50 = vld [vmem:[%s11018_s4 + $0x80] sm:$0xff] }
 0x2c7   : > { %3168 = vst [vmem:[#allocation3 + $0x3c] sm:$0xf] %v3167_v44  ;;  %v2299_v42 = vpop.f32.mrf.mxu3  ;;  %v3264_v55 = vld [vmem:[#allocation3 + $0x38] sm:$0x1]  ;;  %3992 = vmatmul.bf16.gmra.mxu1 %v9409_v48  ;;  %v3517_v19 = vshll.u32 %v9409_v48, 16  ;;  %v3515_v51 = vshrl.u32 %v9409_v48, 16 }
 0x2c8   : > { %v2893_v33 = vshrl.u32 %v2791_v22, 16  ;;  %v2587_v15 = vadd.f32 %v9184_v59, %v2551_v38  ;;  %v2300_v62 = vadd.f32 %v2299_v42, %v9088_v9  ;;  %v3434_v10 = vunpack.c.l.b16 %v3264_v55  ;;  %v3170_v42 = vld [vmem:[#allocation3 + $0x44] sm:$0x1] }
 0x2c9   : > { %v2391_v14 = vpop.f32.mrf.mxu0  ;;  %v2896_v44 = vshll.u32 %v2791_v22, 16  ;;  %v3519_v43 = vrot.slane %v3517_v19, 1  ;;  %4149 = vmatpush.bf16.msrb.mxu3 %v7896_v50  ;;  %4495 = vmatpush.bf16.msrb.mxu0 %v7904_v56  ;;  %v593_v22 = vpack.c.b16 %v575_v45, %v575_v45 }
 0x2ca   : > { %v2895_v12 = vrot.slane %v2893_v33, 7  ;;  %v2619_v9 = vmax.f32 %v2587_v15, 0.0  ;;  %v2389_v38 = vadd.f32 %v2388_v2, %v2300_v62  ;;  %v9430_v55 = vpack.c.b16 %v3434_v10, %v3434_v10 }
 0x2cb   : > { %v3520_v2 = vor.u32 %v3519_v43, %v3515_v51  ;;  %v802_v33 = vshll.u32 %v9108_v34, 16 }
 0x2cc   : > { %v2898_v29 = vor.u32 %v2896_v44, %v2895_v12  ;;  %v2900_v20 = vrot.slane %v2895_v12, 4  ;;  %v2651_v5 = vmin.f32 %v2619_v9, 6.0  ;;  %v2452_v36 = vadd.f32 %v2389_v38, %v11212_v54  ;;  %2341 = vmatmul.bf16.gmra.mxu3 %v8975_v6  ;;  %2430 = vmatmul.bf16.gmra.mxu0 %v8980_v58  ;;  %v2705_v54 = vld [vmem:[#allocation3 + $0x60] sm:$0x1]  ;;  %v9447_v9 = vpop.f32.mrf.mxu2 }
 0x2cd   : > { %v3522_v23 = vshll.u32 %v9430_v55, 16  ;;  %v2706_v58 = vsel %vm9143_vm4, 0, %v2705_v54  ;;  %v804_v38 = vrot.slane %v802_v33, 1  ;;  %v881_v54 = vrot.slane %v9108_v34, 1  ;;  %v11230_v6 = vld [vmem:[#allocation20_spill] sm:$0xff] }
 0x2ce   : > { %v2899_v15 = vsel %vm9231_vm10, %v2891_v53, %v2898_v29  ;;  %v3171_v62 = vsel %vm9143_vm4, %v2900_v20, %v3170_v42  ;;  %v2792_v10 = vpack.c.bf16 %v2651_v5, %v2651_v5  ;;  %v2552_v19 = vmul.f32 %v9178_v31, %v2452_v36  ;;  %2707 = vst [vmem:[#allocation3 + $0x60] sm:$0x1] %v2706_v58 }
 0x2cf   : > { %3169 = vst [vmem:[#allocation3 + $0x40] sm:$0xf] %v2899_v15  ;;  %v2302_v50 = vpop.f32.mrf.mxu3  ;;  %v3524_v56 = vrot.slane %v3522_v23, 1  ;;  %v800_v36 = vshrl.u32 %v9108_v34, 16  ;;  %v807_v53 = vshll.u32 %v593_v22, 16 }
 0x2d0   : > { %3172 = vst [vmem:[#allocation3 + $0x44] sm:$0x1] %v3171_v62  ;;  %v2902_v45 = vshrl.u32 %v2792_v10, 16  ;;  %v2588_v12 = vadd.f32 %v9184_v59, %v2552_v19  ;;  %v2303_v44 = vadd.f32 %v2302_v50, %v9094_v7  ;;  %v2905_v51 = vshll.u32 %v2792_v10, 16  ;;  %v3173_v23 = vld [vmem:[#allocation3 + $0x48] sm:$0xf] }
 0x2d1   : > { %v9450_v20 = vsel %vm594_vm0, %v3520_v2, %v3524_v56  ;;  %v2393_v5 = vpop.f32.mrf.mxu0  ;;  %v805_v19 = vor.u32 %v804_v38, %v800_v36  ;;  %v809_v2 = vrot.slane %v807_v53, 1  ;;  %v882_v50 = vrot.slane %v593_v22, 1 }
 0x2d2   : > { %v2904_v42 = vrot.slane %v2902_v45, 7  ;;  %v2620_v43 = vmax.f32 %v2588_v12, 0.0  ;;  %v2392_v29 = vadd.f32 %v2391_v14, %v2303_v44  ;;  %4081 = vmatmul.bf16.gmra.mxu2 %v9450_v20  ;;  %v2755_v14 = vld [vmem:[#allocation3 + $0x68] sm:$0x1] }
 0x2d3   : > { %v810_v38 = vsel %vm594_vm0, %v805_v19, %v809_v2  ;;  %v883_v53 = vsel %vm829_vm1, %v881_v54, %v882_v50 }
 0x2d4   : > { %v2907_v15 = vor.u32 %v2905_v51, %v2904_v42  ;;  %v2652_v7 = vmin.f32 %v2620_v43, 6.0  ;;  %v2453_v62 = vadd.f32 %v2392_v29, %v8971_v17  ;;  %v2756_v17 = vsel %vm9154_vm6, 0, %v2755_v14 }
 0x2d5   : > { %2757 = vst [vmem:[#allocation3 + $0x68] sm:$0x1] %v2756_v17 }
 0x2d6   : > { %v3174_v33 = vsel %vm9213_vm8, %v2907_v15, %v3173_v23  ;;  %v2793_v56 = vpack.c.bf16 %v2652_v7, %v2652_v7  ;;  %v2553_v10 = vmul.f32 %v9178_v31, %v2453_v62  ;;  %v9459_v58 = vld [vmem:[#allocation3 + $0x3c] sm:$0xff]  ;;  %v9469_v62 = vpop.f32.mrf.mxu2 }
 0x2d7   : > { %3175 = vst [vmem:[#allocation3 + $0x48] sm:$0xf] %v3174_v33  ;;  %v2304_v45 = vpop.f32.mrf.mxu3  ;;  %v3267_v12 = vld [vmem:[#allocation3 + $0x44] sm:$0x1]  ;;  %3997 = vmatmul.bf16.gmra.mxu1 %v9459_v58  ;;  %v3529_v43 = vshll.u32 %v9459_v58, 16  ;;  %v2908_v33 = vrot.slane %v2904_v42, 4 }
 0x2d8   : > { %v2910_v44 = vshrl.u32 %v2793_v56, 16  ;;  %v2589_v36 = vadd.f32 %v9184_v59, %v2553_v10  ;;  %v2305_v34 = vadd.f32 %v2304_v45, %v9101_v11  ;;  %v3435_v51 = vunpack.c.l.b16 %v3267_v12  ;;  %v3177_v10 = vld [vmem:[#allocation3 + $0x50] sm:$0x1] }
 0x2d9   : > { %v2396_v22 = vpop.f32.mrf.mxu0  ;;  %v2913_v23 = vshll.u32 %v2793_v56, 16  ;;  %v3527_v14 = vshrl.u32 %v9459_v58, 16  ;;  %v3531_v45 = vrot.slane %v3529_v43, 1 }
 0x2da   : > { %v2912_v29 = vrot.slane %v2910_v44, 7  ;;  %v2621_v15 = vmax.f32 %v2589_v36, 0.0  ;;  %v2394_v7 = vadd.f32 %v2393_v5, %v2305_v34  ;;  %v9471_v11 = vpack.c.b16 %v3435_v51, %v3435_v51  ;;  %v2708_v36 = vld [vmem:[#allocation3 + $0x6c] sm:$0x1] }
 0x2db   : > { %v3532_v50 = vor.u32 %v3531_v45, %v3527_v14  ;;  %v3180_v45 = vld [vmem:[#allocation3 + $0x54] sm:$0xf] }
 0x2dc   : > { %v2915_v17 = vor.u32 %v2913_v23, %v2912_v29  ;;  %v2917_v19 = vrot.slane %v2912_v29, 4  ;;  %v2653_v2 = vmin.f32 %v2621_v15, 6.0  ;;  %v2454_v54 = vadd.f32 %v2394_v7, %v8984_v32  ;;  %2346 = vmatmul.bf16.gmra.mxu3 %v810_v38  ;;  %2435 = vmatmul.bf16.gmra.mxu0 %v883_v53  ;;  %v7916_v29 = vld [vmem:[%s11018_s4 + $0x120] sm:$0xff] }
 0x2dd   : > { %v3534_v56 = vshll.u32 %v9471_v11, 16  ;;  %v2709_v32 = vsel %vm9143_vm4, 0, %v2708_v36  ;;  %4580 = vmatpush.bf16.msrb.mxu1 %v7916_v29 }
 0x2de   : > { %v2916_v5 = vsel %vm9231_vm10, %v2908_v33, %v2915_v17  ;;  %v3178_v42 = vsel %vm9143_vm4, %v2917_v19, %v3177_v10  ;;  %v2794_v12 = vpack.c.bf16 %v2653_v2, %v2653_v2  ;;  %v2554_v44 = vmul.f32 %v9178_v31, %v2454_v54  ;;  %2710 = vst [vmem:[#allocation3 + $0x6c] sm:$0x1] %v2709_v32  ;;  %v9493_v2 = vpop.f32.mrf.mxu2 }
 0x2df   : > { %3176 = vst [vmem:[#allocation3 + $0x4c] sm:$0xf] %v2916_v5  ;;  %v2307_v34 = vpop.f32.mrf.mxu3  ;;  %v3536_v51 = vrot.slane %v3534_v56, 1  ;;  %v3700_v54 = vrot.slane %v9125_v37, 1 }
 0x2e0   : > { %3179 = vst [vmem:[#allocation3 + $0x50] sm:$0x1] %v3178_v42  ;;  %v2919_v38 = vshrl.u32 %v2794_v12, 16  ;;  %v2590_v53 = vadd.f32 %v9184_v59, %v2554_v44  ;;  %v2308_v43 = vadd.f32 %v2307_v34, %v9120_v46  ;;  %v2922_v33 = vshll.u32 %v2794_v12, 16  ;;  %v2758_v12 = vld [vmem:[#allocation3 + $0x74] sm:$0x1] }
 0x2e1   : > { %v9489_v23 = vsel %vm594_vm0, %v3532_v50, %v3536_v51  ;;  %v2398_v15 = vpop.f32.mrf.mxu0  ;;  %v3701_v50 = vrot.slane %v9139_v47, 1  ;;  %v2759_v37 = vsel %vm9154_vm6, 0, %v2758_v12 }
 0x2e2   : > { %v2921_v7 = vrot.slane %v2919_v38, 7  ;;  %v2622_v10 = vmax.f32 %v2590_v53, 0.0  ;;  %v2397_v14 = vadd.f32 %v2396_v22, %v2308_v43  ;;  %4086 = vmatmul.bf16.gmra.mxu2 %v9489_v23  ;;  %2760 = vst [vmem:[#allocation3 + $0x74] sm:$0x1] %v2759_v37  ;;  %v3973_v37 = vpop.f32.mrf.mxu1 }
 0x2e3   : > { %v3702_v38 = vsel %vm829_vm1, %v3700_v54, %v3701_v50 }
 0x2e4   : > { %v2924_v17 = vor.u32 %v2922_v33, %v2921_v7  ;;  %v2654_v19 = vmin.f32 %v2622_v10, 6.0  ;;  %v2455_v46 = vadd.f32 %v2397_v14, %v8991_v3  ;;  %v7924_v3 = vld [vmem:[%s11018_s4 + $0x160] sm:$0xff] }
 0x2e5   : > { %4669 = vmatpush.bf16.msrb.mxu2 %v7924_v3  ;;  %v2711_v3 = vld [vmem:[#allocation3 + $0x78] sm:$0x1] }
 0x2e6   : > { %v3181_v56 = vsel %vm9213_vm8, %v2924_v17, %v3180_v45  ;;  %v2795_v5 = vpack.c.bf16 %v2654_v19, %v2654_v19  ;;  %v2555_v22 = vmul.f32 %v9178_v31, %v2455_v46  ;;  %v9500_v42 = vld [vmem:[#allocation3 + $0x48] sm:$0xff]  ;;  %v2925_v45 = vrot.slane %v2921_v7, 4  ;;  %v3184_v17 = vld [vmem:[#allocation3 + $0x5c] sm:$0x1] }
 0x2e7   : > { %3182 = vst [vmem:[#allocation3 + $0x54] sm:$0xf] %v3181_v56  ;;  %v2309_v44 = vpop.f32.mrf.mxu3  ;;  %v3270_v36 = vld [vmem:[#allocation3 + $0x50] sm:$0x1]  ;;  %4002 = vmatmul.bf16.gmra.mxu1 %v9500_v42  ;;  %v3541_v43 = vshll.u32 %v9500_v42, 16 }
 0x2e8   : > { %v2927_v47 = vshrl.u32 %v2795_v5, 16  ;;  %v2591_v34 = vadd.f32 %v9184_v59, %v2555_v22  ;;  %v2310_v51 = vadd.f32 %v2309_v44, %v9137_v49  ;;  %v3436_v53 = vunpack.c.l.b16 %v3270_v36 }
 0x2e9   : > { %v2401_v32 = vpop.f32.mrf.mxu0  ;;  %v2930_v33 = vshll.u32 %v2795_v5, 16  ;;  %v3539_v49 = vshrl.u32 %v9500_v42, 16  ;;  %v3543_v46 = vrot.slane %v3541_v43, 1 }
 0x2ea   : > { %v2929_v29 = vrot.slane %v2927_v47, 7  ;;  %v2623_v10 = vmax.f32 %v2591_v34, 0.0  ;;  %v2399_v14 = vadd.f32 %v2398_v15, %v2310_v51  ;;  %v9512_v19 = vpack.c.b16 %v3436_v53, %v3436_v53  ;;  %v4062_v47 = vpop.f32.mrf.mxu2 }
 0x2eb   : > { %v3544_v50 = vor.u32 %v3543_v46, %v3539_v49  ;;  %v2712_v51 = vsel %vm9143_vm4, 0, %v2711_v3  ;;  %v3187_v49 = vld [vmem:[#allocation3 + $0x60] sm:$0xf] }
 0x2ec   : > { %v2932_v56 = vor.u32 %v2930_v33, %v2929_v29  ;;  %v2934_v22 = vrot.slane %v2929_v29, 4  ;;  %v2655_v12 = vmin.f32 %v2623_v10, 6.0  ;;  %v2456_v54 = vadd.f32 %v2399_v14, %v8997_v61  ;;  %4150 = vmatmul.bf16.vlgmr.msrb.gmra.mxu3 %v3702_v38  ;;  %4496 = vmatmul.bf16.vlgmr.msrb.gmra.mxu0 %v9255_v8  ;;  %2713 = vst [vmem:[#allocation3 + $0x78] sm:$0x1] %v2712_v51 }
 0x2ed   : > { %v3546_v5 = vshll.u32 %v9512_v19, 16  ;;  %v9525_v38 = vadd.f32 %v4062_v47, %v3973_v37 }
 0x2ee   : > { %v2933_v15 = vsel %vm9231_vm10, %v2925_v45, %v2932_v56  ;;  %v3185_v7 = vsel %vm9143_vm4, %v2934_v22, %v3184_v17  ;;  %v2796_v44 = vpack.c.bf16 %v2655_v12, %v2655_v12  ;;  %v2556_v36 = vmul.f32 %v9178_v31, %v2456_v54  ;;  %v9540_v54 = vld [vmem:[%s11016_s2] ss:$0 sm:$0xff] }
 0x2ef   : > { %3183 = vst [vmem:[#allocation3 + $0x58] sm:$0xf] %v2933_v15  ;;  %v2312_v61 = vpop.f32.mrf.mxu3  ;;  %v3548_v34 = vrot.slane %v3546_v5, 1  ;;  %v2761_v5 = vld [vmem:[#allocation3 + $0x80] sm:$0x1] }
 0x2f0   : > { %3186 = vst [vmem:[#allocation3 + $0x5c] sm:$0x1] %v3185_v7  ;;  %v2936_v53 = vshrl.u32 %v2796_v44, 16  ;;  %v2592_v43 = vadd.f32 %v9184_v59, %v2556_v36  ;;  %v2313_v29 = vadd.f32 %v2312_v61, %v9161_v25  ;;  %v2939_v14 = vshll.u32 %v2796_v44, 16  ;;  %v9551_v36 = vld [vmem:[%s11017_s3] ss:$0 sm:$0xff] }
 0x2f1   : > { %v9530_v33 = vsel %vm594_vm0, %v3544_v50, %v3548_v34  ;;  %v2403_v31 = vpop.f32.mrf.mxu0  ;;  %v3704_v59 = vrot.slane %v9266_v60, 1  ;;  %v2762_v60 = vsel %vm9154_vm6, 0, %v2761_v5 }
 0x2f2   : > { %v2938_v10 = vrot.slane %v2936_v53, 7  ;;  %v2624_v45 = vmax.f32 %v2592_v43, 0.0  ;;  %v2402_v17 = vadd.f32 %v2401_v32, %v2313_v29  ;;  %4091 = vmatmul.bf16.gmra.mxu2 %v9530_v33  ;;  %2763 = vst [vmem:[#allocation3 + $0x80] sm:$0x1] %v2762_v60 }
 0x2f4   : > { %v2941_v46 = vor.u32 %v2939_v14, %v2938_v10  ;;  %v2656_v56 = vmin.f32 %v2624_v45, 6.0  ;;  %v2457_v22 = vadd.f32 %v2402_v17, %v9011_v57  ;;  %v3703_v57 = vrot.slane %v9255_v8, 1  ;;  %v3191_v45 = vld [vmem:[#allocation3 + $0x68] sm:$0x1] }
 0x2f5   : > { %v2942_v14 = vrot.slane %v2938_v10, 4 }
 0x2f6   : > { %v3188_v25 = vsel %vm9213_vm8, %v2941_v46, %v3187_v49  ;;  %v2797_v12 = vpack.c.bf16 %v2656_v56, %v2656_v56  ;;  %v2557_v32 = vmul.f32 %v9540_v54, %v2457_v22  ;;  %v9543_v50 = vld [vmem:[#allocation3 + $0x54] sm:$0xff]  ;;  %v9557_v8 = vsel %vm829_vm1, %v3703_v57, %v3704_v59 }
 0x2f7   : > { %3189 = vst [vmem:[#allocation3 + $0x60] sm:$0xf] %v3188_v25  ;;  %v2314_v15 = vpop.f32.mrf.mxu3  ;;  %v3273_v7 = vld [vmem:[#allocation3 + $0x5c] sm:$0x1]  ;;  %4007 = vmatmul.bf16.gmra.mxu1 %v9543_v50  ;;  %v3553_v34 = vshll.u32 %v9543_v50, 16 }
 0x2f8   : > { %v2944_v44 = vshrl.u32 %v2797_v12, 16  ;;  %v2593_v3 = vadd.f32 %v9551_v36, %v2557_v32  ;;  %v2315_v37 = vadd.f32 %v2314_v15, %v9170_v13  ;;  %v3437_v61 = vunpack.c.l.b16 %v3273_v7  ;;  %v2714_v15 = vld [vmem:[#allocation3 + $0x84] sm:$0x1] }
 0x2f9   : > { %v2406_v47 = vpop.f32.mrf.mxu0  ;;  %v2947_v53 = vshll.u32 %v2797_v12, 16  ;;  %v3551_v13 = vshrl.u32 %v9543_v50, 16  ;;  %v3555_v49 = vrot.slane %v3553_v34, 1  ;;  %v2715_v7 = vsel %vm9143_vm4, 0, %v2714_v15 }
 0x2fa   : > { %v2946_v51 = vrot.slane %v2944_v44, 7  ;;  %v2625_v43 = vmax.f32 %v2593_v3, 0.0  ;;  %v2404_v29 = vadd.f32 %v2403_v31, %v2315_v37  ;;  %v9560_v17 = vpack.c.b16 %v3437_v61, %v3437_v61  ;;  %v7915_v37 = vld [vmem:[%s11018_s4 + $0x118] sm:$0xff]  ;;  %2716 = vst [vmem:[#allocation3 + $0x84] sm:$0x1] %v2715_v7 }
 0x2fb   : > { %v3556_v25 = vor.u32 %v3555_v49, %v3551_v13  ;;  %4581 = vmatpush.bf16.msrb.mxu1 %v7915_v37  ;;  %v3707_v49 = vrot.slane %v9311_v35, 1 }
 0x2fc   : > { %v2949_v46 = vor.u32 %v2947_v53, %v2946_v51  ;;  %v2951_v56 = vrot.slane %v2946_v51, 4  ;;  %v2657_v22 = vmin.f32 %v2625_v43, 6.0  ;;  %v2458_v59 = vadd.f32 %v2404_v29, %v9017_v16  ;;  %4155 = vmatmul.bf16.gmra.mxu3 %v9557_v8  ;;  %4501 = vmatmul.bf16.gmra.mxu0 %v9300_v28 }
 0x2fd   : > { %v3558_v12 = vshll.u32 %v9560_v17, 16 }
 0x2fe   : > { %v2950_v31 = vsel %vm9231_vm10, %v2942_v14, %v2949_v46  ;;  %v3192_v10 = vsel %vm9143_vm4, %v2951_v56, %v3191_v45  ;;  %v2798_v32 = vpack.c.bf16 %v2657_v22, %v2657_v22  ;;  %v2558_v5 = vmul.f32 %v9540_v54, %v2458_v59  ;;  %v3194_v14 = vld [vmem:[#allocation3 + $0x6c] sm:$0xf] }
 0x2ff   : > { %3190 = vst [vmem:[#allocation3 + $0x64] sm:$0xf] %v2950_v31  ;;  %v2317_v57 = vpop.f32.mrf.mxu3  ;;  %v3560_v16 = vrot.slane %v3558_v12, 1 }
 0x300   : > { %3193 = vst [vmem:[#allocation3 + $0x68] sm:$0x1] %v3192_v10  ;;  %v2953_v60 = vshrl.u32 %v2798_v32, 16  ;;  %v2594_v44 = vadd.f32 %v9551_v36, %v2558_v5  ;;  %v2318_v3 = vadd.f32 %v2317_v57, %v9186_v63  ;;  %v2956_v53 = vshll.u32 %v2798_v32, 16 }
 0x301   : > { %v9580_v61 = vsel %vm594_vm0, %v3556_v25, %v3560_v16  ;;  %v2408_v34 = vpop.f32.mrf.mxu0  ;;  %v2764_v25 = vld [vmem:[#allocation3 + $0x8c] sm:$0x1] }
 0x302   : > { %11213 = vst [vmem:[#allocation33_spill] sm:$0xff] %v9580_v61  ;;  %v2955_v51 = vrot.slane %v2953_v60, 7  ;;  %v2626_v43 = vmax.f32 %v2594_v44, 0.0  ;;  %v2407_v29 = vadd.f32 %v2406_v47, %v2318_v3  ;;  %4096 = vmatmul.bf16.gmra.mxu2 %v9580_v61  ;;  %v3706_v47 = vrot.slane %v9300_v28, 1 }
 0x303   : > { %v2765_v35 = vsel %vm9154_vm6, 0, %v2764_v25 }
 0x304   : > { %v2958_v45 = vor.u32 %v2956_v53, %v2955_v51  ;;  %v2658_v13 = vmin.f32 %v2626_v43, 6.0  ;;  %v2459_v63 = vadd.f32 %v2407_v29, %v9025_v24  ;;  %v7923_v24 = vld [vmem:[%s11018_s4 + $0x158] sm:$0xff]  ;;  %2766 = vst [vmem:[#allocation3 + $0x8c] sm:$0x1] %v2765_v35  ;;  %v9600_v15 = vsel %vm829_vm1, %v3706_v47, %v3707_v49  ;;  %v3198_v53 = vld [vmem:[#allocation3 + $0x74] sm:$0x1] }
 0x305   : > { %11214 = vst [vmem:[#allocation47_spill] sm:$0xff] %v9600_v15  ;;  %4670 = vmatpush.bf16.msrb.mxu2 %v7923_v24  ;;  %v2959_v37 = vrot.slane %v2955_v51, 4 }
 0x306   : > { %v3195_v46 = vsel %vm9213_vm8, %v2958_v45, %v3194_v14  ;;  %v2799_v56 = vpack.c.bf16 %v2658_v13, %v2658_v13  ;;  %v2559_v22 = vmul.f32 %v9540_v54, %v2459_v63  ;;  %v9588_v59 = vld [vmem:[#allocation3 + $0x60] sm:$0xff]  ;;  %v11215_v63 = vld [vmem:[#allocation34_spill] sm:$0xff] }
 0x307   : > { %3196 = vst [vmem:[#allocation3 + $0x6c] sm:$0xf] %v3195_v46  ;;  %v2319_v12 = vpop.f32.mrf.mxu3  ;;  %v3276_v31 = vld [vmem:[#allocation3 + $0x68] sm:$0x1]  ;;  %4012 = vmatmul.bf16.gmra.mxu1 %v9588_v59  ;;  %v3565_v16 = vshll.u32 %v9588_v59, 16  ;;  %v9609_v46 = vpop.f32.mrf.mxu1 }
 0x308   : > { %v2961_v10 = vshrl.u32 %v2799_v56, 16  ;;  %v2595_v32 = vadd.f32 %v9551_v36, %v2559_v22  ;;  %v2320_v5 = vadd.f32 %v2319_v12, %v9199_v4  ;;  %v3438_v57 = vunpack.c.l.b16 %v3276_v31  ;;  %11216 = vst [vmem:[#allocation34_spill] sm:$0xff] %v9609_v46 }
 0x309   : > { %v2411_v28 = vpop.f32.mrf.mxu0  ;;  %v2964_v60 = vshll.u32 %v2799_v56, 16  ;;  %v3563_v4 = vshrl.u32 %v9588_v59, 16  ;;  %v3567_v29 = vrot.slane %v3565_v16, 1 }
 0x30a   : > { %v2963_v7 = vrot.slane %v2961_v10, 7  ;;  %v2627_v44 = vmax.f32 %v2595_v32, 0.0  ;;  %v2409_v3 = vadd.f32 %v2408_v34, %v2320_v5  ;;  %v9603_v43 = vpack.c.b16 %v3438_v57, %v3438_v57  ;;  %v11217_v10 = vld [vmem:[#allocation45_spill] sm:$0xff]  ;;  %v2717_v5 = vld [vmem:[#allocation3 + $0x90] sm:$0x1] }
 0x30b   : > { %v3568_v56 = vor.u32 %v3567_v29, %v3563_v4 }
 0x30c   : > { %v2966_v14 = vor.u32 %v2964_v60, %v2963_v7  ;;  %v2968_v45 = vrot.slane %v2963_v7, 4  ;;  %v2659_v13 = vmin.f32 %v2627_v44, 6.0  ;;  %v2460_v49 = vadd.f32 %v2409_v3, %v11215_v63  ;;  %4160 = vmatmul.bf16.gmra.mxu3 %v9600_v15  ;;  %4506 = vmatmul.bf16.gmra.mxu0 %v9345_v0 }
 0x30d   : > { %v3570_v34 = vshll.u32 %v9603_v43, 16  ;;  %v2718_v7 = vsel %vm9143_vm4, 0, %v2717_v5  ;;  %v3710_v63 = vrot.slane %v9359_v52, 1 }
 0x30e   : > { %v2967_v51 = vsel %vm9231_vm10, %v2959_v37, %v2966_v14  ;;  %v3199_v22 = vsel %vm9143_vm4, %v2968_v45, %v3198_v53  ;;  %v2800_v47 = vpack.c.bf16 %v2659_v13, %v2659_v13  ;;  %v2560_v25 = vmul.f32 %v9540_v54, %v2460_v49  ;;  %2719 = vst [vmem:[#allocation3 + $0x90] sm:$0x1] %v2718_v7  ;;  %v3201_v53 = vld [vmem:[#allocation3 + $0x78] sm:$0xf] }
 0x30f   : > { %3197 = vst [vmem:[#allocation3 + $0x70] sm:$0xf] %v2967_v51  ;;  %v2322_v12 = vpop.f32.mrf.mxu3  ;;  %v3572_v31 = vrot.slane %v3570_v34, 1  ;;  %v11219_v14 = vld [vmem:[#allocation35_spill] sm:$0xff] }
 0x310   : > { %3200 = vst [vmem:[#allocation3 + $0x74] sm:$0x1] %v3199_v22  ;;  %v2970_v24 = vshrl.u32 %v2800_v47, 16  ;;  %v2596_v35 = vadd.f32 %v9551_v36, %v2560_v25  ;;  %v2323_v32 = vadd.f32 %v2322_v12, %v11217_v10  ;;  %v2973_v44 = vshll.u32 %v2800_v47, 16  ;;  %v2767_v25 = vld [vmem:[#allocation3 + $0x98] sm:$0x1] }
 0x311   : > { %v9620_v57 = vsel %vm594_vm0, %v3568_v56, %v3572_v31  ;;  %v2413_v16 = vpop.f32.mrf.mxu0 }
 0x312   : > { %11218 = vst [vmem:[#allocation45_spill] sm:$0xff] %v9620_v57  ;;  %v2972_v60 = vrot.slane %v2970_v24, 7  ;;  %v2628_v3 = vmax.f32 %v2596_v35, 0.0  ;;  %v2412_v37 = vadd.f32 %v2411_v28, %v2323_v32  ;;  %4101 = vmatmul.bf16.gmra.mxu2 %v9620_v57  ;;  %v3709_v28 = vrot.slane %v9345_v0, 1  ;;  %v11241_v57 = vld [vmem:[#allocation39_spill] sm:$0xff] }
 0x313   : > { %v2768_v0 = vsel %vm9154_vm6, 0, %v2767_v25 }
 0x314   : > { %v2975_v4 = vor.u32 %v2973_v44, %v2972_v60  ;;  %v2660_v29 = vmin.f32 %v2628_v3, 6.0  ;;  %v2461_v45 = vadd.f32 %v2412_v37, %v11219_v14  ;;  %v9626_v13 = vpop.f32.mrf.mxu1  ;;  %v9639_v35 = vsel %vm829_vm1, %v3709_v28, %v3710_v63  ;;  %2769 = vst [vmem:[#allocation3 + $0x98] sm:$0x1] %v2768_v0 }
 0x315   : > { %11220 = vst [vmem:[#allocation35_spill] sm:$0xff] %v9639_v35  ;;  %v2976_v37 = vrot.slane %v2972_v60, 4 }
 0x316   : > { %v3202_v49 = vsel %vm9213_vm8, %v2975_v4, %v3201_v53  ;;  %v2801_v56 = vpack.c.bf16 %v2660_v29, %v2660_v29  ;;  %v2561_v34 = vmul.f32 %v9540_v54, %v2461_v45  ;;  %v9632_v51 = vld [vmem:[#allocation3 + $0x6c] sm:$0xff]  ;;  %v3205_v53 = vld [vmem:[#allocation3 + $0x80] sm:$0x1] }
 0x317   : > { %3203 = vst [vmem:[#allocation3 + $0x78] sm:$0xf] %v3202_v49  ;;  %v2324_v22 = vpop.f32.mrf.mxu3  ;;  %v3279_v47 = vld [vmem:[#allocation3 + $0x74] sm:$0x1]  ;;  %4017 = vmatmul.bf16.gmra.mxu1 %v9632_v51  ;;  %v3577_v32 = vshll.u32 %v9632_v51, 16  ;;  %v3575_v4 = vshrl.u32 %v9632_v51, 16 }
 0x318   : > { %v2978_v12 = vshrl.u32 %v2801_v56, 16  ;;  %v2597_v31 = vadd.f32 %v9551_v36, %v2561_v34  ;;  %v2325_v24 = vadd.f32 %v2324_v22, %v9238_v27  ;;  %v3439_v10 = vunpack.c.l.b16 %v3279_v47  ;;  %v11221_v49 = vld [vmem:[#allocation9_spill] sm:$0xff] }
 0x319   : > { %v2416_v52 = vpop.f32.mrf.mxu0  ;;  %v2981_v7 = vshll.u32 %v2801_v56, 16  ;;  %v3579_v29 = vrot.slane %v3577_v32, 1  ;;  %v9650_v56 = vpop.f32.mrf.mxu2 }
 0x31a   : > { %v2980_v5 = vrot.slane %v2978_v12, 7  ;;  %v2629_v44 = vmax.f32 %v2597_v31, 0.0  ;;  %v2414_v3 = vadd.f32 %v2413_v16, %v2325_v24  ;;  %v9644_v27 = vpack.c.b16 %v3439_v10, %v3439_v10  ;;  %11222 = vst [vmem:[#allocation9_spill] sm:$0xff] %v9650_v56 }
 0x31b   : > { %v3580_v60 = vor.u32 %v3579_v29, %v3575_v4 }
 0x31c   : > { %v2983_v14 = vor.u32 %v2981_v7, %v2980_v5  ;;  %v2985_v45 = vrot.slane %v2980_v5, 4  ;;  %v2661_v63 = vmin.f32 %v2629_v44, 6.0  ;;  %v2462_v34 = vadd.f32 %v2414_v3, %v11221_v49  ;;  %4165 = vmatmul.bf16.gmra.mxu3 %v9639_v35  ;;  %4511 = vmatmul.bf16.gmra.mxu0 %v9409_v48  ;;  %v9652_v16 = vpop.f32.mrf.mxu1  ;;  %v7914_v5 = vld [vmem:[%s11018_s4 + $0x110] sm:$0xff]  ;;  %v11224_v49 = vld [vmem:[#allocation11_spill] sm:$0xff] }
 0x31d   : > { %v3582_v28 = vshll.u32 %v9644_v27, 16  ;;  %4582 = vmatpush.bf16.msrb.mxu1 %v7914_v5 }
 0x31e   : > { %v2984_v22 = vsel %vm9231_vm10, %v2976_v37, %v2983_v14  ;;  %v3206_v47 = vsel %vm9143_vm4, %v2985_v45, %v3205_v53  ;;  %v2802_v25 = vpack.c.bf16 %v2661_v63, %v2661_v63  ;;  %v2562_v12 = vmul.f32 %v9540_v54, %v2462_v34  ;;  %v2720_v37 = vld [vmem:[#allocation3 + $0x9c] sm:$0x1] }
 0x31f   : > { %3204 = vst [vmem:[#allocation3 + $0x7c] sm:$0xf] %v2984_v22  ;;  %v2327_v31 = vpop.f32.mrf.mxu3  ;;  %v3584_v24 = vrot.slane %v3582_v28, 1  ;;  %v2721_v14 = vsel %vm9143_vm4, 0, %v2720_v37  ;;  %v3713_v22 = vrot.slane %v9430_v55, 1  ;;  %v7922_v55 = vld [vmem:[%s11018_s4 + $0x150] sm:$0xff] }
 0x320   : > { %3207 = vst [vmem:[#allocation3 + $0x80] sm:$0x1] %v3206_v47  ;;  %v2987_v10 = vshrl.u32 %v2802_v25, 16  ;;  %v2598_v32 = vadd.f32 %v9551_v36, %v2562_v12  ;;  %v2328_v0 = vadd.f32 %v2327_v31, %v9250_v30  ;;  %v2990_v7 = vshll.u32 %v2802_v25, 16  ;;  %v3208_v30 = vld [vmem:[#allocation3 + $0x84] sm:$0xf]  ;;  %4671 = vmatpush.bf16.msrb.mxu2 %v7922_v55 }
 0x321   : > { %v9666_v44 = vsel %vm594_vm0, %v3580_v60, %v3584_v24  ;;  %v2418_v3 = vpop.f32.mrf.mxu0  ;;  %2722 = vst [vmem:[#allocation3 + $0x9c] sm:$0x1] %v2721_v14 }
 0x322   : > { %11223 = vst [vmem:[#allocation48_spill] sm:$0xff] %v9666_v44  ;;  %v2989_v53 = vrot.slane %v2987_v10, 7  ;;  %v2630_v4 = vmax.f32 %v2598_v32, 0.0  ;;  %v2417_v29 = vadd.f32 %v2416_v52, %v2328_v0  ;;  %4106 = vmatmul.bf16.gmra.mxu2 %v9666_v44  ;;  %v3712_v10 = vrot.slane %v9409_v48, 1  ;;  %v11236_v44 = vld [vmem:[#allocation37_spill] sm:$0xff] }
 0x324   : > { %v2992_v45 = vor.u32 %v2990_v7, %v2989_v53  ;;  %v2662_v63 = vmin.f32 %v2630_v4, 6.0  ;;  %v2463_v34 = vadd.f32 %v2417_v29, %v11224_v49  ;;  %v9672_v60 = vpop.f32.mrf.mxu1  ;;  %v9691_v4 = vsel %vm829_vm1, %v3712_v10, %v3713_v22 }
 0x325   : > { %v4067_v28 = vpop.f32.mrf.mxu2  ;;  %11225 = vst [vmem:[#allocation11_spill] sm:$0xff] %v9691_v4 }
 0x326   : > { %v3209_v52 = vsel %vm9213_vm8, %v2992_v45, %v3208_v30  ;;  %v2803_v47 = vpack.c.bf16 %v2662_v63, %v2662_v63  ;;  %v2563_v25 = vmul.f32 %v9540_v54, %v2463_v34  ;;  %v9679_v12 = vadd.f32 %v4067_v28, %v9626_v13  ;;  %v9681_v31 = vld [vmem:[#allocation3 + $0x78] sm:$0xff]  ;;  %v2770_v13 = vld [vmem:[#allocation3 + $0xa4] sm:$0x1]  ;;  %v3212_v34 = vld [vmem:[#allocation3 + $0x8c] sm:$0x1] }
 0x327   : > { %3210 = vst [vmem:[#allocation3 + $0x84] sm:$0xf] %v3209_v52  ;;  %v2329_v24 = vpop.f32.mrf.mxu3  ;;  %v3282_v32 = vld [vmem:[#allocation3 + $0x80] sm:$0x1]  ;;  %4022 = vmatmul.bf16.gmra.mxu1 %v9681_v31  ;;  %v3589_v48 = vshll.u32 %v9681_v31, 16  ;;  %v2771_v14 = vsel %vm9154_vm6, 0, %v2770_v13 }
 0x328   : > { %v2995_v0 = vshrl.u32 %v2803_v47, 16  ;;  %v2599_v5 = vadd.f32 %v9551_v36, %v2563_v25  ;;  %v2330_v7 = vadd.f32 %v2329_v24, %v9273_v26  ;;  %v3440_v29 = vunpack.c.l.b16 %v3282_v32  ;;  %2772 = vst [vmem:[#allocation3 + $0xa4] sm:$0x1] %v2771_v14  ;;  %v11226_v32 = vld [vmem:[#allocation14_spill] sm:$0xff] }
 0x329   : > { %v2421_v37 = vpop.f32.mrf.mxu0  ;;  %v2998_v45 = vshll.u32 %v2803_v47, 16  ;;  %v2993_v26 = vrot.slane %v2989_v53, 4  ;;  %v3587_v52 = vshrl.u32 %v9681_v31, 16  ;;  %v3591_v22 = vrot.slane %v3589_v48, 1 }
 0x32a   : > { %v2997_v30 = vrot.slane %v2995_v0, 7  ;;  %v2631_v63 = vmax.f32 %v2599_v5, 0.0  ;;  %v2419_v49 = vadd.f32 %v2418_v3, %v2330_v7  ;;  %v9696_v28 = vpack.c.b16 %v3440_v29, %v3440_v29 }
 0x32b   : > { %v3592_v3 = vor.u32 %v3591_v22, %v3587_v52  ;;  %v2723_v52 = vld [vmem:[#allocation3 + $0xa8] sm:$0x1] }
 0x32c   : > { %v3000_v25 = vor.u32 %v2998_v45, %v2997_v30  ;;  %v3002_v24 = vrot.slane %v2997_v30, 4  ;;  %v2663_v10 = vmin.f32 %v2631_v63, 6.0  ;;  %v2464_v55 = vadd.f32 %v2419_v49, %v11226_v32  ;;  %4170 = vmatmul.bf16.gmra.mxu3 %v9691_v4  ;;  %4516 = vmatmul.bf16.gmra.mxu0 %v9459_v58  ;;  %v9702_v0 = vpop.f32.mrf.mxu1  ;;  %v3215_v32 = vld [vmem:[#allocation3 + $0x90] sm:$0xf] }
 0x32d   : > { %v4069_v47 = vpop.f32.mrf.mxu2  ;;  %v3594_v53 = vshll.u32 %v9696_v28, 16  ;;  %v2724_v22 = vsel %vm9143_vm4, 0, %v2723_v52  ;;  %v2773_v52 = vld [vmem:[#allocation3 + $0xb0] sm:$0x1] }
 0x32e   : > { %v3001_v5 = vsel %vm9231_vm10, %v2993_v26, %v3000_v25  ;;  %v3213_v7 = vsel %vm9143_vm4, %v3002_v24, %v3212_v34  ;;  %v2804_v13 = vpack.c.bf16 %v2663_v10, %v2663_v10  ;;  %v2564_v29 = vmul.f32 %v9540_v54, %v2464_v55  ;;  %2725 = vst [vmem:[#allocation3 + $0xa8] sm:$0x1] %v2724_v22 }
 0x32f   : > { %3211 = vst [vmem:[#allocation3 + $0x88] sm:$0xf] %v3001_v5  ;;  %v9711_v48 = vadd.f32 %v4069_v47, %v9652_v16  ;;  %v2332_v14 = vpop.f32.mrf.mxu3  ;;  %v3596_v30 = vrot.slane %v3594_v53, 1  ;;  %v11228_v53 = vld [vmem:[#allocation17_spill] sm:$0xff] }
 0x330   : > { %3214 = vst [vmem:[#allocation3 + $0x8c] sm:$0x1] %v3213_v7  ;;  %v3004_v45 = vshrl.u32 %v2804_v13, 16  ;;  %v2600_v63 = vadd.f32 %v9551_v36, %v2564_v29  ;;  %v2333_v49 = vadd.f32 %v2332_v14, %v9295_v41  ;;  %v3007_v24 = vshll.u32 %v2804_v13, 16 }
 0x331   : > { %v9716_v26 = vsel %vm594_vm0, %v3592_v3, %v3596_v30  ;;  %v2423_v34 = vpop.f32.mrf.mxu0  ;;  %v3715_v3 = vrot.slane %v9459_v58, 1  ;;  %v3716_v29 = vrot.slane %v9471_v11, 1 }
 0x332   : > { %11227 = vst [vmem:[#allocation14_spill] sm:$0xff] %v9716_v26  ;;  %v3006_v25 = vrot.slane %v3004_v45, 7  ;;  %v2632_v16 = vmax.f32 %v2600_v63, 0.0  ;;  %v2422_v10 = vadd.f32 %v2421_v37, %v2333_v49  ;;  %4111 = vmatmul.bf16.gmra.mxu2 %v9716_v26 }
 0x334   : > { %v3009_v55 = vor.u32 %v3007_v24, %v3006_v25  ;;  %v2664_v47 = vmin.f32 %v2632_v16, 6.0  ;;  %v2465_v41 = vadd.f32 %v2422_v10, %v11228_v53  ;;  %v9722_v7 = vpop.f32.mrf.mxu1  ;;  %v9738_v16 = vsel %vm829_vm1, %v3715_v3, %v3716_v29 }
 0x335   : > { %v4072_v5 = vpop.f32.mrf.mxu2  ;;  %11229 = vst [vmem:[#allocation17_spill] sm:$0xff] %v9738_v16 }
 0x336   : > { %v3216_v13 = vsel %vm9213_vm8, %v3009_v55, %v3215_v32  ;;  %v2805_v14 = vpack.c.bf16 %v2664_v47, %v2664_v47  ;;  %v2565_v37 = vmul.f32 %v9540_v54, %v2465_v41  ;;  %v9730_v30 = vadd.f32 %v4072_v5, %v9672_v60  ;;  %v9732_v45 = vld [vmem:[#allocation3 + $0x84] sm:$0xff] }
 0x337   : > { %3217 = vst [vmem:[#allocation3 + $0x90] sm:$0xf] %v3216_v13  ;;  %v2334_v63 = vpop.f32.mrf.mxu3  ;;  %v3285_v49 = vld [vmem:[#allocation3 + $0x8c] sm:$0x1]  ;;  %4027 = vmatmul.bf16.gmra.mxu1 %v9732_v45  ;;  %v3601_v60 = vshll.u32 %v9732_v45, 16  ;;  %v2774_v32 = vsel %vm9154_vm6, 0, %v2773_v52 }
 0x338   : > { %v3012_v22 = vshrl.u32 %v2805_v14, 16  ;;  %v2601_v58 = vadd.f32 %v9551_v36, %v2565_v37  ;;  %v2335_v11 = vadd.f32 %v2334_v63, %v9318_v1  ;;  %v3441_v10 = vunpack.c.l.b16 %v3285_v49  ;;  %2775 = vst [vmem:[#allocation3 + $0xb0] sm:$0x1] %v2774_v32  ;;  %v3219_v13 = vld [vmem:[#allocation3 + $0x98] sm:$0x1] }
 0x339   : > { %v2426_v24 = vpop.f32.mrf.mxu0  ;;  %v3015_v47 = vshll.u32 %v2805_v14, 16  ;;  %v3010_v5 = vrot.slane %v3006_v25, 4  ;;  %v3599_v37 = vshrl.u32 %v9732_v45, 16  ;;  %v3603_v63 = vrot.slane %v3601_v60, 1 }
 0x33a   : > { %v3014_v55 = vrot.slane %v3012_v22, 7  ;;  %v2633_v53 = vmax.f32 %v2601_v58, 0.0  ;;  %v2424_v41 = vadd.f32 %v2423_v34, %v2335_v11  ;;  %v9743_v1 = vpack.c.b16 %v3441_v10, %v3441_v10 }
 0x33b   : > { %v3604_v34 = vor.u32 %v3603_v63, %v3599_v37  ;;  %v2726_v63 = vld [vmem:[#allocation3 + $0xb4] sm:$0x1] }
 0x33c   : > { %v3017_v3 = vor.u32 %v3015_v47, %v3014_v55  ;;  %v3019_v29 = vrot.slane %v3014_v55, 4  ;;  %v2665_v49 = vmin.f32 %v2633_v53, 6.0  ;;  %v2466_v56 = vadd.f32 %v2424_v41, %v11230_v6  ;;  %4175 = vmatmul.bf16.gmra.mxu3 %v9738_v16  ;;  %4521 = vmatmul.bf16.gmra.mxu0 %v9500_v42  ;;  %v9749_v52 = vpop.f32.mrf.mxu1  ;;  %v11231_v53 = vld [vmem:[#allocation23_spill] sm:$0xff] }
 0x33d   : > { %v4074_v14 = vpop.f32.mrf.mxu2  ;;  %v3606_v25 = vshll.u32 %v9743_v1, 16 }
 0x33e   : > { %v3018_v22 = vsel %vm9231_vm10, %v3010_v5, %v3017_v3  ;;  %v3220_v58 = vsel %vm9143_vm4, %v3019_v29, %v3219_v13  ;;  %v2806_v11 = vpack.c.bf16 %v2665_v49, %v2665_v49  ;;  %v2566_v10 = vmul.f32 %v9540_v54, %v2466_v56  ;;  %v7913_v5 = vld [vmem:[%s11018_s4 + $0x108] sm:$0xff] }
 0x33f   : > { %3218 = vst [vmem:[#allocation3 + $0x94] sm:$0xf] %v3018_v22  ;;  %v9758_v6 = vadd.f32 %v4074_v14, %v9702_v0  ;;  %v2337_v60 = vpop.f32.mrf.mxu3  ;;  %v3608_v32 = vrot.slane %v3606_v25, 1  ;;  %4583 = vmatpush.bf16.msrb.mxu1 %v7913_v5  ;;  %v2727_v49 = vsel %vm9143_vm4, 0, %v2726_v63  ;;  %v3222_v14 = vld [vmem:[#allocation3 + $0x9c] sm:$0xf] }
 0x340   : > { %3221 = vst [vmem:[#allocation3 + $0x98] sm:$0x1] %v3220_v58  ;;  %v3021_v55 = vshrl.u32 %v2806_v11, 16  ;;  %v2602_v47 = vadd.f32 %v9551_v36, %v2566_v10  ;;  %v2338_v41 = vadd.f32 %v2337_v60, %v11231_v53  ;;  %v3024_v13 = vshll.u32 %v2806_v11, 16  ;;  %v11233_v58 = vld [vmem:[#allocation36_spill] sm:$0xff] }
 0x341   : > { %v9766_v37 = vsel %vm594_vm0, %v3604_v34, %v3608_v32  ;;  %v2428_v56 = vpop.f32.mrf.mxu0  ;;  %2728 = vst [vmem:[#allocation3 + $0xb4] sm:$0x1] %v2727_v49  ;;  %v3719_v60 = vrot.slane %v9512_v19, 1  ;;  %v3718_v5 = vrot.slane %v9500_v42, 1  ;;  %v7921_v19 = vld [vmem:[%s11018_s4 + $0x148] sm:$0xff] }
 0x342   : > { %11232 = vst [vmem:[#allocation20_spill] sm:$0xff] %v9766_v37  ;;  %v3023_v0 = vrot.slane %v3021_v55, 7  ;;  %v2634_v3 = vmax.f32 %v2602_v47, 0.0  ;;  %v2427_v29 = vadd.f32 %v2426_v24, %v2338_v41  ;;  %4116 = vmatmul.bf16.gmra.mxu2 %v9766_v37 }
 0x343   : > { %4672 = vmatpush.bf16.msrb.mxu2 %v7921_v19 }
 0x344   : > { %v3026_v25 = vor.u32 %v3024_v13, %v3023_v0  ;;  %v2666_v22 = vmin.f32 %v2634_v3, 6.0  ;;  %v2467_v11 = vadd.f32 %v2427_v29, %v11233_v58  ;;  %v9772_v34 = vpop.f32.mrf.mxu1  ;;  %v11234_v29 = vld [vmem:[#allocation25_spill] sm:$0xff] }
 0x345   : > { %v4077_v10 = vpop.f32.mrf.mxu2 }
 0x346   : > { %v3223_v24 = vsel %vm9213_vm8, %v3026_v25, %v3222_v14  ;;  %v2807_v32 = vpack.c.bf16 %v2666_v22, %v2666_v22  ;;  %v2567_v55 = vmul.f32 %v9540_v54, %v2467_v11  ;;  %v9779_v47 = vadd.f32 %v4077_v10, %v9722_v7  ;;  %v9781_v53 = vld [vmem:[#allocation3 + $0x90] sm:$0xff]  ;;  %v2776_v7 = vld [vmem:[#allocation3 + $0xbc] sm:$0x1] }
 0x347   : > { %3224 = vst [vmem:[#allocation3 + $0x9c] sm:$0xf] %v3223_v24  ;;  %v2339_v41 = vpop.f32.mrf.mxu3  ;;  %v3288_v13 = vld [vmem:[#allocation3 + $0x98] sm:$0x1]  ;;  %4032 = vmatmul.bf16.gmra.mxu1 %v9781_v53  ;;  %v9791_v25 = vsel %vm829_vm1, %v3718_v5, %v3719_v60  ;;  %v3613_v42 = vshll.u32 %v9781_v53, 16  ;;  %v2777_v58 = vsel %vm9154_vm6, 0, %v2776_v7 }
 0x348   : > { %v3029_v63 = vshrl.u32 %v2807_v32, 16  ;;  %v2603_v3 = vadd.f32 %v9551_v36, %v2567_v55  ;;  %v2340_v49 = vadd.f32 %v2339_v41, %v11234_v29  ;;  %11235 = vst [vmem:[#allocation23_spill] sm:$0xff] %v9791_v25  ;;  %v3442_v22 = vunpack.c.l.b16 %v3288_v13  ;;  %v3226_v29 = vld [vmem:[#allocation3 + $0xa4] sm:$0x1] }
 0x349   : > { %v2431_v14 = vpop.f32.mrf.mxu0  ;;  %v3032_v10 = vshll.u32 %v2807_v32, 16  ;;  %2778 = vst [vmem:[#allocation3 + $0xbc] sm:$0x1] %v2777_v58  ;;  %v3027_v41 = vrot.slane %v3023_v0, 4  ;;  %v3611_v46 = vshrl.u32 %v9781_v53, 16  ;;  %v3615_v60 = vrot.slane %v3613_v42, 1 }
 0x34a   : > { %v3031_v11 = vrot.slane %v3029_v63, 7  ;;  %v2635_v24 = vmax.f32 %v2603_v3, 0.0  ;;  %v2429_v55 = vadd.f32 %v2428_v56, %v2340_v49  ;;  %v9796_v37 = vpack.c.b16 %v3442_v22, %v3442_v22 }
 0x34b   : > { %v3616_v56 = vor.u32 %v3615_v60, %v3611_v46  ;;  %v3736_v21 = vrot.slane %v9781_v53, 1 }
 0x34c   : > { %v3034_v5 = vor.u32 %v3032_v10, %v3031_v11  ;;  %v3036_v13 = vrot.slane %v3031_v11, 4  ;;  %v2667_v26 = vmin.f32 %v2635_v24, 6.0  ;;  %v2468_v19 = vadd.f32 %v2429_v55, %v11236_v44  ;;  %4180 = vmatmul.bf16.gmra.mxu3 %v9791_v25  ;;  %4526 = vmatmul.bf16.gmra.mxu0 %v9543_v50  ;;  %v9802_v63 = vpop.f32.mrf.mxu1  ;;  %v11237_v10 = vld [vmem:[#allocation32_spill] sm:$0xff] }
 0x34d   : > { %v4079_v32 = vpop.f32.mrf.mxu2  ;;  %v3618_v0 = vshll.u32 %v9796_v37, 16  ;;  %v2729_v55 = vld [vmem:[#allocation3 + $0xc0] sm:$0x1] }
 0x34e   : > { %v3035_v3 = vsel %vm9231_vm10, %v3027_v41, %v3034_v5  ;;  %v3227_v49 = vsel %vm9143_vm4, %v3036_v13, %v3226_v29  ;;  %v2808_v7 = vpack.c.bf16 %v2667_v26, %v2667_v26  ;;  %v2568_v22 = vmul.f32 %v9540_v54, %v2468_v19  ;;  %v3229_v19 = vld [vmem:[#allocation3 + $0xa8] sm:$0xf] }
 0x34f   : > { %3225 = vst [vmem:[#allocation3 + $0xa0] sm:$0xf] %v3035_v3  ;;  %v9811_v44 = vadd.f32 %v4079_v32, %v9749_v52  ;;  %v2342_v42 = vpop.f32.mrf.mxu3  ;;  %v3620_v58 = vrot.slane %v3618_v0, 1  ;;  %v2730_v26 = vsel %vm9143_vm4, 0, %v2729_v55  ;;  %v11239_v3 = vld [vmem:[#allocation38_spill] sm:$0xff] }
 0x350   : > { %3228 = vst [vmem:[#allocation3 + $0xa4] sm:$0x1] %v3227_v49  ;;  %v3038_v11 = vshrl.u32 %v2808_v7, 16  ;;  %v2604_v46 = vadd.f32 %v9551_v36, %v2568_v22  ;;  %v2343_v24 = vadd.f32 %v2342_v42, %v11237_v10  ;;  %v3041_v5 = vshll.u32 %v2808_v7, 16 }
 0x351   : > { %v9816_v41 = vsel %vm594_vm0, %v3616_v56, %v3620_v58  ;;  %v2433_v29 = vpop.f32.mrf.mxu0  ;;  %2731 = vst [vmem:[#allocation3 + $0xc0] sm:$0x1] %v2730_v26  ;;  %v3721_v56 = vrot.slane %v9543_v50, 1  ;;  %v3722_v58 = vrot.slane %v9560_v17, 1  ;;  %v2779_v26 = vld [vmem:[#allocation3 + $0xc8] sm:$0x1] }
 0x352   : > { %11238 = vst [vmem:[#allocation36_spill] sm:$0xff] %v9816_v41  ;;  %v3040_v60 = vrot.slane %v3038_v11, 7  ;;  %v2636_v52 = vmax.f32 %v2604_v46, 0.0  ;;  %v2432_v13 = vadd.f32 %v2431_v14, %v2343_v24  ;;  %4121 = vmatmul.bf16.gmra.mxu2 %v9816_v41 }
 0x354   : > { %v3043_v32 = vor.u32 %v3041_v5, %v3040_v60  ;;  %v2668_v0 = vmin.f32 %v2636_v52, 6.0  ;;  %v2469_v49 = vadd.f32 %v2432_v13, %v11239_v3  ;;  %v9822_v42 = vpop.f32.mrf.mxu1  ;;  %v9838_v13 = vsel %vm829_vm1, %v3721_v56, %v3722_v58 }
 0x355   : > { %v4082_v22 = vpop.f32.mrf.mxu2  ;;  %11240 = vst [vmem:[#allocation25_spill] sm:$0xff] %v9838_v13 }
 0x356   : > { %v3230_v7 = vsel %vm9213_vm8, %v3043_v32, %v3229_v19  ;;  %v2809_v11 = vpack.c.bf16 %v2668_v0, %v2668_v0  ;;  %v2569_v14 = vmul.f32 %v9540_v54, %v2469_v49  ;;  %v9830_v46 = vadd.f32 %v4082_v22, %v9772_v34  ;;  %v9832_v10 = vld [vmem:[#allocation3 + $0x9c] sm:$0xff] }
 0x357   : > { %3231 = vst [vmem:[#allocation3 + $0xa8] sm:$0xf] %v3230_v7  ;;  %v2344_v24 = vpop.f32.mrf.mxu3  ;;  %v3291_v55 = vld [vmem:[#allocation3 + $0xa4] sm:$0x1]  ;;  %4037 = vmatmul.bf16.gmra.mxu1 %v9832_v10  ;;  %v3625_v34 = vshll.u32 %v9832_v10, 16  ;;  %v2780_v32 = vsel %vm9154_vm6, 0, %v2779_v26 }
 0x358   : > { %v3046_v5 = vshrl.u32 %v2809_v11, 16  ;;  %v2605_v50 = vadd.f32 %v9551_v36, %v2569_v14  ;;  %v2345_v17 = vadd.f32 %v2344_v24, %v9447_v9  ;;  %v3443_v19 = vunpack.c.l.b16 %v3291_v55  ;;  %2781 = vst [vmem:[#allocation3 + $0xc8] sm:$0x1] %v2780_v32  ;;  %v3233_v14 = vld [vmem:[#allocation3 + $0xb0] sm:$0x1] }
 0x359   : > { %v2436_v52 = vpop.f32.mrf.mxu0  ;;  %v3049_v3 = vshll.u32 %v2809_v11, 16  ;;  %v3044_v7 = vrot.slane %v3040_v60, 4  ;;  %v3623_v24 = vshrl.u32 %v9832_v10, 16  ;;  %v3627_v41 = vrot.slane %v3625_v34, 1 }
 0x35a   : > { %v3048_v0 = vrot.slane %v3046_v5, 7  ;;  %v2637_v49 = vmax.f32 %v2605_v50, 0.0  ;;  %v2434_v22 = vadd.f32 %v2433_v29, %v2345_v17  ;;  %v9843_v9 = vpack.c.b16 %v3443_v19, %v3443_v19 }
 0x35b   : > { %v3628_v29 = vor.u32 %v3627_v41, %v3623_v24 }
 0x35c   : > { %v3051_v56 = vor.u32 %v3049_v3, %v3048_v0  ;;  %v3053_v58 = vrot.slane %v3048_v0, 4  ;;  %v2669_v55 = vmin.f32 %v2637_v49, 6.0  ;;  %v2470_v61 = vadd.f32 %v2434_v22, %v11241_v57  ;;  %4185 = vmatmul.bf16.gmra.mxu3 %v9838_v13  ;;  %4531 = vmatmul.bf16.gmra.mxu0 %v9588_v59  ;;  %v9849_v26 = vpop.f32.mrf.mxu1  ;;  %v7912_v49 = vld [vmem:[%s11018_s4 + $0x100] sm:$0xff] }
 0x35d   : > { %v4084_v11 = vpop.f32.mrf.mxu2  ;;  %v3630_v60 = vshll.u32 %v9843_v9, 16  ;;  %4584 = vmatpush.bf16.msrb.mxu1 %v7912_v49 }
 0x35e   : > { %v3052_v5 = vsel %vm9231_vm10, %v3044_v7, %v3051_v56  ;;  %v3234_v50 = vsel %vm9143_vm4, %v3053_v58, %v3233_v14  ;;  %v2810_v17 = vpack.c.bf16 %v2669_v55, %v2669_v55  ;;  %v2570_v19 = vmul.f32 %v9540_v54, %v2470_v61  ;;  %v7920_v61 = vld [vmem:[%s11018_s4 + $0x140] sm:$0xff] }
 0x35f   : > { %3232 = vst [vmem:[#allocation3 + $0xac] sm:$0xf] %v3052_v5  ;;  %v9858_v57 = vadd.f32 %v4084_v11, %v9802_v63  ;;  %v2347_v34 = vpop.f32.mrf.mxu3  ;;  %v3632_v32 = vrot.slane %v3630_v60, 1  ;;  %4673 = vmatpush.bf16.msrb.mxu2 %v7920_v61  ;;  %v11242_v11 = vld [vmem:[#allocation27_spill] sm:$0xff] }
 0x360   : > { %3235 = vst [vmem:[#allocation3 + $0xb0] sm:$0x1] %v3234_v50  ;;  %v3055_v0 = vshrl.u32 %v2810_v17, 16  ;;  %v2606_v41 = vadd.f32 %v9551_v36, %v2570_v19  ;;  %v2348_v3 = vadd.f32 %v2347_v34, %v9469_v62  ;;  %v3058_v14 = vshll.u32 %v2810_v17, 16  ;;  %v3236_v62 = vld [vmem:[#allocation3 + $0xb4] sm:$0xf] }
 0x361   : > { %v9869_v22 = vsel %vm594_vm0, %v3628_v29, %v3632_v32  ;;  %v2438_v63 = vpop.f32.mrf.mxu0  ;;  %v3725_v29 = vrot.slane %v9603_v43, 1 }
 0x362   : > { %v3057_v7 = vrot.slane %v3055_v0, 7  ;;  %v2638_v24 = vmax.f32 %v2606_v41, 0.0  ;;  %v2437_v56 = vadd.f32 %v2436_v52, %v2348_v3  ;;  %4126 = vmatmul.bf16.gmra.mxu2 %v9869_v22  ;;  %v7935_v0 = vld [vmem:[%s11018_s4 + $0x1b8] sm:$0xff]  ;;  %v3724_v3 = vrot.slane %v9588_v59, 1 }
 0x363   : > { %5044 = vmatpush.bf16.msra.mxu3 %v7935_v0 }
 0x364   : > { %v3060_v58 = vor.u32 %v3058_v14, %v3057_v7  ;;  %v2670_v55 = vmin.f32 %v2638_v24, 6.0  ;;  %v2471_v60 = vadd.f32 %v2437_v56, %v11242_v11  ;;  %v9873_v50 = vpop.f32.mrf.mxu1  ;;  %v3061_v11 = vrot.slane %v3057_v7, 4 }
 0x365   : > { %v4087_v5 = vpop.f32.mrf.mxu2 }
 0x366   : > { %v3237_v19 = vsel %vm9213_vm8, %v3060_v58, %v3236_v62  ;;  %v2811_v17 = vpack.c.bf16 %v2670_v55, %v2670_v55  ;;  %v2571_v52 = vmul.f32 %v9540_v54, %v2471_v60  ;;  %v9880_v34 = vadd.f32 %v4087_v5, %v9822_v42  ;;  %v9882_v32 = vld [vmem:[#allocation3 + $0xa8] sm:$0xff]  ;;  %v3240_v60 = vld [vmem:[#allocation3 + $0xbc] sm:$0x1] }
 0x367   : > { %3238 = vst [vmem:[#allocation3 + $0xb4] sm:$0xf] %v3237_v19  ;;  %v2349_v41 = vpop.f32.mrf.mxu3  ;;  %v3294_v43 = vld [vmem:[#allocation3 + $0xb0] sm:$0x1]  ;;  %4042 = vmatmul.bf16.gmra.mxu1 %v9882_v32  ;;  %v9894_v42 = vsel %vm829_vm1, %v3724_v3, %v3725_v29  ;;  %v3637_v56 = vshll.u32 %v9882_v32, 16 }
 0x368   : > { %v3063_v49 = vshrl.u32 %v2811_v17, 16  ;;  %v2607_v61 = vadd.f32 %v9551_v36, %v2571_v52  ;;  %v2350_v14 = vadd.f32 %v2349_v41, %v9493_v2  ;;  %11243 = vst [vmem:[#allocation37_spill] sm:$0xff] %v9894_v42  ;;  %v3444_v24 = vunpack.c.l.b16 %v3294_v43  ;;  %v11244_v41 = vld [vmem:[#allocation42_spill] sm:$0xff] }
 0x369   : > { %v9891_v54 = vpop.f32.mrf.mxu0  ;;  %v3066_v58 = vshll.u32 %v2811_v17, 16  ;;  %v3635_v2 = vshrl.u32 %v9882_v32, 16  ;;  %v3639_v5 = vrot.slane %v3637_v56, 1  ;;  %v7943_v56 = vld [vmem:[%s11018_s4 + $0x1f8] sm:$0xff] }
 0x36a   : > { %v3065_v62 = vrot.slane %v3063_v49, 7  ;;  %v2639_v59 = vmax.f32 %v2607_v61, 0.0  ;;  %v2439_v55 = vadd.f32 %v2438_v63, %v2350_v14  ;;  %v9897_v36 = vpack.c.b16 %v3444_v24, %v3444_v24  ;;  %v8020_v14 = vld [vmem:[%s11016_s2] ss:$0 sm:$0xff]  ;;  %5133 = vmatpush.bf16.msra.mxu0 %v7943_v56 }
 0x36b   : > { %v3640_v63 = vor.u32 %v3639_v5, %v3635_v2 }
 0x36c   : > { %v3068_v19 = vor.u32 %v3066_v58, %v3065_v62  ;;  %v3070_v52 = vrot.slane %v3065_v62, 4  ;;  %v2671_v0 = vmin.f32 %v2639_v59, 6.0  ;;  %v2472_v29 = vadd.f32 %v2439_v55, %v11244_v41  ;;  %4190 = vmatmul.bf16.gmra.mxu3 %v9894_v42  ;;  %4536 = vmatmul.bf16.gmra.mxu0 %v9632_v51  ;;  %v9903_v17 = vpop.f32.mrf.mxu1  ;;  %v7951_v62 = vld [vmem:[%s11018_s4 + $0x238] sm:$0xff] }
 0x36d   : > { %v4089_v3 = vpop.f32.mrf.mxu2  ;;  %v3642_v7 = vshll.u32 %v9897_v36, 16  ;;  %5222 = vmatpush.bf16.msra.mxu1 %v7951_v62  ;;  %v3728_v62 = vrot.slane %v9644_v27, 1 }
 0x36e   : > { %v3069_v43 = vsel %vm9231_vm10, %v3061_v11, %v3068_v19  ;;  %v3241_v49 = vsel %vm9143_vm4, %v3070_v52, %v3240_v60  ;;  %v2812_v61 = vpack.c.bf16 %v2671_v0, %v2671_v0  ;;  %v2572_v24 = vmul.f32 %v8020_v14, %v2472_v29  ;;  %v8021_v60 = vld [vmem:[%s11017_s3] ss:$0 sm:$0xff]  ;;  %v7959_v29 = vld [vmem:[#allocation4 + $0x38] sm:$0xff] }
 0x36f   : > { %3239 = vst [vmem:[#allocation3 + $0xb8] sm:$0xf] %v3069_v43  ;;  %v9920_v58 = vadd.f32 %v4089_v3, %v9849_v26  ;;  %v4151_v59 = vpop.f32.mrf.mxu3  ;;  %v3644_v55 = vrot.slane %v3642_v7, 1  ;;  %v3243_v3 = vld [vmem:[#allocation3 + $0xc0] sm:$0xf]  ;;  %5607 = vmatpush.bf16.msra.mxu2 %v7959_v29 }
 0x370   : > { %3242 = vst [vmem:[#allocation3 + $0xbc] sm:$0x1] %v3241_v49  ;;  %v3072_v11 = vshrl.u32 %v2812_v61, 16  ;;  %v2608_v2 = vadd.f32 %v8021_v60, %v2572_v24  ;;  %v9926_v5 = vadd.f32 %v4151_v59, %v9525_v38  ;;  %v3075_v0 = vshll.u32 %v2812_v61, 16 }
 0x371   : > { %v9929_v19 = vsel %vm594_vm0, %v3640_v63, %v3644_v55  ;;  %v9931_v52 = vpop.f32.mrf.mxu0 }
 0x372   : > { %11245 = vst [vmem:[#allocation32_spill] sm:$0xff] %v9929_v19  ;;  %v3074_v26 = vrot.slane %v3072_v11, 7  ;;  %v2640_v41 = vmax.f32 %v2608_v2, 0.0  ;;  %4131 = vmatmul.bf16.gmra.mxu2 %v9929_v19  ;;  %v3727_v2 = vrot.slane %v9632_v51, 1  ;;  %v3740_v19 = vrot.slane %v9843_v9, 1 }
 0x374   : > { %v3077_v7 = vor.u32 %v3075_v0, %v3074_v26  ;;  %v2672_v43 = vmin.f32 %v2640_v41, 6.0  ;;  %v4008_v38 = vpop.f32.mrf.mxu1 }
 0x375   : > { %v4092_v49 = vpop.f32.mrf.mxu2 }
 0x376   : > { %v3244_v14 = vsel %vm9213_vm8, %v3077_v7, %v3243_v3  ;;  %v2813_v24 = vpack.c.bf16 %v2672_v43, %v2672_v43  ;;  %v9937_v63 = vadd.f32 %v4092_v49, %v9873_v50  ;;  %v9939_v56 = vld [vmem:[#allocation3 + $0xb4] sm:$0xff]  ;;  %v3247_v3 = vld [vmem:[#allocation3 + $0xc8] sm:$0x1]  ;;  %v9952_v7 = vsel %vm829_vm1, %v3727_v2, %v3728_v62 }
 0x377   : > { %11246 = vst [vmem:[#allocation38_spill] sm:$0xff] %v9939_v56  ;;  %v9941_v61 = vpop.f32.mrf.mxu3  ;;  %v3297_v59 = vld [vmem:[#allocation3 + $0xbc] sm:$0x1]  ;;  %4047 = vmatmul.bf16.gmra.mxu1 %v9939_v56  ;;  %v3649_v0 = vshll.u32 %v9939_v56, 16  ;;  %v3647_v27 = vshrl.u32 %v9939_v56, 16  ;;  %v3078_v49 = vrot.slane %v3074_v26, 4 }
 0x378   : > { %3245 = vst [vmem:[#allocation3 + $0xc0] sm:$0xf] %v3244_v14  ;;  %v3080_v55 = vshrl.u32 %v2813_v24, 16  ;;  %v3445_v11 = vunpack.c.l.b16 %v3297_v59  ;;  %v3083_v41 = vshll.u32 %v2813_v24, 16 }
 0x379   : > { %v9945_v60 = vpop.f32.mrf.mxu0  ;;  %11247 = vst [vmem:[#allocation39_spill] sm:$0xff] %v9952_v7  ;;  %v3651_v43 = vrot.slane %v3649_v0, 1 }
 0x37a   : > { %v3082_v50 = vrot.slane %v3080_v55, 7  ;;  %v9949_v29 = vpack.c.b16 %v3445_v11, %v3445_v11 }
 0x37b   : > { %v3652_v11 = vor.u32 %v3651_v43, %v3647_v27 }
 0x37c   : > { %v3085_v14 = vor.u32 %v3083_v41, %v3082_v50  ;;  %v3087_v59 = vrot.slane %v3082_v50, 4  ;;  %4195 = vmatmul.bf16.gmra.mxu3 %v9952_v7  ;;  %4541 = vmatmul.bf16.gmra.mxu0 %v9681_v31  ;;  %v3654_v51 = vshll.u32 %v9949_v29, 16  ;;  %v4010_v24 = vpop.f32.mrf.mxu1 }
 0x37d   : > { %v4094_v55 = vpop.f32.mrf.mxu2 }
 0x37e   : > { %v3086_v18 = vsel %vm9231_vm10, %v3078_v49, %v3085_v14  ;;  %v3248_v62 = vsel %vm9143_vm4, %v3087_v59, %v3247_v3  ;;  %v9963_v2 = vadd.f32 %v4094_v55, %v9903_v17  ;;  %v3656_v26 = vrot.slane %v3654_v51, 1  ;;  %v11249_v14 = vld [vmem:[#allocation46_spill] sm:$0xff] }
 0x37f   : > { %3246 = vst [vmem:[#allocation3 + $0xc4] sm:$0xf] %v3086_v18  ;;  %v4156_v0 = vpop.f32.mrf.mxu3  ;;  %v7934_v18 = vld [vmem:[%s11018_s4 + $0x1b0] sm:$0xff]  ;;  %v3731_v49 = vrot.slane %v9696_v28, 1  ;;  %v3730_v51 = vrot.slane %v9681_v31, 1 }
 0x380   : > { %3249 = vst [vmem:[#allocation3 + $0xc8] sm:$0x1] %v3248_v62  ;;  %v9966_v50 = vadd.f32 %v4156_v0, %v9679_v12  ;;  %v9969_v41 = vsel %vm594_vm0, %v3652_v11, %v3656_v26  ;;  %5045 = vmatpush.bf16.msra.mxu3 %v7934_v18  ;;  %v7950_v62 = vld [vmem:[%s11018_s4 + $0x230] sm:$0xff] }
 0x381   : > { %11248 = vst [vmem:[#allocation27_spill] sm:$0xff] %v9969_v41  ;;  %v9971_v27 = vpop.f32.mrf.mxu0  ;;  %5223 = vmatpush.bf16.msra.mxu1 %v7950_v62 }
 0x382   : > { %4136 = vmatmul.bf16.gmra.mxu2 %v9969_v41 }
 0x384   : > { %v4013_v43 = vpop.f32.mrf.mxu1 }
 0x385   : > { %v4097_v39 = vpop.f32.mrf.mxu2 }
 0x386   : > { %v9974_v3 = vadd.f32 %v4097_v39, %v4008_v38  ;;  %v9988_v38 = vsel %vm829_vm1, %v3730_v51, %v3731_v49 }
 0x387   : > { %v4158_v17 = vpop.f32.mrf.mxu3  ;;  %4585 = vmatmul.bf16.vlgmr.msrb.gmra.mxu1 %v11249_v14  ;;  %v3734_v14 = vrot.slane %v9743_v1, 1 }
 0x388   : > { %v9981_v12 = vadd.f32 %v4158_v17, %v9711_v48  ;;  %v7942_v48 = vld [vmem:[%s11018_s4 + $0x1f0] sm:$0xff] }
 0x389   : > { %v9984_v59 = vpop.f32.mrf.mxu0  ;;  %5134 = vmatpush.bf16.msra.mxu0 %v7942_v48  ;;  %v3733_v48 = vrot.slane %v9732_v45, 1 }
 0x38c   : > { %4200 = vmatmul.bf16.gmra.mxu3 %v9988_v38  ;;  %4546 = vmatmul.bf16.gmra.mxu0 %v9732_v45  ;;  %v4015_v11 = vpop.f32.mrf.mxu1 }
 0x38d   : > { %v4099_v55 = vpop.f32.mrf.mxu2 }
 0x38e   : > { %v9992_v28 = vadd.f32 %v4099_v55, %v4010_v24  ;;  %v7958_v24 = vld [vmem:[#allocation4 + $0x30] sm:$0xff] }
 0x38f   : > { %v4161_v31 = vpop.f32.mrf.mxu3  ;;  %5608 = vmatpush.bf16.msra.mxu2 %v7958_v24 }
 0x390   : > { %v10001_v26 = vadd.f32 %v4161_v31, %v9730_v30  ;;  %v11250_v30 = vld [vmem:[#allocation28_spill] sm:$0xff] }
 0x391   : > { %v10003_v0 = vpop.f32.mrf.mxu0 }
 0x392   : > { %4674 = vmatmul.bf16.vlgmr.msrb.gmra.mxu2 %v9557_v8  ;;  %v10017_v8 = vsel %vm829_vm1, %v3733_v48, %v3734_v14  ;;  %v7933_v14 = vld [vmem:[%s11018_s4 + $0x1a8] sm:$0xff] }
 0x393   : > { %5046 = vmatpush.bf16.msra.mxu3 %v7933_v14  ;;  %v7949_v14 = vld [vmem:[%s11018_s4 + $0x228] sm:$0xff] }
 0x394   : > { %v4018_v18 = vpop.f32.mrf.mxu1  ;;  %5224 = vmatpush.bf16.msra.mxu1 %v7949_v14  ;;  %v7932_v14 = vld [vmem:[%s11018_s4 + $0x1a0] sm:$0xff] }
 0x395   : > { %v4102_v39 = vpop.f32.mrf.mxu2 }
 0x396   : > { %v10006_v17 = vadd.f32 %v4102_v39, %v4013_v43 }
 0x397   : > { %v4163_v49 = vpop.f32.mrf.mxu3  ;;  %4590 = vmatmul.bf16.gmra.mxu1 %v11250_v30  ;;  %5047 = vmatpush.bf16.msra.mxu3 %v7932_v14  ;;  %v7938_v14 = vld [vmem:[%s11018_s4 + $0x1d0] sm:$0xff] }
 0x398   : > { %v10010_v51 = vadd.f32 %v4163_v49, %v9758_v6 }
 0x399   : > { %v10013_v55 = vpop.f32.mrf.mxu0 }
 0x39c   : > { %4205 = vmatmul.bf16.gmra.mxu3 %v10017_v8  ;;  %4551 = vmatmul.bf16.gmra.mxu0 %v9781_v53  ;;  %v4020_v62 = vpop.f32.mrf.mxu1 }
 0x39d   : > { %v4104_v43 = vpop.f32.mrf.mxu2 }
 0x39e   : > { %v10021_v31 = vadd.f32 %v4104_v43, %v4015_v11  ;;  %v3737_v11 = vrot.slane %v9796_v37, 1 }
 0x39f   : > { %v4166_v1 = vpop.f32.mrf.mxu3 }
 0x3a0   : > { %v10024_v6 = vadd.f32 %v4166_v1, %v9779_v47  ;;  %v11251_v47 = vld [vmem:[#allocation30_spill] sm:$0xff] }
 0x3a1   : > { %v10026_v24 = vpop.f32.mrf.mxu0 }
 0x3a2   : > { %4679 = vmatmul.bf16.gmra.mxu2 %v9600_v15 }
 0x3a4   : > { %v4023_v39 = vpop.f32.mrf.mxu1 }
 0x3a5   : > { %v4107_v45 = vpop.f32.mrf.mxu2 }
 0x3a6   : > { %v10029_v49 = vadd.f32 %v4107_v45, %v4018_v18  ;;  %v10043_v18 = vsel %vm829_vm1, %v3736_v21, %v3737_v11 }
 0x3a7   : > { %v4168_v48 = vpop.f32.mrf.mxu3  ;;  %4595 = vmatmul.bf16.gmra.mxu1 %v11251_v47 }
 0x3a8   : > { %v10036_v43 = vadd.f32 %v4168_v48, %v9811_v44  ;;  %v7941_v44 = vld [vmem:[%s11018_s4 + $0x1e8] sm:$0xff] }
 0x3a9   : > { %v10039_v1 = vpop.f32.mrf.mxu0  ;;  %5135 = vmatpush.bf16.msra.mxu0 %v7941_v44  ;;  %v3739_v44 = vrot.slane %v9832_v10, 1 }
 0x3aa   : > { %11252 = vst [vmem:[#allocation42_spill] sm:$0xff] %v10039_v1 }
 0x3ac   : > { %4210 = vmatmul.bf16.gmra.mxu3 %v10043_v18  ;;  %4556 = vmatmul.bf16.gmra.mxu0 %v9832_v10  ;;  %v4025_v40 = vpop.f32.mrf.mxu1 }
 0x3ad   : > { %v4109_v45 = vpop.f32.mrf.mxu2 }
 0x3ae   : > { %v10047_v37 = vadd.f32 %v4109_v45, %v4020_v62  ;;  %v7957_v62 = vld [vmem:[#allocation4 + $0x28] sm:$0xff] }
 0x3af   : > { %v4171_v53 = vpop.f32.mrf.mxu3  ;;  %5609 = vmatpush.bf16.msra.mxu2 %v7957_v62  ;;  %v7939_v62 = vld [vmem:[%s11018_s4 + $0x1d8] sm:$0xff] }
 0x3b0   : > { %v10056_v21 = vadd.f32 %v4171_v53, %v9830_v46  ;;  %v10078_v53 = vsel %vm829_vm1, %v3739_v44, %v3740_v19 }
 0x3b1   : > { %v10058_v48 = vpop.f32.mrf.mxu0 }
 0x3b2   : > { %4684 = vmatmul.bf16.gmra.mxu2 %v9639_v35 }
 0x3b4   : > { %v4028_v45 = vpop.f32.mrf.mxu1 }
 0x3b5   : > { %v4112_v11 = vpop.f32.mrf.mxu2 }
 0x3b6   : > { %v10061_v15 = vadd.f32 %v4112_v11, %v4023_v39  ;;  %v7940_v39 = vld [vmem:[%s11018_s4 + $0x1e0] sm:$0xff] }
 0x3b7   : > { %v4173_v41 = vpop.f32.mrf.mxu3  ;;  %4600 = vmatmul.bf16.gmra.mxu1 %v9450_v20  ;;  %5136 = vmatpush.bf16.msra.mxu0 %v7940_v39 }
 0x3b8   : > { %v10065_v1 = vadd.f32 %v4173_v41, %v9858_v57  ;;  %v7931_v41 = vld [vmem:[%s11018_s4 + $0x198] sm:$0xff] }
 0x3b9   : > { %v10068_v46 = vpop.f32.mrf.mxu0  ;;  %5048 = vmatpush.bf16.msra.mxu3 %v7931_v41  ;;  %v7929_v41 = vld [vmem:[%s11018_s4 + $0x188] sm:$0xff] }
 0x3bb   : > { %5137 = vmatpush.bf16.msra.mxu0 %v7939_v62  ;;  %v7937_v62 = vld [vmem:[%s11018_s4 + $0x1c8] sm:$0xff] }
 0x3bc   : > { %4215 = vmatmul.bf16.gmra.mxu3 %v10078_v53  ;;  %4561 = vmatmul.bf16.gmra.mxu0 %v9882_v32  ;;  %v4030_v57 = vpop.f32.mrf.mxu1 }
 0x3bd   : > { %v4114_v9 = vpop.f32.mrf.mxu2 }
 0x3be   : > { %v10082_v10 = vadd.f32 %v4114_v9, %v4025_v40  ;;  %v7930_v40 = vld [vmem:[%s11018_s4 + $0x190] sm:$0xff] }
 0x3bf   : > { %v4176_v19 = vpop.f32.mrf.mxu3  ;;  %5049 = vmatpush.bf16.msra.mxu3 %v7930_v40  ;;  %5138 = vmatpush.bf16.msra.mxu0 %v7938_v14  ;;  %v7928_v14 = vld [vmem:[%s11018_s4 + $0x180] sm:$0xff] }
 0x3c0   : > { %v10091_v11 = vadd.f32 %v4176_v19, %v9880_v34 }
 0x3c1   : > { %v10093_v44 = vpop.f32.mrf.mxu0 }
 0x3c2   : > { %11253 = vst [vmem:[#allocation46_spill] sm:$0xff] %v10093_v44  ;;  %4689 = vmatmul.bf16.gmra.mxu2 %v9691_v4  ;;  %v3743_v4 = vrot.slane %v9897_v36, 1 }
 0x3c3   : > { %5050 = vmatpush.bf16.msra.mxu3 %v7929_v41  ;;  %5139 = vmatpush.bf16.msra.mxu0 %v7937_v62  ;;  %v7948_v62 = vld [vmem:[%s11018_s4 + $0x220] sm:$0xff] }
 0x3c4   : > { %v4033_v9 = vpop.f32.mrf.mxu1  ;;  %5225 = vmatpush.bf16.msra.mxu1 %v7948_v62  ;;  %v3745_v62 = vrot.slane %v9939_v56, 1 }
 0x3c5   : > { %v4117_v39 = vpop.f32.mrf.mxu2 }
 0x3c6   : > { %v10102_v34 = vadd.f32 %v4117_v39, %v4028_v45  ;;  %v3742_v45 = vrot.slane %v9882_v32, 1  ;;  %v7936_v39 = vld [vmem:[%s11018_s4 + $0x1c0] sm:$0xff] }
 0x3c7   : > { %v4178_v19 = vpop.f32.mrf.mxu3  ;;  %4605 = vmatmul.bf16.gmra.mxu1 %v9489_v23  ;;  %5051 = vmatpush.bf16.msra.mxu3 %v7928_v14 }
 0x3c8   : > { %v10112_v35 = vadd.f32 %v4178_v19, %v9920_v58  ;;  %v10125_v36 = vsel %vm829_vm1, %v3742_v45, %v3743_v4  ;;  %5140 = vmatpush.bf16.msra.mxu0 %v7936_v39  ;;  %v7956_v45 = vld [vmem:[#allocation4 + $0x20] sm:$0xff] }
 0x3c9   : > { %v10115_v40 = vpop.f32.mrf.mxu0  ;;  %11256 = vst [vmem:[#allocation49_spill] sm:$0xff] %v10125_v36  ;;  %5610 = vmatpush.bf16.msra.mxu2 %v7956_v45 }
 0x3ca   : > { %11254 = vst [vmem:[#allocation28_spill] sm:$0xff] %v10112_v35 }
 0x3cb   : > { %11255 = vst [vmem:[#allocation30_spill] sm:$0xff] %v10115_v40 }
 0x3cc   : > { %4220 = vmatmul.bf16.gmra.mxu3 %v10125_v36  ;;  %4566 = vmatmul.bf16.gmra.mxu0 %v9939_v56  ;;  %v4035_v41 = vpop.f32.mrf.mxu1 }
 0x3cd   : > { %v4119_v58 = vpop.f32.mrf.mxu2 }
 0x3ce   : > { %v10129_v32 = vadd.f32 %v4119_v58, %v4030_v57  ;;  %v3746_v58 = vrot.slane %v9949_v29, 1 }
 0x3cf   : > { %v4181_v19 = vpop.f32.mrf.mxu3 }
 0x3d0   : > { %v10135_v40 = vadd.f32 %v4181_v19, %v9937_v63  ;;  %v10150_v19 = vld [vmem:[#allocation3 + $0xc0] sm:$0xff]  ;;  %v10153_v45 = vsel %vm829_vm1, %v3745_v62, %v3746_v58 }
 0x3d1   : > { %v10137_v4 = vpop.f32.mrf.mxu0 }
 0x3d2   : > { %11257 = vst [vmem:[#allocation50_spill] sm:$0xff] %v10137_v4  ;;  %4694 = vmatmul.bf16.gmra.mxu2 %v9738_v16  ;;  %v11263_v4 = vld [vmem:[#allocation33_spill] sm:$0xff] }
 0x3d4   : > { %v4038_v14 = vpop.f32.mrf.mxu1 }
 0x3d5   : > { %v4122_v35 = vpop.f32.mrf.mxu2 }
 0x3d6   : > { %v10140_v39 = vadd.f32 %v4122_v35, %v4033_v9 }
 0x3d7   : > { %v4183_v57 = vpop.f32.mrf.mxu3  ;;  %4610 = vmatmul.bf16.gmra.mxu1 %v9530_v33 }
 0x3d8   : > { %v10144_v44 = vadd.f32 %v4183_v57, %v9963_v2 }
 0x3d9   : > { %v10147_v63 = vpop.f32.mrf.mxu0 }
 0x3da   : > { %11258 = vst [vmem:[#allocation51_spill] sm:$0xff] %v10144_v44 }
 0x3db   : > { %11259 = vst [vmem:[#allocation52_spill] sm:$0xff] %v10147_v63 }
 0x3dc   : > { %4225 = vmatmul.bf16.gmra.mxu3 %v10153_v45  ;;  %4571 = vmatmul.bf16.gmra.mxu0 %v10150_v19  ;;  %v4040_v29 = vpop.f32.mrf.mxu1 }
 0x3dd   : > { %v4124_v35 = vpop.f32.mrf.mxu2 }
 0x3de   : > { %v10157_v9 = vadd.f32 %v4124_v35, %v4035_v41  ;;  %v8022_v35 = vld [vmem:[#allocation3 + $0x18] sm:$0xff] }
 0x3df   : > { %v4186_v2 = vpop.f32.mrf.mxu3 }
 0x3e0   : > { %v10160_v57 = vadd.f32 %v4186_v2, %v9974_v3 }
 0x3e1   : > { %v10162_v16 = vpop.f32.mrf.mxu0 }
 0x3e2   : > { %11260 = vst [vmem:[#allocation53_spill] sm:$0xff] %v10160_v57  ;;  %4699 = vmatmul.bf16.gmra.mxu2 %v9791_v25 }
 0x3e3   : > { %11261 = vst [vmem:[#allocation54_spill] sm:$0xff] %v10162_v16 }
 0x3e4   : > { %v4043_v63 = vpop.f32.mrf.mxu1 }
 0x3e5   : > { %v4127_v56 = vpop.f32.mrf.mxu2 }
 0x3e6   : > { %v10165_v58 = vadd.f32 %v4127_v56, %v4038_v14  ;;  %v7947_v56 = vld [vmem:[%s11018_s4 + $0x218] sm:$0xff] }
 0x3e7   : > { %v4188_v62 = vpop.f32.mrf.mxu3  ;;  %4615 = vmatmul.bf16.gmra.mxu1 %v11263_v4 }
 0x3e8   : > { %v10168_v44 = vadd.f32 %v4188_v62, %v9992_v28  ;;  %5226 = vmatpush.bf16.msra.mxu1 %v7947_v56 }
 0x3e9   : > { %v10171_v41 = vpop.f32.mrf.mxu0 }
 0x3ea   : > { %11262 = vst [vmem:[#allocation55_spill] sm:$0xff] %v10168_v44  ;;  %v11266_v44 = vld [vmem:[#allocation45_spill] sm:$0xff] }
 0x3eb   : > { %11264 = vst [vmem:[#allocation33_spill] sm:$0xff] %v10171_v41 }
 0x3ec   : > { %5052 = vmatmul.bf16.vlgmr.msra.gmra.mxu3 %v8022_v35  ;;  %5141 = vmatmul.bf16.vlgmr.msra.gmra.mxu0 %v11250_v30  ;;  %v4045_v2 = vpop.f32.mrf.mxu1  ;;  %v7955_v35 = vld [vmem:[#allocation4 + $0x18] sm:$0xff] }
 0x3ed   : > { %v4129_v3 = vpop.f32.mrf.mxu2  ;;  %5611 = vmatpush.bf16.msra.mxu2 %v7955_v35 }
 0x3ee   : > { %v10174_v16 = vadd.f32 %v4129_v3, %v4040_v29 }
 0x3ef   : > { %v4191_v14 = vpop.f32.mrf.mxu3 }
 0x3f0   : > { %v10180_v28 = vadd.f32 %v4191_v14, %v10006_v17  ;;  %v8023_v17 = vld [vmem:[#allocation3 + $0x24] sm:$0xff] }
 0x3f1   : > { %v10182_v62 = vpop.f32.mrf.mxu0 }
 0x3f2   : > { %4704 = vmatmul.bf16.gmra.mxu2 %v9838_v13 }
 0x3f4   : > { %v4048_v25 = vpop.f32.mrf.mxu1 }
 0x3f5   : > { %v4132_v30 = vpop.f32.mrf.mxu2 }
 0x3f6   : > { %v10185_v41 = vadd.f32 %v4132_v30, %v4043_v63 }
 0x3f7   : > { %v4193_v29 = vpop.f32.mrf.mxu3  ;;  %4620 = vmatmul.bf16.gmra.mxu1 %v11266_v44 }
 0x3f8   : > { %v10188_v3 = vadd.f32 %v4193_v29, %v10021_v31 }
 0x3f9   : > { %v10191_v57 = vpop.f32.mrf.mxu0 }
 0x3fa   : > { %11265 = vst [vmem:[#allocation56_spill] sm:$0xff] %v10188_v3 }
 0x3fb   : > { %11267 = vst [vmem:[#allocation45_spill] sm:$0xff] %v10191_v57 }
 0x3fc   : > { %5057 = vmatmul.bf16.gmra.mxu3 %v8023_v17  ;;  %5146 = vmatmul.bf16.gmra.mxu0 %v11251_v47  ;;  %v4050_v14 = vpop.f32.mrf.mxu1  ;;  %v11270_v47 = vld [vmem:[#allocation48_spill] sm:$0xff] }
 0x3fd   : > { %v4134_v56 = vpop.f32.mrf.mxu2 }
 0x3fe   : > { %v10194_v13 = vadd.f32 %v4134_v56, %v4045_v2  ;;  %v8024_v56 = vld [vmem:[#allocation3 + $0x30] sm:$0xff] }
 0x3ff   : > { %v4196_v35 = vpop.f32.mrf.mxu3 }
 0x400   : > { %v10197_v63 = vadd.f32 %v4196_v35, %v10029_v49 }
 0x401   : > { %v10199_v30 = vpop.f32.mrf.mxu0 }
 0x402   : > { %11268 = vst [vmem:[#allocation57_spill] sm:$0xff] %v10199_v30  ;;  %4709 = vmatmul.bf16.gmra.mxu2 %v9894_v42 }
 0x404   : > { %v4586_v29 = vpop.f32.mrf.mxu1 }
 0x405   : > { %v4137_v31 = vpop.f32.mrf.mxu2 }
 0x406   : > { %v10202_v3 = vadd.f32 %v4137_v31, %v4048_v25  ;;  %v7954_v31 = vld [vmem:[#allocation4 + $0x10] sm:$0xff] }
 0x407   : > { %v4198_v57 = vpop.f32.mrf.mxu3  ;;  %4625 = vmatmul.bf16.gmra.mxu1 %v11270_v47  ;;  %5612 = vmatpush.bf16.msra.mxu2 %v7954_v31 }
 0x408   : > { %v10205_v17 = vadd.f32 %v4198_v57, %v10047_v37  ;;  %v7946_v37 = vld [vmem:[%s11018_s4 + $0x210] sm:$0xff] }
 0x409   : > { %v10208_v2 = vpop.f32.mrf.mxu0  ;;  %5227 = vmatpush.bf16.msra.mxu1 %v7946_v37  ;;  %v11277_v37 = vld [vmem:[#allocation9_spill] sm:$0xff] }
 0x40a   : > { %11269 = vst [vmem:[#allocation58_spill] sm:$0xff] %v10205_v17 }
 0x40b   : > { %11271 = vst [vmem:[#allocation48_spill] sm:$0xff] %v10208_v2 }
 0x40c   : > { %5062 = vmatmul.bf16.gmra.mxu3 %v8024_v56  ;;  %5151 = vmatmul.bf16.gmra.mxu0 %v9450_v20  ;;  %v4588_v35 = vpop.f32.mrf.mxu1  ;;  %v4587_v20 = vadd.f32 %v4586_v29, %v9891_v54  ;;  %v8025_v29 = vld [vmem:[#allocation3 + $0x3c] sm:$0xff] }
 0x40d   : > { %v4139_v49 = vpop.f32.mrf.mxu2  ;;  %v4589_v54 = vadd.f32 %v4588_v35, %v9931_v52 }
 0x40e   : > { %v10211_v30 = vadd.f32 %v4139_v49, %v4050_v14 }
 0x40f   : > { %v4201_v42 = vpop.f32.mrf.mxu3 }
 0x410   : > { %v10214_v25 = vadd.f32 %v4201_v42, %v10061_v15 }
 0x411   : > { %v10219_v57 = vpop.f32.mrf.mxu0 }
 0x412   : > { %11272 = vst [vmem:[#allocation59_spill] sm:$0xff] %v10214_v25  ;;  %4714 = vmatmul.bf16.gmra.mxu2 %v9952_v7  ;;  %v11275_v25 = vld [vmem:[#allocation14_spill] sm:$0xff] }
 0x413   : > { %11273 = vst [vmem:[#allocation60_spill] sm:$0xff] %v10219_v57  ;;  %v11276_v7 = vld [vmem:[#allocation34_spill] sm:$0xff] }
 0x414   : > { %v4591_v14 = vpop.f32.mrf.mxu1  ;;  %v4065_v17 = vadd.f32 %v11277_v37, %v11276_v7 }
 0x415   : > { %v4675_v56 = vpop.f32.mrf.mxu2  ;;  %v4592_v52 = vadd.f32 %v4591_v14, %v9945_v60 }
 0x416   : > { %v4676_v49 = vadd.f32 %v4675_v56, %v4587_v20 }
 0x417   : > { %v4203_v2 = vpop.f32.mrf.mxu3  ;;  %4630 = vmatmul.bf16.gmra.mxu1 %v11275_v25 }
 0x418   : > { %v10224_v15 = vadd.f32 %v4676_v49, %v9926_v5  ;;  %v10227_v42 = vadd.f32 %v4203_v2, %v10082_v10  ;;  %v4154_v5 = vadd.f32 %v9941_v61, %v4065_v17  ;;  %v11278_v17 = vld [vmem:[#allocation20_spill] sm:$0xff] }
 0x419   : > { %v10230_v57 = vpop.f32.mrf.mxu0 }
 0x41a   : > { %11274 = vst [vmem:[#allocation61_spill] sm:$0xff] %v10224_v15 }
 0x41c   : > { %5067 = vmatmul.bf16.gmra.mxu3 %v8025_v29  ;;  %5156 = vmatmul.bf16.gmra.mxu0 %v9489_v23  ;;  %v4593_v20 = vpop.f32.mrf.mxu1 }
 0x41d   : > { %v4677_v31 = vpop.f32.mrf.mxu2 }
 0x41e   : > { %v4678_v56 = vadd.f32 %v4677_v31, %v4589_v54  ;;  %v4594_v54 = vadd.f32 %v4593_v20, %v9971_v27  ;;  %v8026_v31 = vld [vmem:[#allocation3 + $0x48] sm:$0xff] }
 0x41f   : > { %v4206_v10 = vpop.f32.mrf.mxu3 }
 0x420   : > { %v10237_v2 = vadd.f32 %v4678_v56, %v4154_v5  ;;  %v10240_v49 = vadd.f32 %v4206_v10, %v10102_v34  ;;  %v7945_v10 = vld [vmem:[%s11018_s4 + $0x208] sm:$0xff] }
 0x421   : > { %v10242_v15 = vpop.f32.mrf.mxu0  ;;  %5228 = vmatpush.bf16.msra.mxu1 %v7945_v10 }
 0x422   : > { %4719 = vmatmul.bf16.gmra.mxu2 %v9988_v38 }
 0x424   : > { %v4596_v35 = vpop.f32.mrf.mxu1 }
 0x425   : > { %v4680_v7 = vpop.f32.mrf.mxu2  ;;  %v4597_v27 = vadd.f32 %v4596_v35, %v9984_v59 }
 0x426   : > { %v4681_v23 = vadd.f32 %v4680_v7, %v4592_v52 }
 0x427   : > { %v4208_v37 = vpop.f32.mrf.mxu3  ;;  %4635 = vmatmul.bf16.gmra.mxu1 %v11278_v17 }
 0x428   : > { %v10247_v29 = vadd.f32 %v4681_v23, %v9966_v50  ;;  %v10250_v61 = vadd.f32 %v4208_v37, %v10129_v32 }
 0x429   : > { %v10253_v34 = vpop.f32.mrf.mxu0 }
 0x42c   : > { %5072 = vmatmul.bf16.gmra.mxu3 %v8026_v31  ;;  %5161 = vmatmul.bf16.gmra.mxu0 %v9530_v33  ;;  %v4598_v14 = vpop.f32.mrf.mxu1  ;;  %v7953_v33 = vld [vmem:[#allocation4 + $0x8] sm:$0xff] }
 0x42d   : > { %v4682_v60 = vpop.f32.mrf.mxu2  ;;  %5613 = vmatpush.bf16.msra.mxu2 %v7953_v33 }
 0x42e   : > { %v4683_v5 = vadd.f32 %v4682_v60, %v4594_v54  ;;  %v11279_v54 = vld [vmem:[#allocation36_spill] sm:$0xff]  ;;  %v4599_v60 = vadd.f32 %v4598_v14, %v10003_v0 }
 0x42f   : > { %v4211_v56 = vpop.f32.mrf.mxu3 }
 0x430   : > { %v10258_v50 = vadd.f32 %v4683_v5, %v9981_v12  ;;  %v10261_v32 = vadd.f32 %v4211_v56, %v10140_v39  ;;  %v8027_v5 = vld [vmem:[#allocation3 + $0x54] sm:$0xff] }
 0x431   : > { %v10266_v52 = vpop.f32.mrf.mxu0 }
 0x432   : > { %4724 = vmatmul.bf16.gmra.mxu2 %v10017_v8 }
 0x434   : > { %v4601_v7 = vpop.f32.mrf.mxu1 }
 0x435   : > { %v4685_v20 = vpop.f32.mrf.mxu2  ;;  %v4602_v0 = vadd.f32 %v4601_v7, %v10013_v55 }
 0x436   : > { %v4686_v12 = vadd.f32 %v4685_v20, %v4597_v27 }
 0x437   : > { %v4213_v23 = vpop.f32.mrf.mxu3  ;;  %4640 = vmatmul.bf16.gmra.mxu1 %v11279_v54 }
 0x438   : > { %v10271_v39 = vadd.f32 %v4686_v12, %v10001_v26  ;;  %v10274_v37 = vadd.f32 %v4213_v23, %v10157_v9 }
 0x439   : > { %v10277_v31 = vpop.f32.mrf.mxu0 }
 0x43c   : > { %5077 = vmatmul.bf16.gmra.mxu3 %v8027_v5  ;;  %5166 = vmatmul.bf16.gmra.mxu0 %v11263_v4  ;;  %v4603_v35 = vpop.f32.mrf.mxu1 }
 0x43d   : > { %v4687_v59 = vpop.f32.mrf.mxu2 }
 0x43e   : > { %v4688_v56 = vadd.f32 %v4687_v59, %v4599_v60  ;;  %v8028_v60 = vld [vmem:[#allocation3 + $0x60] sm:$0xff] }
 0x43f   : > { %v4216_v10 = vpop.f32.mrf.mxu3 }
 0x440   : > { %v10282_v26 = vadd.f32 %v4688_v56, %v10010_v51  ;;  %v10285_v9 = vadd.f32 %v4216_v10, %v10165_v58  ;;  %v4604_v58 = vadd.f32 %v4603_v35, %v10026_v24  ;;  %v7944_v56 = vld [vmem:[%s11018_s4 + $0x200] sm:$0xff]  ;;  %v7952_v24 = vld [vmem:[#allocation4] sm:$0xff] }
 0x441   : > { %v10287_v33 = vpop.f32.mrf.mxu0  ;;  %5229 = vmatpush.bf16.msra.mxu1 %v7944_v56  ;;  %5614 = vmatpush.bf16.msra.mxu2 %v7952_v24 }
 0x442   : > { %4729 = vmatmul.bf16.gmra.mxu2 %v10043_v18 }
 0x444   : > { %v4606_v27 = vpop.f32.mrf.mxu1 }
 0x445   : > { %v4690_v14 = vpop.f32.mrf.mxu2 }
 0x446   : > { %v4691_v20 = vadd.f32 %v4690_v14, %v4602_v0 }
 0x447   : > { %v4218_v4 = vpop.f32.mrf.mxu3  ;;  %4645 = vmatmul.bf16.gmra.mxu1 %v9869_v22 }
 0x448   : > { %v10292_v12 = vadd.f32 %v4691_v20, %v10024_v6  ;;  %v10295_v23 = vadd.f32 %v4218_v4, %v10174_v16 }
 0x449   : > { %v10298_v51 = vpop.f32.mrf.mxu0 }
 0x44c   : > { %5082 = vmatmul.bf16.gmra.mxu3 %v8028_v60  ;;  %5171 = vmatmul.bf16.gmra.mxu0 %v11266_v44  ;;  %v4608_v7 = vpop.f32.mrf.mxu1  ;;  %v11281_v44 = vld [vmem:[#allocation42_spill] sm:$0xff] }
 0x44d   : > { %v4692_v55 = vpop.f32.mrf.mxu2  ;;  %v4607_v35 = vadd.f32 %v4606_v27, %v11281_v44 }
 0x44e   : > { %v4693_v5 = vadd.f32 %v4692_v55, %v4604_v58  ;;  %v11283_v58 = vld [vmem:[#allocation32_spill] sm:$0xff]  ;;  %v4609_v55 = vadd.f32 %v4608_v7, %v10058_v48  ;;  %v3300_v7 = vld [vmem:[#allocation3 + $0xc8] sm:$0x1] }
 0x44f   : > { %v4221_v59 = vpop.f32.mrf.mxu3 }
 0x450   : > { %v10303_v6 = vadd.f32 %v4693_v5, %v10036_v43  ;;  %v10306_v16 = vadd.f32 %v4221_v59, %v10185_v41  ;;  %v8029_v5 = vld [vmem:[#allocation3 + $0x6c] sm:$0xff] }
 0x451   : > { %v10311_v10 = vpop.f32.mrf.mxu0 }
 0x452   : > { %11280 = vst [vmem:[#allocation14_spill] sm:$0xff] %v10303_v6  ;;  %4734 = vmatmul.bf16.gmra.mxu2 %v10078_v53 }
 0x454   : > { %v4611_v14 = vpop.f32.mrf.mxu1 }
 0x455   : > { %v4695_v0 = vpop.f32.mrf.mxu2  ;;  %v4612_v48 = vadd.f32 %v4611_v14, %v10068_v46  ;;  %v8030_v14 = vld [vmem:[#allocation3 + $0x78] sm:$0xff] }
 0x456   : > { %v4696_v43 = vadd.f32 %v4695_v0, %v4607_v35 }
 0x457   : > { %v4223_v20 = vpop.f32.mrf.mxu3  ;;  %4650 = vmatmul.bf16.gmra.mxu1 %v11283_v58 }
 0x458   : > { %v10316_v41 = vadd.f32 %v4696_v43, %v10056_v21  ;;  %v10319_v4 = vadd.f32 %v4223_v20, %v10194_v13  ;;  %v3446_v20 = vunpack.c.l.b16 %v3300_v7 }
 0x459   : > { %v10322_v60 = vpop.f32.mrf.mxu0 }
 0x45a   : > { %11282 = vst [vmem:[#allocation34_spill] sm:$0xff] %v10316_v41  ;;  %v3659_v41 = vshrl.u32 %v10150_v19, 16 }
 0x45c   : > { %5087 = vmatmul.bf16.gmra.mxu3 %v8029_v5  ;;  %5176 = vmatmul.bf16.gmra.mxu0 %v11270_v47  ;;  %v4613_v59 = vpop.f32.mrf.mxu1 }
 0x45d   : > { %v4697_v27 = vpop.f32.mrf.mxu2 }
 0x45e   : > { %v4698_v56 = vadd.f32 %v4697_v27, %v4609_v55  ;;  %v3464_v27 = vpack.c.b16 %v3446_v20, %v3446_v20 }
 0x45f   : > { %v4226_v24 = vpop.f32.mrf.mxu3 }
 0x460   : > { %v10327_v21 = vadd.f32 %v4698_v56, %v10065_v1  ;;  %v10330_v13 = vadd.f32 %v4226_v24, %v10202_v3  ;;  %v11286_v3 = vld [vmem:[#allocation27_spill] sm:$0xff]  ;;  %v3661_v56 = vshll.u32 %v10150_v19, 16  ;;  %v11287_v24 = vld [vmem:[#allocation46_spill] sm:$0xff] }
 0x461   : > { %v10332_v44 = vpop.f32.mrf.mxu0  ;;  %v4614_v46 = vadd.f32 %v4613_v59, %v11287_v24 }
 0x462   : > { %11284 = vst [vmem:[#allocation9_spill] sm:$0xff] %v10327_v21  ;;  %4739 = vmatmul.bf16.gmra.mxu2 %v10125_v36 }
 0x464   : > { %v4616_v0 = vpop.f32.mrf.mxu1 }
 0x465   : > { %v4700_v35 = vpop.f32.mrf.mxu2 }
 0x466   : > { %v4701_v47 = vadd.f32 %v4700_v35, %v4612_v48 }
 0x467   : > { %v4228_v43 = vpop.f32.mrf.mxu3  ;;  %4655 = vmatmul.bf16.gmra.mxu1 %v11286_v3 }
 0x468   : > { %v10337_v55 = vadd.f32 %v4701_v47, %v10091_v11  ;;  %v10340_v1 = vadd.f32 %v4228_v43, %v10211_v30  ;;  %v3663_v47 = vrot.slane %v3661_v56, 1  ;;  %v11288_v30 = vld [vmem:[#allocation28_spill] sm:$0xff] }
 0x469   : > { %v5142_v5 = vpop.f32.mrf.mxu0 }
 0x46a   : > { %11285 = vst [vmem:[#allocation20_spill] sm:$0xff] %v10337_v55  ;;  %v3666_v55 = vshll.u32 %v3464_v27, 16  ;;  %v3664_v59 = vor.u32 %v3663_v47, %v3659_v41  ;;  %v3749_v47 = vrot.slane %v3464_v27, 1 }
 0x46c   : > { %5092 = vmatmul.bf16.gmra.mxu3 %v8030_v14  ;;  %5181 = vmatmul.bf16.gmra.mxu0 %v11275_v25  ;;  %v4618_v7 = vpop.f32.mrf.mxu1  ;;  %v3668_v24 = vrot.slane %v3666_v55, 1  ;;  %v11290_v14 = vld [vmem:[#allocation30_spill] sm:$0xff]  ;;  %v8031_v55 = vld [vmem:[#allocation3 + $0x84] sm:$0xff] }
 0x46d   : > { %v4702_v48 = vpop.f32.mrf.mxu2  ;;  %v4617_v25 = vadd.f32 %v4616_v0, %v11290_v14 }
 0x46e   : > { %v4703_v35 = vadd.f32 %v4702_v48, %v4614_v46  ;;  %v10355_v56 = vsel %vm594_vm0, %v3664_v59, %v3668_v24  ;;  %v3748_v24 = vrot.slane %v10150_v19, 1 }
 0x46f   : > { %v5053_v11 = vpop.f32.mrf.mxu3 }
 0x470   : > { %v10347_v43 = vadd.f32 %v4703_v35, %v11288_v30  ;;  %v10349_v21 = vadd.f32 %v5142_v5, %v5053_v11  ;;  %v11292_v30 = vld [vmem:[#allocation50_spill] sm:$0xff] }
 0x471   : > { %v5144_v20 = vpop.f32.mrf.mxu0  ;;  %v4619_v41 = vadd.f32 %v4618_v7, %v11292_v30 }
 0x472   : > { %11289 = vst [vmem:[#allocation36_spill] sm:$0xff] %v10347_v43  ;;  %4744 = vmatmul.bf16.gmra.mxu2 %v10153_v45 }
 0x474   : > { %v4621_v6 = vpop.f32.mrf.mxu1 }
 0x475   : > { %v4705_v36 = vpop.f32.mrf.mxu2 }
 0x476   : > { %v4706_v46 = vadd.f32 %v4705_v36, %v4617_v25 }
 0x477   : > { %v5055_v48 = vpop.f32.mrf.mxu3  ;;  %4660 = vmatmul.bf16.gmra.mxu1 %v10355_v56 }
 0x478   : > { %v10358_v35 = vadd.f32 %v4706_v46, %v10135_v40  ;;  %v10360_v5 = vadd.f32 %v5144_v20, %v5055_v48  ;;  %v11293_v40 = vld [vmem:[#allocation51_spill] sm:$0xff]  ;;  %v10372_v46 = vsel %vm829_vm1, %v3748_v24, %v3749_v47  ;;  %v11296_v48 = vld [vmem:[#allocation52_spill] sm:$0xff]  ;;  %v8032_v24 = vld [vmem:[#allocation3 + $0x90] sm:$0xff] }
 0x479   : > { %v5147_v11 = vpop.f32.mrf.mxu0  ;;  %11295 = vst [vmem:[#allocation27_spill] sm:$0xff] %v10372_v46 }
 0x47a   : > { %11291 = vst [vmem:[#allocation42_spill] sm:$0xff] %v10358_v35 }
 0x47c   : > { %5097 = vmatmul.bf16.gmra.mxu3 %v8031_v55  ;;  %5186 = vmatmul.bf16.gmra.mxu0 %v11278_v17  ;;  %v4623_v36 = vpop.f32.mrf.mxu1  ;;  %v4622_v17 = vadd.f32 %v4621_v6, %v11296_v48 }
 0x47d   : > { %v4707_v0 = vpop.f32.mrf.mxu2 }
 0x47e   : > { %v4708_v14 = vadd.f32 %v4707_v0, %v4619_v41  ;;  %v11297_v0 = vld [vmem:[#allocation53_spill] sm:$0xff] }
 0x47f   : > { %v5058_v59 = vpop.f32.mrf.mxu3 }
 0x480   : > { %v10367_v25 = vadd.f32 %v4708_v14, %v11293_v40  ;;  %v10369_v20 = vadd.f32 %v5147_v11, %v5058_v59  ;;  %v11299_v14 = vld [vmem:[#allocation47_spill] sm:$0xff]  ;;  %v11300_v11 = vld [vmem:[#allocation54_spill] sm:$0xff] }
 0x481   : > { %v5149_v7 = vpop.f32.mrf.mxu0  ;;  %v4624_v59 = vadd.f32 %v4623_v36, %v11300_v11 }
 0x482   : > { %11294 = vst [vmem:[#allocation32_spill] sm:$0xff] %v10367_v25  ;;  %4749 = vmatmul.bf16.gmra.mxu2 %v10372_v46 }
 0x484   : > { %v4626_v55 = vpop.f32.mrf.mxu1 }
 0x485   : > { %v4710_v30 = vpop.f32.mrf.mxu2 }
 0x486   : > { %v4711_v27 = vadd.f32 %v4710_v30, %v4622_v17  ;;  %v11301_v17 = vld [vmem:[#allocation55_spill] sm:$0xff] }
 0x487   : > { %v5060_v41 = vpop.f32.mrf.mxu3  ;;  %5230 = vmatmul.bf16.vlgmr.msra.gmra.mxu1 %v11299_v14 }
 0x488   : > { %v10377_v35 = vadd.f32 %v4711_v27, %v11297_v0  ;;  %v10379_v43 = vadd.f32 %v5149_v7, %v5060_v41  ;;  %v11302_v7 = vld [vmem:[#allocation7_spill] sm:$0xff]  ;;  %v11303_v41 = vld [vmem:[#allocation33_spill] sm:$0xff] }
 0x489   : > { %v5152_v47 = vpop.f32.mrf.mxu0  ;;  %v4627_v0 = vadd.f32 %v4626_v55, %v11303_v41  ;;  %v11306_v41 = vld [vmem:[#allocation8_spill] sm:$0xff] }
 0x48a   : > { %11298 = vst [vmem:[#allocation46_spill] sm:$0xff] %v10377_v35 }
 0x48c   : > { %5102 = vmatmul.bf16.gmra.mxu3 %v8032_v24  ;;  %5191 = vmatmul.bf16.gmra.mxu0 %v11279_v54  ;;  %v4628_v6 = vpop.f32.mrf.mxu1 }
 0x48d   : > { %v4712_v40 = vpop.f32.mrf.mxu2 }
 0x48e   : > { %v4713_v48 = vadd.f32 %v4712_v40, %v4624_v59  ;;  %v11304_v59 = vld [vmem:[#allocation35_spill] sm:$0xff]  ;;  %v4629_v40 = vadd.f32 %v4628_v6, %v10182_v62  ;;  %v11309_v6 = vld [vmem:[#allocation57_spill] sm:$0xff] }
 0x48f   : > { %v5063_v25 = vpop.f32.mrf.mxu3  ;;  %v11308_v62 = vld [vmem:[#allocation11_spill] sm:$0xff] }
 0x490   : > { %v10385_v30 = vadd.f32 %v4713_v48, %v11301_v17  ;;  %v10387_v27 = vadd.f32 %v5152_v47, %v5063_v25  ;;  %v8033_v25 = vld [vmem:[#allocation3 + $0x9c] sm:$0xff] }
 0x491   : > { %v5154_v35 = vpop.f32.mrf.mxu0  ;;  %v11305_v17 = vld [vmem:[#allocation56_spill] sm:$0xff] }
 0x492   : > { %5615 = vmatmul.bf16.vlgmr.msra.gmra.mxu2 %v11302_v7 }
 0x494   : > { %v4631_v36 = vpop.f32.mrf.mxu1 }
 0x495   : > { %v4715_v14 = vpop.f32.mrf.mxu2 }
 0x496   : > { %v4716_v11 = vadd.f32 %v4715_v14, %v4627_v0 }
 0x497   : > { %v5065_v24 = vpop.f32.mrf.mxu3  ;;  %5235 = vmatmul.bf16.gmra.mxu1 %v11304_v59  ;;  %v8034_v59 = vld [vmem:[#allocation3 + $0xa8] sm:$0xff] }
 0x498   : > { %v10392_v54 = vadd.f32 %v4716_v11, %v10180_v28  ;;  %v10394_v46 = vadd.f32 %v5154_v35, %v5065_v24  ;;  %v11307_v28 = vld [vmem:[#allocation45_spill] sm:$0xff] }
 0x499   : > { %v4632_v0 = vadd.f32 %v4631_v36, %v11307_v28  ;;  %v11311_v36 = vld [vmem:[#allocation10_spill] sm:$0xff] }
 0x49c   : > { %5107 = vmatmul.bf16.gmra.mxu3 %v8033_v25  ;;  %5196 = vmatmul.bf16.gmra.mxu0 %v9869_v22  ;;  %v4633_v55 = vpop.f32.mrf.mxu1 }
 0x49d   : > { %v4717_v47 = vpop.f32.mrf.mxu2  ;;  %v4634_v22 = vadd.f32 %v4633_v55, %v11309_v6  ;;  %v11314_v55 = vld [vmem:[#allocation17_spill] sm:$0xff]  ;;  %v11315_v6 = vld [vmem:[#allocation60_spill] sm:$0xff] }
 0x49e   : > { %v4718_v48 = vadd.f32 %v4717_v47, %v4629_v40 }
 0x4a0   : > { %v10400_v7 = vadd.f32 %v4718_v48, %v11305_v17  ;;  %v11310_v48 = vld [vmem:[#allocation58_spill] sm:$0xff] }
 0x4a2   : > { %5620 = vmatmul.bf16.gmra.mxu2 %v11306_v41  ;;  %v11312_v41 = vld [vmem:[#allocation48_spill] sm:$0xff] }
 0x4a4   : > { %v4636_v14 = vpop.f32.mrf.mxu1 }
 0x4a5   : > { %v4720_v35 = vpop.f32.mrf.mxu2  ;;  %v4637_v28 = vadd.f32 %v4636_v14, %v11312_v41  ;;  %v11317_v14 = vld [vmem:[#allocation13_spill] sm:$0xff] }
 0x4a6   : > { %v4721_v11 = vadd.f32 %v4720_v35, %v4632_v0 }
 0x4a7   : > { %5240 = vmatmul.bf16.gmra.mxu1 %v11308_v62 }
 0x4a8   : > { %v10405_v24 = vadd.f32 %v4721_v11, %v10197_v63  ;;  %v11313_v11 = vld [vmem:[#allocation59_spill] sm:$0xff] }
 0x4ac   : > { %5112 = vmatmul.bf16.gmra.mxu3 %v8034_v59  ;;  %5201 = vmatmul.bf16.gmra.mxu0 %v11283_v58  ;;  %v4638_v25 = vpop.f32.mrf.mxu1  ;;  %v11316_v59 = vld [vmem:[#allocation38_spill] sm:$0xff] }
 0x4ad   : > { %v4722_v40 = vpop.f32.mrf.mxu2  ;;  %v4639_v58 = vadd.f32 %v4638_v25, %v11315_v6  ;;  %v11318_v25 = vld [vmem:[#allocation23_spill] sm:$0xff] }
 0x4ae   : > { %v4723_v47 = vadd.f32 %v4722_v40, %v4634_v22 }
 0x4b0   : > { %v10411_v17 = vadd.f32 %v4723_v47, %v11310_v48 }
 0x4b2   : > { %5625 = vmatmul.bf16.gmra.mxu2 %v11311_v36 }
 0x4b4   : > { %v4641_v0 = vpop.f32.mrf.mxu1 }
 0x4b5   : > { %v4725_v63 = vpop.f32.mrf.mxu2  ;;  %v4642_v36 = vadd.f32 %v4641_v0, %v10230_v57  ;;  %v11319_v57 = vld [vmem:[#allocation16_spill] sm:$0xff] }
 0x4b6   : > { %v4726_v35 = vadd.f32 %v4725_v63, %v4637_v28 }
 0x4b7   : > { %5245 = vmatmul.bf16.gmra.mxu1 %v11314_v55 }
 0x4b8   : > { %v10416_v62 = vadd.f32 %v4726_v35, %v11313_v11 }
 0x4bc   : > { %5117 = vmatmul.bf16.gmra.mxu3 %v11316_v59  ;;  %5206 = vmatmul.bf16.gmra.mxu0 %v11286_v3  ;;  %v4643_v40 = vpop.f32.mrf.mxu1 }
 0x4bd   : > { %v4727_v22 = vpop.f32.mrf.mxu2  ;;  %v4644_v3 = vadd.f32 %v4643_v40, %v10242_v15  ;;  %v11320_v15 = vld [vmem:[#allocation25_spill] sm:$0xff] }
 0x4be   : > { %v4728_v47 = vadd.f32 %v4727_v22, %v4639_v58 }
 0x4c0   : > { %v10423_v48 = vadd.f32 %v4728_v47, %v10227_v42 }
 0x4c2   : > { %5630 = vmatmul.bf16.gmra.mxu2 %v11317_v14  ;;  %v11321_v14 = vld [vmem:[#allocation19_spill] sm:$0xff] }
 0x4c4   : > { %v4646_v28 = vpop.f32.mrf.mxu1 }
 0x4c5   : > { %v4730_v41 = vpop.f32.mrf.mxu2  ;;  %v4647_v0 = vadd.f32 %v4646_v28, %v10253_v34 }
 0x4c6   : > { %v4731_v63 = vadd.f32 %v4730_v41, %v4642_v36 }
 0x4c7   : > { %5250 = vmatmul.bf16.gmra.mxu1 %v11318_v25 }
 0x4c8   : > { %v10428_v35 = vadd.f32 %v4731_v63, %v10240_v49  ;;  %v11322_v63 = vld [vmem:[#allocation37_spill] sm:$0xff] }
 0x4cc   : > { %5122 = vmatmul.bf16.gmra.mxu3 %v10150_v19  ;;  %5211 = vmatmul.bf16.gmra.mxu0 %v10355_v56  ;;  %v4648_v11 = vpop.f32.mrf.mxu1 }
 0x4cd   : > { %v4732_v42 = vpop.f32.mrf.mxu2  ;;  %v4649_v19 = vadd.f32 %v4648_v11, %v10266_v52  ;;  %v11323_v11 = vld [vmem:[#allocation22_spill] sm:$0xff] }
 0x4ce   : > { %v4733_v55 = vadd.f32 %v4732_v42, %v4644_v3 }
 0x4d0   : > { %v10435_v6 = vadd.f32 %v4733_v55, %v10250_v61 }
 0x4d2   : > { %5635 = vmatmul.bf16.gmra.mxu2 %v11319_v57 }
 0x4d4   : > { %v4651_v58 = vpop.f32.mrf.mxu1 }
 0x4d5   : > { %v4735_v49 = vpop.f32.mrf.mxu2  ;;  %v4652_v34 = vadd.f32 %v4651_v58, %v10277_v31 }
 0x4d6   : > { %v4736_v59 = vadd.f32 %v4735_v49, %v4647_v0  ;;  %v11325_v49 = vld [vmem:[#allocation39_spill] sm:$0xff] }
 0x4d7   : > { %5255 = vmatmul.bf16.gmra.mxu1 %v11320_v15 }
 0x4d8   : > { %v10440_v22 = vadd.f32 %v4736_v59, %v10261_v32 }
 0x4dc   : > { %v4653_v40 = vpop.f32.mrf.mxu1 }
 0x4dd   : > { %v4737_v56 = vpop.f32.mrf.mxu2  ;;  %v4654_v52 = vadd.f32 %v4653_v40, %v10287_v33 }
 0x4de   : > { %v4738_v47 = vadd.f32 %v4737_v56, %v4649_v19  ;;  %v10464_v19 = vpop.f32.mrf.mxu0 }
 0x4e0   : > { %v10445_v61 = vadd.f32 %v4738_v47, %v10274_v37 }
 0x4e2   : > { %5640 = vmatmul.bf16.gmra.mxu2 %v11321_v14 }
 0x4e4   : > { %v4656_v41 = vpop.f32.mrf.mxu1 }
 0x4e5   : > { %v4740_v36 = vpop.f32.mrf.mxu2  ;;  %v4657_v31 = vadd.f32 %v4656_v41, %v10298_v51  ;;  %v11327_v51 = vld [vmem:[#allocation24_spill] sm:$0xff] }
 0x4e6   : > { %v4741_v28 = vadd.f32 %v4740_v36, %v4652_v34  ;;  %v11329_v36 = vld [vmem:[#allocation61_spill] sm:$0xff] }
 0x4e7   : > { %5260 = vmatmul.bf16.gmra.mxu1 %v11322_v63 }
 0x4e8   : > { %v10450_v32 = vadd.f32 %v4741_v28, %v10285_v9  ;;  %v10479_v28 = vpop.f32.mrf.mxu0 }
 0x4ec   : > { %v4658_v3 = vpop.f32.mrf.mxu1 }
 0x4ed   : > { %v4742_v25 = vpop.f32.mrf.mxu2  ;;  %v4659_v33 = vadd.f32 %v4658_v3, %v10311_v10 }
 0x4ee   : > { %v4743_v42 = vadd.f32 %v4742_v25, %v4654_v52 }
 0x4f0   : > { %v10455_v37 = vadd.f32 %v4743_v42, %v10295_v23  ;;  %v10466_v23 = vpop.f32.mrf.mxu3  ;;  %v11331_v42 = vld [vmem:[#allocation26_spill] sm:$0xff] }
 0x4f2   : > { %5645 = vmatmul.bf16.gmra.mxu2 %v11323_v11 }
 0x4f4   : > { %v4661_v57 = vpop.f32.mrf.mxu1 }
 0x4f5   : > { %v4745_v55 = vpop.f32.mrf.mxu2  ;;  %v4662_v40 = vadd.f32 %v4661_v57, %v10322_v60  ;;  %v10506_v57 = vld [vmem:[%s11020_s6] ss:$0 sm:$0xff] }
 0x4f6   : > { %v4746_v0 = vadd.f32 %v4745_v55, %v4657_v31 }
 0x4f7   : > { %5265 = vmatmul.bf16.gmra.mxu1 %v11325_v49  ;;  %v7722_v49 = vld [vmem:[%s9114_s12 + $0xc] sm:$0x1] }
 0x4f8   : > { %v10460_v9 = vadd.f32 %v4746_v0, %v10306_v16  ;;  %v7706_v0 = vld [vmem:[%s9114_s12 + $0x8] sm:$0x1] }
 0x4fa   : > { %11324 = vst [vmem:[#allocation28_spill] sm:$0xff] %v10460_v9  ;;  %v10631_v9 = vld [vmem:[#allocation3 + $0xcc] sm:$0xff] }
 0x4fc   : > { %v4663_v59 = vpop.f32.mrf.mxu1 }
 0x4fd   : > { %v4747_v58 = vpop.f32.mrf.mxu2  ;;  %v4664_v63 = vadd.f32 %v4663_v59, %v10332_v44 }
 0x4fe   : > { %v4748_v15 = vadd.f32 %v4747_v58, %v4659_v33 }
 0x500   : > { %v10469_v56 = vadd.f32 %v4748_v15, %v10319_v4  ;;  %v10481_v4 = vpop.f32.mrf.mxu3  ;;  %v6191_v15 = vsel %vm9143_vm4, 0, %v7706_v0  ;;  %5127 = vmatmul.bf16.gmra.mxu3 %v10631_v9 }
 0x501   : > { %7707 = vst [vmem:[%s9114_s12 + $0x8] sm:$0x1] %v6191_v15 }
 0x502   : > { %11326 = vst [vmem:[#allocation30_spill] sm:$0xff] %v10469_v56  ;;  %5650 = vmatmul.bf16.gmra.mxu2 %v11327_v51  ;;  %v6215_v51 = vsel %vm9154_vm6, 0, %v7722_v49 }
 0x503   : > { %7723 = vst [vmem:[%s9114_s12 + $0xc] sm:$0x1] %v6215_v51 }
 0x504   : > { %v5231_v47 = vpop.f32.mrf.mxu1 }
 0x505   : > { %v4750_v16 = vpop.f32.mrf.mxu2  ;;  %v5232_v34 = vadd.f32 %v5231_v47, %v10349_v21 }
 0x506   : > { %v4751_v14 = vadd.f32 %v4750_v16, %v4662_v40  ;;  %v10522_v16 = vld [vmem:[%s11022_s8] ss:$0 sm:$0xff] }
 0x507   : > { %v5311_v41 = vadd.f32 %v5232_v34, %v11329_v36  ;;  %5270 = vmatmul.bf16.gmra.mxu1 %v9988_v38  ;;  %v10490_v38 = vpop.f32.mrf.mxu0 }
 0x508   : > { %v10475_v10 = vadd.f32 %v4751_v14, %v10330_v13  ;;  %v10492_v11 = vpop.f32.mrf.mxu3 }
 0x50a   : > { %11328 = vst [vmem:[#allocation50_spill] sm:$0xff] %v10475_v10 }
 0x50c   : > { %v5233_v60 = vpop.f32.mrf.mxu1 }
 0x50d   : > { %v4752_v52 = vpop.f32.mrf.mxu2  ;;  %v5234_v3 = vadd.f32 %v5233_v60, %v10360_v5  ;;  %v10498_v5 = vld [vmem:[%s11019_s5] ss:$0 sm:$0xff] }
 0x50e   : > { %v4753_v25 = vadd.f32 %v4752_v52, %v4664_v63  ;;  %v10534_v63 = vld [vmem:[%s11023_s9] ss:$0 sm:$0xff]  ;;  %v11334_v52 = vld [vmem:[#allocation29_spill] sm:$0xff] }
 0x50f   : > { %v5312_v13 = vadd.f32 %v5234_v3, %v10237_v2  ;;  %v5411_v2 = vmul.f32 %v10498_v5, %v5311_v41 }
 0x510   : > { %v10486_v21 = vadd.f32 %v4753_v25, %v10340_v1  ;;  %v10517_v40 = vpop.f32.mrf.mxu3 }
 0x511   : > { %v5447_v14 = vadd.f32 %v10506_v57, %v5411_v2 }
 0x512   : > { %11330 = vst [vmem:[#allocation51_spill] sm:$0xff] %v10486_v21  ;;  %5655 = vmatmul.bf16.gmra.mxu2 %v11331_v42 }
 0x513   : > { %v5479_v60 = vmax.f32 %v5447_v14, 0.0 }
 0x514   : > { %v5236_v44 = vpop.f32.mrf.mxu1 }
 0x515   : > { %v5616_v31 = vpop.f32.mrf.mxu2  ;;  %v5237_v55 = vadd.f32 %v5236_v44, %v10369_v20 }
 0x516   : > { %v5700_v41 = vmul.f32 %v10522_v16, %v5616_v31 }
 0x517   : > { %v5313_v1 = vadd.f32 %v5237_v55, %v10247_v29  ;;  %5275 = vmatmul.bf16.gmra.mxu1 %v10017_v8  ;;  %v10515_v8 = vpop.f32.mrf.mxu0 }
 0x518   : > { %v5736_v55 = vadd.f32 %v10534_v63, %v5700_v41  ;;  %v10544_v2 = vpop.f32.mrf.mxu3 }
 0x519   : > { %v5413_v20 = vmul.f32 %v10498_v5, %v5313_v1 }
 0x51b   : > { %v5449_v34 = vadd.f32 %v10506_v57, %v5413_v20  ;;  %v5511_v20 = vmin.f32 %v5479_v60, 6.0 }
 0x51c   : > { %v5238_v58 = vpop.f32.mrf.mxu1 }
 0x51d   : > { %v5618_v33 = vpop.f32.mrf.mxu2  ;;  %v5239_v47 = vadd.f32 %v5238_v58, %v10379_v43  ;;  %v5481_v25 = vmax.f32 %v5449_v34, 0.0  ;;  %v5412_v43 = vmul.f32 %v10498_v5, %v5312_v13  ;;  %v5768_v51 = vadd.f32 %v5736_v55, %v5511_v20 }
 0x51f   : > { %v5314_v36 = vadd.f32 %v5239_v47, %v10258_v50  ;;  %v10542_v1 = vpop.f32.mrf.mxu0  ;;  %v5513_v0 = vmin.f32 %v5481_v25, 6.0  ;;  %v5448_v58 = vadd.f32 %v10506_v57, %v5412_v43 }
 0x521   : > { %v5414_v3 = vmul.f32 %v10498_v5, %v5314_v36  ;;  %v5480_v34 = vmax.f32 %v5448_v58, 0.0 }
 0x522   : > { %5660 = vmatmul.bf16.gmra.mxu2 %v11334_v52 }
 0x523   : > { %v5450_v15 = vadd.f32 %v10506_v57, %v5414_v3 }
 0x524   : > { %v5241_v44 = vpop.f32.mrf.mxu1 }
 0x525   : > { %v5621_v42 = vpop.f32.mrf.mxu2  ;;  %v5242_v31 = vadd.f32 %v5241_v44, %v10387_v27  ;;  %v5701_v27 = vmul.f32 %v10522_v16, %v5618_v33  ;;  %v5482_v36 = vmax.f32 %v5450_v15, 0.0  ;;  %v5512_v33 = vmin.f32 %v5480_v34, 6.0  ;;  %v10563_v15 = vpop.f32.mrf.mxu3 }
 0x526   : > { %v5702_v50 = vmul.f32 %v10522_v16, %v5621_v42 }
 0x527   : > { %v10548_v13 = vadd.f32 %v5242_v31, %v10271_v39  ;;  %5280 = vmatmul.bf16.gmra.mxu1 %v10043_v18  ;;  %v5737_v44 = vadd.f32 %v10534_v63, %v5701_v27  ;;  %v5514_v20 = vmin.f32 %v5482_v36, 6.0  ;;  %v10561_v58 = vpop.f32.mrf.mxu0 }
 0x528   : > { %v5738_v49 = vadd.f32 %v10534_v63, %v5702_v50 }
 0x52a   : > { %v5770_v47 = vadd.f32 %v5738_v49, %v5513_v0 }
 0x52c   : > { %v5800_v14 = vmax.f32 %v5768_v51, %v5770_v47  ;;  %v5243_v52 = vpop.f32.mrf.mxu1 }
 0x52d   : > { %v5623_v41 = vpop.f32.mrf.mxu2  ;;  %v5244_v43 = vadd.f32 %v5243_v52, %v10394_v46  ;;  %v11335_v46 = vld [vmem:[#allocation31_spill] sm:$0xff]  ;;  %v5769_v52 = vadd.f32 %v5737_v44, %v5512_v33 }
 0x52e   : > { %v5832_v60 = vrot.slane %v5800_v14, 2  ;;  %v5833_v25 = vrot.slane %v5800_v14, 4  ;;  %v5834_v42 = vrot.slane %v5800_v14, 6  ;;  %v7640_v39 = vrot.slane %v5800_v14, 9 }
 0x52f   : > { %v5703_v18 = vmul.f32 %v10522_v16, %v5623_v41  ;;  %v10559_v49 = vadd.f32 %v5244_v43, %v10282_v26  ;;  %v5160_v26 = vadd.f32 %v10479_v28, %v10481_v4 }
 0x530   : > { %v7641_v3 = vrot.slane %v5832_v60, 9  ;;  %v7642_v55 = vrot.slane %v5833_v25, 9  ;;  %v7643_v50 = vrot.slane %v5834_v42, 9  ;;  %v6120_v31 = vmax.f32 %v5800_v14, %v7640_v39 }
 0x531   : > { %v5739_v0 = vadd.f32 %v10534_v63, %v5703_v18  ;;  %v5158_v39 = vadd.f32 %v10464_v19, %v10466_v23 }
 0x532   : > { %v6121_v51 = vmax.f32 %v5832_v60, %v7641_v3  ;;  %v6122_v47 = vmax.f32 %v5833_v25, %v7642_v55  ;;  %v6123_v27 = vmax.f32 %v5834_v42, %v7643_v50  ;;  %v6238_v41 = vpack.c.bf16 %v6120_v31, %v6120_v31  ;;  %5665 = vmatmul.bf16.gmra.mxu2 %v11335_v46  ;;  %v10572_v46 = vpop.f32.mrf.mxu0 }
 0x533   : > { %v5771_v21 = vadd.f32 %v5739_v0, %v5514_v20 }
 0x534   : > { %v6239_v14 = vpack.c.bf16 %v6121_v51, %v6121_v51  ;;  %v6240_v34 = vpack.c.bf16 %v6122_v47, %v6122_v47  ;;  %v6366_v36 = vunpack.c.l.b16 %v6238_v41  ;;  %v5246_v10 = vpop.f32.mrf.mxu1  ;;  %v6241_v60 = vpack.c.bf16 %v6123_v27, %v6123_v27 }
 0x535   : > { %v5801_v18 = vmax.f32 %v5769_v52, %v5771_v21  ;;  %v5626_v43 = vpop.f32.mrf.mxu2  ;;  %v5247_v51 = vadd.f32 %v5246_v10, %v5158_v39  ;;  %v10574_v52 = vpop.f32.mrf.mxu3 }
 0x536   : > { %v6367_v25 = vunpack.c.l.b16 %v6239_v14  ;;  %v6368_v42 = vunpack.c.l.b16 %v6240_v34  ;;  %v6430_v31 = vrot.slane %v6366_v36, 7  ;;  %v6369_v21 = vunpack.c.l.b16 %v6241_v60 }
 0x537   : > { %v5835_v3 = vrot.slane %v5801_v18, 2  ;;  %v5836_v55 = vrot.slane %v5801_v18, 4  ;;  %v5837_v44 = vrot.slane %v5801_v18, 6  ;;  %v7644_v50 = vrot.slane %v5801_v18, 9  ;;  %5285 = vmatmul.bf16.gmra.mxu1 %v10078_v53 }
 0x538   : > { %v6431_v33 = vrot.slane %v6367_v25, 6  ;;  %v6434_v20 = vrot.slane %v6368_v42, 5  ;;  %v5415_v53 = vmul.f32 %v10498_v5, %v10548_v13  ;;  %v5317_v34 = vadd.f32 %v5247_v51, %v10292_v12 }
 0x539   : > { %v7645_v19 = vrot.slane %v5835_v3, 9  ;;  %v7646_v23 = vrot.slane %v5836_v55, 9  ;;  %v7647_v28 = vrot.slane %v5837_v44, 9  ;;  %v6124_v4 = vmax.f32 %v5801_v18, %v7644_v50 }
 0x53a   : > { %v6433_v0 = vsel %vm6432_vm11, %v6431_v33, %v6430_v31  ;;  %v6437_v42 = vrot.slane %v6369_v21, 4  ;;  %v7740_v33 = vld [vmem:[%s9114_s12 + $0xc] sm:$0x1] }
 0x53b   : > { %v6125_v47 = vmax.f32 %v5835_v3, %v7645_v19  ;;  %v6126_v27 = vmax.f32 %v5836_v55, %v7646_v23  ;;  %v6127_v41 = vmax.f32 %v5837_v44, %v7647_v28  ;;  %v6242_v14 = vpack.c.bf16 %v6124_v4, %v6124_v4  ;;  %v7708_v28 = vld [vmem:[%s9114_s12 + $0x10] sm:$0x1]  ;;  %v7724_v4 = vld [vmem:[%s9114_s12 + $0x14] sm:$0x1] }
 0x53c   : > { %v6436_v36 = vsel %vm6435_vm12, %v6434_v20, %v6433_v0  ;;  %v5248_v25 = vpop.f32.mrf.mxu1  ;;  %v5417_v55 = vmul.f32 %v10498_v5, %v5317_v34  ;;  %v5451_v20 = vadd.f32 %v10506_v57, %v5415_v53 }
 0x53d   : > { %v6243_v18 = vpack.c.bf16 %v6125_v47, %v6125_v47  ;;  %v6244_v10 = vpack.c.bf16 %v6126_v27, %v6126_v27  ;;  %v6245_v39 = vpack.c.bf16 %v6127_v41, %v6127_v41  ;;  %v5628_v60 = vpop.f32.mrf.mxu2  ;;  %v6370_v3 = vunpack.c.l.b16 %v6242_v14  ;;  %v11337_v14 = vld [vmem:[#allocation12_spill] sm:$0xff] }
 0x53e   : > { %v5249_v44 = vadd.f32 %v5248_v25, %v5160_v26  ;;  %v6439_v12 = vsel %vm6438_vm13, %v6437_v42, %v6436_v36  ;;  %v5453_v23 = vadd.f32 %v10506_v57, %v5417_v55  ;;  %v11336_v26 = vld [vmem:[#allocation14_spill] sm:$0xff]  ;;  %v5704_v41 = vmul.f32 %v10522_v16, %v5626_v43 }
 0x53f   : > { %v6371_v13 = vunpack.c.l.b16 %v6243_v18  ;;  %v6372_v50 = vunpack.c.l.b16 %v6244_v10  ;;  %v6373_v31 = vunpack.c.l.b16 %v6245_v39  ;;  %v6440_v19 = vrot.slane %v6370_v3, 3  ;;  %v7738_v39 = vld [vmem:[%s9114_s12 + $0x8] sm:$0xf] }
 0x540   : > { %v5318_v47 = vadd.f32 %v5249_v44, %v11336_v26  ;;  %v6194_v36 = vsel %vm9143_vm4, 0, %v7708_v28  ;;  %v6218_v18 = vsel %vm9154_vm6, 0, %v7724_v4  ;;  %v5483_v43 = vmax.f32 %v5451_v20, 0.0  ;;  %v11339_v4 = vld [vmem:[#allocation49_spill] sm:$0xff] }
 0x541   : > { %v6443_v21 = vrot.slane %v6371_v13, 2  ;;  %v6446_v0 = vrot.slane %v6372_v50, 1  ;;  %v6541_v51 = vpack.c.b16 %v6373_v31, %v6373_v31  ;;  %v6442_v27 = vsel %vm6441_vm14, %v6440_v19, %v6439_v12  ;;  %7709 = vst [vmem:[%s9114_s12 + $0x10] sm:$0x1] %v6194_v36  ;;  %v10605_v50 = vpop.f32.mrf.mxu0  ;;  %v10607_v31 = vpop.f32.mrf.mxu3 }
 0x542   : > { %5670 = vmatmul.bf16.gmra.mxu2 %v11337_v14  ;;  %v5485_v25 = vmax.f32 %v5453_v23, 0.0  ;;  %v5416_v3 = vmul.f32 %v10498_v5, %v10559_v49  ;;  %v5418_v55 = vmul.f32 %v10498_v5, %v5318_v47  ;;  %7725 = vst [vmem:[%s9114_s12 + $0x14] sm:$0x1] %v6218_v18  ;;  %v5515_v23 = vmin.f32 %v5483_v43, 6.0 }
 0x543   : > { %v6445_v53 = vsel %vm6444_vm15, %v6443_v21, %v6442_v27  ;;  %v6576_v34 = vsel %vm9143_vm4, %v6541_v51, %v7740_v33  ;;  %v5740_v33 = vadd.f32 %v10534_v63, %v5704_v41  ;;  %v5163_v47 = vadd.f32 %v10490_v38, %v10492_v11 }
 0x544   : > { %v6448_v10 = vsel %vm6447_vm2, %v6446_v0, %v6445_v53  ;;  %7741 = vst [vmem:[%s9114_s12 + $0xc] sm:$0x1] %v6576_v34  ;;  %v5251_v13 = vpop.f32.mrf.mxu1  ;;  %v5517_v49 = vmin.f32 %v5485_v25, 6.0  ;;  %v5452_v21 = vadd.f32 %v10506_v57, %v5416_v3  ;;  %v5454_v0 = vadd.f32 %v10506_v57, %v5418_v55 }
 0x545   : > { %v6540_v42 = vpack.c.b16 %v6448_v10, %v6448_v10  ;;  %v5631_v44 = vpop.f32.mrf.mxu2  ;;  %v5772_v51 = vadd.f32 %v5740_v33, %v5515_v23  ;;  %v5705_v27 = vmul.f32 %v10522_v16, %v5628_v60  ;;  %v5252_v53 = vadd.f32 %v5251_v13, %v5163_v47 }
 0x546   : > { %v5706_v12 = vmul.f32 %v10522_v16, %v5631_v44  ;;  %v5484_v14 = vmax.f32 %v5452_v21, 0.0  ;;  %v5486_v34 = vmax.f32 %v5454_v0, 0.0 }
 0x547   : > { %v6573_v19 = vsel %vm9213_vm8, %v6540_v42, %v7738_v39  ;;  %5290 = vmatmul.bf16.gmra.mxu1 %v11339_v4  ;;  %v5741_v42 = vadd.f32 %v10534_v63, %v5705_v27 }
 0x548   : > { %7739 = vst [vmem:[%s9114_s12 + $0x8] sm:$0xf] %v6573_v19  ;;  %v5742_v28 = vadd.f32 %v10534_v63, %v5706_v12  ;;  %v5516_v13 = vmin.f32 %v5484_v14, 6.0  ;;  %v11340_v12 = vld [vmem:[#allocation34_spill] sm:$0xff]  ;;  %v5518_v23 = vmin.f32 %v5486_v34, 6.0  ;;  %v5168_v14 = vadd.f32 %v10542_v1, %v10544_v2 }
 0x549   : > { %v10624_v55 = vpop.f32.mrf.mxu0  ;;  %v10626_v44 = vpop.f32.mrf.mxu3  ;;  %v5319_v19 = vadd.f32 %v5252_v53, %v11340_v12 }
 0x54a   : > { %v5774_v26 = vadd.f32 %v5742_v28, %v5517_v49 }
 0x54c   : > { %v5802_v41 = vmax.f32 %v5772_v51, %v5774_v26  ;;  %v5253_v18 = vpop.f32.mrf.mxu1  ;;  %v11341_v51 = vld [vmem:[#allocation15_spill] sm:$0xff]  ;;  %v5773_v26 = vadd.f32 %v5741_v42, %v5516_v13  ;;  %v5419_v42 = vmul.f32 %v10498_v5, %v5319_v19 }
 0x54d   : > { %v5633_v36 = vpop.f32.mrf.mxu2 }
 0x54e   : > { %v5838_v10 = vrot.slane %v5802_v41, 2  ;;  %v5839_v39 = vrot.slane %v5802_v41, 4  ;;  %v5840_v43 = vrot.slane %v5802_v41, 6  ;;  %v7648_v25 = vrot.slane %v5802_v41, 9 }
 0x54f   : > { %v5707_v3 = vmul.f32 %v10522_v16, %v5633_v36 }
 0x550   : > { %v7649_v38 = vrot.slane %v5838_v10, 9  ;;  %v7650_v11 = vrot.slane %v5839_v39, 9  ;;  %v7651_v60 = vrot.slane %v5840_v43, 9  ;;  %v6128_v33 = vmax.f32 %v5802_v41, %v7648_v25 }
 0x551   : > { %v5743_v49 = vadd.f32 %v10534_v63, %v5707_v3  ;;  %v5165_v41 = vadd.f32 %v10515_v8, %v10517_v40 }
 0x552   : > { %v6129_v28 = vmax.f32 %v5838_v10, %v7649_v38  ;;  %v6130_v4 = vmax.f32 %v5839_v39, %v7650_v11  ;;  %v6131_v21 = vmax.f32 %v5840_v43, %v7651_v60  ;;  %v6246_v0 = vpack.c.bf16 %v6128_v33, %v6128_v33  ;;  %5675 = vmatmul.bf16.gmra.mxu2 %v11341_v51 }
 0x553   : > { %v5775_v47 = vadd.f32 %v5743_v49, %v5518_v23  ;;  %v5254_v40 = vadd.f32 %v5253_v18, %v5165_v41  ;;  %v10640_v49 = vpop.f32.mrf.mxu0 }
 0x554   : > { %v6247_v27 = vpack.c.bf16 %v6129_v28, %v6129_v28  ;;  %v6248_v36 = vpack.c.bf16 %v6130_v4, %v6130_v4  ;;  %v6374_v56 = vunpack.c.l.b16 %v6246_v0  ;;  %v5256_v10 = vpop.f32.mrf.mxu1  ;;  %v6249_v39 = vpack.c.bf16 %v6131_v21, %v6131_v21  ;;  %v10642_v28 = vpop.f32.mrf.mxu3 }
 0x555   : > { %v5803_v53 = vmax.f32 %v5773_v26, %v5775_v47  ;;  %v5636_v34 = vpop.f32.mrf.mxu2  ;;  %v5257_v21 = vadd.f32 %v5256_v10, %v5168_v14  ;;  %v11342_v47 = vld [vmem:[#allocation9_spill] sm:$0xff] }
 0x556   : > { %v6375_v43 = vunpack.c.l.b16 %v6247_v27  ;;  %v6376_v25 = vunpack.c.l.b16 %v6248_v36  ;;  %v6449_v33 = vrot.slane %v6374_v56, 7  ;;  %v6377_v19 = vunpack.c.l.b16 %v6249_v39  ;;  %v11343_v36 = vld [vmem:[#allocation20_spill] sm:$0xff] }
 0x557   : > { %v5841_v3 = vrot.slane %v5803_v53, 2  ;;  %v5842_v38 = vrot.slane %v5803_v53, 4  ;;  %v5843_v11 = vrot.slane %v5803_v53, 6  ;;  %v7652_v60 = vrot.slane %v5803_v53, 9  ;;  %5295 = vmatmul.bf16.gmra.mxu1 %v10153_v45 }
 0x558   : > { %v6450_v13 = vrot.slane %v6375_v43, 6  ;;  %v6452_v8 = vrot.slane %v6376_v25, 5  ;;  %v5170_v56 = vadd.f32 %v10561_v58, %v10563_v15  ;;  %v5455_v45 = vadd.f32 %v10506_v57, %v5419_v42 }
 0x559   : > { %v7653_v1 = vrot.slane %v5841_v3, 9  ;;  %v7654_v2 = vrot.slane %v5842_v38, 9  ;;  %v7655_v12 = vrot.slane %v5843_v11, 9  ;;  %v6132_v23 = vmax.f32 %v5803_v53, %v7652_v60  ;;  %v3303_v53 = vld [vmem:[#allocation3 + $0xd4] sm:$0x1] }
 0x55a   : > { %v6451_v4 = vsel %vm6432_vm11, %v6450_v13, %v6449_v33  ;;  %v5320_v27 = vadd.f32 %v5254_v40, %v11342_v47  ;;  %v5321_v41 = vadd.f32 %v5257_v21, %v11343_v36  ;;  %v6454_v15 = vrot.slane %v6377_v19, 4  ;;  %v7726_v21 = vld [vmem:[%s9114_s12 + $0x1c] sm:$0x1]  ;;  %v11345_v36 = vld [vmem:[#allocation18_spill] sm:$0xff] }
 0x55b   : > { %v6133_v0 = vmax.f32 %v5841_v3, %v7653_v1  ;;  %v6134_v51 = vmax.f32 %v5842_v38, %v7654_v2  ;;  %v6135_v18 = vmax.f32 %v5843_v11, %v7655_v12  ;;  %v6250_v26 = vpack.c.bf16 %v6132_v23, %v6132_v23  ;;  %v7710_v11 = vld [vmem:[%s9114_s12 + $0x18] sm:$0x1]  ;;  %v7744_v2 = vld [vmem:[%s9114_s12 + $0x14] sm:$0x1]  ;;  %v11344_v23 = vld [vmem:[#allocation36_spill] sm:$0xff] }
 0x55c   : > { %v6453_v39 = vsel %vm6435_vm12, %v6452_v8, %v6451_v4  ;;  %v5258_v58 = vpop.f32.mrf.mxu1  ;;  %v5421_v38 = vmul.f32 %v10498_v5, %v5321_v41  ;;  %v3447_v40 = vunpack.c.l.b16 %v3303_v53  ;;  %v5708_v47 = vmul.f32 %v10522_v16, %v5636_v34 }
 0x55d   : > { %v6251_v43 = vpack.c.bf16 %v6133_v0, %v6133_v0  ;;  %v6252_v14 = vpack.c.bf16 %v6134_v51, %v6134_v51  ;;  %v6253_v10 = vpack.c.bf16 %v6135_v18, %v6135_v18  ;;  %v5638_v25 = vpop.f32.mrf.mxu2  ;;  %v6378_v3 = vunpack.c.l.b16 %v6250_v26 }
 0x55e   : > { %v5259_v42 = vadd.f32 %v5258_v58, %v5170_v56  ;;  %v6455_v8 = vsel %vm6438_vm13, %v6454_v15, %v6453_v39  ;;  %v5457_v12 = vadd.f32 %v10506_v57, %v5421_v38  ;;  %v6197_v51 = vsel %vm9143_vm4, 0, %v7710_v11 }
 0x55f   : > { %v6379_v60 = vunpack.c.l.b16 %v6251_v43  ;;  %v6380_v33 = vunpack.c.l.b16 %v6252_v14  ;;  %v6381_v13 = vunpack.c.l.b16 %v6253_v10  ;;  %v6456_v1 = vrot.slane %v6378_v3, 3  ;;  %7711 = vst [vmem:[%s9114_s12 + $0x18] sm:$0x1] %v6197_v51  ;;  %v10672_v14 = vpop.f32.mrf.mxu0  ;;  %v10674_v10 = vpop.f32.mrf.mxu3 }
 0x560   : > { %v5322_v4 = vadd.f32 %v5259_v42, %v11344_v23  ;;  %v5420_v26 = vmul.f32 %v10498_v5, %v5320_v27  ;;  %v6221_v39 = vsel %vm9154_vm6, 0, %v7726_v21  ;;  %v10670_v43 = vpack.c.b16 %v3447_v40, %v3447_v40  ;;  %v7742_v27 = vld [vmem:[%s9114_s12 + $0x10] sm:$0xf] }
 0x561   : > { %v6458_v19 = vrot.slane %v6379_v60, 2  ;;  %v6460_v0 = vrot.slane %v6380_v33, 1  ;;  %v6543_v56 = vpack.c.b16 %v6381_v13, %v6381_v13  ;;  %v6457_v18 = vsel %vm6441_vm14, %v6456_v1, %v6455_v8  ;;  %7727 = vst [vmem:[%s9114_s12 + $0x1c] sm:$0x1] %v6221_v39 }
 0x562   : > { %5680 = vmatmul.bf16.gmra.mxu2 %v11345_v36  ;;  %v5487_v58 = vmax.f32 %v5455_v45, 0.0  ;;  %v5422_v15 = vmul.f32 %v10498_v5, %v5322_v4  ;;  %v5489_v3 = vmax.f32 %v5457_v12, 0.0  ;;  %v3671_v60 = vshrl.u32 %v10631_v9, 16 }
 0x563   : > { %v6459_v41 = vsel %vm6444_vm15, %v6458_v19, %v6457_v18  ;;  %v6582_v53 = vsel %vm9143_vm4, %v6543_v56, %v7744_v2  ;;  %v3673_v33 = vshll.u32 %v10631_v9, 16  ;;  %v3678_v13 = vshll.u32 %v10670_v43, 16  ;;  %v11346_v19 = vld [vmem:[#allocation27_spill] sm:$0xff] }
 0x564   : > { %v6461_v34 = vsel %vm6447_vm2, %v6460_v0, %v6459_v41  ;;  %7745 = vst [vmem:[%s9114_s12 + $0x14] sm:$0x1] %v6582_v53  ;;  %v5261_v11 = vpop.f32.mrf.mxu1  ;;  %v5744_v40 = vadd.f32 %v10534_v63, %v5708_v47  ;;  %v5456_v1 = vadd.f32 %v10506_v57, %v5420_v26  ;;  %v5519_v23 = vmin.f32 %v5487_v58, 6.0 }
 0x565   : > { %v6542_v38 = vpack.c.b16 %v6461_v34, %v6461_v34  ;;  %v5641_v42 = vpop.f32.mrf.mxu2  ;;  %v3675_v2 = vrot.slane %v3673_v33, 1  ;;  %v3680_v12 = vrot.slane %v3678_v13, 1  ;;  %v5521_v4 = vmin.f32 %v5489_v3, 6.0 }
 0x566   : > { %v5710_v8 = vmul.f32 %v10522_v16, %v5641_v42  ;;  %v5458_v0 = vadd.f32 %v10506_v57, %v5422_v15  ;;  %v5776_v51 = vadd.f32 %v5744_v40, %v5519_v23  ;;  %v5173_v47 = vadd.f32 %v10572_v46, %v10574_v52 }
 0x567   : > { %v6579_v45 = vsel %vm9213_vm8, %v6542_v38, %v7742_v27  ;;  %5300 = vmatmul.bf16.gmra.mxu1 %v11346_v19  ;;  %v3676_v56 = vor.u32 %v3675_v2, %v3671_v60  ;;  %v5488_v36 = vmax.f32 %v5456_v1, 0.0  ;;  %v5709_v26 = vmul.f32 %v10522_v16, %v5638_v25  ;;  %v10697_v3 = vpop.f32.mrf.mxu0  ;;  %v10699_v15 = vpop.f32.mrf.mxu3  ;;  %v11347_v1 = vld [vmem:[#allocation42_spill] sm:$0xff] }
 0x568   : > { %7743 = vst [vmem:[%s9114_s12 + $0x10] sm:$0xf] %v6579_v45  ;;  %v5746_v21 = vadd.f32 %v10534_v63, %v5710_v8  ;;  %v5262_v39 = vadd.f32 %v5261_v11, %v5173_v47  ;;  %v5490_v34 = vmax.f32 %v5458_v0, 0.0  ;;  %v3751_v13 = vrot.slane %v10631_v9, 1 }
 0x569   : > { %v3681_v41 = vsel %vm594_vm0, %v3676_v56, %v3680_v12  ;;  %v5520_v46 = vmin.f32 %v5488_v36, 6.0  ;;  %v5745_v52 = vadd.f32 %v10534_v63, %v5709_v26 }
 0x56a   : > { %v5778_v18 = vadd.f32 %v5746_v21, %v5521_v4  ;;  %5216 = vmatmul.bf16.gmra.mxu0 %v3681_v41  ;;  %v5323_v2 = vadd.f32 %v5262_v39, %v11347_v1  ;;  %v5522_v12 = vmin.f32 %v5490_v34, 6.0  ;;  %v3752_v4 = vrot.slane %v10670_v43, 1 }
 0x56b   : > { %v5175_v41 = vadd.f32 %v10605_v50, %v10607_v31 }
 0x56c   : > { %v5804_v53 = vmax.f32 %v5776_v51, %v5778_v18  ;;  %v5263_v58 = vpop.f32.mrf.mxu1  ;;  %v11348_v51 = vld [vmem:[#allocation21_spill] sm:$0xff]  ;;  %v5777_v18 = vadd.f32 %v5745_v52, %v5520_v46 }
 0x56d   : > { %v5643_v27 = vpop.f32.mrf.mxu2 }
 0x56e   : > { %v5844_v38 = vrot.slane %v5804_v53, 2  ;;  %v5845_v42 = vrot.slane %v5804_v53, 4  ;;  %v5846_v60 = vrot.slane %v5804_v53, 6  ;;  %v7656_v33 = vrot.slane %v5804_v53, 9 }
 0x56f   : > { %v5711_v25 = vmul.f32 %v10522_v16, %v5643_v27  ;;  %v3753_v27 = vsel %vm829_vm1, %v3751_v13, %v3752_v4  ;;  %v10718_v50 = vpop.f32.mrf.mxu3 }
 0x570   : > { %v7657_v40 = vrot.slane %v5844_v38, 9  ;;  %v7658_v11 = vrot.slane %v5845_v42, 9  ;;  %v7659_v8 = vrot.slane %v5846_v60, 9  ;;  %v6136_v45 = vmax.f32 %v5804_v53, %v7656_v33 }
 0x571   : > { %v5747_v23 = vadd.f32 %v10534_v63, %v5711_v25  ;;  %v5178_v53 = vadd.f32 %v10624_v55, %v10626_v44  ;;  %v5423_v33 = vmul.f32 %v10498_v5, %v5323_v2 }
 0x572   : > { %v6137_v21 = vmax.f32 %v5844_v38, %v7657_v40  ;;  %v6138_v19 = vmax.f32 %v5845_v42, %v7658_v11  ;;  %v6139_v0 = vmax.f32 %v5846_v60, %v7659_v8  ;;  %v6254_v56 = vpack.c.bf16 %v6136_v45, %v6136_v45  ;;  %5685 = vmatmul.bf16.gmra.mxu2 %v11348_v51  ;;  %v10716_v11 = vpop.f32.mrf.mxu0 }
 0x573   : > { %v5779_v47 = vadd.f32 %v5747_v23, %v5522_v12  ;;  %v5264_v8 = vadd.f32 %v5263_v58, %v5175_v41  ;;  %v5459_v51 = vadd.f32 %v10506_v57, %v5423_v33  ;;  %v7728_v33 = vld [vmem:[%s9114_s12 + $0x24] sm:$0x1] }
 0x574   : > { %v6255_v9 = vpack.c.bf16 %v6137_v21, %v6137_v21  ;;  %v6256_v36 = vpack.c.bf16 %v6138_v19, %v6138_v19  ;;  %v6382_v26 = vunpack.c.l.b16 %v6254_v56  ;;  %v5266_v43 = vpop.f32.mrf.mxu1  ;;  %v6257_v38 = vpack.c.bf16 %v6139_v0, %v6139_v0 }
 0x575   : > { %v5805_v39 = vmax.f32 %v5777_v18, %v5779_v47  ;;  %v10712_v34 = vpop.f32.mrf.mxu2  ;;  %v5267_v4 = vadd.f32 %v5266_v43, %v5178_v53  ;;  %v5180_v21 = vadd.f32 %v10640_v49, %v10642_v28  ;;  %v11349_v18 = vld [vmem:[#allocation32_spill] sm:$0xff] }
 0x576   : > { %v6383_v42 = vunpack.c.l.b16 %v6255_v9  ;;  %v6384_v60 = vunpack.c.l.b16 %v6256_v36  ;;  %v6462_v31 = vrot.slane %v6382_v26, 7  ;;  %v6385_v23 = vunpack.c.l.b16 %v6257_v38  ;;  %v11350_v9 = vld [vmem:[#allocation46_spill] sm:$0xff]  ;;  %v7712_v26 = vld [vmem:[%s9114_s12 + $0x20] sm:$0x1] }
 0x577   : > { %v5847_v46 = vrot.slane %v5805_v39, 2  ;;  %v5848_v52 = vrot.slane %v5805_v39, 4  ;;  %v5849_v25 = vrot.slane %v5805_v39, 6  ;;  %v7660_v40 = vrot.slane %v5805_v39, 9  ;;  %5305 = vmatmul.bf16.gmra.mxu1 %v3753_v27 }
 0x578   : > { %v6463_v55 = vrot.slane %v6383_v42, 6  ;;  %v6465_v44 = vrot.slane %v6384_v60, 5  ;;  %v5324_v47 = vadd.f32 %v5264_v8, %v11349_v18  ;;  %v5325_v36 = vadd.f32 %v5267_v4, %v11350_v9  ;;  %v10741_v4 = vpop.f32.mrf.mxu3  ;;  %v7746_v18 = vld [vmem:[%s9114_s12 + $0x18] sm:$0xf] }
 0x579   : > { %v7661_v13 = vrot.slane %v5847_v46, 9  ;;  %v7662_v45 = vrot.slane %v5848_v52, 9  ;;  %v7663_v1 = vrot.slane %v5849_v25, 9  ;;  %v6140_v12 = vmax.f32 %v5805_v39, %v7660_v40 }
 0x57a   : > { %v6464_v2 = vsel %vm6432_vm11, %v6463_v55, %v6462_v31  ;;  %v6467_v28 = vrot.slane %v6385_v23, 4  ;;  %v5425_v42 = vmul.f32 %v10498_v5, %v5325_v36  ;;  %v6200_v40 = vsel %vm9143_vm4, 0, %v7712_v26 }
 0x57b   : > { %v6141_v19 = vmax.f32 %v5847_v46, %v7661_v13  ;;  %v6142_v0 = vmax.f32 %v5848_v52, %v7662_v45  ;;  %v6143_v56 = vmax.f32 %v5849_v25, %v7663_v1  ;;  %v6258_v58 = vpack.c.bf16 %v6140_v12, %v6140_v12  ;;  %7713 = vst [vmem:[%s9114_s12 + $0x20] sm:$0x1] %v6200_v40 }
 0x57c   : > { %v6466_v41 = vsel %vm6435_vm12, %v6465_v44, %v6464_v2  ;;  %v5268_v49 = vpop.f32.mrf.mxu1  ;;  %v7748_v44 = vld [vmem:[%s9114_s12 + $0x1c] sm:$0x1]  ;;  %v5461_v8 = vadd.f32 %v10506_v57, %v5425_v42  ;;  %v6224_v23 = vsel %vm9154_vm6, 0, %v7728_v33  ;;  %v10739_v2 = vpop.f32.mrf.mxu0  ;;  %v5491_v9 = vmax.f32 %v5459_v51, 0.0 }
 0x57d   : > { %v6259_v39 = vpack.c.bf16 %v6141_v19, %v6141_v19  ;;  %v6260_v53 = vpack.c.bf16 %v6142_v0, %v6142_v0  ;;  %v6261_v43 = vpack.c.bf16 %v6143_v56, %v6143_v56  ;;  %v5648_v27 = vpop.f32.mrf.mxu2  ;;  %v6386_v38 = vunpack.c.l.b16 %v6258_v58  ;;  %v11351_v0 = vld [vmem:[#allocation44_spill] sm:$0xff]  ;;  %7729 = vst [vmem:[%s9114_s12 + $0x24] sm:$0x1] %v6224_v23 }
 0x57e   : > { %v5269_v60 = vadd.f32 %v5268_v49, %v5180_v21  ;;  %v6468_v31 = vsel %vm6438_vm13, %v6467_v28, %v6466_v41  ;;  %v5712_v19 = vmul.f32 %v10522_v16, %v10712_v34  ;;  %v5493_v36 = vmax.f32 %v5461_v8, 0.0 }
 0x57f   : > { %v6387_v46 = vunpack.c.l.b16 %v6259_v39  ;;  %v6388_v52 = vunpack.c.l.b16 %v6260_v53  ;;  %v6389_v25 = vunpack.c.l.b16 %v6261_v43  ;;  %v6469_v55 = vrot.slane %v6386_v38, 3 }
 0x580   : > { %v5326_v13 = vadd.f32 %v5269_v60, %v10385_v30  ;;  %v5424_v41 = vmul.f32 %v10498_v5, %v5324_v47  ;;  %v5748_v43 = vadd.f32 %v10534_v63, %v5712_v19  ;;  %v5523_v38 = vmin.f32 %v5491_v9, 6.0 }
 0x581   : > { %v6471_v45 = vrot.slane %v6387_v46, 2  ;;  %v6473_v1 = vrot.slane %v6388_v52, 1  ;;  %v6545_v12 = vpack.c.b16 %v6389_v25, %v6389_v25  ;;  %v6470_v21 = vsel %vm6441_vm14, %v6469_v55, %v6468_v31  ;;  %v10769_v31 = vpop.f32.mrf.mxu3 }
 0x582   : > { %5690 = vmatmul.bf16.gmra.mxu2 %v11351_v0  ;;  %v5426_v34 = vmul.f32 %v10498_v5, %v5326_v13  ;;  %v5525_v42 = vmin.f32 %v5493_v36, 6.0  ;;  %v5460_v60 = vadd.f32 %v10506_v57, %v5424_v41  ;;  %v5780_v33 = vadd.f32 %v5748_v43, %v5523_v38 }
 0x583   : > { %v6472_v30 = vsel %vm6444_vm15, %v6471_v45, %v6470_v21  ;;  %v6588_v56 = vsel %vm9143_vm4, %v6545_v12, %v7748_v44  ;;  %v5183_v52 = vadd.f32 %v10672_v14, %v10674_v10  ;;  %v5713_v25 = vmul.f32 %v10522_v16, %v5648_v27 }
 0x584   : > { %v6474_v58 = vsel %vm6447_vm2, %v6473_v1, %v6472_v30  ;;  %7749 = vst [vmem:[%s9114_s12 + $0x1c] sm:$0x1] %v6588_v56  ;;  %v5271_v53 = vpop.f32.mrf.mxu1  ;;  %v5462_v47 = vadd.f32 %v10506_v57, %v5426_v34  ;;  %v10767_v40 = vpop.f32.mrf.mxu0  ;;  %v5492_v44 = vmax.f32 %v5460_v60, 0.0 }
 0x585   : > { %v6544_v26 = vpack.c.b16 %v6474_v58, %v6474_v58  ;;  %v5651_v39 = vpop.f32.mrf.mxu2  ;;  %v5272_v8 = vadd.f32 %v5271_v53, %v5183_v52  ;;  %v5749_v0 = vadd.f32 %v10534_v63, %v5713_v25 }
 0x586   : > { %v5714_v49 = vmul.f32 %v10522_v16, %v5651_v39  ;;  %v5494_v13 = vmax.f32 %v5462_v47, 0.0  ;;  %v5524_v58 = vmin.f32 %v5492_v44, 6.0 }
 0x587   : > { %v6585_v28 = vsel %vm9213_vm8, %v6544_v26, %v7746_v18  ;;  %v5327_v18 = vadd.f32 %v5272_v8, %v10392_v54 }
 0x588   : > { %7747 = vst [vmem:[%s9114_s12 + $0x18] sm:$0xf] %v6585_v28  ;;  %v5750_v51 = vadd.f32 %v10534_v63, %v5714_v49  ;;  %v5526_v9 = vmin.f32 %v5494_v13, 6.0  ;;  %v5781_v53 = vadd.f32 %v5749_v0, %v5524_v58 }
 0x589   : > { %v10783_v47 = vpop.f32.mrf.mxu3  ;;  %v5427_v25 = vmul.f32 %v10498_v5, %v5327_v18  ;;  %v5190_v5 = vadd.f32 %v10739_v2, %v10741_v4 }
 0x58a   : > { %v5782_v46 = vadd.f32 %v5750_v51, %v5525_v42  ;;  %v5188_v42 = vadd.f32 %v10716_v11, %v10718_v50 }
 0x58c   : > { %v5806_v55 = vmax.f32 %v5780_v33, %v5782_v46  ;;  %v5273_v1 = vpop.f32.mrf.mxu1 }
 0x58d   : > { %v5653_v45 = vpop.f32.mrf.mxu2 }
 0x58e   : > { %v5850_v12 = vrot.slane %v5806_v55, 2  ;;  %v5851_v23 = vrot.slane %v5806_v55, 4  ;;  %v5852_v21 = vrot.slane %v5806_v55, 6  ;;  %v7664_v19 = vrot.slane %v5806_v55, 9 }
 0x58f   : > { %v5715_v14 = vmul.f32 %v10522_v16, %v5653_v45  ;;  %v5185_v16 = vadd.f32 %v10697_v3, %v10699_v15 }
 0x590   : > { %v7665_v10 = vrot.slane %v5850_v12, 9  ;;  %v7666_v27 = vrot.slane %v5851_v23, 9  ;;  %v7667_v30 = vrot.slane %v5852_v21, 9  ;;  %v6144_v56 = vmax.f32 %v5806_v55, %v7664_v19 }
 0x591   : > { %v5751_v36 = vadd.f32 %v10534_v63, %v5715_v14  ;;  %v10781_v63 = vpop.f32.mrf.mxu0  ;;  %v5274_v50 = vadd.f32 %v5273_v1, %v5185_v16 }
 0x592   : > { %v6145_v26 = vmax.f32 %v5850_v12, %v7665_v10  ;;  %v6146_v41 = vmax.f32 %v5851_v23, %v7666_v27  ;;  %v6147_v34 = vmax.f32 %v5852_v21, %v7667_v30  ;;  %v6262_v39 = vpack.c.bf16 %v6144_v56, %v6144_v56 }
 0x593   : > { %v5783_v43 = vadd.f32 %v5751_v36, %v5526_v9  ;;  %v5463_v56 = vadd.f32 %v10506_v57, %v5427_v25  ;;  %v5328_v1 = vadd.f32 %v5274_v50, %v10400_v7  ;;  %v7714_v9 = vld [vmem:[%s9114_s12 + $0x28] sm:$0x1]  ;;  %v10797_v57 = vld [vmem:[%s11019_s5] ss:$0 sm:$0xff] }
 0x594   : > { %v6263_v49 = vpack.c.bf16 %v6145_v26, %v6145_v26  ;;  %v6264_v28 = vpack.c.bf16 %v6146_v41, %v6146_v41  ;;  %v6390_v38 = vunpack.c.l.b16 %v6262_v39  ;;  %v5276_v60 = vpop.f32.mrf.mxu1  ;;  %v6265_v33 = vpack.c.bf16 %v6147_v34, %v6147_v34 }
 0x595   : > { %v5807_v51 = vmax.f32 %v5781_v53, %v5783_v43  ;;  %v10779_v54 = vpop.f32.mrf.mxu2  ;;  %v5277_v14 = vadd.f32 %v5276_v60, %v5188_v42  ;;  %v7730_v43 = vld [vmem:[%s9114_s12 + $0x2c] sm:$0x1]  ;;  %v6203_v16 = vsel %vm9143_vm4, 0, %v7714_v9 }
 0x596   : > { %v6391_v46 = vunpack.c.l.b16 %v6263_v49  ;;  %v6392_v52 = vunpack.c.l.b16 %v6264_v28  ;;  %v6475_v15 = vrot.slane %v6390_v38, 7  ;;  %v6393_v19 = vunpack.c.l.b16 %v6265_v33  ;;  %7715 = vst [vmem:[%s9114_s12 + $0x28] sm:$0x1] %v6203_v16 }
 0x597   : > { %v5853_v55 = vrot.slane %v5807_v51, 2  ;;  %v5854_v44 = vrot.slane %v5807_v51, 4  ;;  %v5855_v8 = vrot.slane %v5807_v51, 6  ;;  %v7668_v3 = vrot.slane %v5807_v51, 9 }
 0x598   : > { %v6476_v13 = vrot.slane %v6391_v46, 6  ;;  %v6478_v11 = vrot.slane %v6392_v52, 5  ;;  %v5329_v18 = vadd.f32 %v5277_v14, %v10405_v24  ;;  %v6480_v4 = vrot.slane %v6393_v19, 4  ;;  %v7752_v46 = vld [vmem:[%s9114_s12 + $0x24] sm:$0x1] }
 0x599   : > { %v7669_v45 = vrot.slane %v5853_v55, 9  ;;  %v7670_v12 = vrot.slane %v5854_v44, 9  ;;  %v7671_v23 = vrot.slane %v5855_v8, 9  ;;  %v6148_v21 = vmax.f32 %v5807_v51, %v7668_v3  ;;  %v10803_v42 = vpop.f32.mrf.mxu0  ;;  %v10805_v51 = vpop.f32.mrf.mxu3  ;;  %v10812_v52 = vld [vmem:[%s11020_s6] ss:$0 sm:$0xff] }
 0x59a   : > { %v6477_v0 = vsel %vm6432_vm11, %v6476_v13, %v6475_v15  ;;  %v5429_v7 = vmul.f32 %v10797_v57, %v5329_v18  ;;  %v6227_v15 = vsel %vm9154_vm6, 0, %v7730_v43  ;;  %v5428_v14 = vmul.f32 %v10797_v57, %v5328_v1 }
 0x59b   : > { %v6149_v10 = vmax.f32 %v5853_v55, %v7669_v45  ;;  %v6150_v27 = vmax.f32 %v5854_v44, %v7670_v12  ;;  %v6151_v30 = vmax.f32 %v5855_v8, %v7671_v23  ;;  %v6266_v58 = vpack.c.bf16 %v6148_v21, %v6148_v21  ;;  %7731 = vst [vmem:[%s9114_s12 + $0x2c] sm:$0x1] %v6227_v15  ;;  %v7750_v23 = vld [vmem:[%s9114_s12 + $0x20] sm:$0xf] }
 0x59c   : > { %v6479_v36 = vsel %vm6435_vm12, %v6478_v11, %v6477_v0  ;;  %v5278_v2 = vpop.f32.mrf.mxu1  ;;  %v5465_v25 = vadd.f32 %v10812_v52, %v5429_v7  ;;  %v10823_v11 = vld [vmem:[%s11022_s8] ss:$0 sm:$0xff]  ;;  %v5495_v21 = vmax.f32 %v5463_v56, 0.0 }
 0x59d   : > { %v6267_v26 = vpack.c.bf16 %v6149_v10, %v6149_v10  ;;  %v6268_v41 = vpack.c.bf16 %v6150_v27, %v6150_v27  ;;  %v6269_v34 = vpack.c.bf16 %v6151_v30, %v6151_v30  ;;  %v5658_v39 = vpop.f32.mrf.mxu2  ;;  %v6394_v53 = vunpack.c.l.b16 %v6266_v58  ;;  %v10839_v27 = vld [vmem:[%s11023_s9] ss:$0 sm:$0xff] }
 0x59e   : > { %v5279_v24 = vadd.f32 %v5278_v2, %v5190_v5  ;;  %v6481_v60 = vsel %vm6438_vm13, %v6480_v4, %v6479_v36  ;;  %v5716_v50 = vmul.f32 %v10823_v11, %v10779_v54  ;;  %v5497_v19 = vmax.f32 %v5465_v25, 0.0 }
 0x59f   : > { %v6395_v49 = vunpack.c.l.b16 %v6267_v26  ;;  %v6396_v28 = vunpack.c.l.b16 %v6268_v41  ;;  %v6397_v38 = vunpack.c.l.b16 %v6269_v34  ;;  %v6482_v33 = vrot.slane %v6394_v53, 3 }
 0x5a0   : > { %v5330_v55 = vadd.f32 %v5279_v24, %v10411_v17  ;;  %v5752_v30 = vadd.f32 %v10839_v27, %v5716_v50  ;;  %v5527_v18 = vmin.f32 %v5495_v21, 6.0  ;;  %v5529_v9 = vmin.f32 %v5497_v19, 6.0 }
 0x5a1   : > { %v6484_v44 = vrot.slane %v6395_v49, 2  ;;  %v6486_v8 = vrot.slane %v6396_v28, 1  ;;  %v6547_v3 = vpack.c.b16 %v6397_v38, %v6397_v38  ;;  %v6483_v13 = vsel %vm6441_vm14, %v6482_v33, %v6481_v60  ;;  %v5199_v41 = vpop.f32.mrf.mxu0  ;;  %v5110_v34 = vpop.f32.mrf.mxu3 }
 0x5a2   : > { %v5430_v5 = vmul.f32 %v10797_v57, %v5330_v55  ;;  %v5464_v36 = vadd.f32 %v10812_v52, %v5428_v14  ;;  %v5784_v2 = vadd.f32 %v5752_v30, %v5527_v18  ;;  %v5193_v53 = vadd.f32 %v10767_v40, %v10769_v31 }
 0x5a3   : > { %v6485_v17 = vsel %vm6444_vm15, %v6484_v44, %v6483_v13  ;;  %v6594_v45 = vsel %vm9143_vm4, %v6547_v3, %v7752_v46  ;;  %v5717_v7 = vmul.f32 %v10823_v11, %v5658_v39  ;;  %v5195_v30 = vadd.f32 %v10781_v63, %v10783_v47 }
 0x5a4   : > { %v6487_v12 = vsel %vm6447_vm2, %v6486_v8, %v6485_v17  ;;  %7753 = vst [vmem:[%s9114_s12 + $0x24] sm:$0x1] %v6594_v45  ;;  %v5281_v54 = vpop.f32.mrf.mxu1  ;;  %v5466_v26 = vadd.f32 %v10812_v52, %v5430_v5  ;;  %v5496_v43 = vmax.f32 %v5464_v36, 0.0 }
 0x5a5   : > { %v6546_v0 = vpack.c.b16 %v6487_v12, %v6487_v12  ;;  %v5661_v10 = vpop.f32.mrf.mxu2  ;;  %v5282_v49 = vadd.f32 %v5281_v54, %v5193_v53  ;;  %v5753_v55 = vadd.f32 %v10839_v27, %v5717_v7 }
 0x5a6   : > { %v5718_v58 = vmul.f32 %v10823_v11, %v5661_v10  ;;  %v5498_v28 = vmax.f32 %v5466_v26, 0.0  ;;  %v5528_v31 = vmin.f32 %v5496_v43, 6.0 }
 0x5a7   : > { %v6591_v56 = vsel %vm9213_vm8, %v6546_v0, %v7750_v23  ;;  %v5331_v39 = vadd.f32 %v5282_v49, %v10416_v62  ;;  %v5198_v62 = vadd.f32 %v10803_v42, %v10805_v51 }
 0x5a8   : > { %7751 = vst [vmem:[%s9114_s12 + $0x20] sm:$0xf] %v6591_v56  ;;  %v5754_v1 = vadd.f32 %v10839_v27, %v5718_v58  ;;  %v5530_v13 = vmin.f32 %v5498_v28, 6.0  ;;  %v5785_v21 = vadd.f32 %v5753_v55, %v5528_v31 }
 0x5a9   : > { %v10856_v0 = vpop.f32.mrf.mxu0  ;;  %v10858_v14 = vpop.f32.mrf.mxu3  ;;  %v5431_v26 = vmul.f32 %v10797_v57, %v5331_v39 }
 0x5aa   : > { %v5786_v4 = vadd.f32 %v5754_v1, %v5529_v9 }
 0x5ac   : > { %v5808_v24 = vmax.f32 %v5784_v2, %v5786_v4  ;;  %v5283_v16 = vpop.f32.mrf.mxu1 }
 0x5ad   : > { %v5663_v38 = vpop.f32.mrf.mxu2  ;;  %v5284_v28 = vadd.f32 %v5283_v16, %v5195_v30 }
 0x5ae   : > { %v5856_v60 = vrot.slane %v5808_v24, 2  ;;  %v5857_v33 = vrot.slane %v5808_v24, 4  ;;  %v5858_v46 = vrot.slane %v5808_v24, 6  ;;  %v7672_v25 = vrot.slane %v5808_v24, 9 }
 0x5af   : > { %v5719_v44 = vmul.f32 %v10823_v11, %v5663_v38 }
 0x5b0   : > { %v7673_v8 = vrot.slane %v5856_v60, 9  ;;  %v7674_v3 = vrot.slane %v5857_v33, 9  ;;  %v7675_v15 = vrot.slane %v5858_v46, 9  ;;  %v6152_v40 = vmax.f32 %v5808_v24, %v7672_v25 }
 0x5b1   : > { %v5755_v50 = vadd.f32 %v10839_v27, %v5719_v44 }
 0x5b2   : > { %v6153_v17 = vmax.f32 %v5856_v60, %v7673_v8  ;;  %v6154_v45 = vmax.f32 %v5857_v33, %v7674_v3  ;;  %v6155_v12 = vmax.f32 %v5858_v46, %v7675_v15  ;;  %v6270_v23 = vpack.c.bf16 %v6152_v40, %v6152_v40  ;;  %v7716_v40 = vld [vmem:[%s9114_s12 + $0x30] sm:$0x1] }
 0x5b3   : > { %v5787_v19 = vadd.f32 %v5755_v50, %v5530_v13  ;;  %v5200_v46 = vadd.f32 %v5199_v41, %v5110_v34  ;;  %v5467_v8 = vadd.f32 %v10812_v52, %v5431_v26  ;;  %v5332_v15 = vadd.f32 %v5284_v28, %v10423_v48  ;;  %v10871_v34 = vpop.f32.mrf.mxu0 }
 0x5b4   : > { %v6271_v5 = vpack.c.bf16 %v6153_v17, %v6153_v17  ;;  %v6272_v10 = vpack.c.bf16 %v6154_v45, %v6154_v45  ;;  %v6398_v54 = vunpack.c.l.b16 %v6270_v23  ;;  %v5286_v18 = vpop.f32.mrf.mxu1  ;;  %v6273_v9 = vpack.c.bf16 %v6155_v12, %v6155_v12  ;;  %v10873_v45 = vpop.f32.mrf.mxu3 }
 0x5b5   : > { %v5809_v58 = vmax.f32 %v5785_v21, %v5787_v19  ;;  %v5666_v56 = vpop.f32.mrf.mxu2  ;;  %v5287_v33 = vadd.f32 %v5286_v18, %v5198_v62 }
 0x5b6   : > { %v6399_v1 = vunpack.c.l.b16 %v6271_v5  ;;  %v6400_v36 = vunpack.c.l.b16 %v6272_v10  ;;  %v6488_v24 = vrot.slane %v6398_v54, 7  ;;  %v6401_v38 = vunpack.c.l.b16 %v6273_v9 }
 0x5b7   : > { %v5859_v2 = vrot.slane %v5809_v58, 2  ;;  %v5860_v4 = vrot.slane %v5809_v58, 4  ;;  %v5861_v53 = vrot.slane %v5809_v58, 6  ;;  %v7676_v7 = vrot.slane %v5809_v58, 9 }
 0x5b8   : > { %v6489_v43 = vrot.slane %v6399_v1, 6  ;;  %v6491_v49 = vrot.slane %v6400_v36, 5  ;;  %v5333_v16 = vadd.f32 %v5287_v33, %v10428_v35  ;;  %v6493_v12 = vrot.slane %v6401_v38, 4  ;;  %v7732_v35 = vld [vmem:[%s9114_s12 + $0x34] sm:$0x1] }
 0x5b9   : > { %v7677_v63 = vrot.slane %v5859_v2, 9  ;;  %v7678_v47 = vrot.slane %v5860_v4, 9  ;;  %v7679_v42 = vrot.slane %v5861_v53, 9  ;;  %v6156_v51 = vmax.f32 %v5809_v58, %v7676_v7  ;;  %v7756_v58 = vld [vmem:[%s9114_s12 + $0x2c] sm:$0x1] }
 0x5ba   : > { %v6490_v60 = vsel %vm6432_vm11, %v6489_v43, %v6488_v24  ;;  %v5433_v48 = vmul.f32 %v10797_v57, %v5333_v16  ;;  %v6206_v54 = vsel %vm9143_vm4, 0, %v7716_v40  ;;  %v7754_v43 = vld [vmem:[%s9114_s12 + $0x28] sm:$0xf] }
 0x5bb   : > { %v6157_v25 = vmax.f32 %v5859_v2, %v7677_v63  ;;  %v6158_v55 = vmax.f32 %v5860_v4, %v7678_v47  ;;  %v6159_v44 = vmax.f32 %v5861_v53, %v7679_v42  ;;  %v6274_v3 = vpack.c.bf16 %v6156_v51, %v6156_v51  ;;  %7717 = vst [vmem:[%s9114_s12 + $0x30] sm:$0x1] %v6206_v54 }
 0x5bc   : > { %v6492_v31 = vsel %vm6435_vm12, %v6491_v49, %v6490_v60  ;;  %v5288_v41 = vpop.f32.mrf.mxu1  ;;  %v5469_v18 = vadd.f32 %v10812_v52, %v5433_v48  ;;  %v6230_v2 = vsel %vm9154_vm6, 0, %v7732_v35  ;;  %v5720_v53 = vmul.f32 %v10823_v11, %v5666_v56 }
 0x5bd   : > { %v6275_v39 = vpack.c.bf16 %v6157_v25, %v6157_v25  ;;  %v6276_v13 = vpack.c.bf16 %v6158_v55, %v6158_v55  ;;  %v6277_v50 = vpack.c.bf16 %v6159_v44, %v6159_v44  ;;  %v5668_v17 = vpop.f32.mrf.mxu2  ;;  %v6402_v23 = vunpack.c.l.b16 %v6274_v3  ;;  %7733 = vst [vmem:[%s9114_s12 + $0x34] sm:$0x1] %v6230_v2  ;;  %v5118_v25 = vpop.f32.mrf.mxu3 }
 0x5be   : > { %v5289_v21 = vadd.f32 %v5288_v41, %v5200_v46  ;;  %v6494_v30 = vsel %vm6438_vm13, %v6493_v12, %v6492_v31  ;;  %v5499_v49 = vmax.f32 %v5467_v8, 0.0  ;;  %v5501_v28 = vmax.f32 %v5469_v18, 0.0  ;;  %v5207_v46 = vpop.f32.mrf.mxu0 }
 0x5bf   : > { %v6403_v19 = vunpack.c.l.b16 %v6275_v39  ;;  %v6404_v5 = vunpack.c.l.b16 %v6276_v13  ;;  %v6405_v10 = vunpack.c.l.b16 %v6277_v50  ;;  %v6495_v62 = vrot.slane %v6402_v23, 3 }
 0x5c0   : > { %v5334_v9 = vadd.f32 %v5289_v21, %v10435_v6  ;;  %v5432_v47 = vmul.f32 %v10797_v57, %v5332_v15  ;;  %v5756_v38 = vadd.f32 %v10839_v27, %v5720_v53  ;;  %v5531_v55 = vmin.f32 %v5499_v49, 6.0 }
 0x5c1   : > { %v6497_v1 = vrot.slane %v6403_v19, 2  ;;  %v6499_v36 = vrot.slane %v6404_v5, 1  ;;  %v6549_v26 = vpack.c.b16 %v6405_v10, %v6405_v10  ;;  %v6496_v4 = vsel %vm6441_vm14, %v6495_v62, %v6494_v30 }
 0x5c2   : > { %v5434_v42 = vmul.f32 %v10797_v57, %v5334_v9  ;;  %v5533_v44 = vmin.f32 %v5501_v28, 6.0  ;;  %v5468_v3 = vadd.f32 %v10812_v52, %v5432_v47  ;;  %v5788_v16 = vadd.f32 %v5756_v38, %v5531_v55 }
 0x5c3   : > { %v6498_v7 = vsel %vm6444_vm15, %v6497_v1, %v6496_v4  ;;  %v6600_v24 = vsel %vm9143_vm4, %v6549_v26, %v7756_v58  ;;  %v5203_v31 = vadd.f32 %v10856_v0, %v10858_v14  ;;  %v5721_v39 = vmul.f32 %v10823_v11, %v5668_v17 }
 0x5c4   : > { %v6500_v6 = vsel %vm6447_vm2, %v6499_v36, %v6498_v7  ;;  %7757 = vst [vmem:[%s9114_s12 + $0x2c] sm:$0x1] %v6600_v24  ;;  %v5291_v56 = vpop.f32.mrf.mxu1  ;;  %v5470_v15 = vadd.f32 %v10812_v52, %v5434_v42  ;;  %v5500_v50 = vmax.f32 %v5468_v3, 0.0  ;;  %v5205_v28 = vadd.f32 %v10871_v34, %v10873_v45 }
 0x5c5   : > { %v6548_v63 = vpack.c.b16 %v6500_v6, %v6500_v6  ;;  %v5671_v51 = vpop.f32.mrf.mxu2  ;;  %v5292_v41 = vadd.f32 %v5291_v56, %v5203_v31  ;;  %v5757_v10 = vadd.f32 %v10839_v27, %v5721_v39  ;;  %v5120_v36 = vpop.f32.mrf.mxu3 }
 0x5c6   : > { %v5722_v60 = vmul.f32 %v10823_v11, %v5671_v51  ;;  %v5502_v12 = vmax.f32 %v5470_v15, 0.0  ;;  %v5532_v14 = vmin.f32 %v5500_v50, 6.0  ;;  %v5209_v1 = vpop.f32.mrf.mxu0 }
 0x5c7   : > { %v6597_v33 = vsel %vm9213_vm8, %v6548_v63, %v7754_v43  ;;  %v5335_v17 = vadd.f32 %v5292_v41, %v10440_v22  ;;  %v5208_v63 = vadd.f32 %v5207_v46, %v5118_v25  ;;  %v5210_v50 = vadd.f32 %v5209_v1, %v5120_v36 }
 0x5c8   : > { %7755 = vst [vmem:[%s9114_s12 + $0x28] sm:$0xf] %v6597_v33  ;;  %v5758_v8 = vadd.f32 %v10839_v27, %v5722_v60  ;;  %v5534_v18 = vmin.f32 %v5502_v12, 6.0  ;;  %v5789_v7 = vadd.f32 %v5757_v10, %v5532_v14 }
 0x5c9   : > { %v5435_v60 = vmul.f32 %v10797_v57, %v5335_v17 }
 0x5ca   : > { %v5790_v40 = vadd.f32 %v5758_v8, %v5533_v44 }
 0x5cc   : > { %v5810_v13 = vmax.f32 %v5788_v16, %v5790_v40  ;;  %v5293_v48 = vpop.f32.mrf.mxu1 }
 0x5cd   : > { %v5673_v23 = vpop.f32.mrf.mxu2  ;;  %v5294_v40 = vadd.f32 %v5293_v48, %v5205_v28 }
 0x5ce   : > { %v5862_v21 = vrot.slane %v5810_v13, 2  ;;  %v5863_v35 = vrot.slane %v5810_v13, 4  ;;  %v5864_v19 = vrot.slane %v5810_v13, 6  ;;  %v7680_v5 = vrot.slane %v5810_v13, 9 }
 0x5cf   : > { %v5723_v54 = vmul.f32 %v10823_v11, %v5673_v23  ;;  %v5336_v48 = vadd.f32 %v5294_v40, %v10445_v61 }
 0x5d0   : > { %v7681_v30 = vrot.slane %v5862_v21, 9  ;;  %v7682_v62 = vrot.slane %v5863_v35, 9  ;;  %v7683_v58 = vrot.slane %v5864_v19, 9  ;;  %v6160_v0 = vmax.f32 %v5810_v13, %v7680_v5 }
 0x5d1   : > { %v5759_v9 = vadd.f32 %v10839_v27, %v5723_v54  ;;  %v7718_v54 = vld [vmem:[%s9114_s12 + $0x38] sm:$0x1] }
 0x5d2   : > { %v6161_v26 = vmax.f32 %v5862_v21, %v7681_v30  ;;  %v6162_v2 = vmax.f32 %v5863_v35, %v7682_v62  ;;  %v6163_v4 = vmax.f32 %v5864_v19, %v7683_v58  ;;  %v6278_v53 = vpack.c.bf16 %v6160_v0, %v6160_v0  ;;  %v5212_v21 = vpop.f32.mrf.mxu0  ;;  %v5123_v35 = vpop.f32.mrf.mxu3 }
 0x5d3   : > { %v5791_v24 = vadd.f32 %v5759_v9, %v5534_v18  ;;  %v5471_v19 = vadd.f32 %v10812_v52, %v5435_v60  ;;  %v7758_v60 = vld [vmem:[%s9114_s12 + $0x30] sm:$0xf] }
 0x5d4   : > { %v6279_v6 = vpack.c.bf16 %v6161_v26, %v6161_v26  ;;  %v6280_v43 = vpack.c.bf16 %v6162_v2, %v6162_v2  ;;  %v6406_v49 = vunpack.c.l.b16 %v6278_v53  ;;  %v5296_v42 = vpop.f32.mrf.mxu1  ;;  %v6281_v51 = vpack.c.bf16 %v6163_v4, %v6163_v4  ;;  %v7734_v26 = vld [vmem:[%s9114_s12 + $0x3c] sm:$0x1] }
 0x5d5   : > { %v5811_v47 = vmax.f32 %v5789_v7, %v5791_v24  ;;  %v5676_v22 = vpop.f32.mrf.mxu2  ;;  %v5297_v13 = vadd.f32 %v5296_v42, %v5208_v63  ;;  %v6209_v4 = vsel %vm9143_vm4, 0, %v7718_v54  ;;  %v7760_v24 = vld [vmem:[%s9114_s12 + $0x34] sm:$0x1] }
 0x5d6   : > { %v6407_v56 = vunpack.c.l.b16 %v6279_v6  ;;  %v6408_v38 = vunpack.c.l.b16 %v6280_v43  ;;  %v6501_v3 = vrot.slane %v6406_v49, 7  ;;  %v6409_v46 = vunpack.c.l.b16 %v6281_v51  ;;  %7719 = vst [vmem:[%s9114_s12 + $0x38] sm:$0x1] %v6209_v4 }
 0x5d7   : > { %v5865_v33 = vrot.slane %v5811_v47, 2  ;;  %v5866_v55 = vrot.slane %v5811_v47, 4  ;;  %v5867_v44 = vrot.slane %v5811_v47, 6  ;;  %v7684_v8 = vrot.slane %v5811_v47, 9 }
 0x5d8   : > { %v6502_v15 = vrot.slane %v6407_v56, 6  ;;  %v6504_v16 = vrot.slane %v6408_v38, 5  ;;  %v5337_v10 = vadd.f32 %v5297_v13, %v10450_v32  ;;  %v6506_v18 = vrot.slane %v6409_v46, 4 }
 0x5d9   : > { %v7685_v31 = vrot.slane %v5865_v33, 9  ;;  %v7686_v39 = vrot.slane %v5866_v55, 9  ;;  %v7687_v34 = vrot.slane %v5867_v44, 9  ;;  %v6164_v45 = vmax.f32 %v5811_v47, %v7684_v8 }
 0x5da   : > { %v6503_v25 = vsel %vm6432_vm11, %v6502_v15, %v6501_v3  ;;  %v5437_v1 = vmul.f32 %v10797_v57, %v5337_v10  ;;  %v6233_v47 = vsel %vm9154_vm6, 0, %v7734_v26  ;;  %v5724_v51 = vmul.f32 %v10823_v11, %v5676_v22 }
 0x5db   : > { %v6165_v41 = vmax.f32 %v5865_v33, %v7685_v31  ;;  %v6166_v12 = vmax.f32 %v5866_v55, %v7686_v39  ;;  %v6167_v23 = vmax.f32 %v5867_v44, %v7687_v34  ;;  %v6282_v5 = vpack.c.bf16 %v6164_v45, %v6164_v45  ;;  %7735 = vst [vmem:[%s9114_s12 + $0x3c] sm:$0x1] %v6233_v47  ;;  %v5214_v31 = vpop.f32.mrf.mxu0  ;;  %v5125_v39 = vpop.f32.mrf.mxu3 }
 0x5dc   : > { %v6505_v30 = vsel %vm6435_vm12, %v6504_v16, %v6503_v25  ;;  %v5298_v17 = vpop.f32.mrf.mxu1  ;;  %v5473_v6 = vadd.f32 %v10812_v52, %v5437_v1  ;;  %v5503_v33 = vmax.f32 %v5471_v19, 0.0  ;;  %v5436_v8 = vmul.f32 %v10797_v57, %v5336_v48 }
 0x5dd   : > { %v6283_v62 = vpack.c.bf16 %v6165_v41, %v6165_v41  ;;  %v6284_v58 = vpack.c.bf16 %v6166_v12, %v6166_v12  ;;  %v6285_v0 = vpack.c.bf16 %v6167_v23, %v6167_v23  ;;  %v5678_v14 = vpop.f32.mrf.mxu2  ;;  %v6410_v9 = vunpack.c.l.b16 %v6282_v5 }
 0x5de   : > { %v5299_v36 = vadd.f32 %v5298_v17, %v5210_v50  ;;  %v6507_v53 = vsel %vm6438_vm13, %v6506_v18, %v6505_v30  ;;  %v5505_v55 = vmax.f32 %v5473_v6, 0.0  ;;  %v5760_v16 = vadd.f32 %v10839_v27, %v5724_v51 }
 0x5df   : > { %v6411_v2 = vunpack.c.l.b16 %v6283_v62  ;;  %v6412_v61 = vunpack.c.l.b16 %v6284_v58  ;;  %v6413_v32 = vunpack.c.l.b16 %v6285_v0  ;;  %v6508_v7 = vrot.slane %v6410_v9, 3 }
 0x5e0   : > { %v5338_v43 = vadd.f32 %v5299_v36, %v10455_v37  ;;  %v5535_v45 = vmin.f32 %v5503_v33, 6.0  ;;  %v5537_v46 = vmin.f32 %v5505_v55, 6.0  ;;  %v5472_v13 = vadd.f32 %v10812_v52, %v5436_v8 }
 0x5e1   : > { %v6510_v49 = vrot.slane %v6411_v2, 2  ;;  %v6512_v28 = vrot.slane %v6412_v61, 1  ;;  %v6551_v63 = vpack.c.b16 %v6413_v32, %v6413_v32  ;;  %v6509_v42 = vsel %vm6441_vm14, %v6508_v7, %v6507_v53  ;;  %v11352_v32 = vld [vmem:[#allocation28_spill] sm:$0xff] }
 0x5e2   : > { %v5438_v3 = vmul.f32 %v10797_v57, %v5338_v43  ;;  %v5792_v41 = vadd.f32 %v5760_v16, %v5535_v45  ;;  %v5213_v23 = vadd.f32 %v5212_v21, %v5123_v35  ;;  %v5725_v19 = vmul.f32 %v10823_v11, %v5678_v14 }
 0x5e3   : > { %v6511_v56 = vsel %vm6444_vm15, %v6510_v49, %v6509_v42  ;;  %v6606_v38 = vsel %vm9143_vm4, %v6551_v63, %v7760_v24  ;;  %v5504_v48 = vmax.f32 %v5472_v13, 0.0  ;;  %v5128_v36 = vpop.f32.mrf.mxu3 }
 0x5e4   : > { %v6513_v37 = vsel %vm6447_vm2, %v6512_v28, %v6511_v56  ;;  %7761 = vst [vmem:[%s9114_s12 + $0x34] sm:$0x1] %v6606_v38  ;;  %v5301_v22 = vpop.f32.mrf.mxu1  ;;  %v5474_v50 = vadd.f32 %v10812_v52, %v5438_v3  ;;  %v5761_v9 = vadd.f32 %v10839_v27, %v5725_v19  ;;  %v5215_v56 = vadd.f32 %v5214_v31, %v5125_v39 }
 0x5e5   : > { %v6550_v44 = vpack.c.b16 %v6513_v37, %v6513_v37  ;;  %v5681_v15 = vpop.f32.mrf.mxu2  ;;  %v5302_v10 = vadd.f32 %v5301_v22, %v5213_v23  ;;  %v5536_v61 = vmin.f32 %v5504_v48, 6.0 }
 0x5e6   : > { %v5726_v40 = vmul.f32 %v10823_v11, %v5681_v15  ;;  %v5506_v54 = vmax.f32 %v5474_v50, 0.0 }
 0x5e7   : > { %v6603_v34 = vsel %vm9213_vm8, %v6550_v44, %v7758_v60  ;;  %v5217_v26 = vpop.f32.mrf.mxu0  ;;  %v5339_v4 = vadd.f32 %v5302_v10, %v11352_v32  ;;  %v5793_v28 = vadd.f32 %v5761_v9, %v5536_v61 }
 0x5e8   : > { %7759 = vst [vmem:[%s9114_s12 + $0x30] sm:$0xf] %v6603_v34  ;;  %v5762_v25 = vadd.f32 %v10839_v27, %v5726_v40  ;;  %v5538_v53 = vmin.f32 %v5506_v54, 6.0  ;;  %v5218_v3 = vadd.f32 %v5217_v26, %v5128_v36 }
 0x5e9   : > { %v5439_v38 = vmul.f32 %v10797_v57, %v5339_v4 }
 0x5ea   : > { %v5794_v12 = vadd.f32 %v5762_v25, %v5537_v46 }
 0x5eb   : > { %v5475_v48 = vadd.f32 %v10812_v52, %v5439_v38 }
 0x5ec   : > { %v5812_v5 = vmax.f32 %v5792_v41, %v5794_v12  ;;  %v5303_v62 = vpop.f32.mrf.mxu1  ;;  %v5130_v41 = vpop.f32.mrf.mxu3 }
 0x5ed   : > { %v5683_v30 = vpop.f32.mrf.mxu2  ;;  %v5304_v25 = vadd.f32 %v5303_v62, %v5215_v56 }
 0x5ee   : > { %v5868_v58 = vrot.slane %v5812_v5, 2  ;;  %v5869_v0 = vrot.slane %v5812_v5, 4  ;;  %v5870_v17 = vrot.slane %v5812_v5, 6  ;;  %v7688_v18 = vrot.slane %v5812_v5, 9 }
 0x5ef   : > { %v5727_v1 = vmul.f32 %v10823_v11, %v5683_v30  ;;  %v5219_v12 = vpop.f32.mrf.mxu0 }
 0x5f0   : > { %v7689_v2 = vrot.slane %v5868_v58, 9  ;;  %v7690_v21 = vrot.slane %v5869_v0, 9  ;;  %v7691_v35 = vrot.slane %v5870_v17, 9  ;;  %v6168_v14 = vmax.f32 %v5812_v5, %v7688_v18 }
 0x5f1   : > { %v5763_v7 = vadd.f32 %v10839_v27, %v5727_v1  ;;  %v5220_v9 = vadd.f32 %v5219_v12, %v5130_v41  ;;  %v7720_v1 = vld [vmem:[%s9114_s12 + $0x40] sm:$0x1] }
 0x5f2   : > { %v6169_v24 = vmax.f32 %v5868_v58, %v7689_v2  ;;  %v6170_v6 = vmax.f32 %v5869_v0, %v7690_v21  ;;  %v6171_v43 = vmax.f32 %v5870_v17, %v7691_v35  ;;  %v6286_v49 = vpack.c.bf16 %v6168_v14, %v6168_v14  ;;  %v11353_v0 = vld [vmem:[#allocation30_spill] sm:$0xff] }
 0x5f3   : > { %v5795_v63 = vadd.f32 %v5763_v7, %v5538_v53  ;;  %v5340_v62 = vadd.f32 %v5304_v25, %v11353_v0  ;;  %v11354_v17 = vld [vmem:[#allocation50_spill] sm:$0xff]  ;;  %v7736_v7 = vld [vmem:[%s9114_s12 + $0x44] sm:$0x1] }
 0x5f4   : > { %v6287_v47 = vpack.c.bf16 %v6169_v24, %v6169_v24  ;;  %v6288_v42 = vpack.c.bf16 %v6170_v6, %v6170_v6  ;;  %v6414_v51 = vunpack.c.l.b16 %v6286_v49  ;;  %v5306_v33 = vpop.f32.mrf.mxu1  ;;  %v6289_v55 = vpack.c.bf16 %v6171_v43, %v6171_v43 }
 0x5f5   : > { %v5813_v37 = vmax.f32 %v5793_v28, %v5795_v63  ;;  %v5686_v60 = vpop.f32.mrf.mxu2  ;;  %v5307_v5 = vadd.f32 %v5306_v33, %v5218_v3  ;;  %v6212_v49 = vsel %vm9143_vm4, 0, %v7720_v1  ;;  %v5440_v29 = vmul.f32 %v10797_v57, %v5340_v62 }
 0x5f6   : > { %v6415_v44 = vunpack.c.l.b16 %v6287_v47  ;;  %v6416_v8 = vunpack.c.l.b16 %v6288_v42  ;;  %v6514_v34 = vrot.slane %v6414_v51, 7  ;;  %v6417_v23 = vunpack.c.l.b16 %v6289_v55  ;;  %v7764_v47 = vld [vmem:[%s9114_s12 + $0x3c] sm:$0x1]  ;;  %7721 = vst [vmem:[%s9114_s12 + $0x40] sm:$0x1] %v6212_v49 }
 0x5f7   : > { %v5871_v15 = vrot.slane %v5813_v37, 2  ;;  %v5872_v22 = vrot.slane %v5813_v37, 4  ;;  %v5873_v16 = vrot.slane %v5813_v37, 6  ;;  %v7692_v40 = vrot.slane %v5813_v37, 9  ;;  %v11355_v51 = vld [vmem:[#allocation51_spill] sm:$0xff] }
 0x5f8   : > { %v6515_v45 = vrot.slane %v6415_v44, 6  ;;  %v6517_v46 = vrot.slane %v6416_v8, 5  ;;  %v5341_v18 = vadd.f32 %v5307_v5, %v11354_v17  ;;  %v6519_v61 = vrot.slane %v6417_v23, 4 }
 0x5f9   : > { %v7693_v13 = vrot.slane %v5871_v15, 9  ;;  %v7694_v50 = vrot.slane %v5872_v22, 9  ;;  %v7695_v31 = vrot.slane %v5873_v16, 9  ;;  %v6172_v39 = vmax.f32 %v5813_v37, %v7692_v40 }
 0x5fa   : > { %v6516_v19 = vsel %vm6432_vm11, %v6515_v45, %v6514_v34  ;;  %v5441_v4 = vmul.f32 %v10797_v57, %v5341_v18  ;;  %v6236_v55 = vsel %vm9154_vm6, 0, %v7736_v7  ;;  %v5728_v8 = vmul.f32 %v10823_v11, %v5686_v60 }
 0x5fb   : > { %v6173_v10 = vmax.f32 %v5871_v15, %v7693_v13  ;;  %v6174_v54 = vmax.f32 %v5872_v22, %v7694_v50  ;;  %v6175_v30 = vmax.f32 %v5873_v16, %v7695_v31  ;;  %v6290_v58 = vpack.c.bf16 %v6172_v39, %v6172_v39  ;;  %7737 = vst [vmem:[%s9114_s12 + $0x44] sm:$0x1] %v6236_v55  ;;  %v7762_v16 = vld [vmem:[%s9114_s12 + $0x38] sm:$0xf] }
 0x5fc   : > { %v6518_v36 = vsel %vm6435_vm12, %v6517_v46, %v6516_v19  ;;  %v5308_v14 = vpop.f32.mrf.mxu1  ;;  %v5477_v42 = vadd.f32 %v10812_v52, %v5441_v4  ;;  %v5507_v40 = vmax.f32 %v5475_v48, 0.0  ;;  %v5764_v60 = vadd.f32 %v10839_v27, %v5728_v8 }
 0x5fd   : > { %v6291_v26 = vpack.c.bf16 %v6173_v10, %v6173_v10  ;;  %v6292_v2 = vpack.c.bf16 %v6174_v54, %v6174_v54  ;;  %v6293_v21 = vpack.c.bf16 %v6175_v30, %v6175_v30  ;;  %v5688_v35 = vpop.f32.mrf.mxu2  ;;  %v6418_v32 = vunpack.c.l.b16 %v6290_v58 }
 0x5fe   : > { %v5309_v53 = vadd.f32 %v5308_v14, %v5220_v9  ;;  %v6520_v28 = vsel %vm6438_vm13, %v6519_v61, %v6518_v36  ;;  %v5509_v34 = vmax.f32 %v5477_v42, 0.0  ;;  %v5539_v31 = vmin.f32 %v5507_v40, 6.0 }
 0x5ff   : > { %v6419_v24 = vunpack.c.l.b16 %v6291_v26  ;;  %v6420_v6 = vunpack.c.l.b16 %v6292_v2  ;;  %v6421_v43 = vunpack.c.l.b16 %v6293_v21  ;;  %v6521_v63 = vrot.slane %v6418_v32, 3 }
 0x600   : > { %v5342_v56 = vadd.f32 %v5309_v53, %v11355_v51  ;;  %v5541_v39 = vmin.f32 %v5509_v34, 6.0  ;;  %v5476_v12 = vadd.f32 %v10812_v52, %v5440_v29  ;;  %v5796_v19 = vadd.f32 %v5764_v60, %v5539_v31 }
 0x601   : > { %v6523_v38 = vrot.slane %v6419_v24, 2  ;;  %v6525_v37 = vrot.slane %v6420_v6, 1  ;;  %v6553_v33 = vpack.c.b16 %v6421_v43, %v6421_v43  ;;  %v6522_v44 = vsel %vm6441_vm14, %v6521_v63, %v6520_v28 }
 0x602   : > { %v5442_v46 = vmul.f32 %v10797_v57, %v5342_v56  ;;  %v5729_v57 = vmul.f32 %v10823_v11, %v5688_v35  ;;  %v5508_v10 = vmax.f32 %v5476_v12, 0.0  ;;  %v7768_v12 = vld [vmem:[%s9114_s12 + $0x44] sm:$0x1] }
 0x603   : > { %v6524_v3 = vsel %vm6444_vm15, %v6523_v38, %v6522_v44  ;;  %v6612_v15 = vsel %vm9143_vm4, %v6553_v33, %v7764_v47 }
 0x604   : > { %v6526_v22 = vsel %vm6447_vm2, %v6525_v37, %v6524_v3  ;;  %7765 = vst [vmem:[%s9114_s12 + $0x3c] sm:$0x1] %v6612_v15  ;;  %v5478_v23 = vadd.f32 %v10812_v52, %v5442_v46  ;;  %v5765_v18 = vadd.f32 %v10839_v27, %v5729_v57  ;;  %v5540_v2 = vmin.f32 %v5508_v10, 6.0 }
 0x605   : > { %v6552_v45 = vpack.c.b16 %v6526_v22, %v6526_v22  ;;  %v5691_v25 = vpop.f32.mrf.mxu2 }
 0x606   : > { %v5730_v13 = vmul.f32 %v10823_v11, %v5691_v25  ;;  %v5510_v54 = vmax.f32 %v5478_v23, 0.0  ;;  %v5797_v53 = vadd.f32 %v5765_v18, %v5540_v2 }
 0x607   : > { %v6609_v50 = vsel %vm9213_vm8, %v6552_v45, %v7762_v16 }
 0x608   : > { %7763 = vst [vmem:[%s9114_s12 + $0x38] sm:$0xf] %v6609_v50  ;;  %v5766_v41 = vadd.f32 %v10839_v27, %v5730_v13  ;;  %v5542_v21 = vmin.f32 %v5510_v54, 6.0 }
 0x60a   : > { %v5798_v5 = vadd.f32 %v5766_v41, %v5541_v39 }
 0x60c   : > { %v5814_v48 = vmax.f32 %v5796_v19, %v5798_v5 }
 0x60d   : > { %v5693_v30 = vpop.f32.mrf.mxu2 }
 0x60e   : > { %v5874_v58 = vrot.slane %v5814_v48, 2  ;;  %v5875_v0 = vrot.slane %v5814_v48, 4  ;;  %v5876_v62 = vrot.slane %v5814_v48, 6  ;;  %v7696_v17 = vrot.slane %v5814_v48, 9 }
 0x60f   : > { %v5731_v9 = vmul.f32 %v10823_v11, %v5693_v30 }
 0x610   : > { %v7697_v1 = vrot.slane %v5874_v58, 9  ;;  %v7698_v36 = vrot.slane %v5875_v0, 9  ;;  %v7699_v26 = vrot.slane %v5876_v62, 9  ;;  %v6176_v52 = vmax.f32 %v5814_v48, %v7696_v17 }
 0x611   : > { %v5767_v35 = vadd.f32 %v10839_v27, %v5731_v9 }
 0x612   : > { %v6177_v14 = vmax.f32 %v5874_v58, %v7697_v1  ;;  %v6178_v61 = vmax.f32 %v5875_v0, %v7698_v36  ;;  %v6179_v32 = vmax.f32 %v5876_v62, %v7699_v26  ;;  %v6294_v4 = vpack.c.bf16 %v6176_v52, %v6176_v52  ;;  %v7766_v58 = vld [vmem:[%s9114_s12 + $0x40] sm:$0xf] }
 0x613   : > { %v5799_v7 = vadd.f32 %v5767_v35, %v5542_v21 }
 0x614   : > { %v6295_v24 = vpack.c.bf16 %v6177_v14, %v6177_v14  ;;  %v6296_v6 = vpack.c.bf16 %v6178_v61, %v6178_v61  ;;  %v6422_v43 = vunpack.c.l.b16 %v6294_v4  ;;  %v6297_v28 = vpack.c.bf16 %v6179_v32, %v6179_v32 }
 0x615   : > { %v5815_v49 = vmax.f32 %v5797_v53, %v5799_v7 }
 0x616   : > { %v6423_v11 = vunpack.c.l.b16 %v6295_v24  ;;  %v6424_v63 = vunpack.c.l.b16 %v6296_v6  ;;  %v6527_v38 = vrot.slane %v6422_v43, 7  ;;  %v6425_v8 = vunpack.c.l.b16 %v6297_v28 }
 0x617   : > { %v5877_v47 = vrot.slane %v5815_v49, 2  ;;  %v5878_v42 = vrot.slane %v5815_v49, 4  ;;  %v5879_v51 = vrot.slane %v5815_v49, 6  ;;  %v7700_v56 = vrot.slane %v5815_v49, 9 }
 0x618   : > { %v6528_v37 = vrot.slane %v6423_v11, 6  ;;  %v6530_v3 = vrot.slane %v6424_v63, 5  ;;  %v6532_v13 = vrot.slane %v6425_v8, 4 }
 0x619   : > { %v7701_v27 = vrot.slane %v5877_v47, 9  ;;  %v7702_v33 = vrot.slane %v5878_v42, 9  ;;  %v7703_v55 = vrot.slane %v5879_v51, 9  ;;  %v6180_v44 = vmax.f32 %v5815_v49, %v7700_v56 }
 0x61a   : > { %v6529_v15 = vsel %vm6432_vm11, %v6528_v37, %v6527_v38 }
 0x61b   : > { %v6181_v22 = vmax.f32 %v5877_v47, %v7701_v27  ;;  %v6182_v16 = vmax.f32 %v5878_v42, %v7702_v33  ;;  %v6183_v40 = vmax.f32 %v5879_v51, %v7703_v55  ;;  %v6298_v34 = vpack.c.bf16 %v6180_v44, %v6180_v44 }
 0x61c   : > { %v6531_v25 = vsel %vm6435_vm12, %v6530_v3, %v6529_v15 }
 0x61d   : > { %v6299_v45 = vpack.c.bf16 %v6181_v22, %v6181_v22  ;;  %v6300_v29 = vpack.c.bf16 %v6182_v16, %v6182_v16  ;;  %v6301_v46 = vpack.c.bf16 %v6183_v40, %v6183_v40  ;;  %v6426_v60 = vunpack.c.l.b16 %v6298_v34 }
 0x61e   : > { %v6533_v23 = vsel %vm6438_vm13, %v6532_v13, %v6531_v25 }
 0x61f   : > { %v6427_v50 = vunpack.c.l.b16 %v6299_v45  ;;  %v6428_v31 = vunpack.c.l.b16 %v6300_v29  ;;  %v6429_v39 = vunpack.c.l.b16 %v6301_v46  ;;  %v6534_v41 = vrot.slane %v6426_v60, 3 }
 0x621   : > { %v6536_v19 = vrot.slane %v6427_v50, 2  ;;  %v6538_v5 = vrot.slane %v6428_v31, 1  ;;  %v6555_v57 = vpack.c.b16 %v6429_v39, %v6429_v39  ;;  %v6535_v48 = vsel %vm6441_vm14, %v6534_v41, %v6533_v23 }
 0x623   : > { %v6537_v10 = vsel %vm6444_vm15, %v6536_v19, %v6535_v48  ;;  %v6618_v54 = vsel %vm9143_vm4, %v6555_v57, %v7768_v12 }
 0x624   : > { %v6539_v30 = vsel %vm6447_vm2, %v6538_v5, %v6537_v10  ;;  %7769 = vst [vmem:[%s9114_s12 + $0x44] sm:$0x1] %v6618_v54 }
 0x625   : > { %v6554_v0 = vpack.c.b16 %v6539_v30, %v6539_v30 }
 0x627   : > { %v6615_v62 = vsel %vm9213_vm8, %v6554_v0, %v7766_v58 }
 0x628   : > { %7767 = vst [vmem:[%s9114_s12 + $0x40] sm:$0xf] %v6615_v62 }
 0x629 PF: > { %s21_s13 = sadd.s32 1, %s8079_s13  }
 0x62a   : > { %p18_p7 = scmp.ge.s32.totalorder %s21_s13, 4  }
 0x62c   :  { %20 = sbr.rel (!%p18_p7) target bundleno = 1 (0x1), region = 103 }
 0x631   :  { %6641 = vsyncpa [#allocation5], 1 }
 0x632   :  { %6643 = vsyncpa [#allocation5 + $0x1], 1 }

</bundles_post_ra>
